<compile_context>
chip_gen: v6e
topology: v6e:2x2x1
jax: 0.10.0
libtpu: 0.0.40
codegen_flags: <defaults>
</compile_context>

<pallas_src>
import functools

import numpy as np
import jax
import jax.numpy as jnp
from jax import lax
from jax.experimental import pallas as pl
from jax.experimental.pallas import tpu as pltpu

EPS = 1e-5     # PyTorch BatchNorm2d default eps
K = 10         # temporal kernel width of every conv stage
CPAD = 128     # every channel axis lives on one full 128-lane tile

# (C_in, C_out, pool_kernel, pool_stride) of the 4 fused {conv, BN, ELU, maxpool} stages.
STAGE_CFGS = ((62, 25, 3, 2), (25, 50, 3, 2), (50, 100, 3, 2), (100, 100, 3, 3))


def _rep(cin):
    """How many temporal taps of a cin-channel activation fit in one 128-lane tile."""
    return min(K, CPAD // cin)


def _n_tiles(cin):
    return -(-K // _rep(cin))


def _stage_dims(T):
    """Per-stage (W_in, W_conv, W_pool, row_stride) for input time length T."""
    dims, w = [], T
    for (_, _, pk, ps) in STAGE_CFGS:
        wc = w - K + 1
        if wc < pk:
            raise ValueError(
                f"time length {T} too small: a stage's conv width {wc} < pool kernel {pk}")
        wp = (wc - pk) // ps + 1
        dims.append((w, wc, wp, ((wc + 15) // 16) * 16))   # stride 16-aligned (bf16 tiles)
        w = wp
    return tuple(dims)


def _fused_kernel(dims, B, x_ref, *refs):
    """B samples: 4x [tap-packed bf16 im2col -> MXU matmul -> BN -> ELU -> maxpool]."""
    w_refs = refs[0:12:3]
    s_refs = refs[1:12:3]
    b_refs = refs[2:12:3]
    out_ref = refs[12]
    lhs_refs = refs[13:17]
    y_refs = refs[17:21]

    hs = [x_ref[b] for b in range(B)]          # per-sample (W_in, 128) bf16
    last = len(STAGE_CFGS) - 1
    for i, ((cin, _, pk, ps), (_, w_conv, w_pool, stride)) in enumerate(
            zip(STAGE_CFGS, dims)):
        rep = _rep(cin)
        n_tiles = _n_tiles(cin)
        if rep > 1:
            lane = lax.broadcasted_iota(jnp.int32, (1, CPAD), 1)
            bands = [(lane >= j * cin) & (lane < (j + 1) * cin) for j in range(rep)]

        # --- packed im2col: `rep` taps per 128-lane tile.  The incoming activation
        #     already carries `rep` lane-band replicas of its channels (produced for
        #     free by the previous stage's folded weight / by the wrapper for x), so
        #     each band only needs a select -- no cross-lane data movement. ----------
        for b in range(B):
            h = hs[b]
            for t in range(n_tiles):
                taps = range(t * rep, min((t + 1) * rep, K))
                tile = None
                for j, k in enumerate(taps):
                    part = h[k:k + w_conv, :]
                    if rep > 1:
                        part = jnp.where(bands[j], part, 0)
                    tile = part if tile is None else tile + part
                lhs_refs[i][pl.ds(b * stride, w_conv), pl.ds(t * CPAD, CPAD)] = tile
        # Rows [b*stride + w_conv, (b+1)*stride) of lhs/y are never written/read; they
        # only feed pad rows of `acc` that are discarded.

        acc = jnp.dot(lhs_refs[i][...], w_refs[i][...],
                      preferred_element_type=jnp.float32)     # (B*stride, 128) f32
        # folded conv-bias + BatchNorm (eval mode), replicated per output lane band
        acc = acc * s_refs[i][...] + b_refs[i][...]
        # ELU (alpha=1).  exp(x)-1 for x<=0 is within ~6e-8 of expm1 in f32 and lowers
        # on every TPU generation.
        y_refs[i][...] = jnp.where(acc > 0, acc,
                                   jnp.exp(jnp.minimum(acc, 0.0)) - 1.0)

        # --- overlapping MaxPool(pk, stride ps) via strided sublane reads ------------
        new_hs = []
        for b in range(B):
            base = b * stride
            pooled = y_refs[i][pl.ds(base, w_pool, stride=ps), :]
            for j in range(1, pk):
                pooled = jnp.maximum(
                    pooled, y_refs[i][pl.ds(base + j, w_pool, stride=ps), :])
            if i == last:
                out_ref[b] = pooled                            # f32 embedding rows
            else:
                new_hs.append(pooled.astype(jnp.bfloat16))     # bf16 into next stage
        hs = new_hs


@functools.lru_cache(maxsize=None)
def _build_fused(N, B, T):
    dims = _stage_dims(T)
    w_out = dims[-1][2]
    const2 = lambda n: (0, 0)                  # VMEM-resident parameter blocks

    param_specs, lhs_scratch, y_scratch = [], [], []
    for (cin, _, _, _), (_, _, _, stride) in zip(STAGE_CFGS, dims):
        nt = _n_tiles(cin)
        param_specs += [pl.BlockSpec((nt * CPAD, CPAD), const2),   # packed conv weight
                        pl.BlockSpec((1, CPAD), const2),           # BN scale
                        pl.BlockSpec((1, CPAD), const2)]           # BN shift (+bias)
        lhs_scratch.append(pltpu.VMEM((B * stride, nt * CPAD), jnp.bfloat16))
        y_scratch.append(pltpu.VMEM((B * stride, CPAD), jnp.float32))

    fn = pl.pallas_call(
        functools.partial(_fused_kernel, dims, B),
        out_shape=jax.ShapeDtypeStruct((N, w_out, CPAD), jnp.float32),
        grid=(N // B,),
        in_specs=[pl.BlockSpec((B, T, CPAD), lambda n: (n, 0, 0))] + param_specs,
        out_specs=pl.BlockSpec((B, w_out, CPAD), lambda n: (n, 0, 0)),
        scratch_shapes=lhs_scratch + y_scratch,
        compiler_params=pltpu.CompilerParams(
            dimension_semantics=("parallel",),
            vmem_limit_bytes=32 * 1024 * 1024),
    )
    return fn, w_out


def init_params(key):
    """Deterministic synthetic parameters with the module's exact shapes."""
    ks = jax.random.split(key, 24)

    def nrm(k, shape, s):
        return (s * jax.random.normal(k, shape)).astype(jnp.float32)

    p = {}
    p["w1"] = nrm(ks[0], (25, 1, 1, 10), 0.1)      # Conv2d(1, 25, (1,10)) + bias
    p["b1"] = nrm(ks[1], (25,), 0.1)
    p["w2"] = nrm(ks[2], (25, 25, 62, 1), 0.05)    # Conv2d(25, 25, (62,1)), no bias
    p["w3"] = nrm(ks[3], (50, 25, 1, 10), 0.05)    # Conv2d(25, 50, (1,10)), no bias
    p["w4"] = nrm(ks[4], (100, 50, 1, 10), 0.05)   # Conv2d(50, 100, (1,10)), no bias
    p["w5"] = nrm(ks[5], (100, 100, 1, 10), 0.05)  # Conv2d(100, 100, (1,10)) + bias
    p["b5"] = nrm(ks[6], (100,), 0.1)
    for i, c in enumerate((25, 50, 100, 100)):     # BatchNorm2d params / stats
        p[f"g{i+1}"] = 1.0 + nrm(ks[7 + i], (c,), 0.1)
        p[f"be{i+1}"] = nrm(ks[11 + i], (c,), 0.1)
        p[f"m{i+1}"] = nrm(ks[15 + i], (c,), 0.1)
        p[f"v{i+1}"] = jax.random.uniform(
            ks[19 + i], (c,), minval=0.5, maxval=1.5).astype(jnp.float32)
    return p


def fold_params(p):
    """Per-stage (packed weight (n_tiles*128,128) bf16, scale (1,128) f32, shift (1,128) f32).

    Weight ROWS follow the kernel's tap packing (tap t*rep+j at lanes [j*cin,(j+1)*cin)
    of 128-lane tile t); weight COLUMNS / scale / shift replicate the output channels
    into the lane bands the NEXT stage's packing expects.  Unused lanes get weight /
    scale / shift = 0 so they stay exactly zero through BN / ELU / maxpool.
    """
    hp = jax.lax.Precision.HIGHEST
    # Stage 1: fuse the (1,10) temporal conv with the (62,1) spatial conv.
    w1 = p["w1"][:, 0, 0, :]                                   # (25, 10)
    w2 = p["w2"][:, :, :, 0]                                   # (25, 25, 62)
    w_eff = jnp.einsum("ik,oih->kho", w1, w2, precision=hp)    # (10, 62, 25)
    b_eff = jnp.einsum("i,oih->o", p["b1"], w2, precision=hp)  # (25,)
    raw = [(w_eff, b_eff, 1)]
    # Stages 2-4: plain (1,10) convs; conv bias only on stage 4.
    for i, (w, b) in enumerate(((p["w3"], None), (p["w4"], None),
                                (p["w5"], p["b5"])), start=2):
        wk = jnp.transpose(w[:, :, 0, :], (2, 1, 0))           # (K, Cin, Cout)
        raw.append((wk, 0.0 if b is None else b, i))

    folded = []
    for idx, (wk, bias, i) in enumerate(raw):
        cin, cout = wk.shape[1], wk.shape[2]
        rep_in = _rep(cin)
        nt = _n_tiles(cin)
        out_rep = _rep(STAGE_CFGS[idx + 1][0]) if idx + 1 < len(raw) else 1
        s = p[f"g{i}"] / jnp.sqrt(p[f"v{i}"] + EPS)
        sh = p[f"be{i}"] + (bias - p[f"m{i}"]) * s
        wpad = jnp.zeros((nt, CPAD, CPAD), jnp.float32)
        spad = jnp.zeros((CPAD,), jnp.float32)
        hpad = jnp.zeros((CPAD,), jnp.float32)
        for r in range(out_rep):
            co = r * cout
            spad = spad.at[co:co + cout].set(s)
            hpad = hpad.at[co:co + cout].set(sh)
            for k in range(K):
                t, j = divmod(k, rep_in)
                wpad = wpad.at[t, j * cin:(j + 1) * cin, co:co + cout].set(wk[k])
        folded.append((wpad.reshape(nt * CPAD, CPAD).astype(jnp.bfloat16),
                       spad[None, :], hpad[None, :]))
    return folded


def _pick_block(N):
    """Samples per grid step: prefer an even number of grid steps (v7x runs 2 TCs)."""
    for b in range(min(8, N), 0, -1):
        if N % b == 0 and (N // b) % 2 == 0:
            return b
    for b in range(min(8, N), 0, -1):
        if N % b == 0:
            return b
    return 1


def deep4net_ws_forward(x_nchw, params):
    """x_nchw: (N, 1, 62, T) f32 -> flattened embedding, matches PyTorch forward()."""
    N, _, c_elec, T = x_nchw.shape
    assert c_elec == STAGE_CFGS[0][0], "Deep4NetWs expects 62 electrodes"
    rep0 = _rep(c_elec)
    # NCHW -> channels-last (N, T, 62); replicate the electrodes into the lane bands
    # stage 1's tap packing expects, zero-fill the rest, bf16 halves the HBM read.
    h = jnp.transpose(x_nchw[:, 0], (0, 2, 1))
    pieces = [h] * rep0
    if CPAD - rep0 * c_elec > 0:
        pieces.append(jnp.zeros((N, T, CPAD - rep0 * c_elec), h.dtype))
    h = jnp.concatenate(pieces, axis=-1).astype(jnp.bfloat16)

    flat = [leaf for tpl in fold_params(params) for leaf in tpl]
    B = _pick_block(N)
    fn, _ = _build_fused(N, B, T)
    out = fn(h, *flat)                                        # (N, W_final, 128)
    out = out[:, :, :STAGE_CFGS[-1][1]]                       # drop zero-padded lanes
    # match PyTorch's (N, C, 1, W).view(N, -1) flatten order.
    return jnp.transpose(out, (0, 2, 1)).reshape(N, -1)


def ref_forward(x, p):
    """Pure-JAX f32 reference (lax conv / reduce_window), NCHW like PyTorch."""
    hp = jax.lax.Precision.HIGHEST

    def conv(h, w, b=None):
        y = jax.lax.conv_general_dilated(
            h, w, (1, 1), "VALID",
            dimension_numbers=("NCHW", "OIHW", "NCHW"), precision=hp)
        return y if b is None else y + b[None, :, None, None]

    def bn(h, i):
        g, be, m, v = p[f"g{i}"], p[f"be{i}"], p[f"m{i}"], p[f"v{i}"]
        return ((h - m[None, :, None, None])
                / jnp.sqrt(v + EPS)[None, :, None, None]
                * g[None, :, None, None] + be[None, :, None, None])

    def elu(h):
        return jnp.where(h > 0, h, jnp.expm1(h))

    def pool(h, k, s):
        return jax.lax.reduce_window(h, -jnp.inf, jax.lax.max,
                                     (1, 1, 1, k), (1, 1, 1, s), "VALID")

    h = conv(x, p["w1"], p["b1"])
    h = conv(h, p["w2"])
    h = pool(elu(bn(h, 1)), 3, 2)
    h = pool(elu(bn(conv(h, p["w3"]), 2)), 3, 2)
    h = pool(elu(bn(conv(h, p["w4"]), 3)), 3, 2)
    h = pool(elu(bn(conv(h, p["w5"], p["b5"]), 4)), 3, 3)
    return h.reshape(h.shape[0], -1)


if __name__ == "__main__":
    key = jax.random.PRNGKey(0)
    pkey, xkey = jax.random.split(key)
    params = init_params(pkey)

    # 62 electrodes are required by the (62,1) spatial conv; T=200 keeps every stage
    # non-empty; N=4 -> 2 samples per grid step and an even 2-step grid (v7x: 2 TCs).
    N, T = 4, 200
    x = jax.random.normal(xkey, (N, 1, 62, T), dtype=jnp.float32)

    fwd = jax.jit(deep4net_ws_forward)
    out = jax.block_until_ready(fwd(x, params))
    ref = jax.block_until_ready(ref_forward(x, params))

    assert out.shape == ref.shape, (out.shape, ref.shape)
    # bf16 MXU inputs with f32 accumulation -> tolerance 2e-2.
    if not np.allclose(np.asarray(out), np.asarray(ref), rtol=2e-2, atol=2e-2):
        err = float(np.max(np.abs(np.asarray(out) - np.asarray(ref))))
        raise AssertionError(f"Pallas output mismatch vs reference, max|err|={err}")
    print("KERNEL_OK")
</pallas_src>

<mosaic_0001>
module attributes {stable_mosaic.version = 11 : i64} {
  func.func @_fused_kernel(%arg0: i32, %arg1: memref<2x200x128xbf16, #tpu.memory_space<vmem>>, %arg2: memref<640x128xbf16, #tpu.memory_space<vmem>>, %arg3: memref<1x128xf32, #tpu.memory_space<vmem>>, %arg4: memref<1x128xf32, #tpu.memory_space<vmem>>, %arg5: memref<256x128xbf16, #tpu.memory_space<vmem>>, %arg6: memref<1x128xf32, #tpu.memory_space<vmem>>, %arg7: memref<1x128xf32, #tpu.memory_space<vmem>>, %arg8: memref<640x128xbf16, #tpu.memory_space<vmem>>, %arg9: memref<1x128xf32, #tpu.memory_space<vmem>>, %arg10: memref<1x128xf32, #tpu.memory_space<vmem>>, %arg11: memref<1280x128xbf16, #tpu.memory_space<vmem>>, %arg12: memref<1x128xf32, #tpu.memory_space<vmem>>, %arg13: memref<1x128xf32, #tpu.memory_space<vmem>>, %arg14: memref<2x2x128xf32, #tpu.memory_space<vmem>>, %arg15: memref<384x640xbf16, #tpu.memory_space<vmem>>, %arg16: memref<192x256xbf16, #tpu.memory_space<vmem>>, %arg17: memref<96x640xbf16, #tpu.memory_space<vmem>>, %arg18: memref<32x1280xbf16, #tpu.memory_space<vmem>>, %arg19: memref<384x128xf32, #tpu.memory_space<vmem>>, %arg20: memref<192x128xf32, #tpu.memory_space<vmem>>, %arg21: memref<96x128xf32, #tpu.memory_space<vmem>>, %arg22: memref<32x128xf32, #tpu.memory_space<vmem>>) attributes {dimension_semantics = [#tpu.dimension_semantics<parallel>], iteration_bounds = array<i64: 2>, scalar_prefetch = 0 : i64, scratch_operands = 8 : i64, tpu.core_type = #tpu.core_type<tc>, window_params = [{transform_indices = @transform_0, window_bounds = array<i64: 2, 200, 128>}, {pipeline_mode = #tpu.pipeline_mode<synchronous>, transform_indices = @transform_1, window_bounds = array<i64: 640, 128>}, {pipeline_mode = #tpu.pipeline_mode<synchronous>, transform_indices = @transform_2, window_bounds = array<i64: 1, 128>}, {pipeline_mode = #tpu.pipeline_mode<synchronous>, transform_indices = @transform_3, window_bounds = array<i64: 1, 128>}, {pipeline_mode = #tpu.pipeline_mode<synchronous>, transform_indices = @transform_4, window_bounds = array<i64: 256, 128>}, {pipeline_mode = #tpu.pipeline_mode<synchronous>, transform_indices = @transform_5, window_bounds = array<i64: 1, 128>}, {pipeline_mode = #tpu.pipeline_mode<synchronous>, transform_indices = @transform_6, window_bounds = array<i64: 1, 128>}, {pipeline_mode = #tpu.pipeline_mode<synchronous>, transform_indices = @transform_7, window_bounds = array<i64: 640, 128>}, {pipeline_mode = #tpu.pipeline_mode<synchronous>, transform_indices = @transform_8, window_bounds = array<i64: 1, 128>}, {pipeline_mode = #tpu.pipeline_mode<synchronous>, transform_indices = @transform_9, window_bounds = array<i64: 1, 128>}, {pipeline_mode = #tpu.pipeline_mode<synchronous>, transform_indices = @transform_10, window_bounds = array<i64: 1280, 128>}, {pipeline_mode = #tpu.pipeline_mode<synchronous>, transform_indices = @transform_11, window_bounds = array<i64: 1, 128>}, {pipeline_mode = #tpu.pipeline_mode<synchronous>, transform_indices = @transform_12, window_bounds = array<i64: 1, 128>}, {transform_indices = @transform_13, window_bounds = array<i64: 2, 2, 128>}]} {
    %c0 = arith.constant 0 : index
    %c0_0 = arith.constant 0 : index
    %c0_1 = arith.constant 0 : index
    %0 = vector.load %arg1[%c0, %c0_0, %c0_1] : memref<2x200x128xbf16, #tpu.memory_space<vmem>>, vector<1x200x128xbf16>
    %1 = vector.shape_cast %0 : vector<1x200x128xbf16> to vector<200x128xbf16>
    %c1 = arith.constant 1 : index
    %c0_2 = arith.constant 0 : index
    %c0_3 = arith.constant 0 : index
    %2 = vector.load %arg1[%c1, %c0_2, %c0_3] : memref<2x200x128xbf16, #tpu.memory_space<vmem>>, vector<1x200x128xbf16>
    %3 = vector.shape_cast %2 : vector<1x200x128xbf16> to vector<200x128xbf16>
    %4 = tpu.iota {dimensions = array<i32: 1>} : vector<1x128xi32>
    %c0_i32 = arith.constant 0 : i32
    %5 = vector.broadcast %c0_i32 : i32 to vector<1x128xi32>
    %6 = arith.cmpi sge, %4, %5 : vector<1x128xi32>
    %c62_i32 = arith.constant 62 : i32
    %7 = vector.broadcast %c62_i32 : i32 to vector<1x128xi32>
    %8 = arith.cmpi slt, %4, %7 : vector<1x128xi32>
    %9 = arith.andi %6, %8 : vector<1x128xi1>
    %c62_i32_4 = arith.constant 62 : i32
    %10 = vector.broadcast %c62_i32_4 : i32 to vector<1x128xi32>
    %11 = arith.cmpi sge, %4, %10 : vector<1x128xi32>
    %c124_i32 = arith.constant 124 : i32
    %12 = vector.broadcast %c124_i32 : i32 to vector<1x128xi32>
    %13 = arith.cmpi slt, %4, %12 : vector<1x128xi32>
    %14 = arith.andi %11, %13 : vector<1x128xi1>
    %15 = vector.extract_strided_slice %1 {offsets = [0, 0], sizes = [191, 128], strides = [1, 1]} : vector<200x128xbf16> to vector<191x128xbf16>
    %c0_i32_5 = arith.constant 0 : i32
    %16 = arith.sitofp %c0_i32_5 : i32 to bf16
    %17 = vector.shape_cast %9 : vector<1x128xi1> to vector<1x128xi1>
    %18 = vector.broadcast %17 : vector<1x128xi1> to vector<191x128xi1>
    %19 = vector.broadcast %16 : bf16 to vector<191x128xbf16>
    %20 = arith.select %18, %15, %19 : vector<191x128xi1>, vector<191x128xbf16>
    %21 = vector.extract_strided_slice %1 {offsets = [1, 0], sizes = [191, 128], strides = [1, 1]} : vector<200x128xbf16> to vector<191x128xbf16>
    %c0_i32_6 = arith.constant 0 : i32
    %22 = arith.sitofp %c0_i32_6 : i32 to bf16
    %23 = vector.shape_cast %14 : vector<1x128xi1> to vector<1x128xi1>
    %24 = vector.broadcast %23 : vector<1x128xi1> to vector<191x128xi1>
    %25 = vector.broadcast %22 : bf16 to vector<191x128xbf16>
    %26 = arith.select %24, %21, %25 : vector<191x128xi1>, vector<191x128xbf16>
    %27 = arith.addf %20, %26 : vector<191x128xbf16>
    %c0_7 = arith.constant 0 : index
    %c0_8 = arith.constant 0 : index
    %28 = vector.load %arg15[%c0_7, %c0_8] : memref<384x640xbf16, #tpu.memory_space<vmem>>, vector<191x128xbf16>
    tpu.vector_store %arg15[%c0_7, %c0_8], %27 {strides = array<i32>} : memref<384x640xbf16, #tpu.memory_space<vmem>>, vector<191x128xbf16>,
    %29 = vector.extract_strided_slice %1 {offsets = [2, 0], sizes = [191, 128], strides = [1, 1]} : vector<200x128xbf16> to vector<191x128xbf16>
    %c0_i32_9 = arith.constant 0 : i32
    %30 = arith.sitofp %c0_i32_9 : i32 to bf16
    %31 = vector.shape_cast %9 : vector<1x128xi1> to vector<1x128xi1>
    %32 = vector.broadcast %31 : vector<1x128xi1> to vector<191x128xi1>
    %33 = vector.broadcast %30 : bf16 to vector<191x128xbf16>
    %34 = arith.select %32, %29, %33 : vector<191x128xi1>, vector<191x128xbf16>
    %35 = vector.extract_strided_slice %1 {offsets = [3, 0], sizes = [191, 128], strides = [1, 1]} : vector<200x128xbf16> to vector<191x128xbf16>
    %c0_i32_10 = arith.constant 0 : i32
    %36 = arith.sitofp %c0_i32_10 : i32 to bf16
    %37 = vector.shape_cast %14 : vector<1x128xi1> to vector<1x128xi1>
    %38 = vector.broadcast %37 : vector<1x128xi1> to vector<191x128xi1>
    %39 = vector.broadcast %36 : bf16 to vector<191x128xbf16>
    %40 = arith.select %38, %35, %39 : vector<191x128xi1>, vector<191x128xbf16>
    %41 = arith.addf %34, %40 : vector<191x128xbf16>
    %c0_11 = arith.constant 0 : index
    %c128 = arith.constant 128 : index
    %42 = vector.load %arg15[%c0_11, %c128] : memref<384x640xbf16, #tpu.memory_space<vmem>>, vector<191x128xbf16>
    tpu.vector_store %arg15[%c0_11, %c128], %41 {strides = array<i32>} : memref<384x640xbf16, #tpu.memory_space<vmem>>, vector<191x128xbf16>,
    %43 = vector.extract_strided_slice %1 {offsets = [4, 0], sizes = [191, 128], strides = [1, 1]} : vector<200x128xbf16> to vector<191x128xbf16>
    %c0_i32_12 = arith.constant 0 : i32
    %44 = arith.sitofp %c0_i32_12 : i32 to bf16
    %45 = vector.shape_cast %9 : vector<1x128xi1> to vector<1x128xi1>
    %46 = vector.broadcast %45 : vector<1x128xi1> to vector<191x128xi1>
    %47 = vector.broadcast %44 : bf16 to vector<191x128xbf16>
    %48 = arith.select %46, %43, %47 : vector<191x128xi1>, vector<191x128xbf16>
    %49 = vector.extract_strided_slice %1 {offsets = [5, 0], sizes = [191, 128], strides = [1, 1]} : vector<200x128xbf16> to vector<191x128xbf16>
    %c0_i32_13 = arith.constant 0 : i32
    %50 = arith.sitofp %c0_i32_13 : i32 to bf16
    %51 = vector.shape_cast %14 : vector<1x128xi1> to vector<1x128xi1>
    %52 = vector.broadcast %51 : vector<1x128xi1> to vector<191x128xi1>
    %53 = vector.broadcast %50 : bf16 to vector<191x128xbf16>
    %54 = arith.select %52, %49, %53 : vector<191x128xi1>, vector<191x128xbf16>
    %55 = arith.addf %48, %54 : vector<191x128xbf16>
    %c0_14 = arith.constant 0 : index
    %c256 = arith.constant 256 : index
    %56 = vector.load %arg15[%c0_14, %c256] : memref<384x640xbf16, #tpu.memory_space<vmem>>, vector<191x128xbf16>
    tpu.vector_store %arg15[%c0_14, %c256], %55 {strides = array<i32>} : memref<384x640xbf16, #tpu.memory_space<vmem>>, vector<191x128xbf16>,
    %57 = vector.extract_strided_slice %1 {offsets = [6, 0], sizes = [191, 128], strides = [1, 1]} : vector<200x128xbf16> to vector<191x128xbf16>
    %c0_i32_15 = arith.constant 0 : i32
    %58 = arith.sitofp %c0_i32_15 : i32 to bf16
    %59 = vector.shape_cast %9 : vector<1x128xi1> to vector<1x128xi1>
    %60 = vector.broadcast %59 : vector<1x128xi1> to vector<191x128xi1>
    %61 = vector.broadcast %58 : bf16 to vector<191x128xbf16>
    %62 = arith.select %60, %57, %61 : vector<191x128xi1>, vector<191x128xbf16>
    %63 = vector.extract_strided_slice %1 {offsets = [7, 0], sizes = [191, 128], strides = [1, 1]} : vector<200x128xbf16> to vector<191x128xbf16>
    %c0_i32_16 = arith.constant 0 : i32
    %64 = arith.sitofp %c0_i32_16 : i32 to bf16
    %65 = vector.shape_cast %14 : vector<1x128xi1> to vector<1x128xi1>
    %66 = vector.broadcast %65 : vector<1x128xi1> to vector<191x128xi1>
    %67 = vector.broadcast %64 : bf16 to vector<191x128xbf16>
    %68 = arith.select %66, %63, %67 : vector<191x128xi1>, vector<191x128xbf16>
    %69 = arith.addf %62, %68 : vector<191x128xbf16>
    %c0_17 = arith.constant 0 : index
    %c384 = arith.constant 384 : index
    %70 = vector.load %arg15[%c0_17, %c384] : memref<384x640xbf16, #tpu.memory_space<vmem>>, vector<191x128xbf16>
    tpu.vector_store %arg15[%c0_17, %c384], %69 {strides = array<i32>} : memref<384x640xbf16, #tpu.memory_space<vmem>>, vector<191x128xbf16>,
    %71 = vector.extract_strided_slice %1 {offsets = [8, 0], sizes = [191, 128], strides = [1, 1]} : vector<200x128xbf16> to vector<191x128xbf16>
    %c0_i32_18 = arith.constant 0 : i32
    %72 = arith.sitofp %c0_i32_18 : i32 to bf16
    %73 = vector.shape_cast %9 : vector<1x128xi1> to vector<1x128xi1>
    %74 = vector.broadcast %73 : vector<1x128xi1> to vector<191x128xi1>
    %75 = vector.broadcast %72 : bf16 to vector<191x128xbf16>
    %76 = arith.select %74, %71, %75 : vector<191x128xi1>, vector<191x128xbf16>
    %77 = vector.extract_strided_slice %1 {offsets = [9, 0], sizes = [191, 128], strides = [1, 1]} : vector<200x128xbf16> to vector<191x128xbf16>
    %c0_i32_19 = arith.constant 0 : i32
    %78 = arith.sitofp %c0_i32_19 : i32 to bf16
    %79 = vector.shape_cast %14 : vector<1x128xi1> to vector<1x128xi1>
    %80 = vector.broadcast %79 : vector<1x128xi1> to vector<191x128xi1>
    %81 = vector.broadcast %78 : bf16 to vector<191x128xbf16>
    %82 = arith.select %80, %77, %81 : vector<191x128xi1>, vector<191x128xbf16>
    %83 = arith.addf %76, %82 : vector<191x128xbf16>
    %c0_20 = arith.constant 0 : index
    %c512 = arith.constant 512 : index
    %84 = vector.load %arg15[%c0_20, %c512] : memref<384x640xbf16, #tpu.memory_space<vmem>>, vector<191x128xbf16>
    tpu.vector_store %arg15[%c0_20, %c512], %83 {strides = array<i32>} : memref<384x640xbf16, #tpu.memory_space<vmem>>, vector<191x128xbf16>,
    %85 = vector.extract_strided_slice %3 {offsets = [0, 0], sizes = [191, 128], strides = [1, 1]} : vector<200x128xbf16> to vector<191x128xbf16>
    %c0_i32_21 = arith.constant 0 : i32
    %86 = arith.sitofp %c0_i32_21 : i32 to bf16
    %87 = vector.shape_cast %9 : vector<1x128xi1> to vector<1x128xi1>
    %88 = vector.broadcast %87 : vector<1x128xi1> to vector<191x128xi1>
    %89 = vector.broadcast %86 : bf16 to vector<191x128xbf16>
    %90 = arith.select %88, %85, %89 : vector<191x128xi1>, vector<191x128xbf16>
    %91 = vector.extract_strided_slice %3 {offsets = [1, 0], sizes = [191, 128], strides = [1, 1]} : vector<200x128xbf16> to vector<191x128xbf16>
    %c0_i32_22 = arith.constant 0 : i32
    %92 = arith.sitofp %c0_i32_22 : i32 to bf16
    %93 = vector.shape_cast %14 : vector<1x128xi1> to vector<1x128xi1>
    %94 = vector.broadcast %93 : vector<1x128xi1> to vector<191x128xi1>
    %95 = vector.broadcast %92 : bf16 to vector<191x128xbf16>
    %96 = arith.select %94, %91, %95 : vector<191x128xi1>, vector<191x128xbf16>
    %97 = arith.addf %90, %96 : vector<191x128xbf16>
    %c192 = arith.constant 192 : index
    %c0_23 = arith.constant 0 : index
    %98 = vector.load %arg15[%c192, %c0_23] : memref<384x640xbf16, #tpu.memory_space<vmem>>, vector<191x128xbf16>
    tpu.vector_store %arg15[%c192, %c0_23], %97 {strides = array<i32>} : memref<384x640xbf16, #tpu.memory_space<vmem>>, vector<191x128xbf16>,
    %99 = vector.extract_strided_slice %3 {offsets = [2, 0], sizes = [191, 128], strides = [1, 1]} : vector<200x128xbf16> to vector<191x128xbf16>
    %c0_i32_24 = arith.constant 0 : i32
    %100 = arith.sitofp %c0_i32_24 : i32 to bf16
    %101 = vector.shape_cast %9 : vector<1x128xi1> to vector<1x128xi1>
    %102 = vector.broadcast %101 : vector<1x128xi1> to vector<191x128xi1>
    %103 = vector.broadcast %100 : bf16 to vector<191x128xbf16>
    %104 = arith.select %102, %99, %103 : vector<191x128xi1>, vector<191x128xbf16>
    %105 = vector.extract_strided_slice %3 {offsets = [3, 0], sizes = [191, 128], strides = [1, 1]} : vector<200x128xbf16> to vector<191x128xbf16>
    %c0_i32_25 = arith.constant 0 : i32
    %106 = arith.sitofp %c0_i32_25 : i32 to bf16
    %107 = vector.shape_cast %14 : vector<1x128xi1> to vector<1x128xi1>
    %108 = vector.broadcast %107 : vector<1x128xi1> to vector<191x128xi1>
    %109 = vector.broadcast %106 : bf16 to vector<191x128xbf16>
    %110 = arith.select %108, %105, %109 : vector<191x128xi1>, vector<191x128xbf16>
    %111 = arith.addf %104, %110 : vector<191x128xbf16>
    %c192_26 = arith.constant 192 : index
    %c128_27 = arith.constant 128 : index
    %112 = vector.load %arg15[%c192_26, %c128_27] : memref<384x640xbf16, #tpu.memory_space<vmem>>, vector<191x128xbf16>
    tpu.vector_store %arg15[%c192_26, %c128_27], %111 {strides = array<i32>} : memref<384x640xbf16, #tpu.memory_space<vmem>>, vector<191x128xbf16>,
    %113 = vector.extract_strided_slice %3 {offsets = [4, 0], sizes = [191, 128], strides = [1, 1]} : vector<200x128xbf16> to vector<191x128xbf16>
    %c0_i32_28 = arith.constant 0 : i32
    %114 = arith.sitofp %c0_i32_28 : i32 to bf16
    %115 = vector.shape_cast %9 : vector<1x128xi1> to vector<1x128xi1>
    %116 = vector.broadcast %115 : vector<1x128xi1> to vector<191x128xi1>
    %117 = vector.broadcast %114 : bf16 to vector<191x128xbf16>
    %118 = arith.select %116, %113, %117 : vector<191x128xi1>, vector<191x128xbf16>
    %119 = vector.extract_strided_slice %3 {offsets = [5, 0], sizes = [191, 128], strides = [1, 1]} : vector<200x128xbf16> to vector<191x128xbf16>
    %c0_i32_29 = arith.constant 0 : i32
    %120 = arith.sitofp %c0_i32_29 : i32 to bf16
    %121 = vector.shape_cast %14 : vector<1x128xi1> to vector<1x128xi1>
    %122 = vector.broadcast %121 : vector<1x128xi1> to vector<191x128xi1>
    %123 = vector.broadcast %120 : bf16 to vector<191x128xbf16>
    %124 = arith.select %122, %119, %123 : vector<191x128xi1>, vector<191x128xbf16>
    %125 = arith.addf %118, %124 : vector<191x128xbf16>
    %c192_30 = arith.constant 192 : index
    %c256_31 = arith.constant 256 : index
    %126 = vector.load %arg15[%c192_30, %c256_31] : memref<384x640xbf16, #tpu.memory_space<vmem>>, vector<191x128xbf16>
    tpu.vector_store %arg15[%c192_30, %c256_31], %125 {strides = array<i32>} : memref<384x640xbf16, #tpu.memory_space<vmem>>, vector<191x128xbf16>,
    %127 = vector.extract_strided_slice %3 {offsets = [6, 0], sizes = [191, 128], strides = [1, 1]} : vector<200x128xbf16> to vector<191x128xbf16>
    %c0_i32_32 = arith.constant 0 : i32
    %128 = arith.sitofp %c0_i32_32 : i32 to bf16
    %129 = vector.shape_cast %9 : vector<1x128xi1> to vector<1x128xi1>
    %130 = vector.broadcast %129 : vector<1x128xi1> to vector<191x128xi1>
    %131 = vector.broadcast %128 : bf16 to vector<191x128xbf16>
    %132 = arith.select %130, %127, %131 : vector<191x128xi1>, vector<191x128xbf16>
    %133 = vector.extract_strided_slice %3 {offsets = [7, 0], sizes = [191, 128], strides = [1, 1]} : vector<200x128xbf16> to vector<191x128xbf16>
    %c0_i32_33 = arith.constant 0 : i32
    %134 = arith.sitofp %c0_i32_33 : i32 to bf16
    %135 = vector.shape_cast %14 : vector<1x128xi1> to vector<1x128xi1>
    %136 = vector.broadcast %135 : vector<1x128xi1> to vector<191x128xi1>
    %137 = vector.broadcast %134 : bf16 to vector<191x128xbf16>
    %138 = arith.select %136, %133, %137 : vector<191x128xi1>, vector<191x128xbf16>
    %139 = arith.addf %132, %138 : vector<191x128xbf16>
    %c192_34 = arith.constant 192 : index
    %c384_35 = arith.constant 384 : index
    %140 = vector.load %arg15[%c192_34, %c384_35] : memref<384x640xbf16, #tpu.memory_space<vmem>>, vector<191x128xbf16>
    tpu.vector_store %arg15[%c192_34, %c384_35], %139 {strides = array<i32>} : memref<384x640xbf16, #tpu.memory_space<vmem>>, vector<191x128xbf16>,
    %141 = vector.extract_strided_slice %3 {offsets = [8, 0], sizes = [191, 128], strides = [1, 1]} : vector<200x128xbf16> to vector<191x128xbf16>
    %c0_i32_36 = arith.constant 0 : i32
    %142 = arith.sitofp %c0_i32_36 : i32 to bf16
    %143 = vector.shape_cast %9 : vector<1x128xi1> to vector<1x128xi1>
    %144 = vector.broadcast %143 : vector<1x128xi1> to vector<191x128xi1>
    %145 = vector.broadcast %142 : bf16 to vector<191x128xbf16>
    %146 = arith.select %144, %141, %145 : vector<191x128xi1>, vector<191x128xbf16>
    %147 = vector.extract_strided_slice %3 {offsets = [9, 0], sizes = [191, 128], strides = [1, 1]} : vector<200x128xbf16> to vector<191x128xbf16>
    %c0_i32_37 = arith.constant 0 : i32
    %148 = arith.sitofp %c0_i32_37 : i32 to bf16
    %149 = vector.shape_cast %14 : vector<1x128xi1> to vector<1x128xi1>
    %150 = vector.broadcast %149 : vector<1x128xi1> to vector<191x128xi1>
    %151 = vector.broadcast %148 : bf16 to vector<191x128xbf16>
    %152 = arith.select %150, %147, %151 : vector<191x128xi1>, vector<191x128xbf16>
    %153 = arith.addf %146, %152 : vector<191x128xbf16>
    %c192_38 = arith.constant 192 : index
    %c512_39 = arith.constant 512 : index
    %154 = vector.load %arg15[%c192_38, %c512_39] : memref<384x640xbf16, #tpu.memory_space<vmem>>, vector<191x128xbf16>
    tpu.vector_store %arg15[%c192_38, %c512_39], %153 {strides = array<i32>} : memref<384x640xbf16, #tpu.memory_space<vmem>>, vector<191x128xbf16>,
    %c0_40 = arith.constant 0 : index
    %c0_41 = arith.constant 0 : index
    %155 = vector.load %arg15[%c0_40, %c0_41] : memref<384x640xbf16, #tpu.memory_space<vmem>>, vector<384x640xbf16>
    %c0_42 = arith.constant 0 : index
    %c0_43 = arith.constant 0 : index
    %156 = vector.load %arg2[%c0_42, %c0_43] : memref<640x128xbf16, #tpu.memory_space<vmem>>, vector<640x128xbf16>
    %cst = arith.constant dense<0.000000e+00> : vector<384x128xf32>
    %157 = tpu.matmul %155, %156, %cst {dimension_numbers = #tpu.dot_dimension_numbers<[1], [0], [0], [1], [0, 0, 1, 1], [], []>} : vector<384x640xbf16>, vector<640x128xbf16>, vector<384x128xf32> -> vector<384x128xf32>
    %c0_44 = arith.constant 0 : index
    %c0_45 = arith.constant 0 : index
    %158 = vector.load %arg3[%c0_44, %c0_45] : memref<1x128xf32, #tpu.memory_space<vmem>>, vector<1x128xf32>
    %159 = vector.broadcast %158 : vector<1x128xf32> to vector<384x128xf32>
    %160 = arith.mulf %157, %159 : vector<384x128xf32>
    %c0_46 = arith.constant 0 : index
    %c0_47 = arith.constant 0 : index
    %161 = vector.load %arg4[%c0_46, %c0_47] : memref<1x128xf32, #tpu.memory_space<vmem>>, vector<1x128xf32>
    %162 = vector.broadcast %161 : vector<1x128xf32> to vector<384x128xf32>
    %163 = arith.addf %160, %162 : vector<384x128xf32>
    %cst_48 = arith.constant 0.000000e+00 : f32
    %164 = vector.broadcast %cst_48 : f32 to vector<384x128xf32>
    %165 = arith.cmpf ogt, %163, %164 : vector<384x128xf32>
    %cst_49 = arith.constant 0.000000e+00 : f32
    %166 = vector.broadcast %cst_49 : f32 to vector<384x128xf32>
    %167 = arith.minimumf %163, %166 : vector<384x128xf32>
    %168 = math.exp %167 : vector<384x128xf32>
    %cst_50 = arith.constant 1.000000e+00 : f32
    %169 = vector.broadcast %cst_50 : f32 to vector<384x128xf32>
    %170 = arith.subf %168, %169 : vector<384x128xf32>
    %171 = arith.select %165, %163, %170 : vector<384x128xi1>, vector<384x128xf32>
    %c0_51 = arith.constant 0 : index
    %c0_52 = arith.constant 0 : index
    %172 = vector.load %arg19[%c0_51, %c0_52] : memref<384x128xf32, #tpu.memory_space<vmem>>, vector<384x128xf32>
    tpu.vector_store %arg19[%c0_51, %c0_52], %171 {strides = array<i32>} : memref<384x128xf32, #tpu.memory_space<vmem>>, vector<384x128xf32>,
    %c0_53 = arith.constant 0 : index
    %c0_54 = arith.constant 0 : index
    %173 = tpu.strided_load %arg19[%c0_53, %c0_54] {strides = array<i32: 2, 1>} : memref<384x128xf32, #tpu.memory_space<vmem>>, vector<95x128xf32>
    %c1_55 = arith.constant 1 : index
    %c0_56 = arith.constant 0 : index
    %174 = tpu.strided_load %arg19[%c1_55, %c0_56] {strides = array<i32: 2, 1>} : memref<384x128xf32, #tpu.memory_space<vmem>>, vector<95x128xf32>
    %175 = arith.maximumf %173, %174 : vector<95x128xf32>
    %c2 = arith.constant 2 : index
    %c0_57 = arith.constant 0 : index
    %176 = tpu.strided_load %arg19[%c2, %c0_57] {strides = array<i32: 2, 1>} : memref<384x128xf32, #tpu.memory_space<vmem>>, vector<95x128xf32>
    %177 = arith.maximumf %175, %176 : vector<95x128xf32>
    %178 = arith.truncf %177 : vector<95x128xf32> to vector<95x128xbf16>
    %c192_58 = arith.constant 192 : index
    %c0_59 = arith.constant 0 : index
    %179 = tpu.strided_load %arg19[%c192_58, %c0_59] {strides = array<i32: 2, 1>} : memref<384x128xf32, #tpu.memory_space<vmem>>, vector<95x128xf32>
    %c193 = arith.constant 193 : index
    %c0_60 = arith.constant 0 : index
    %180 = tpu.strided_load %arg19[%c193, %c0_60] {strides = array<i32: 2, 1>} : memref<384x128xf32, #tpu.memory_space<vmem>>, vector<95x128xf32>
    %181 = arith.maximumf %179, %180 : vector<95x128xf32>
    %c194 = arith.constant 194 : index
    %c0_61 = arith.constant 0 : index
    %182 = tpu.strided_load %arg19[%c194, %c0_61] {strides = array<i32: 2, 1>} : memref<384x128xf32, #tpu.memory_space<vmem>>, vector<95x128xf32>
    %183 = arith.maximumf %181, %182 : vector<95x128xf32>
    %184 = arith.truncf %183 : vector<95x128xf32> to vector<95x128xbf16>
    %185 = tpu.iota {dimensions = array<i32: 1>} : vector<1x128xi32>
    %c0_i32_62 = arith.constant 0 : i32
    %186 = vector.broadcast %c0_i32_62 : i32 to vector<1x128xi32>
    %187 = arith.cmpi sge, %185, %186 : vector<1x128xi32>
    %c25_i32 = arith.constant 25 : i32
    %188 = vector.broadcast %c25_i32 : i32 to vector<1x128xi32>
    %189 = arith.cmpi slt, %185, %188 : vector<1x128xi32>
    %190 = arith.andi %187, %189 : vector<1x128xi1>
    %c25_i32_63 = arith.constant 25 : i32
    %191 = vector.broadcast %c25_i32_63 : i32 to vector<1x128xi32>
    %192 = arith.cmpi sge, %185, %191 : vector<1x128xi32>
    %c50_i32 = arith.constant 50 : i32
    %193 = vector.broadcast %c50_i32 : i32 to vector<1x128xi32>
    %194 = arith.cmpi slt, %185, %193 : vector<1x128xi32>
    %195 = arith.andi %192, %194 : vector<1x128xi1>
    %c50_i32_64 = arith.constant 50 : i32
    %196 = vector.broadcast %c50_i32_64 : i32 to vector<1x128xi32>
    %197 = arith.cmpi sge, %185, %196 : vector<1x128xi32>
    %c75_i32 = arith.constant 75 : i32
    %198 = vector.broadcast %c75_i32 : i32 to vector<1x128xi32>
    %199 = arith.cmpi slt, %185, %198 : vector<1x128xi32>
    %200 = arith.andi %197, %199 : vector<1x128xi1>
    %c75_i32_65 = arith.constant 75 : i32
    %201 = vector.broadcast %c75_i32_65 : i32 to vector<1x128xi32>
    %202 = arith.cmpi sge, %185, %201 : vector<1x128xi32>
    %c100_i32 = arith.constant 100 : i32
    %203 = vector.broadcast %c100_i32 : i32 to vector<1x128xi32>
    %204 = arith.cmpi slt, %185, %203 : vector<1x128xi32>
    %205 = arith.andi %202, %204 : vector<1x128xi1>
    %c100_i32_66 = arith.constant 100 : i32
    %206 = vector.broadcast %c100_i32_66 : i32 to vector<1x128xi32>
    %207 = arith.cmpi sge, %185, %206 : vector<1x128xi32>
    %c125_i32 = arith.constant 125 : i32
    %208 = vector.broadcast %c125_i32 : i32 to vector<1x128xi32>
    %209 = arith.cmpi slt, %185, %208 : vector<1x128xi32>
    %210 = arith.andi %207, %209 : vector<1x128xi1>
    %211 = vector.extract_strided_slice %178 {offsets = [0, 0], sizes = [86, 128], strides = [1, 1]} : vector<95x128xbf16> to vector<86x128xbf16>
    %c0_i32_67 = arith.constant 0 : i32
    %212 = arith.sitofp %c0_i32_67 : i32 to bf16
    %213 = vector.shape_cast %190 : vector<1x128xi1> to vector<1x128xi1>
    %214 = vector.broadcast %213 : vector<1x128xi1> to vector<86x128xi1>
    %215 = vector.broadcast %212 : bf16 to vector<86x128xbf16>
    %216 = arith.select %214, %211, %215 : vector<86x128xi1>, vector<86x128xbf16>
    %217 = vector.extract_strided_slice %178 {offsets = [1, 0], sizes = [86, 128], strides = [1, 1]} : vector<95x128xbf16> to vector<86x128xbf16>
    %c0_i32_68 = arith.constant 0 : i32
    %218 = arith.sitofp %c0_i32_68 : i32 to bf16
    %219 = vector.shape_cast %195 : vector<1x128xi1> to vector<1x128xi1>
    %220 = vector.broadcast %219 : vector<1x128xi1> to vector<86x128xi1>
    %221 = vector.broadcast %218 : bf16 to vector<86x128xbf16>
    %222 = arith.select %220, %217, %221 : vector<86x128xi1>, vector<86x128xbf16>
    %223 = arith.addf %216, %222 : vector<86x128xbf16>
    %224 = vector.extract_strided_slice %178 {offsets = [2, 0], sizes = [86, 128], strides = [1, 1]} : vector<95x128xbf16> to vector<86x128xbf16>
    %c0_i32_69 = arith.constant 0 : i32
    %225 = arith.sitofp %c0_i32_69 : i32 to bf16
    %226 = vector.shape_cast %200 : vector<1x128xi1> to vector<1x128xi1>
    %227 = vector.broadcast %226 : vector<1x128xi1> to vector<86x128xi1>
    %228 = vector.broadcast %225 : bf16 to vector<86x128xbf16>
    %229 = arith.select %227, %224, %228 : vector<86x128xi1>, vector<86x128xbf16>
    %230 = arith.addf %223, %229 : vector<86x128xbf16>
    %231 = vector.extract_strided_slice %178 {offsets = [3, 0], sizes = [86, 128], strides = [1, 1]} : vector<95x128xbf16> to vector<86x128xbf16>
    %c0_i32_70 = arith.constant 0 : i32
    %232 = arith.sitofp %c0_i32_70 : i32 to bf16
    %233 = vector.shape_cast %205 : vector<1x128xi1> to vector<1x128xi1>
    %234 = vector.broadcast %233 : vector<1x128xi1> to vector<86x128xi1>
    %235 = vector.broadcast %232 : bf16 to vector<86x128xbf16>
    %236 = arith.select %234, %231, %235 : vector<86x128xi1>, vector<86x128xbf16>
    %237 = arith.addf %230, %236 : vector<86x128xbf16>
    %238 = vector.extract_strided_slice %178 {offsets = [4, 0], sizes = [86, 128], strides = [1, 1]} : vector<95x128xbf16> to vector<86x128xbf16>
    %c0_i32_71 = arith.constant 0 : i32
    %239 = arith.sitofp %c0_i32_71 : i32 to bf16
    %240 = vector.shape_cast %210 : vector<1x128xi1> to vector<1x128xi1>
    %241 = vector.broadcast %240 : vector<1x128xi1> to vector<86x128xi1>
    %242 = vector.broadcast %239 : bf16 to vector<86x128xbf16>
    %243 = arith.select %241, %238, %242 : vector<86x128xi1>, vector<86x128xbf16>
    %244 = arith.addf %237, %243 : vector<86x128xbf16>
    %c0_72 = arith.constant 0 : index
    %c0_73 = arith.constant 0 : index
    %245 = vector.load %arg16[%c0_72, %c0_73] : memref<192x256xbf16, #tpu.memory_space<vmem>>, vector<86x128xbf16>
    tpu.vector_store %arg16[%c0_72, %c0_73], %244 {strides = array<i32>} : memref<192x256xbf16, #tpu.memory_space<vmem>>, vector<86x128xbf16>,
    %246 = vector.extract_strided_slice %178 {offsets = [5, 0], sizes = [86, 128], strides = [1, 1]} : vector<95x128xbf16> to vector<86x128xbf16>
    %c0_i32_74 = arith.constant 0 : i32
    %247 = arith.sitofp %c0_i32_74 : i32 to bf16
    %248 = vector.shape_cast %190 : vector<1x128xi1> to vector<1x128xi1>
    %249 = vector.broadcast %248 : vector<1x128xi1> to vector<86x128xi1>
    %250 = vector.broadcast %247 : bf16 to vector<86x128xbf16>
    %251 = arith.select %249, %246, %250 : vector<86x128xi1>, vector<86x128xbf16>
    %252 = vector.extract_strided_slice %178 {offsets = [6, 0], sizes = [86, 128], strides = [1, 1]} : vector<95x128xbf16> to vector<86x128xbf16>
    %c0_i32_75 = arith.constant 0 : i32
    %253 = arith.sitofp %c0_i32_75 : i32 to bf16
    %254 = vector.shape_cast %195 : vector<1x128xi1> to vector<1x128xi1>
    %255 = vector.broadcast %254 : vector<1x128xi1> to vector<86x128xi1>
    %256 = vector.broadcast %253 : bf16 to vector<86x128xbf16>
    %257 = arith.select %255, %252, %256 : vector<86x128xi1>, vector<86x128xbf16>
    %258 = arith.addf %251, %257 : vector<86x128xbf16>
    %259 = vector.extract_strided_slice %178 {offsets = [7, 0], sizes = [86, 128], strides = [1, 1]} : vector<95x128xbf16> to vector<86x128xbf16>
    %c0_i32_76 = arith.constant 0 : i32
    %260 = arith.sitofp %c0_i32_76 : i32 to bf16
    %261 = vector.shape_cast %200 : vector<1x128xi1> to vector<1x128xi1>
    %262 = vector.broadcast %261 : vector<1x128xi1> to vector<86x128xi1>
    %263 = vector.broadcast %260 : bf16 to vector<86x128xbf16>
    %264 = arith.select %262, %259, %263 : vector<86x128xi1>, vector<86x128xbf16>
    %265 = arith.addf %258, %264 : vector<86x128xbf16>
    %266 = vector.extract_strided_slice %178 {offsets = [8, 0], sizes = [86, 128], strides = [1, 1]} : vector<95x128xbf16> to vector<86x128xbf16>
    %c0_i32_77 = arith.constant 0 : i32
    %267 = arith.sitofp %c0_i32_77 : i32 to bf16
    %268 = vector.shape_cast %205 : vector<1x128xi1> to vector<1x128xi1>
    %269 = vector.broadcast %268 : vector<1x128xi1> to vector<86x128xi1>
    %270 = vector.broadcast %267 : bf16 to vector<86x128xbf16>
    %271 = arith.select %269, %266, %270 : vector<86x128xi1>, vector<86x128xbf16>
    %272 = arith.addf %265, %271 : vector<86x128xbf16>
    %273 = vector.extract_strided_slice %178 {offsets = [9, 0], sizes = [86, 128], strides = [1, 1]} : vector<95x128xbf16> to vector<86x128xbf16>
    %c0_i32_78 = arith.constant 0 : i32
    %274 = arith.sitofp %c0_i32_78 : i32 to bf16
    %275 = vector.shape_cast %210 : vector<1x128xi1> to vector<1x128xi1>
    %276 = vector.broadcast %275 : vector<1x128xi1> to vector<86x128xi1>
    %277 = vector.broadcast %274 : bf16 to vector<86x128xbf16>
    %278 = arith.select %276, %273, %277 : vector<86x128xi1>, vector<86x128xbf16>
    %279 = arith.addf %272, %278 : vector<86x128xbf16>
    %c0_79 = arith.constant 0 : index
    %c128_80 = arith.constant 128 : index
    %280 = vector.load %arg16[%c0_79, %c128_80] : memref<192x256xbf16, #tpu.memory_space<vmem>>, vector<86x128xbf16>
    tpu.vector_store %arg16[%c0_79, %c128_80], %279 {strides = array<i32>} : memref<192x256xbf16, #tpu.memory_space<vmem>>, vector<86x128xbf16>,
    %281 = vector.extract_strided_slice %184 {offsets = [0, 0], sizes = [86, 128], strides = [1, 1]} : vector<95x128xbf16> to vector<86x128xbf16>
    %c0_i32_81 = arith.constant 0 : i32
    %282 = arith.sitofp %c0_i32_81 : i32 to bf16
    %283 = vector.shape_cast %190 : vector<1x128xi1> to vector<1x128xi1>
    %284 = vector.broadcast %283 : vector<1x128xi1> to vector<86x128xi1>
    %285 = vector.broadcast %282 : bf16 to vector<86x128xbf16>
    %286 = arith.select %284, %281, %285 : vector<86x128xi1>, vector<86x128xbf16>
    %287 = vector.extract_strided_slice %184 {offsets = [1, 0], sizes = [86, 128], strides = [1, 1]} : vector<95x128xbf16> to vector<86x128xbf16>
    %c0_i32_82 = arith.constant 0 : i32
    %288 = arith.sitofp %c0_i32_82 : i32 to bf16
    %289 = vector.shape_cast %195 : vector<1x128xi1> to vector<1x128xi1>
    %290 = vector.broadcast %289 : vector<1x128xi1> to vector<86x128xi1>
    %291 = vector.broadcast %288 : bf16 to vector<86x128xbf16>
    %292 = arith.select %290, %287, %291 : vector<86x128xi1>, vector<86x128xbf16>
    %293 = arith.addf %286, %292 : vector<86x128xbf16>
    %294 = vector.extract_strided_slice %184 {offsets = [2, 0], sizes = [86, 128], strides = [1, 1]} : vector<95x128xbf16> to vector<86x128xbf16>
    %c0_i32_83 = arith.constant 0 : i32
    %295 = arith.sitofp %c0_i32_83 : i32 to bf16
    %296 = vector.shape_cast %200 : vector<1x128xi1> to vector<1x128xi1>
    %297 = vector.broadcast %296 : vector<1x128xi1> to vector<86x128xi1>
    %298 = vector.broadcast %295 : bf16 to vector<86x128xbf16>
    %299 = arith.select %297, %294, %298 : vector<86x128xi1>, vector<86x128xbf16>
    %300 = arith.addf %293, %299 : vector<86x128xbf16>
    %301 = vector.extract_strided_slice %184 {offsets = [3, 0], sizes = [86, 128], strides = [1, 1]} : vector<95x128xbf16> to vector<86x128xbf16>
    %c0_i32_84 = arith.constant 0 : i32
    %302 = arith.sitofp %c0_i32_84 : i32 to bf16
    %303 = vector.shape_cast %205 : vector<1x128xi1> to vector<1x128xi1>
    %304 = vector.broadcast %303 : vector<1x128xi1> to vector<86x128xi1>
    %305 = vector.broadcast %302 : bf16 to vector<86x128xbf16>
    %306 = arith.select %304, %301, %305 : vector<86x128xi1>, vector<86x128xbf16>
    %307 = arith.addf %300, %306 : vector<86x128xbf16>
    %308 = vector.extract_strided_slice %184 {offsets = [4, 0], sizes = [86, 128], strides = [1, 1]} : vector<95x128xbf16> to vector<86x128xbf16>
    %c0_i32_85 = arith.constant 0 : i32
    %309 = arith.sitofp %c0_i32_85 : i32 to bf16
    %310 = vector.shape_cast %210 : vector<1x128xi1> to vector<1x128xi1>
    %311 = vector.broadcast %310 : vector<1x128xi1> to vector<86x128xi1>
    %312 = vector.broadcast %309 : bf16 to vector<86x128xbf16>
    %313 = arith.select %311, %308, %312 : vector<86x128xi1>, vector<86x128xbf16>
    %314 = arith.addf %307, %313 : vector<86x128xbf16>
    %c96 = arith.constant 96 : index
    %c0_86 = arith.constant 0 : index
    %315 = vector.load %arg16[%c96, %c0_86] : memref<192x256xbf16, #tpu.memory_space<vmem>>, vector<86x128xbf16>
    tpu.vector_store %arg16[%c96, %c0_86], %314 {strides = array<i32>} : memref<192x256xbf16, #tpu.memory_space<vmem>>, vector<86x128xbf16>,
    %316 = vector.extract_strided_slice %184 {offsets = [5, 0], sizes = [86, 128], strides = [1, 1]} : vector<95x128xbf16> to vector<86x128xbf16>
    %c0_i32_87 = arith.constant 0 : i32
    %317 = arith.sitofp %c0_i32_87 : i32 to bf16
    %318 = vector.shape_cast %190 : vector<1x128xi1> to vector<1x128xi1>
    %319 = vector.broadcast %318 : vector<1x128xi1> to vector<86x128xi1>
    %320 = vector.broadcast %317 : bf16 to vector<86x128xbf16>
    %321 = arith.select %319, %316, %320 : vector<86x128xi1>, vector<86x128xbf16>
    %322 = vector.extract_strided_slice %184 {offsets = [6, 0], sizes = [86, 128], strides = [1, 1]} : vector<95x128xbf16> to vector<86x128xbf16>
    %c0_i32_88 = arith.constant 0 : i32
    %323 = arith.sitofp %c0_i32_88 : i32 to bf16
    %324 = vector.shape_cast %195 : vector<1x128xi1> to vector<1x128xi1>
    %325 = vector.broadcast %324 : vector<1x128xi1> to vector<86x128xi1>
    %326 = vector.broadcast %323 : bf16 to vector<86x128xbf16>
    %327 = arith.select %325, %322, %326 : vector<86x128xi1>, vector<86x128xbf16>
    %328 = arith.addf %321, %327 : vector<86x128xbf16>
    %329 = vector.extract_strided_slice %184 {offsets = [7, 0], sizes = [86, 128], strides = [1, 1]} : vector<95x128xbf16> to vector<86x128xbf16>
    %c0_i32_89 = arith.constant 0 : i32
    %330 = arith.sitofp %c0_i32_89 : i32 to bf16
    %331 = vector.shape_cast %200 : vector<1x128xi1> to vector<1x128xi1>
    %332 = vector.broadcast %331 : vector<1x128xi1> to vector<86x128xi1>
    %333 = vector.broadcast %330 : bf16 to vector<86x128xbf16>
    %334 = arith.select %332, %329, %333 : vector<86x128xi1>, vector<86x128xbf16>
    %335 = arith.addf %328, %334 : vector<86x128xbf16>
    %336 = vector.extract_strided_slice %184 {offsets = [8, 0], sizes = [86, 128], strides = [1, 1]} : vector<95x128xbf16> to vector<86x128xbf16>
    %c0_i32_90 = arith.constant 0 : i32
    %337 = arith.sitofp %c0_i32_90 : i32 to bf16
    %338 = vector.shape_cast %205 : vector<1x128xi1> to vector<1x128xi1>
    %339 = vector.broadcast %338 : vector<1x128xi1> to vector<86x128xi1>
    %340 = vector.broadcast %337 : bf16 to vector<86x128xbf16>
    %341 = arith.select %339, %336, %340 : vector<86x128xi1>, vector<86x128xbf16>
    %342 = arith.addf %335, %341 : vector<86x128xbf16>
    %343 = vector.extract_strided_slice %184 {offsets = [9, 0], sizes = [86, 128], strides = [1, 1]} : vector<95x128xbf16> to vector<86x128xbf16>
    %c0_i32_91 = arith.constant 0 : i32
    %344 = arith.sitofp %c0_i32_91 : i32 to bf16
    %345 = vector.shape_cast %210 : vector<1x128xi1> to vector<1x128xi1>
    %346 = vector.broadcast %345 : vector<1x128xi1> to vector<86x128xi1>
    %347 = vector.broadcast %344 : bf16 to vector<86x128xbf16>
    %348 = arith.select %346, %343, %347 : vector<86x128xi1>, vector<86x128xbf16>
    %349 = arith.addf %342, %348 : vector<86x128xbf16>
    %c96_92 = arith.constant 96 : index
    %c128_93 = arith.constant 128 : index
    %350 = vector.load %arg16[%c96_92, %c128_93] : memref<192x256xbf16, #tpu.memory_space<vmem>>, vector<86x128xbf16>
    tpu.vector_store %arg16[%c96_92, %c128_93], %349 {strides = array<i32>} : memref<192x256xbf16, #tpu.memory_space<vmem>>, vector<86x128xbf16>,
    %c0_94 = arith.constant 0 : index
    %c0_95 = arith.constant 0 : index
    %351 = vector.load %arg16[%c0_94, %c0_95] : memref<192x256xbf16, #tpu.memory_space<vmem>>, vector<192x256xbf16>
    %c0_96 = arith.constant 0 : index
    %c0_97 = arith.constant 0 : index
    %352 = vector.load %arg5[%c0_96, %c0_97] : memref<256x128xbf16, #tpu.memory_space<vmem>>, vector<256x128xbf16>
    %cst_98 = arith.constant dense<0.000000e+00> : vector<192x128xf32>
    %353 = tpu.matmul %351, %352, %cst_98 {dimension_numbers = #tpu.dot_dimension_numbers<[1], [0], [0], [1], [0, 0, 1, 1], [], []>} : vector<192x256xbf16>, vector<256x128xbf16>, vector<192x128xf32> -> vector<192x128xf32>
    %c0_99 = arith.constant 0 : index
    %c0_100 = arith.constant 0 : index
    %354 = vector.load %arg6[%c0_99, %c0_100] : memref<1x128xf32, #tpu.memory_space<vmem>>, vector<1x128xf32>
    %355 = vector.broadcast %354 : vector<1x128xf32> to vector<192x128xf32>
    %356 = arith.mulf %353, %355 : vector<192x128xf32>
    %c0_101 = arith.constant 0 : index
    %c0_102 = arith.constant 0 : index
    %357 = vector.load %arg7[%c0_101, %c0_102] : memref<1x128xf32, #tpu.memory_space<vmem>>, vector<1x128xf32>
    %358 = vector.broadcast %357 : vector<1x128xf32> to vector<192x128xf32>
    %359 = arith.addf %356, %358 : vector<192x128xf32>
    %cst_103 = arith.constant 0.000000e+00 : f32
    %360 = vector.broadcast %cst_103 : f32 to vector<192x128xf32>
    %361 = arith.cmpf ogt, %359, %360 : vector<192x128xf32>
    %cst_104 = arith.constant 0.000000e+00 : f32
    %362 = vector.broadcast %cst_104 : f32 to vector<192x128xf32>
    %363 = arith.minimumf %359, %362 : vector<192x128xf32>
    %364 = math.exp %363 : vector<192x128xf32>
    %cst_105 = arith.constant 1.000000e+00 : f32
    %365 = vector.broadcast %cst_105 : f32 to vector<192x128xf32>
    %366 = arith.subf %364, %365 : vector<192x128xf32>
    %367 = arith.select %361, %359, %366 : vector<192x128xi1>, vector<192x128xf32>
    %c0_106 = arith.constant 0 : index
    %c0_107 = arith.constant 0 : index
    %368 = vector.load %arg20[%c0_106, %c0_107] : memref<192x128xf32, #tpu.memory_space<vmem>>, vector<192x128xf32>
    tpu.vector_store %arg20[%c0_106, %c0_107], %367 {strides = array<i32>} : memref<192x128xf32, #tpu.memory_space<vmem>>, vector<192x128xf32>,
    %c0_108 = arith.constant 0 : index
    %c0_109 = arith.constant 0 : index
    %369 = tpu.strided_load %arg20[%c0_108, %c0_109] {strides = array<i32: 2, 1>} : memref<192x128xf32, #tpu.memory_space<vmem>>, vector<42x128xf32>
    %c1_110 = arith.constant 1 : index
    %c0_111 = arith.constant 0 : index
    %370 = tpu.strided_load %arg20[%c1_110, %c0_111] {strides = array<i32: 2, 1>} : memref<192x128xf32, #tpu.memory_space<vmem>>, vector<42x128xf32>
    %371 = arith.maximumf %369, %370 : vector<42x128xf32>
    %c2_112 = arith.constant 2 : index
    %c0_113 = arith.constant 0 : index
    %372 = tpu.strided_load %arg20[%c2_112, %c0_113] {strides = array<i32: 2, 1>} : memref<192x128xf32, #tpu.memory_space<vmem>>, vector<42x128xf32>
    %373 = arith.maximumf %371, %372 : vector<42x128xf32>
    %374 = arith.truncf %373 : vector<42x128xf32> to vector<42x128xbf16>
    %c96_114 = arith.constant 96 : index
    %c0_115 = arith.constant 0 : index
    %375 = tpu.strided_load %arg20[%c96_114, %c0_115] {strides = array<i32: 2, 1>} : memref<192x128xf32, #tpu.memory_space<vmem>>, vector<42x128xf32>
    %c97 = arith.constant 97 : index
    %c0_116 = arith.constant 0 : index
    %376 = tpu.strided_load %arg20[%c97, %c0_116] {strides = array<i32: 2, 1>} : memref<192x128xf32, #tpu.memory_space<vmem>>, vector<42x128xf32>
    %377 = arith.maximumf %375, %376 : vector<42x128xf32>
    %c98 = arith.constant 98 : index
    %c0_117 = arith.constant 0 : index
    %378 = tpu.strided_load %arg20[%c98, %c0_117] {strides = array<i32: 2, 1>} : memref<192x128xf32, #tpu.memory_space<vmem>>, vector<42x128xf32>
    %379 = arith.maximumf %377, %378 : vector<42x128xf32>
    %380 = arith.truncf %379 : vector<42x128xf32> to vector<42x128xbf16>
    %381 = tpu.iota {dimensions = array<i32: 1>} : vector<1x128xi32>
    %c0_i32_118 = arith.constant 0 : i32
    %382 = vector.broadcast %c0_i32_118 : i32 to vector<1x128xi32>
    %383 = arith.cmpi sge, %381, %382 : vector<1x128xi32>
    %c50_i32_119 = arith.constant 50 : i32
    %384 = vector.broadcast %c50_i32_119 : i32 to vector<1x128xi32>
    %385 = arith.cmpi slt, %381, %384 : vector<1x128xi32>
    %386 = arith.andi %383, %385 : vector<1x128xi1>
    %c50_i32_120 = arith.constant 50 : i32
    %387 = vector.broadcast %c50_i32_120 : i32 to vector<1x128xi32>
    %388 = arith.cmpi sge, %381, %387 : vector<1x128xi32>
    %c100_i32_121 = arith.constant 100 : i32
    %389 = vector.broadcast %c100_i32_121 : i32 to vector<1x128xi32>
    %390 = arith.cmpi slt, %381, %389 : vector<1x128xi32>
    %391 = arith.andi %388, %390 : vector<1x128xi1>
    %392 = vector.extract_strided_slice %374 {offsets = [0, 0], sizes = [33, 128], strides = [1, 1]} : vector<42x128xbf16> to vector<33x128xbf16>
    %c0_i32_122 = arith.constant 0 : i32
    %393 = arith.sitofp %c0_i32_122 : i32 to bf16
    %394 = vector.shape_cast %386 : vector<1x128xi1> to vector<1x128xi1>
    %395 = vector.broadcast %394 : vector<1x128xi1> to vector<33x128xi1>
    %396 = vector.broadcast %393 : bf16 to vector<33x128xbf16>
    %397 = arith.select %395, %392, %396 : vector<33x128xi1>, vector<33x128xbf16>
    %398 = vector.extract_strided_slice %374 {offsets = [1, 0], sizes = [33, 128], strides = [1, 1]} : vector<42x128xbf16> to vector<33x128xbf16>
    %c0_i32_123 = arith.constant 0 : i32
    %399 = arith.sitofp %c0_i32_123 : i32 to bf16
    %400 = vector.shape_cast %391 : vector<1x128xi1> to vector<1x128xi1>
    %401 = vector.broadcast %400 : vector<1x128xi1> to vector<33x128xi1>
    %402 = vector.broadcast %399 : bf16 to vector<33x128xbf16>
    %403 = arith.select %401, %398, %402 : vector<33x128xi1>, vector<33x128xbf16>
    %404 = arith.addf %397, %403 : vector<33x128xbf16>
    %c0_124 = arith.constant 0 : index
    %c0_125 = arith.constant 0 : index
    %405 = vector.load %arg17[%c0_124, %c0_125] : memref<96x640xbf16, #tpu.memory_space<vmem>>, vector<33x128xbf16>
    tpu.vector_store %arg17[%c0_124, %c0_125], %404 {strides = array<i32>} : memref<96x640xbf16, #tpu.memory_space<vmem>>, vector<33x128xbf16>,
    %406 = vector.extract_strided_slice %374 {offsets = [2, 0], sizes = [33, 128], strides = [1, 1]} : vector<42x128xbf16> to vector<33x128xbf16>
    %c0_i32_126 = arith.constant 0 : i32
    %407 = arith.sitofp %c0_i32_126 : i32 to bf16
    %408 = vector.shape_cast %386 : vector<1x128xi1> to vector<1x128xi1>
    %409 = vector.broadcast %408 : vector<1x128xi1> to vector<33x128xi1>
    %410 = vector.broadcast %407 : bf16 to vector<33x128xbf16>
    %411 = arith.select %409, %406, %410 : vector<33x128xi1>, vector<33x128xbf16>
    %412 = vector.extract_strided_slice %374 {offsets = [3, 0], sizes = [33, 128], strides = [1, 1]} : vector<42x128xbf16> to vector<33x128xbf16>
    %c0_i32_127 = arith.constant 0 : i32
    %413 = arith.sitofp %c0_i32_127 : i32 to bf16
    %414 = vector.shape_cast %391 : vector<1x128xi1> to vector<1x128xi1>
    %415 = vector.broadcast %414 : vector<1x128xi1> to vector<33x128xi1>
    %416 = vector.broadcast %413 : bf16 to vector<33x128xbf16>
    %417 = arith.select %415, %412, %416 : vector<33x128xi1>, vector<33x128xbf16>
    %418 = arith.addf %411, %417 : vector<33x128xbf16>
    %c0_128 = arith.constant 0 : index
    %c128_129 = arith.constant 128 : index
    %419 = vector.load %arg17[%c0_128, %c128_129] : memref<96x640xbf16, #tpu.memory_space<vmem>>, vector<33x128xbf16>
    tpu.vector_store %arg17[%c0_128, %c128_129], %418 {strides = array<i32>} : memref<96x640xbf16, #tpu.memory_space<vmem>>, vector<33x128xbf16>,
    %420 = vector.extract_strided_slice %374 {offsets = [4, 0], sizes = [33, 128], strides = [1, 1]} : vector<42x128xbf16> to vector<33x128xbf16>
    %c0_i32_130 = arith.constant 0 : i32
    %421 = arith.sitofp %c0_i32_130 : i32 to bf16
    %422 = vector.shape_cast %386 : vector<1x128xi1> to vector<1x128xi1>
    %423 = vector.broadcast %422 : vector<1x128xi1> to vector<33x128xi1>
    %424 = vector.broadcast %421 : bf16 to vector<33x128xbf16>
    %425 = arith.select %423, %420, %424 : vector<33x128xi1>, vector<33x128xbf16>
    %426 = vector.extract_strided_slice %374 {offsets = [5, 0], sizes = [33, 128], strides = [1, 1]} : vector<42x128xbf16> to vector<33x128xbf16>
    %c0_i32_131 = arith.constant 0 : i32
    %427 = arith.sitofp %c0_i32_131 : i32 to bf16
    %428 = vector.shape_cast %391 : vector<1x128xi1> to vector<1x128xi1>
    %429 = vector.broadcast %428 : vector<1x128xi1> to vector<33x128xi1>
    %430 = vector.broadcast %427 : bf16 to vector<33x128xbf16>
    %431 = arith.select %429, %426, %430 : vector<33x128xi1>, vector<33x128xbf16>
    %432 = arith.addf %425, %431 : vector<33x128xbf16>
    %c0_132 = arith.constant 0 : index
    %c256_133 = arith.constant 256 : index
    %433 = vector.load %arg17[%c0_132, %c256_133] : memref<96x640xbf16, #tpu.memory_space<vmem>>, vector<33x128xbf16>
    tpu.vector_store %arg17[%c0_132, %c256_133], %432 {strides = array<i32>} : memref<96x640xbf16, #tpu.memory_space<vmem>>, vector<33x128xbf16>,
    %434 = vector.extract_strided_slice %374 {offsets = [6, 0], sizes = [33, 128], strides = [1, 1]} : vector<42x128xbf16> to vector<33x128xbf16>
    %c0_i32_134 = arith.constant 0 : i32
    %435 = arith.sitofp %c0_i32_134 : i32 to bf16
    %436 = vector.shape_cast %386 : vector<1x128xi1> to vector<1x128xi1>
    %437 = vector.broadcast %436 : vector<1x128xi1> to vector<33x128xi1>
    %438 = vector.broadcast %435 : bf16 to vector<33x128xbf16>
    %439 = arith.select %437, %434, %438 : vector<33x128xi1>, vector<33x128xbf16>
    %440 = vector.extract_strided_slice %374 {offsets = [7, 0], sizes = [33, 128], strides = [1, 1]} : vector<42x128xbf16> to vector<33x128xbf16>
    %c0_i32_135 = arith.constant 0 : i32
    %441 = arith.sitofp %c0_i32_135 : i32 to bf16
    %442 = vector.shape_cast %391 : vector<1x128xi1> to vector<1x128xi1>
    %443 = vector.broadcast %442 : vector<1x128xi1> to vector<33x128xi1>
    %444 = vector.broadcast %441 : bf16 to vector<33x128xbf16>
    %445 = arith.select %443, %440, %444 : vector<33x128xi1>, vector<33x128xbf16>
    %446 = arith.addf %439, %445 : vector<33x128xbf16>
    %c0_136 = arith.constant 0 : index
    %c384_137 = arith.constant 384 : index
    %447 = vector.load %arg17[%c0_136, %c384_137] : memref<96x640xbf16, #tpu.memory_space<vmem>>, vector<33x128xbf16>
    tpu.vector_store %arg17[%c0_136, %c384_137], %446 {strides = array<i32>} : memref<96x640xbf16, #tpu.memory_space<vmem>>, vector<33x128xbf16>,
    %448 = vector.extract_strided_slice %374 {offsets = [8, 0], sizes = [33, 128], strides = [1, 1]} : vector<42x128xbf16> to vector<33x128xbf16>
    %c0_i32_138 = arith.constant 0 : i32
    %449 = arith.sitofp %c0_i32_138 : i32 to bf16
    %450 = vector.shape_cast %386 : vector<1x128xi1> to vector<1x128xi1>
    %451 = vector.broadcast %450 : vector<1x128xi1> to vector<33x128xi1>
    %452 = vector.broadcast %449 : bf16 to vector<33x128xbf16>
    %453 = arith.select %451, %448, %452 : vector<33x128xi1>, vector<33x128xbf16>
    %454 = vector.extract_strided_slice %374 {offsets = [9, 0], sizes = [33, 128], strides = [1, 1]} : vector<42x128xbf16> to vector<33x128xbf16>
    %c0_i32_139 = arith.constant 0 : i32
    %455 = arith.sitofp %c0_i32_139 : i32 to bf16
    %456 = vector.shape_cast %391 : vector<1x128xi1> to vector<1x128xi1>
    %457 = vector.broadcast %456 : vector<1x128xi1> to vector<33x128xi1>
    %458 = vector.broadcast %455 : bf16 to vector<33x128xbf16>
    %459 = arith.select %457, %454, %458 : vector<33x128xi1>, vector<33x128xbf16>
    %460 = arith.addf %453, %459 : vector<33x128xbf16>
    %c0_140 = arith.constant 0 : index
    %c512_141 = arith.constant 512 : index
    %461 = vector.load %arg17[%c0_140, %c512_141] : memref<96x640xbf16, #tpu.memory_space<vmem>>, vector<33x128xbf16>
    tpu.vector_store %arg17[%c0_140, %c512_141], %460 {strides = array<i32>} : memref<96x640xbf16, #tpu.memory_space<vmem>>, vector<33x128xbf16>,
    %462 = vector.extract_strided_slice %380 {offsets = [0, 0], sizes = [33, 128], strides = [1, 1]} : vector<42x128xbf16> to vector<33x128xbf16>
    %c0_i32_142 = arith.constant 0 : i32
    %463 = arith.sitofp %c0_i32_142 : i32 to bf16
    %464 = vector.shape_cast %386 : vector<1x128xi1> to vector<1x128xi1>
    %465 = vector.broadcast %464 : vector<1x128xi1> to vector<33x128xi1>
    %466 = vector.broadcast %463 : bf16 to vector<33x128xbf16>
    %467 = arith.select %465, %462, %466 : vector<33x128xi1>, vector<33x128xbf16>
    %468 = vector.extract_strided_slice %380 {offsets = [1, 0], sizes = [33, 128], strides = [1, 1]} : vector<42x128xbf16> to vector<33x128xbf16>
    %c0_i32_143 = arith.constant 0 : i32
    %469 = arith.sitofp %c0_i32_143 : i32 to bf16
    %470 = vector.shape_cast %391 : vector<1x128xi1> to vector<1x128xi1>
    %471 = vector.broadcast %470 : vector<1x128xi1> to vector<33x128xi1>
    %472 = vector.broadcast %469 : bf16 to vector<33x128xbf16>
    %473 = arith.select %471, %468, %472 : vector<33x128xi1>, vector<33x128xbf16>
    %474 = arith.addf %467, %473 : vector<33x128xbf16>
    %c48 = arith.constant 48 : index
    %c0_144 = arith.constant 0 : index
    %475 = vector.load %arg17[%c48, %c0_144] : memref<96x640xbf16, #tpu.memory_space<vmem>>, vector<33x128xbf16>
    tpu.vector_store %arg17[%c48, %c0_144], %474 {strides = array<i32>} : memref<96x640xbf16, #tpu.memory_space<vmem>>, vector<33x128xbf16>,
    %476 = vector.extract_strided_slice %380 {offsets = [2, 0], sizes = [33, 128], strides = [1, 1]} : vector<42x128xbf16> to vector<33x128xbf16>
    %c0_i32_145 = arith.constant 0 : i32
    %477 = arith.sitofp %c0_i32_145 : i32 to bf16
    %478 = vector.shape_cast %386 : vector<1x128xi1> to vector<1x128xi1>
    %479 = vector.broadcast %478 : vector<1x128xi1> to vector<33x128xi1>
    %480 = vector.broadcast %477 : bf16 to vector<33x128xbf16>
    %481 = arith.select %479, %476, %480 : vector<33x128xi1>, vector<33x128xbf16>
    %482 = vector.extract_strided_slice %380 {offsets = [3, 0], sizes = [33, 128], strides = [1, 1]} : vector<42x128xbf16> to vector<33x128xbf16>
    %c0_i32_146 = arith.constant 0 : i32
    %483 = arith.sitofp %c0_i32_146 : i32 to bf16
    %484 = vector.shape_cast %391 : vector<1x128xi1> to vector<1x128xi1>
    %485 = vector.broadcast %484 : vector<1x128xi1> to vector<33x128xi1>
    %486 = vector.broadcast %483 : bf16 to vector<33x128xbf16>
    %487 = arith.select %485, %482, %486 : vector<33x128xi1>, vector<33x128xbf16>
    %488 = arith.addf %481, %487 : vector<33x128xbf16>
    %c48_147 = arith.constant 48 : index
    %c128_148 = arith.constant 128 : index
    %489 = vector.load %arg17[%c48_147, %c128_148] : memref<96x640xbf16, #tpu.memory_space<vmem>>, vector<33x128xbf16>
    tpu.vector_store %arg17[%c48_147, %c128_148], %488 {strides = array<i32>} : memref<96x640xbf16, #tpu.memory_space<vmem>>, vector<33x128xbf16>,
    %490 = vector.extract_strided_slice %380 {offsets = [4, 0], sizes = [33, 128], strides = [1, 1]} : vector<42x128xbf16> to vector<33x128xbf16>
    %c0_i32_149 = arith.constant 0 : i32
    %491 = arith.sitofp %c0_i32_149 : i32 to bf16
    %492 = vector.shape_cast %386 : vector<1x128xi1> to vector<1x128xi1>
    %493 = vector.broadcast %492 : vector<1x128xi1> to vector<33x128xi1>
    %494 = vector.broadcast %491 : bf16 to vector<33x128xbf16>
    %495 = arith.select %493, %490, %494 : vector<33x128xi1>, vector<33x128xbf16>
    %496 = vector.extract_strided_slice %380 {offsets = [5, 0], sizes = [33, 128], strides = [1, 1]} : vector<42x128xbf16> to vector<33x128xbf16>
    %c0_i32_150 = arith.constant 0 : i32
    %497 = arith.sitofp %c0_i32_150 : i32 to bf16
    %498 = vector.shape_cast %391 : vector<1x128xi1> to vector<1x128xi1>
    %499 = vector.broadcast %498 : vector<1x128xi1> to vector<33x128xi1>
    %500 = vector.broadcast %497 : bf16 to vector<33x128xbf16>
    %501 = arith.select %499, %496, %500 : vector<33x128xi1>, vector<33x128xbf16>
    %502 = arith.addf %495, %501 : vector<33x128xbf16>
    %c48_151 = arith.constant 48 : index
    %c256_152 = arith.constant 256 : index
    %503 = vector.load %arg17[%c48_151, %c256_152] : memref<96x640xbf16, #tpu.memory_space<vmem>>, vector<33x128xbf16>
    tpu.vector_store %arg17[%c48_151, %c256_152], %502 {strides = array<i32>} : memref<96x640xbf16, #tpu.memory_space<vmem>>, vector<33x128xbf16>,
    %504 = vector.extract_strided_slice %380 {offsets = [6, 0], sizes = [33, 128], strides = [1, 1]} : vector<42x128xbf16> to vector<33x128xbf16>
    %c0_i32_153 = arith.constant 0 : i32
    %505 = arith.sitofp %c0_i32_153 : i32 to bf16
    %506 = vector.shape_cast %386 : vector<1x128xi1> to vector<1x128xi1>
    %507 = vector.broadcast %506 : vector<1x128xi1> to vector<33x128xi1>
    %508 = vector.broadcast %505 : bf16 to vector<33x128xbf16>
    %509 = arith.select %507, %504, %508 : vector<33x128xi1>, vector<33x128xbf16>
    %510 = vector.extract_strided_slice %380 {offsets = [7, 0], sizes = [33, 128], strides = [1, 1]} : vector<42x128xbf16> to vector<33x128xbf16>
    %c0_i32_154 = arith.constant 0 : i32
    %511 = arith.sitofp %c0_i32_154 : i32 to bf16
    %512 = vector.shape_cast %391 : vector<1x128xi1> to vector<1x128xi1>
    %513 = vector.broadcast %512 : vector<1x128xi1> to vector<33x128xi1>
    %514 = vector.broadcast %511 : bf16 to vector<33x128xbf16>
    %515 = arith.select %513, %510, %514 : vector<33x128xi1>, vector<33x128xbf16>
    %516 = arith.addf %509, %515 : vector<33x128xbf16>
    %c48_155 = arith.constant 48 : index
    %c384_156 = arith.constant 384 : index
    %517 = vector.load %arg17[%c48_155, %c384_156] : memref<96x640xbf16, #tpu.memory_space<vmem>>, vector<33x128xbf16>
    tpu.vector_store %arg17[%c48_155, %c384_156], %516 {strides = array<i32>} : memref<96x640xbf16, #tpu.memory_space<vmem>>, vector<33x128xbf16>,
    %518 = vector.extract_strided_slice %380 {offsets = [8, 0], sizes = [33, 128], strides = [1, 1]} : vector<42x128xbf16> to vector<33x128xbf16>
    %c0_i32_157 = arith.constant 0 : i32
    %519 = arith.sitofp %c0_i32_157 : i32 to bf16
    %520 = vector.shape_cast %386 : vector<1x128xi1> to vector<1x128xi1>
    %521 = vector.broadcast %520 : vector<1x128xi1> to vector<33x128xi1>
    %522 = vector.broadcast %519 : bf16 to vector<33x128xbf16>
    %523 = arith.select %521, %518, %522 : vector<33x128xi1>, vector<33x128xbf16>
    %524 = vector.extract_strided_slice %380 {offsets = [9, 0], sizes = [33, 128], strides = [1, 1]} : vector<42x128xbf16> to vector<33x128xbf16>
    %c0_i32_158 = arith.constant 0 : i32
    %525 = arith.sitofp %c0_i32_158 : i32 to bf16
    %526 = vector.shape_cast %391 : vector<1x128xi1> to vector<1x128xi1>
    %527 = vector.broadcast %526 : vector<1x128xi1> to vector<33x128xi1>
    %528 = vector.broadcast %525 : bf16 to vector<33x128xbf16>
    %529 = arith.select %527, %524, %528 : vector<33x128xi1>, vector<33x128xbf16>
    %530 = arith.addf %523, %529 : vector<33x128xbf16>
    %c48_159 = arith.constant 48 : index
    %c512_160 = arith.constant 512 : index
    %531 = vector.load %arg17[%c48_159, %c512_160] : memref<96x640xbf16, #tpu.memory_space<vmem>>, vector<33x128xbf16>
    tpu.vector_store %arg17[%c48_159, %c512_160], %530 {strides = array<i32>} : memref<96x640xbf16, #tpu.memory_space<vmem>>, vector<33x128xbf16>,
    %c0_161 = arith.constant 0 : index
    %c0_162 = arith.constant 0 : index
    %532 = vector.load %arg17[%c0_161, %c0_162] : memref<96x640xbf16, #tpu.memory_space<vmem>>, vector<96x640xbf16>
    %c0_163 = arith.constant 0 : index
    %c0_164 = arith.constant 0 : index
    %533 = vector.load %arg8[%c0_163, %c0_164] : memref<640x128xbf16, #tpu.memory_space<vmem>>, vector<640x128xbf16>
    %cst_165 = arith.constant dense<0.000000e+00> : vector<96x128xf32>
    %534 = tpu.matmul %532, %533, %cst_165 {dimension_numbers = #tpu.dot_dimension_numbers<[1], [0], [0], [1], [0, 0, 1, 1], [], []>} : vector<96x640xbf16>, vector<640x128xbf16>, vector<96x128xf32> -> vector<96x128xf32>
    %c0_166 = arith.constant 0 : index
    %c0_167 = arith.constant 0 : index
    %535 = vector.load %arg9[%c0_166, %c0_167] : memref<1x128xf32, #tpu.memory_space<vmem>>, vector<1x128xf32>
    %536 = vector.broadcast %535 : vector<1x128xf32> to vector<96x128xf32>
    %537 = arith.mulf %534, %536 : vector<96x128xf32>
    %c0_168 = arith.constant 0 : index
    %c0_169 = arith.constant 0 : index
    %538 = vector.load %arg10[%c0_168, %c0_169] : memref<1x128xf32, #tpu.memory_space<vmem>>, vector<1x128xf32>
    %539 = vector.broadcast %538 : vector<1x128xf32> to vector<96x128xf32>
    %540 = arith.addf %537, %539 : vector<96x128xf32>
    %cst_170 = arith.constant 0.000000e+00 : f32
    %541 = vector.broadcast %cst_170 : f32 to vector<96x128xf32>
    %542 = arith.cmpf ogt, %540, %541 : vector<96x128xf32>
    %cst_171 = arith.constant 0.000000e+00 : f32
    %543 = vector.broadcast %cst_171 : f32 to vector<96x128xf32>
    %544 = arith.minimumf %540, %543 : vector<96x128xf32>
    %545 = math.exp %544 : vector<96x128xf32>
    %cst_172 = arith.constant 1.000000e+00 : f32
    %546 = vector.broadcast %cst_172 : f32 to vector<96x128xf32>
    %547 = arith.subf %545, %546 : vector<96x128xf32>
    %548 = arith.select %542, %540, %547 : vector<96x128xi1>, vector<96x128xf32>
    %c0_173 = arith.constant 0 : index
    %c0_174 = arith.constant 0 : index
    %549 = vector.load %arg21[%c0_173, %c0_174] : memref<96x128xf32, #tpu.memory_space<vmem>>, vector<96x128xf32>
    tpu.vector_store %arg21[%c0_173, %c0_174], %548 {strides = array<i32>} : memref<96x128xf32, #tpu.memory_space<vmem>>, vector<96x128xf32>,
    %c0_175 = arith.constant 0 : index
    %c0_176 = arith.constant 0 : index
    %550 = tpu.strided_load %arg21[%c0_175, %c0_176] {strides = array<i32: 2, 1>} : memref<96x128xf32, #tpu.memory_space<vmem>>, vector<16x128xf32>
    %c1_177 = arith.constant 1 : index
    %c0_178 = arith.constant 0 : index
    %551 = tpu.strided_load %arg21[%c1_177, %c0_178] {strides = array<i32: 2, 1>} : memref<96x128xf32, #tpu.memory_space<vmem>>, vector<16x128xf32>
    %552 = arith.maximumf %550, %551 : vector<16x128xf32>
    %c2_179 = arith.constant 2 : index
    %c0_180 = arith.constant 0 : index
    %553 = tpu.strided_load %arg21[%c2_179, %c0_180] {strides = array<i32: 2, 1>} : memref<96x128xf32, #tpu.memory_space<vmem>>, vector<16x128xf32>
    %554 = arith.maximumf %552, %553 : vector<16x128xf32>
    %555 = arith.truncf %554 : vector<16x128xf32> to vector<16x128xbf16>
    %c48_181 = arith.constant 48 : index
    %c0_182 = arith.constant 0 : index
    %556 = tpu.strided_load %arg21[%c48_181, %c0_182] {strides = array<i32: 2, 1>} : memref<96x128xf32, #tpu.memory_space<vmem>>, vector<16x128xf32>
    %c49 = arith.constant 49 : index
    %c0_183 = arith.constant 0 : index
    %557 = tpu.strided_load %arg21[%c49, %c0_183] {strides = array<i32: 2, 1>} : memref<96x128xf32, #tpu.memory_space<vmem>>, vector<16x128xf32>
    %558 = arith.maximumf %556, %557 : vector<16x128xf32>
    %c50 = arith.constant 50 : index
    %c0_184 = arith.constant 0 : index
    %559 = tpu.strided_load %arg21[%c50, %c0_184] {strides = array<i32: 2, 1>} : memref<96x128xf32, #tpu.memory_space<vmem>>, vector<16x128xf32>
    %560 = arith.maximumf %558, %559 : vector<16x128xf32>
    %561 = arith.truncf %560 : vector<16x128xf32> to vector<16x128xbf16>
    %562 = vector.extract_strided_slice %555 {offsets = [0, 0], sizes = [7, 128], strides = [1, 1]} : vector<16x128xbf16> to vector<7x128xbf16>
    %c0_185 = arith.constant 0 : index
    %c0_186 = arith.constant 0 : index
    %563 = vector.load %arg18[%c0_185, %c0_186] : memref<32x1280xbf16, #tpu.memory_space<vmem>>, vector<7x128xbf16>
    tpu.vector_store %arg18[%c0_185, %c0_186], %562 {strides = array<i32>} : memref<32x1280xbf16, #tpu.memory_space<vmem>>, vector<7x128xbf16>,
    %564 = vector.extract_strided_slice %555 {offsets = [1, 0], sizes = [7, 128], strides = [1, 1]} : vector<16x128xbf16> to vector<7x128xbf16>
    %c0_187 = arith.constant 0 : index
    %c128_188 = arith.constant 128 : index
    %565 = vector.load %arg18[%c0_187, %c128_188] : memref<32x1280xbf16, #tpu.memory_space<vmem>>, vector<7x128xbf16>
    tpu.vector_store %arg18[%c0_187, %c128_188], %564 {strides = array<i32>} : memref<32x1280xbf16, #tpu.memory_space<vmem>>, vector<7x128xbf16>,
    %566 = vector.extract_strided_slice %555 {offsets = [2, 0], sizes = [7, 128], strides = [1, 1]} : vector<16x128xbf16> to vector<7x128xbf16>
    %c0_189 = arith.constant 0 : index
    %c256_190 = arith.constant 256 : index
    %567 = vector.load %arg18[%c0_189, %c256_190] : memref<32x1280xbf16, #tpu.memory_space<vmem>>, vector<7x128xbf16>
    tpu.vector_store %arg18[%c0_189, %c256_190], %566 {strides = array<i32>} : memref<32x1280xbf16, #tpu.memory_space<vmem>>, vector<7x128xbf16>,
    %568 = vector.extract_strided_slice %555 {offsets = [3, 0], sizes = [7, 128], strides = [1, 1]} : vector<16x128xbf16> to vector<7x128xbf16>
    %c0_191 = arith.constant 0 : index
    %c384_192 = arith.constant 384 : index
    %569 = vector.load %arg18[%c0_191, %c384_192] : memref<32x1280xbf16, #tpu.memory_space<vmem>>, vector<7x128xbf16>
    tpu.vector_store %arg18[%c0_191, %c384_192], %568 {strides = array<i32>} : memref<32x1280xbf16, #tpu.memory_space<vmem>>, vector<7x128xbf16>,
    %570 = vector.extract_strided_slice %555 {offsets = [4, 0], sizes = [7, 128], strides = [1, 1]} : vector<16x128xbf16> to vector<7x128xbf16>
    %c0_193 = arith.constant 0 : index
    %c512_194 = arith.constant 512 : index
    %571 = vector.load %arg18[%c0_193, %c512_194] : memref<32x1280xbf16, #tpu.memory_space<vmem>>, vector<7x128xbf16>
    tpu.vector_store %arg18[%c0_193, %c512_194], %570 {strides = array<i32>} : memref<32x1280xbf16, #tpu.memory_space<vmem>>, vector<7x128xbf16>,
    %572 = vector.extract_strided_slice %555 {offsets = [5, 0], sizes = [7, 128], strides = [1, 1]} : vector<16x128xbf16> to vector<7x128xbf16>
    %c0_195 = arith.constant 0 : index
    %c640 = arith.constant 640 : index
    %573 = vector.load %arg18[%c0_195, %c640] : memref<32x1280xbf16, #tpu.memory_space<vmem>>, vector<7x128xbf16>
    tpu.vector_store %arg18[%c0_195, %c640], %572 {strides = array<i32>} : memref<32x1280xbf16, #tpu.memory_space<vmem>>, vector<7x128xbf16>,
    %574 = vector.extract_strided_slice %555 {offsets = [6, 0], sizes = [7, 128], strides = [1, 1]} : vector<16x128xbf16> to vector<7x128xbf16>
    %c0_196 = arith.constant 0 : index
    %c768 = arith.constant 768 : index
    %575 = vector.load %arg18[%c0_196, %c768] : memref<32x1280xbf16, #tpu.memory_space<vmem>>, vector<7x128xbf16>
    tpu.vector_store %arg18[%c0_196, %c768], %574 {strides = array<i32>} : memref<32x1280xbf16, #tpu.memory_space<vmem>>, vector<7x128xbf16>,
    %576 = vector.extract_strided_slice %555 {offsets = [7, 0], sizes = [7, 128], strides = [1, 1]} : vector<16x128xbf16> to vector<7x128xbf16>
    %c0_197 = arith.constant 0 : index
    %c896 = arith.constant 896 : index
    %577 = vector.load %arg18[%c0_197, %c896] : memref<32x1280xbf16, #tpu.memory_space<vmem>>, vector<7x128xbf16>
    tpu.vector_store %arg18[%c0_197, %c896], %576 {strides = array<i32>} : memref<32x1280xbf16, #tpu.memory_space<vmem>>, vector<7x128xbf16>,
    %578 = vector.extract_strided_slice %555 {offsets = [8, 0], sizes = [7, 128], strides = [1, 1]} : vector<16x128xbf16> to vector<7x128xbf16>
    %c0_198 = arith.constant 0 : index
    %c1024 = arith.constant 1024 : index
    %579 = vector.load %arg18[%c0_198, %c1024] : memref<32x1280xbf16, #tpu.memory_space<vmem>>, vector<7x128xbf16>
    tpu.vector_store %arg18[%c0_198, %c1024], %578 {strides = array<i32>} : memref<32x1280xbf16, #tpu.memory_space<vmem>>, vector<7x128xbf16>,
    %580 = vector.extract_strided_slice %555 {offsets = [9, 0], sizes = [7, 128], strides = [1, 1]} : vector<16x128xbf16> to vector<7x128xbf16>
    %c0_199 = arith.constant 0 : index
    %c1152 = arith.constant 1152 : index
    %581 = vector.load %arg18[%c0_199, %c1152] : memref<32x1280xbf16, #tpu.memory_space<vmem>>, vector<7x128xbf16>
    tpu.vector_store %arg18[%c0_199, %c1152], %580 {strides = array<i32>} : memref<32x1280xbf16, #tpu.memory_space<vmem>>, vector<7x128xbf16>,
    %582 = vector.extract_strided_slice %561 {offsets = [0, 0], sizes = [7, 128], strides = [1, 1]} : vector<16x128xbf16> to vector<7x128xbf16>
    %c16 = arith.constant 16 : index
    %c0_200 = arith.constant 0 : index
    %583 = vector.load %arg18[%c16, %c0_200] : memref<32x1280xbf16, #tpu.memory_space<vmem>>, vector<7x128xbf16>
    tpu.vector_store %arg18[%c16, %c0_200], %582 {strides = array<i32>} : memref<32x1280xbf16, #tpu.memory_space<vmem>>, vector<7x128xbf16>,
    %584 = vector.extract_strided_slice %561 {offsets = [1, 0], sizes = [7, 128], strides = [1, 1]} : vector<16x128xbf16> to vector<7x128xbf16>
    %c16_201 = arith.constant 16 : index
    %c128_202 = arith.constant 128 : index
    %585 = vector.load %arg18[%c16_201, %c128_202] : memref<32x1280xbf16, #tpu.memory_space<vmem>>, vector<7x128xbf16>
    tpu.vector_store %arg18[%c16_201, %c128_202], %584 {strides = array<i32>} : memref<32x1280xbf16, #tpu.memory_space<vmem>>, vector<7x128xbf16>,
    %586 = vector.extract_strided_slice %561 {offsets = [2, 0], sizes = [7, 128], strides = [1, 1]} : vector<16x128xbf16> to vector<7x128xbf16>
    %c16_203 = arith.constant 16 : index
    %c256_204 = arith.constant 256 : index
    %587 = vector.load %arg18[%c16_203, %c256_204] : memref<32x1280xbf16, #tpu.memory_space<vmem>>, vector<7x128xbf16>
    tpu.vector_store %arg18[%c16_203, %c256_204], %586 {strides = array<i32>} : memref<32x1280xbf16, #tpu.memory_space<vmem>>, vector<7x128xbf16>,
    %588 = vector.extract_strided_slice %561 {offsets = [3, 0], sizes = [7, 128], strides = [1, 1]} : vector<16x128xbf16> to vector<7x128xbf16>
    %c16_205 = arith.constant 16 : index
    %c384_206 = arith.constant 384 : index
    %589 = vector.load %arg18[%c16_205, %c384_206] : memref<32x1280xbf16, #tpu.memory_space<vmem>>, vector<7x128xbf16>
    tpu.vector_store %arg18[%c16_205, %c384_206], %588 {strides = array<i32>} : memref<32x1280xbf16, #tpu.memory_space<vmem>>, vector<7x128xbf16>,
    %590 = vector.extract_strided_slice %561 {offsets = [4, 0], sizes = [7, 128], strides = [1, 1]} : vector<16x128xbf16> to vector<7x128xbf16>
    %c16_207 = arith.constant 16 : index
    %c512_208 = arith.constant 512 : index
    %591 = vector.load %arg18[%c16_207, %c512_208] : memref<32x1280xbf16, #tpu.memory_space<vmem>>, vector<7x128xbf16>
    tpu.vector_store %arg18[%c16_207, %c512_208], %590 {strides = array<i32>} : memref<32x1280xbf16, #tpu.memory_space<vmem>>, vector<7x128xbf16>,
    %592 = vector.extract_strided_slice %561 {offsets = [5, 0], sizes = [7, 128], strides = [1, 1]} : vector<16x128xbf16> to vector<7x128xbf16>
    %c16_209 = arith.constant 16 : index
    %c640_210 = arith.constant 640 : index
    %593 = vector.load %arg18[%c16_209, %c640_210] : memref<32x1280xbf16, #tpu.memory_space<vmem>>, vector<7x128xbf16>
    tpu.vector_store %arg18[%c16_209, %c640_210], %592 {strides = array<i32>} : memref<32x1280xbf16, #tpu.memory_space<vmem>>, vector<7x128xbf16>,
    %594 = vector.extract_strided_slice %561 {offsets = [6, 0], sizes = [7, 128], strides = [1, 1]} : vector<16x128xbf16> to vector<7x128xbf16>
    %c16_211 = arith.constant 16 : index
    %c768_212 = arith.constant 768 : index
    %595 = vector.load %arg18[%c16_211, %c768_212] : memref<32x1280xbf16, #tpu.memory_space<vmem>>, vector<7x128xbf16>
    tpu.vector_store %arg18[%c16_211, %c768_212], %594 {strides = array<i32>} : memref<32x1280xbf16, #tpu.memory_space<vmem>>, vector<7x128xbf16>,
    %596 = vector.extract_strided_slice %561 {offsets = [7, 0], sizes = [7, 128], strides = [1, 1]} : vector<16x128xbf16> to vector<7x128xbf16>
    %c16_213 = arith.constant 16 : index
    %c896_214 = arith.constant 896 : index
    %597 = vector.load %arg18[%c16_213, %c896_214] : memref<32x1280xbf16, #tpu.memory_space<vmem>>, vector<7x128xbf16>
    tpu.vector_store %arg18[%c16_213, %c896_214], %596 {strides = array<i32>} : memref<32x1280xbf16, #tpu.memory_space<vmem>>, vector<7x128xbf16>,
    %598 = vector.extract_strided_slice %561 {offsets = [8, 0], sizes = [7, 128], strides = [1, 1]} : vector<16x128xbf16> to vector<7x128xbf16>
    %c16_215 = arith.constant 16 : index
    %c1024_216 = arith.constant 1024 : index
    %599 = vector.load %arg18[%c16_215, %c1024_216] : memref<32x1280xbf16, #tpu.memory_space<vmem>>, vector<7x128xbf16>
    tpu.vector_store %arg18[%c16_215, %c1024_216], %598 {strides = array<i32>} : memref<32x1280xbf16, #tpu.memory_space<vmem>>, vector<7x128xbf16>,
    %600 = vector.extract_strided_slice %561 {offsets = [9, 0], sizes = [7, 128], strides = [1, 1]} : vector<16x128xbf16> to vector<7x128xbf16>
    %c16_217 = arith.constant 16 : index
    %c1152_218 = arith.constant 1152 : index
    %601 = vector.load %arg18[%c16_217, %c1152_218] : memref<32x1280xbf16, #tpu.memory_space<vmem>>, vector<7x128xbf16>
    tpu.vector_store %arg18[%c16_217, %c1152_218], %600 {strides = array<i32>} : memref<32x1280xbf16, #tpu.memory_space<vmem>>, vector<7x128xbf16>,
    %c0_219 = arith.constant 0 : index
    %c0_220 = arith.constant 0 : index
    %602 = vector.load %arg18[%c0_219, %c0_220] : memref<32x1280xbf16, #tpu.memory_space<vmem>>, vector<32x1280xbf16>
    %c0_221 = arith.constant 0 : index
    %c0_222 = arith.constant 0 : index
    %603 = vector.load %arg11[%c0_221, %c0_222] : memref<1280x128xbf16, #tpu.memory_space<vmem>>, vector<1280x128xbf16>
    %cst_223 = arith.constant dense<0.000000e+00> : vector<32x128xf32>
    %604 = tpu.matmul %602, %603, %cst_223 {dimension_numbers = #tpu.dot_dimension_numbers<[1], [0], [0], [1], [0, 0, 1, 1], [], []>} : vector<32x1280xbf16>, vector<1280x128xbf16>, vector<32x128xf32> -> vector<32x128xf32>
    %c0_224 = arith.constant 0 : index
    %c0_225 = arith.constant 0 : index
    %605 = vector.load %arg12[%c0_224, %c0_225] : memref<1x128xf32, #tpu.memory_space<vmem>>, vector<1x128xf32>
    %606 = vector.broadcast %605 : vector<1x128xf32> to vector<32x128xf32>
    %607 = arith.mulf %604, %606 : vector<32x128xf32>
    %c0_226 = arith.constant 0 : index
    %c0_227 = arith.constant 0 : index
    %608 = vector.load %arg13[%c0_226, %c0_227] : memref<1x128xf32, #tpu.memory_space<vmem>>, vector<1x128xf32>
    %609 = vector.broadcast %608 : vector<1x128xf32> to vector<32x128xf32>
    %610 = arith.addf %607, %609 : vector<32x128xf32>
    %cst_228 = arith.constant 0.000000e+00 : f32
    %611 = vector.broadcast %cst_228 : f32 to vector<32x128xf32>
    %612 = arith.cmpf ogt, %610, %611 : vector<32x128xf32>
    %cst_229 = arith.constant 0.000000e+00 : f32
    %613 = vector.broadcast %cst_229 : f32 to vector<32x128xf32>
    %614 = arith.minimumf %610, %613 : vector<32x128xf32>
    %615 = math.exp %614 : vector<32x128xf32>
    %cst_230 = arith.constant 1.000000e+00 : f32
    %616 = vector.broadcast %cst_230 : f32 to vector<32x128xf32>
    %617 = arith.subf %615, %616 : vector<32x128xf32>
    %618 = arith.select %612, %610, %617 : vector<32x128xi1>, vector<32x128xf32>
    %c0_231 = arith.constant 0 : index
    %c0_232 = arith.constant 0 : index
    %619 = vector.load %arg22[%c0_231, %c0_232] : memref<32x128xf32, #tpu.memory_space<vmem>>, vector<32x128xf32>
    tpu.vector_store %arg22[%c0_231, %c0_232], %618 {strides = array<i32>} : memref<32x128xf32, #tpu.memory_space<vmem>>, vector<32x128xf32>,
    %c0_233 = arith.constant 0 : index
    %c0_234 = arith.constant 0 : index
    %620 = tpu.strided_load %arg22[%c0_233, %c0_234] {strides = array<i32: 3, 1>} : memref<32x128xf32, #tpu.memory_space<vmem>>, vector<2x128xf32>
    %c1_235 = arith.constant 1 : index
    %c0_236 = arith.constant 0 : index
    %621 = tpu.strided_load %arg22[%c1_235, %c0_236] {strides = array<i32: 3, 1>} : memref<32x128xf32, #tpu.memory_space<vmem>>, vector<2x128xf32>
    %622 = arith.maximumf %620, %621 : vector<2x128xf32>
    %c2_237 = arith.constant 2 : index
    %c0_238 = arith.constant 0 : index
    %623 = tpu.strided_load %arg22[%c2_237, %c0_238] {strides = array<i32: 3, 1>} : memref<32x128xf32, #tpu.memory_space<vmem>>, vector<2x128xf32>
    %624 = arith.maximumf %622, %623 : vector<2x128xf32>
    %c0_239 = arith.constant 0 : index
    %c0_240 = arith.constant 0 : index
    %c0_241 = arith.constant 0 : index
    %625 = vector.load %arg14[%c0_239, %c0_240, %c0_241] : memref<2x2x128xf32, #tpu.memory_space<vmem>>, vector<1x2x128xf32>
    %626 = vector.shape_cast %625 : vector<1x2x128xf32> to vector<2x128xf32>
    %627 = vector.shape_cast %624 : vector<2x128xf32> to vector<1x2x128xf32>
    tpu.vector_store %arg14[%c0_239, %c0_240, %c0_241], %627 {strides = array<i32>} : memref<2x2x128xf32, #tpu.memory_space<vmem>>, vector<1x2x128xf32>,
    %c16_242 = arith.constant 16 : index
    %c0_243 = arith.constant 0 : index
    %628 = tpu.strided_load %arg22[%c16_242, %c0_243] {strides = array<i32: 3, 1>} : memref<32x128xf32, #tpu.memory_space<vmem>>, vector<2x128xf32>
    %c17 = arith.constant 17 : index
    %c0_244 = arith.constant 0 : index
    %629 = tpu.strided_load %arg22[%c17, %c0_244] {strides = array<i32: 3, 1>} : memref<32x128xf32, #tpu.memory_space<vmem>>, vector<2x128xf32>
    %630 = arith.maximumf %628, %629 : vector<2x128xf32>
    %c18 = arith.constant 18 : index
    %c0_245 = arith.constant 0 : index
    %631 = tpu.strided_load %arg22[%c18, %c0_245] {strides = array<i32: 3, 1>} : memref<32x128xf32, #tpu.memory_space<vmem>>, vector<2x128xf32>
    %632 = arith.maximumf %630, %631 : vector<2x128xf32>
    %c1_246 = arith.constant 1 : index
    %c0_247 = arith.constant 0 : index
    %c0_248 = arith.constant 0 : index
    %633 = vector.load %arg14[%c1_246, %c0_247, %c0_248] : memref<2x2x128xf32, #tpu.memory_space<vmem>>, vector<1x2x128xf32>
    %634 = vector.shape_cast %633 : vector<1x2x128xf32> to vector<2x128xf32>
    %635 = vector.shape_cast %632 : vector<2x128xf32> to vector<1x2x128xf32>
    tpu.vector_store %arg14[%c1_246, %c0_247, %c0_248], %635 {strides = array<i32>} : memref<2x2x128xf32, #tpu.memory_space<vmem>>, vector<1x2x128xf32>,
    return
  }
  func.func @transform_0(%arg0: i32) -> (i32, i32, i32) {
    %c0_i32 = arith.constant 0 : i32
    %c0_i32_0 = arith.constant 0 : i32
    %c0_i32_1 = arith.constant 0 : i32
    return %arg0, %c0_i32, %c0_i32_0 : i32, i32, i32
  }
  func.func @transform_1(%arg0: i32) -> (i32, i32) {
    %c0_i32 = arith.constant 0 : i32
    %c0_i32_0 = arith.constant 0 : i32
    %c0_i32_1 = arith.constant 0 : i32
    return %c0_i32, %c0_i32_0 : i32, i32
  }
  func.func @transform_2(%arg0: i32) -> (i32, i32) {
    %c0_i32 = arith.constant 0 : i32
    %c0_i32_0 = arith.constant 0 : i32
    %c0_i32_1 = arith.constant 0 : i32
    return %c0_i32, %c0_i32_0 : i32, i32
  }
  func.func @transform_3(%arg0: i32) -> (i32, i32) {
    %c0_i32 = arith.constant 0 : i32
    %c0_i32_0 = arith.constant 0 : i32
    %c0_i32_1 = arith.constant 0 : i32
    return %c0_i32, %c0_i32_0 : i32, i32
  }
  func.func @transform_4(%arg0: i32) -> (i32, i32) {
    %c0_i32 = arith.constant 0 : i32
    %c0_i32_0 = arith.constant 0 : i32
    %c0_i32_1 = arith.constant 0 : i32
    return %c0_i32, %c0_i32_0 : i32, i32
  }
  func.func @transform_5(%arg0: i32) -> (i32, i32) {
    %c0_i32 = arith.constant 0 : i32
    %c0_i32_0 = arith.constant 0 : i32
    %c0_i32_1 = arith.constant 0 : i32
    return %c0_i32, %c0_i32_0 : i32, i32
  }
  func.func @transform_6(%arg0: i32) -> (i32, i32) {
    %c0_i32 = arith.constant 0 : i32
    %c0_i32_0 = arith.constant 0 : i32
    %c0_i32_1 = arith.constant 0 : i32
    return %c0_i32, %c0_i32_0 : i32, i32
  }
  func.func @transform_7(%arg0: i32) -> (i32, i32) {
    %c0_i32 = arith.constant 0 : i32
    %c0_i32_0 = arith.constant 0 : i32
    %c0_i32_1 = arith.constant 0 : i32
    return %c0_i32, %c0_i32_0 : i32, i32
  }
  func.func @transform_8(%arg0: i32) -> (i32, i32) {
    %c0_i32 = arith.constant 0 : i32
    %c0_i32_0 = arith.constant 0 : i32
    %c0_i32_1 = arith.constant 0 : i32
    return %c0_i32, %c0_i32_0 : i32, i32
  }
  func.func @transform_9(%arg0: i32) -> (i32, i32) {
    %c0_i32 = arith.constant 0 : i32
    %c0_i32_0 = arith.constant 0 : i32
    %c0_i32_1 = arith.constant 0 : i32
    return %c0_i32, %c0_i32_0 : i32, i32
  }
  func.func @transform_10(%arg0: i32) -> (i32, i32) {
    %c0_i32 = arith.constant 0 : i32
    %c0_i32_0 = arith.constant 0 : i32
    %c0_i32_1 = arith.constant 0 : i32
    return %c0_i32, %c0_i32_0 : i32, i32
  }
  func.func @transform_11(%arg0: i32) -> (i32, i32) {
    %c0_i32 = arith.constant 0 : i32
    %c0_i32_0 = arith.constant 0 : i32
    %c0_i32_1 = arith.constant 0 : i32
    return %c0_i32, %c0_i32_0 : i32, i32
  }
  func.func @transform_12(%arg0: i32) -> (i32, i32) {
    %c0_i32 = arith.constant 0 : i32
    %c0_i32_0 = arith.constant 0 : i32
    %c0_i32_1 = arith.constant 0 : i32
    return %c0_i32, %c0_i32_0 : i32, i32
  }
  func.func @transform_13(%arg0: i32) -> (i32, i32, i32) {
    %c0_i32 = arith.constant 0 : i32
    %c0_i32_0 = arith.constant 0 : i32
    %c0_i32_1 = arith.constant 0 : i32
    return %arg0, %c0_i32, %c0_i32_0 : i32, i32, i32
  }
}

</mosaic_0001>

<bundles_post_ra>
// kernel: deep4net_ws_forward.1
= control target key start
LH: loop header
LB: loop body
LE: loop exit
PB: predicated region body
PF: predicated region fallthrough
CT: control target
= control target key end

     0   :  { %s10458_s25 = smov 0   ;;  %s14261_s0 = inlined_call_operand.vmem [shape: bf16[4,200,128], index: 0, kind: input, shape index: {}]   ;;  %s14262_s1 = inlined_call_operand.vmem [shape: bf16[640,128], index: 1, kind: input, shape index: {}]   ;;  %s14263_s2 = inlined_call_operand.vmem [shape: f32[1,128], index: 2, kind: input, shape index: {}]   ;;  %s14264_s3 = inlined_call_operand.vmem [shape: f32[1,128], index: 3, kind: input, shape index: {}]   ;;  %s14265_s4 = inlined_call_operand.vmem [shape: bf16[256,128], index: 4, kind: input, shape index: {}]   ;;  %s14266_s5 = inlined_call_operand.vmem [shape: f32[1,128], index: 5, kind: input, shape index: {}]   ;;  %s14267_s6 = inlined_call_operand.vmem [shape: f32[1,128], index: 6, kind: input, shape index: {}]   ;;  %s14268_s7 = inlined_call_operand.vmem [shape: bf16[640,128], index: 7, kind: input, shape index: {}]   ;;  %s14269_s8 = inlined_call_operand.vmem [shape: f32[1,128], index: 8, kind: input, shape index: {}]   ;;  %s14270_s9 = inlined_call_operand.vmem [shape: f32[1,128], index: 9, kind: input, shape index: {}]   ;;  %s14271_s10 = inlined_call_operand.vmem [shape: bf16[1280,128], index: 10, kind: input, shape index: {}]   ;;  %s14272_s11 = inlined_call_operand.vmem [shape: f32[1,128], index: 11, kind: input, shape index: {}]   ;;  %s14273_s12 = inlined_call_operand.vmem [shape: f32[1,128], index: 12, kind: input, shape index: {}]   ;;  %s14274_s13 = inlined_call_operand.vmem [shape: f32[4,2,128], index: 13, kind: output, shape index: {}]  }
   0x1 LB: > { %s8723_s26 = sadd.s32 4294967295, %s10385_s25   ;;  %p8727_p0 = scmp.ge.s32.totalorder %s10385_s25, 1  ;;  %s10385_s25 = sphi %s10458_s25, %s23_s25  }
   0x2   : > { %p389_p1 = scmp.lt.s32.totalorder %s10385_s25, 3 }
   0x4   : > { %p390_p2 = pnand %p8727_p0, %p389_p1 }
   0x6   : > { %393 = sbr.rel (%p390_p2) target bundleno = 1661 (0x67d), region = 72 }
   0xb   : > { %v9772_v0 = vld [vmem:[%s14262_s1 + $0x38] sm:$0xff]   ;;  %v14275_v1 = vmov 0   ;;  %v9774_v3 = vld [vmem:[%s14262_s1 + $0x30] sm:$0xff]   ;;  %v9776_v5 = vld [vmem:[%s14262_s1 + $0x28] sm:$0xff]   ;;  %s8728_s30 = sshll.u32 %s8723_s26, 1  ;;  %v14277_v13 = vlaneseq  ;;  %vm921_vm8 = vcmask 1042432  }
   0xc   : > { %3229 = vmatprep.subr.bf16.mxu0 %v14275_v1  ;;  %3454 = vmatprep.subr.bf16.mxu1 %v14275_v1  ;;  %v9773_v2 = vld [vmem:[%s14262_s1 + $0xb8] sm:$0xff]   ;;  %v9775_v4 = vld [vmem:[%s14262_s1 + $0xb0] sm:$0xff]   ;;  %v9777_v6 = vld [vmem:[%s14262_s1 + $0xa8] sm:$0xff]   ;;  %p435_p3 = scmp.lt.s32.totalorder %s8728_s30, 3  ;;  %vm563_vm6 = vsmask.f32 3328 }
   0xd   : > { %3230 = vmatpush1.bf16.msra.mxu0 %v9772_v0  ;;  %3455 = vmatpush1.bf16.msra.mxu1 %v9773_v2  ;;  %v9778_v7 = vld [vmem:[%s14262_s1 + $0x20] sm:$0xff]   ;;  %v9780_v9 = vld [vmem:[%s14262_s1 + $0x18] sm:$0xff]   ;;  %v9782_v11 = vld [vmem:[%s14262_s1 + $0x10] sm:$0xff]   ;;  %v10528_v16 = vand.u32 127, %v14277_v13  ;;  %vm564_vm7 = vsmask.f32 7440 }
   0xe   : > { %3231 = vmatprep.subr.bf16.mxu0 %v14275_v1  ;;  %3456 = vmatprep.subr.bf16.mxu1 %v14275_v1  ;;  %v9779_v8 = vld [vmem:[%s14262_s1 + $0xa0] sm:$0xff]   ;;  %v9781_v10 = vld [vmem:[%s14262_s1 + $0x98] sm:$0xff]   ;;  %v9783_v12 = vld [vmem:[%s14262_s1 + $0x90] sm:$0xff]   ;;  %s14426_s30 = smov (!%p435_p3, %s8728_s30), 3  ;;  %vm922_vm9 = vcmask 1046532   ;;  %vm1052_vm10 = vcmask 1041408  }
   0xf   : > { %v9784_v14 = vld [vmem:[%s14262_s1 + $0x8] sm:$0xff]   ;;  %s9762_s23 = smul.u32 100, %s14426_s30  ;;  %14302 = vst [vmem:[#allocation10_spill] sm:$0xff] %v10528_v16  ;;  %v9786_v17 = vld [vmem:[%s14262_s1] sm:$0xff]   ;;  %vm506_vm0 = vcmp.ge.s32.totalorder %v10528_v16, 62  ;;  %v9788_v19 = vld [vmem:[%s14262_s1 + $0x78] sm:$0xff]  }
  0x10   : > { %v9785_v15 = vld [vmem:[%s14262_s1 + $0x88] sm:$0xff]   ;;  %v9787_v18 = vld [vmem:[%s14262_s1 + $0x80] sm:$0xff]   ;;  %vm507_vm1 = vcmp.lt.s32.totalorder %v10528_v16, 124  ;;  %v9789_v20 = vld [vmem:[%s14262_s1 + $0xf8] sm:$0xff]   ;;  %vm504_vm2 = vcmp.lt.s32.totalorder %v10528_v16, 62  ;;  %vm1053_vm11 = vcmask 1045508  }
  0x11   : > { %3232 = vmatpush1.bf16.msra.mxu0 %v9774_v3  ;;  %3457 = vmatpush1.bf16.msra.mxu1 %v9775_v4  ;;  %s10541_s16 = scalar_lea.vmem %s14261_s0, %s9762_s23  ;;  %v9790_v21 = vld [vmem:[%s14262_s1 + $0x70] sm:$0xff]   ;;  %vm508_vm3 = vmand %vm506_vm0, %vm507_vm1  ;;  %v9792_v34 = vld [vmem:[%s14262_s1 + $0x68] sm:$0xff]   ;;  %vm14289_vm12 = vcmask 1040384   ;;  %vm1184_vm13 = vcmask 1044484   ;;  %s8731_s14 = sshll.u32 %s14426_s30, 1 }
  0x12   : > { %3233 = vmatprep.subr.bf16.mxu0 %v14275_v1  ;;  %3458 = vmatprep.subr.bf16.mxu1 %v14275_v1  ;;  %v450_v22 = vld [vmem:[%s10541_s16] sm:$0xf]  ;;  %v10559_v23 = vld [vmem:[%s10541_s16 + $0x4] sm:$0xf]  ;;  %v10562_v24 = vld [vmem:[%s10541_s16 + $0x8] sm:$0xf]  ;;  %s445_s18 = scalar_lea.vmem %s14274_s13, %s8731_s14 }
  0x13   : > { %v10565_v25 = vld [vmem:[%s10541_s16 + $0xc] sm:$0xf]  ;;  %vm10567_vm4 = vmpackc.low %vm504_vm2, %vm504_vm2  ;;  %v9791_v27 = vld [vmem:[%s14262_s1 + $0xf0] sm:$0xff]   ;;  %vm876_vm2 = vcmask 1043456  }
  0x14   : > { %v10577_v28 = vsel %vm10567_vm4, %v450_v22, 0  ;;  %vm10579_vm5 = vmpackc.low %vm508_vm3, %vm508_vm3  ;;  %v9793_v35 = vld [vmem:[%s14262_s1 + $0xe8] sm:$0xff]   ;;  %v513_v40 = vsel %vm10567_vm4, %v10559_v23, 0  ;;  %v10605_v44 = vld [vmem:[%s10541_s16 + $0x10] sm:$0xf]  ;;  %v514_v50 = vsel %vm10567_vm4, %v10562_v24, 0 }
  0x15   : > { %3234 = vmatpush1.bf16.msra.mxu0 %v9776_v5  ;;  %3459 = vmatpush1.bf16.msra.mxu1 %v9777_v6  ;;  %v539_v30 = vsel %vm10579_vm5, %v450_v22, 0  ;;  %v540_v31 = vsel %vm10579_vm5, %v10559_v23, 0  ;;  %v541_v32 = vsel %vm10579_vm5, %v10562_v24, 0  ;;  %v542_v33 = vsel %vm10579_vm5, %v10565_v25, 0  ;;  %v10609_v49 = vld [vmem:[%s10541_s16 + $0x14] sm:$0xf]  ;;  %vm10625_vm14 = vmor %vm563_vm6, %vm564_vm7 }
  0x16   : > { %3235 = vmatprep.subr.bf16.mxu0 %v14275_v1  ;;  %3460 = vmatprep.subr.bf16.mxu1 %v14275_v1  ;;  %v567_v36 = vshrl.u32 %v539_v30, 16  ;;  %v570_v37 = vshll.u32 %v539_v30, 16  ;;  %v576_v38 = vshll.u32 %v540_v31, 16  ;;  %v580_v39 = vshrl.u32 %v540_v31, 16  ;;  %v9794_v58 = vld [vmem:[%s14262_s1 + $0x60] sm:$0xff]   ;;  %vm10663_vm15 = vmor %vm921_vm8, %vm922_vm9 }
  0x17   : > { %v586_v41 = vshll.u32 %v541_v32, 16  ;;  %v590_v42 = vshrl.u32 %v541_v32, 16  ;;  %v596_v43 = vshll.u32 %v542_v33, 16  ;;  %v543_v57 = vsel %vm10579_vm5, %v10605_v44, 0  ;;  %v9795_v0 = vld [vmem:[%s14262_s1 + $0xe0] sm:$0xff]   ;;  %vm10671_vm0 = vmor %vm1052_vm10, %vm1053_vm11 }
  0x18   : > { %v569_v45 = vrot.slane %v567_v36, 4  ;;  %v572_v46 = vrot.slane %v570_v37, 5  ;;  %v578_v47 = vrot.slane %v576_v38, 5  ;;  %v582_v48 = vrot.slane %v580_v39, 4  ;;  %vm10680_vm1 = vmor %vm14289_vm12, %vm1184_vm13 }
  0x19   : > { %3236 = vmatpush1.bf16.msra.mxu0 %v9778_v7  ;;  %3461 = vmatpush1.bf16.msra.mxu1 %v9779_v8  ;;  %v588_v51 = vrot.slane %v586_v41, 5  ;;  %v592_v52 = vrot.slane %v590_v42, 4  ;;  %v10615_v53 = vrot.slane %v596_v43, 5  ;;  %v10632_v61 = vsel %vm10579_vm5, %v10609_v49, 0  ;;  %v9799_v41 = vld [vmem:[%s14262_s1 + $0xd0] sm:$0xff]   ;;  %vm11243_vm3 = vmand %vm876_vm2, %vm563_vm6 }
  0x1a   : > { %3237 = vmatprep.subr.bf16.mxu0 %v14275_v1  ;;  %3462 = vmatprep.subr.bf16.mxu1 %v14275_v1  ;;  %v573_v54 = vor.u32 %v572_v46, %v569_v45  ;;  %v583_v55 = vor.u32 %v582_v48, %v578_v47  ;;  %v1178_v56 = vrot.slane %v569_v45, 4  ;;  %v600_v62 = vshrl.u32 %v542_v33, 16 }
  0x1b   : > { %v593_v60 = vor.u32 %v592_v52, %v588_v51  ;;  %v606_v63 = vshll.u32 %v543_v57, 16  ;;  %v610_v5 = vshrl.u32 %v543_v57, 16  ;;  %v616_v22 = vshll.u32 %v10632_v61, 16 }
  0x1c   : > { %v574_v2 = vrot.slane %v573_v54, 4  ;;  %v584_v3 = vrot.slane %v583_v55, 4  ;;  %v1179_v4 = vsel %vm10625_vm14, %v1178_v56, %v578_v47  ;;  %v602_v8 = vrot.slane %v600_v62, 4 }
  0x1d   : > { %3238 = vmatpush1.bf16.msra.mxu0 %v9780_v9  ;;  %3463 = vmatpush1.bf16.msra.mxu1 %v9781_v10  ;;  %v594_v6 = vrot.slane %v593_v60, 4  ;;  %v1181_v7 = vadd.bf16 %v1179_v4, %v10577_v28  ;;  %v10642_v9 = vrot.slane %v606_v63, 5  ;;  %v9796_v10 = vld [vmem:[%s14262_s1 + $0x58] sm:$0xff]   ;;  %v14312_v24 = vmov 0  ;;  %v9800_v63 = vld [vmem:[%s14262_s1 + $0x48] sm:$0xff]  }
  0x1e   : > { %3239 = vmatprep.subr.bf16.mxu0 %v14275_v1  ;;  %3464 = vmatprep.subr.bf16.mxu1 %v14275_v1  ;;  %v14313_v24 = vsel %vm10671_vm0, 4294967295, %v14312_v24  ;;  %v10703_v52 = vrot.slane %v616_v22, 5  ;;  %v620_v4 = vshrl.u32 %v10632_v61, 16  ;;  %v517_v61 = vsel %vm10567_vm4, %v10609_v49, 0 }
  0x1f   : > { %14314 = vst [vmem:[#allocation12_spill] sm:$0xff] %v14313_v24  ;;  %vm4553_vm11 = vcmp.lt.s32.totalorder %v10528_v16, 25  ;;  %vm4559_vm2 = vcmp.lt.s32.totalorder %v10528_v16, 75 }
  0x21   : > { %3240 = vmatpush1.bf16.msra.mxu0 %v9782_v11  ;;  %3465 = vmatpush1.bf16.msra.mxu1 %v9783_v12  ;;  %v9797_v11 = vld [vmem:[%s14262_s1 + $0xd8] sm:$0xff]   ;;  %v579_v12 = vsel %vm10625_vm14, %v574_v2, %v578_v47 }
  0x22   : > { %3241 = vmatprep.subr.bf16.mxu0 %v14275_v1  ;;  %3466 = vmatprep.subr.bf16.mxu1 %v14275_v1  ;;  %v10695_v47 = vld [vmem:[%s10541_s16 + $0x18] sm:$0xf] }
  0x23   : > { %v545_v2 = vsel %vm10579_vm5, %v10695_v47, 0 }
  0x25   : > { %3242 = vmatpush1.bf16.msra.mxu0 %v9784_v14  ;;  %3467 = vmatpush1.bf16.msra.mxu1 %v9785_v15  ;;  %v589_v14 = vsel %vm10625_vm14, %v584_v3, %v588_v51  ;;  %v515_v15 = vsel %vm10567_vm4, %v10565_v25, 0  ;;  %v516_v51 = vsel %vm10567_vm4, %v10605_v44, 0 }
  0x26   : > { %3243 = vmatprep.subr.bf16.mxu0 %v14275_v1  ;;  %3468 = vmatprep.subr.bf16.mxu1 %v14275_v1 }
  0x29   : > { %3244 = vmatpush1.bf16.msra.mxu0 %v9786_v17  ;;  %3469 = vmatpush1.bf16.msra.mxu1 %v9787_v18  ;;  %v612_v17 = vrot.slane %v610_v5, 4  ;;  %v599_v18 = vsel %vm10625_vm14, %v594_v6, %v10615_v53  ;;  %v9801_v5 = vld [vmem:[%s14262_s1 + $0xc8] sm:$0xff]  }
  0x2a   : > { %3245 = vmatprep.subr.bf16.mxu0 %v14275_v1  ;;  %3470 = vmatprep.subr.bf16.mxu1 %v14275_v1  ;;  %v831_v23 = vadd.bf16 %v599_v18, %v514_v50 }
  0x2b   : > { %v613_v30 = vor.u32 %v612_v17, %v10642_v9 }
  0x2c   : > { %v929_v36 = vrot.slane %v831_v23, 5  ;;  %855 = vst [vmem:[#allocation2 + $0x28] sm:$0xf] %v831_v23  ;;  %1310 = vst [vmem:[#allocation2 + $0x24] sm:$0xf] %v831_v23  ;;  %v1060_v37 = vrot.slane %v831_v23, 6 }
  0x2d   : > { %3246 = vmatpush2.bf16.msra.mxu0 %v9788_v19  ;;  %3471 = vmatpush2.bf16.msra.mxu1 %v9789_v20  ;;  %v829_v19 = vadd.bf16 %v579_v12, %v10577_v28  ;;  %v830_v20 = vadd.bf16 %v589_v14, %v513_v40  ;;  %v603_v28 = vor.u32 %v602_v8, %v10615_v53  ;;  %v1191_v39 = vrot.slane %v831_v23, 7  ;;  %v9798_v40 = vld [vmem:[%s14262_s1 + $0x50] sm:$0xff]   ;;  %v10706_v53 = vld [vmem:[%s10541_s16 + $0x1c] sm:$0xf]  ;;  %v9802_v14 = vld [vmem:[%s14262_s1 + $0x40] sm:$0xff]  }
  0x2e   : > { %3247 = vmatprep.subr.bf16.mxu0 %v14275_v1  ;;  %3472 = vmatprep.subr.bf16.mxu1 %v14275_v1  ;;  %v931_v55 = vrot.slane %v929_v36, 4  ;;  %v614_v62 = vrot.slane %v613_v30, 4  ;;  %v10727_v3 = vsel %vm10579_vm5, %v10706_v53, 0  ;;  %v518_v8 = vsel %vm10567_vm4, %v10695_v47, 0 }
  0x2f   : > { %853 = vst [vmem:[#allocation2] sm:$0xf] %v829_v19  ;;  %854 = vst [vmem:[#allocation2 + $0x14] sm:$0xf] %v830_v20  ;;  %v8757_v31 = vrot.slane %v829_v19, 9  ;;  %v926_v32 = vrot.slane %v830_v20, 5 }
  0x30   : > { %1309 = vst [vmem:[#allocation2 + $0x10] sm:$0xf] %v830_v20  ;;  %v8758_v33 = vrot.slane %v829_v19, 10  ;;  %v1188_v38 = vrot.slane %v830_v20, 7  ;;  %v604_v57 = vrot.slane %v603_v28, 4  ;;  %v1193_v60 = vrot.slane %v1191_v39, 4 }
  0x31   : > { %3248 = vmatpush2.bf16.msra.mxu0 %v9790_v21  ;;  %3473 = vmatpush2.bf16.msra.mxu1 %v9791_v27  ;;  %v14309_v21 = vmov 0  ;;  %v8759_v27 = vrot.slane %v1181_v7, 11  ;;  %v927_v42 = vsel %vm10663_vm15, %v8757_v31, %v926_v32  ;;  %v928_v43 = vrot.slane %v926_v32, 4  ;;  %v9803_v19 = vld [vmem:[%s14262_s1 + $0xc0] sm:$0xff]  }
  0x32   : > { %3249 = vmatprep.subr.bf16.mxu0 %v14275_v1  ;;  %3474 = vmatprep.subr.bf16.mxu1 %v14275_v1  ;;  %v14310_v21 = vsel %vm10663_vm15, 4294967295, %v14309_v21  ;;  %1021 = vst [vmem:[#allocation2 + $0x4] sm:$0xf] %v927_v42  ;;  %v1190_v50 = vrot.slane %v1188_v38, 4  ;;  %v619_v6 = vsel %vm10625_vm14, %v614_v62, %v10703_v52  ;;  %v630_v12 = vshrl.u32 %v545_v2, 16 }
  0x33   : > { %14311 = vst [vmem:[#allocation11_spill] sm:$0xff] %v14310_v21  ;;  %v1189_v48 = vsel %vm10680_vm1, %v8759_v27, %v1188_v38  ;;  %v930_v54 = vsel %vm10663_vm15, %v928_v43, %v929_v36  ;;  %v636_v18 = vshll.u32 %v10727_v3, 16  ;;  %v10768_v36 = vld [vmem:[%s10541_s16 + $0x24] sm:$0xf] }
  0x34   : > { %1283 = vst [vmem:[#allocation2 + $0xc] sm:$0xf] %v1189_v48  ;;  %1022 = vst [vmem:[#allocation2 + $0x18] sm:$0xf] %v930_v54  ;;  %v1192_v44 = vsel %vm10680_vm1, %v1190_v50, %v1191_v39  ;;  %v521_v47 = vsel %vm10567_vm4, %v10768_v36, 0 }
  0x35   : > { %3250 = vmatpush2.bf16.msra.mxu0 %v9792_v34  ;;  %3475 = vmatpush2.bf16.msra.mxu1 %v9793_v35  ;;  %v1057_v34 = vrot.slane %v830_v20, 6  ;;  %v14315_v35 = vmov 0  ;;  %1284 = vst [vmem:[#allocation2 + $0x20] sm:$0xf] %v1192_v44  ;;  %v9810_v20 = vld [vmem:[%s14262_s1 + $0x138] sm:$0xff]   ;;  %v10782_v54 = vrot.slane %v636_v18, 5 }
  0x36   : > { %3251 = vmatprep.subr.bf16.mxu0 %v14275_v1  ;;  %3476 = vmatprep.subr.bf16.mxu1 %v14275_v1  ;;  %v14316_v35 = vsel %vm10680_vm1, 4294967295, %v14315_v35  ;;  %v9804_v42 = vld [vmem:[#allocation2] ss:$20 sps:$4 sm:$0xff]  }
  0x37   : > { %14317 = vst [vmem:[#allocation13_spill] sm:$0xff] %v14316_v35  ;;  %v1058_v45 = vsel %vm10671_vm0, %v8758_v33, %v1057_v34  ;;  %v1059_v46 = vrot.slane %v1057_v34, 4  ;;  %v10765_v34 = vld [vmem:[%s10541_s16 + $0x20] sm:$0xf] }
  0x38   : > { %1152 = vst [vmem:[#allocation2 + $0x8] sm:$0xf] %v1058_v45  ;;  %v520_v44 = vsel %vm10567_vm4, %v10765_v34, 0 }
  0x39   : > { %3252 = vmatpush2.bf16.msra.mxu0 %v9794_v58  ;;  %3477 = vmatpush2.bf16.msra.mxu1 %v9795_v0  ;;  %v1061_v56 = vsel %vm10671_vm0, %v1059_v46, %v1060_v37  ;;  %v1062_v58 = vrot.slane %v1060_v37, 4  ;;  %v609_v0 = vsel %vm10625_vm14, %v604_v57, %v10642_v9  ;;  %v833_v9 = vadd.bf16 %v619_v6, %v516_v51 }
  0x3a   : > { %3253 = vmatprep.subr.bf16.mxu0 %v14275_v1  ;;  %3478 = vmatprep.subr.bf16.mxu1 %v14275_v1  ;;  %1153 = vst [vmem:[#allocation2 + $0x1c] sm:$0xf] %v1061_v56  ;;  %v832_v7 = vadd.bf16 %v609_v0, %v515_v15  ;;  %v547_v0 = vsel %vm10579_vm5, %v10765_v34, 0 }
  0x3b   : > { %v935_v22 = vrot.slane %v833_v9, 5  ;;  %857 = vst [vmem:[#allocation2 + $0x50] sm:$0xf] %v833_v9  ;;  %1312 = vst [vmem:[#allocation2 + $0x4c] sm:$0xf] %v833_v9  ;;  %v1066_v23 = vrot.slane %v833_v9, 6 }
  0x3c   : > { %856 = vst [vmem:[#allocation2 + $0x3c] sm:$0xf] %v832_v7  ;;  %v932_v25 = vrot.slane %v832_v7, 5  ;;  %1311 = vst [vmem:[#allocation2 + $0x38] sm:$0xf] %v832_v7  ;;  %v1063_v15 = vrot.slane %v832_v7, 6 }
  0x3d   : > { %3254 = vmatpush2.bf16.msra.mxu0 %v9796_v10  ;;  %3479 = vmatpush2.bf16.msra.mxu1 %v9797_v11  ;;  %v622_v10 = vrot.slane %v620_v4, 4  ;;  %v626_v11 = vshll.u32 %v545_v2, 16  ;;  %v1194_v17 = vrot.slane %v832_v7, 7  ;;  %v1197_v27 = vrot.slane %v833_v9, 7  ;;  %v9806_v37 = vld [vmem:[#allocation2 + $0x4] ss:$20 sps:$4 sm:$0xff]  }
  0x3e   : > { %3255 = vmatprep.subr.bf16.mxu0 %v14275_v1  ;;  %3480 = vmatprep.subr.bf16.mxu1 %v14275_v1  ;;  %v933_v30 = vsel %vm10663_vm15, %v931_v55, %v932_v25  ;;  %v934_v31 = vrot.slane %v932_v25, 4  ;;  %v1064_v32 = vsel %vm10671_vm0, %v1062_v58, %v1063_v15  ;;  %v1065_v33 = vrot.slane %v1063_v15, 4  ;;  %v9809_v43 = vld [vmem:[#allocation2 + $0xc] ss:$20 sps:$4 sm:$0xff]  }
  0x3f   : > { %v623_v28 = vor.u32 %v622_v10, %v10703_v52  ;;  %1023 = vst [vmem:[#allocation2 + $0x2c] sm:$0xf] %v933_v30  ;;  %1154 = vst [vmem:[#allocation2 + $0x30] sm:$0xf] %v1064_v32  ;;  %v1195_v38 = vsel %vm10680_vm1, %v1193_v60, %v1194_v17  ;;  %v1196_v39 = vrot.slane %v1194_v17, 4  ;;  %3261 = vmatprep.mubr.bf16.mxu0 %v9806_v37  ;;  %v632_v52 = vrot.slane %v630_v12, 4 }
  0x40   : > { %v936_v45 = vsel %vm10663_vm15, %v934_v31, %v935_v22  ;;  %v1067_v46 = vsel %vm10671_vm0, %v1065_v33, %v1066_v23  ;;  %1285 = vst [vmem:[#allocation2 + $0x34] sm:$0xf] %v1195_v38  ;;  %v937_v55 = vrot.slane %v935_v22, 4  ;;  %3486 = vmatprep.mubr.bf16.mxu1 %v9809_v43  ;;  %v1068_v57 = vrot.slane %v1066_v23, 4  ;;  %v9826_v60 = vld [vmem:[%s14262_s1 + $0x130] sm:$0xff]  }
  0x41   : > { %3256 = vmatpush2.bf16.msra.mxu0 %v9798_v40  ;;  %3481 = vmatpush2.bf16.msra.mxu1 %v9799_v41  ;;  %v628_v40 = vrot.slane %v626_v11, 5  ;;  %v519_v41 = vsel %vm10567_vm4, %v10706_v53, 0  ;;  %v624_v48 = vrot.slane %v623_v28, 4  ;;  %v9807_v50 = vld [vmem:[#allocation2 + $0x8] ss:$20 sps:$4 sm:$0xff]   ;;  %v1198_v51 = vsel %vm10680_vm1, %v1196_v39, %v1197_v27 }
  0x42   : > { %3257 = vmatprep.subr.bf16.mxu0 %v14275_v1  ;;  %3482 = vmatprep.subr.bf16.mxu1 %v14275_v1  ;;  %1024 = vst [vmem:[#allocation2 + $0x40] sm:$0xf] %v936_v45  ;;  %1155 = vst [vmem:[#allocation2 + $0x44] sm:$0xf] %v1067_v46  ;;  %v1199_v58 = vrot.slane %v1197_v27, 4  ;;  %v10802_v2 = vsel %vm10579_vm5, %v10768_v36, 0 }
  0x43   : > { %1286 = vst [vmem:[#allocation2 + $0x48] sm:$0xf] %v1198_v51  ;;  %v629_v56 = vsel %vm10625_vm14, %v624_v48, %v628_v40  ;;  %v633_v62 = vor.u32 %v632_v52, %v628_v40  ;;  %v640_v4 = vshrl.u32 %v10727_v3, 16  ;;  %v650_v6 = vshrl.u32 %v547_v0, 16  ;;  %v9842_v11 = vld [vmem:[%s14262_s1 + $0x128] sm:$0xff]   ;;  %v9858_v48 = vld [vmem:[%s14262_s1 + $0x120] sm:$0xff]  }
  0x44   : > { %v656_v7 = vshll.u32 %v10802_v2, 16  ;;  %v10819_v22 = vld [vmem:[%s10541_s16 + $0x28] sm:$0xf]  ;;  %v10822_v23 = vld [vmem:[%s10541_s16 + $0x2c] sm:$0xf] }
  0x45   : > { %3258 = vmatpush2.bf16.msra.mxu0 %v9800_v63  ;;  %3483 = vmatpush2.bf16.msra.mxu1 %v9801_v5  ;;  %v834_v63 = vadd.bf16 %v629_v56, %v517_v61  ;;  %v646_v5 = vshll.u32 %v547_v0, 16  ;;  %v634_v49 = vrot.slane %v633_v62, 4  ;;  %v642_v3 = vrot.slane %v640_v4, 4  ;;  %v10860_v4 = vld [vmem:[%s10541_s16 + $0x30] sm:$0xf] }
  0x46   : > { %3259 = vmatprep.subr.bf16.mxu0 %v14275_v1  ;;  %3484 = vmatprep.subr.bf16.mxu1 %v14275_v1  ;;  %v2147_v12 = vld [vmem:[#allocation2 + $0x28] sm:$0xff]  ;;  %v652_v25 = vrot.slane %v650_v6, 4  ;;  %v10809_v15 = vrot.slane %v656_v7, 5  ;;  %v522_v46 = vsel %vm10567_vm4, %v10819_v22, 0  ;;  %v549_v52 = vsel %vm10579_vm5, %v10819_v22, 0  ;;  %v9890_v22 = vld [vmem:[%s14262_s1 + $0x110] sm:$0xff]  }
  0x47   : > { %858 = vst [vmem:[#allocation2 + $0x64] sm:$0xf] %v834_v63  ;;  %v938_v61 = vrot.slane %v834_v63, 5  ;;  %1313 = vst [vmem:[#allocation2 + $0x60] sm:$0xf] %v834_v63  ;;  %v1069_v9 = vrot.slane %v834_v63, 6  ;;  %v639_v17 = vsel %vm10625_vm14, %v634_v49, %v10782_v54  ;;  %v643_v40 = vor.u32 %v642_v3, %v10782_v54 }
  0x48   : > { %v1200_v10 = vrot.slane %v834_v63, 7  ;;  %v835_v30 = vadd.bf16 %v639_v17, %v518_v8  ;;  %v10846_v54 = vsel %vm10579_vm5, %v10822_v23, 0  ;;  %v660_v7 = vshrl.u32 %v10802_v2, 16 }
  0x49   : > { %3260 = vmatpush2.bf16.msra.mxu0 %v9802_v14  ;;  %3485 = vmatpush2.bf16.msra.mxu1 %v9803_v19  ;;  %v648_v14 = vrot.slane %v646_v5, 5  ;;  %v939_v18 = vsel %vm10663_vm15, %v937_v55, %v938_v61  ;;  %v940_v19 = vrot.slane %v938_v61, 4  ;;  %v2150_v27 = vld [vmem:[#allocation2 + $0x3c] sm:$0xff]  ;;  %v1071_v31 = vrot.slane %v1069_v9, 4  ;;  %v9815_v39 = vld [vmem:[#allocation2 + $0x30] ss:$20 sps:$4 sm:$0xff]  }
  0x4a   : > { %9670 = vmatprep.subr.bf16.mxu0 %v9810_v20  ;;  %v9811_v28 = vld [vmem:[#allocation2 + $0x2c] ss:$20 sps:$4 sm:$0xff]   ;;  %1025 = vst [vmem:[#allocation2 + $0x54] sm:$0xf] %v939_v18  ;;  %v1201_v32 = vsel %vm10680_vm1, %v1199_v58, %v1200_v10  ;;  %v1202_v33 = vrot.slane %v1200_v10, 4  ;;  %v8768_v38 = vcombine.low %v2147_v12, %v2150_v27  ;;  %v941_v8 = vrot.slane %v835_v30, 5 }
  0x4b   : > { %v9813_v37 = vld [vmem:[#allocation2 + $0x34] ss:$20 sps:$4 sm:$0xff]   ;;  %1287 = vst [vmem:[#allocation2 + $0x5c] sm:$0xf] %v1201_v32  ;;  %859 = vst [vmem:[#allocation2 + $0x78] sm:$0xf] %v835_v30 }
  0x4c   : > { %3262 = vmatmul.mubr.bf16.vlgmr.msra.gmra.mxu0 %v9804_v42  ;;  %3487 = vmatmul.mubr.bf16.vlgmr.msra.gmra.mxu1 %v9807_v50  ;;  %v653_v42 = vor.u32 %v652_v25, %v648_v14  ;;  %1314 = vst [vmem:[#allocation2 + $0x74] sm:$0xf] %v835_v30  ;;  %v1072_v43 = vrot.slane %v835_v30, 6  ;;  %v1203_v45 = vrot.slane %v835_v30, 7  ;;  %v644_v50 = vrot.slane %v643_v40, 4  ;;  %v9874_v61 = vld [vmem:[%s14262_s1 + $0x118] sm:$0xff]  }
  0x4d   : > { %9671 = vmatpush3.bf16.msra.mxu0 %v9810_v20  ;;  %v1070_v20 = vsel %vm10671_vm0, %v1068_v57, %v1069_v9  ;;  %3269 = vmatprep.mubr.bf16.mxu0 %v9811_v28  ;;  %v942_v55 = vsel %vm10663_vm15, %v940_v19, %v941_v8  ;;  %v943_v58 = vrot.slane %v941_v8, 4  ;;  %v666_v49 = vshll.u32 %v549_v52, 16  ;;  %v10882_v18 = vld [vmem:[%s10541_s16 + $0x34] sm:$0xf] }
  0x4e   : > { %9672 = vmatprep.subr.bf16.mxu0 %v9826_v60  ;;  %1156 = vst [vmem:[#allocation2 + $0x58] sm:$0xf] %v1070_v20  ;;  %3494 = vmatprep.mubr.bf16.mxu1 %v9813_v37  ;;  %v654_v51 = vrot.slane %v653_v42, 4  ;;  %v1073_v56 = vsel %vm10671_vm0, %v1071_v31, %v1072_v43  ;;  %v1204_v57 = vsel %vm10680_vm1, %v1202_v33, %v1203_v45  ;;  %1026 = vst [vmem:[#allocation2 + $0x68] sm:$0xf] %v942_v55 }
  0x4f   : > { %1157 = vst [vmem:[#allocation2 + $0x6c] sm:$0xf] %v1073_v56  ;;  %1288 = vst [vmem:[#allocation2 + $0x70] sm:$0xf] %v1204_v57  ;;  %v1074_v63 = vrot.slane %v1072_v43, 4  ;;  %v1205_v0 = vrot.slane %v1203_v45, 4 }
  0x50   : > { %v659_v62 = vsel %vm10625_vm14, %v654_v51, %v10809_v15  ;;  %v670_v9 = vshrl.u32 %v549_v52, 16  ;;  %v676_v10 = vshll.u32 %v10846_v54, 16  ;;  %v523_v53 = vsel %vm10567_vm4, %v10822_v23, 0 }
  0x51   : > { %9673 = vmatpush3.bf16.msra.mxu0 %v9826_v60  ;;  %v649_v60 = vsel %vm10625_vm14, %v644_v50, %v648_v14  ;;  %v837_v6 = vadd.bf16 %v659_v62, %v520_v44  ;;  %v524_v34 = vsel %vm10567_vm4, %v10860_v4, 0  ;;  %v662_v25 = vrot.slane %v660_v7, 4  ;;  %v10916_v7 = vld [vmem:[%s10541_s16 + $0x38] sm:$0xf] }
  0x52   : > { %9674 = vmatprep.subr.bf16.mxu0 %v9842_v11  ;;  %v836_v5 = vadd.bf16 %v649_v60, %v519_v41  ;;  %v2153_v41 = vld [vmem:[#allocation2 + $0x50] sm:$0xff]  ;;  %v668_v17 = vrot.slane %v666_v49, 5  ;;  %v672_v33 = vrot.slane %v670_v9, 4  ;;  %v10895_v42 = vrot.slane %v676_v10, 5 }
  0x53   : > { %v947_v2 = vrot.slane %v837_v6, 5  ;;  %861 = vst [vmem:[#allocation2 + $0xa0] sm:$0xf] %v837_v6  ;;  %1316 = vst [vmem:[#allocation2 + $0x9c] sm:$0xf] %v837_v6  ;;  %v1078_v12 = vrot.slane %v837_v6, 6  ;;  %v663_v32 = vor.u32 %v662_v25, %v10809_v15 }
  0x54   : > { %3270 = vmatmul.mubr.bf16.gmra.mxu0 %v8768_v38  ;;  %3495 = vmatmul.mubr.bf16.gmra.mxu1 %v9815_v39  ;;  %860 = vst [vmem:[#allocation2 + $0x8c] sm:$0xf] %v836_v5  ;;  %v944_v44 = vrot.slane %v836_v5, 5  ;;  %1315 = vst [vmem:[#allocation2 + $0x88] sm:$0xf] %v836_v5  ;;  %v1206_v3 = vrot.slane %v836_v5, 7  ;;  %v673_v51 = vor.u32 %v672_v33, %v668_v17 }
  0x55   : > { %9675 = vmatpush3.bf16.msra.mxu0 %v9842_v11  ;;  %v1075_v11 = vrot.slane %v836_v5, 6  ;;  %v1209_v14 = vrot.slane %v837_v6, 7  ;;  %v2156_v37 = vld [vmem:[#allocation2 + $0x64] sm:$0xff]  ;;  %v949_v8 = vrot.slane %v947_v2, 4  ;;  %v664_v50 = vrot.slane %v663_v32, 4 }
  0x56   : > { %9676 = vmatprep.subr.bf16.mxu0 %v9858_v48  ;;  %v945_v19 = vsel %vm10663_vm15, %v943_v58, %v944_v44  ;;  %v946_v20 = vrot.slane %v944_v44, 4  ;;  %v1207_v30 = vsel %vm10680_vm1, %v1205_v0, %v1206_v3  ;;  %v1208_v31 = vrot.slane %v1206_v3, 4  ;;  %v9816_v38 = vld [vmem:[#allocation2 + $0x54] ss:$20 sps:$4 sm:$0xff]   ;;  %v9818_v43 = vld [vmem:[#allocation2 + $0x5c] ss:$20 sps:$4 sm:$0xff]  }
  0x57   : > { %v1076_v27 = vsel %vm10671_vm0, %v1074_v63, %v1075_v11  ;;  %v1077_v28 = vrot.slane %v1075_v11, 4  ;;  %1027 = vst [vmem:[#allocation2 + $0x7c] sm:$0xf] %v945_v19  ;;  %1289 = vst [vmem:[#allocation2 + $0x84] sm:$0xf] %v1207_v30  ;;  %v8773_v45 = vcombine.low %v2153_v41, %v2156_v37  ;;  %3277 = vmatprep.mubr.bf16.mxu0 %v9816_v38  ;;  %v1080_v52 = vrot.slane %v1078_v12, 4 }
  0x58   : > { %1158 = vst [vmem:[#allocation2 + $0x80] sm:$0xf] %v1076_v27  ;;  %v948_v39 = vsel %vm10663_vm15, %v946_v20, %v947_v2  ;;  %v1210_v15 = vsel %vm10680_vm1, %v1208_v31, %v1209_v14  ;;  %v1211_v55 = vrot.slane %v1209_v14, 4  ;;  %v551_v56 = vsel %vm10579_vm5, %v10860_v4, 0  ;;  %3502 = vmatprep.mubr.bf16.mxu1 %v9818_v43  ;;  %v10932_v11 = vld [vmem:[%s10541_s16 + $0x3c] sm:$0xf] }
  0x59   : > { %9677 = vmatpush3.bf16.msra.mxu0 %v9858_v48  ;;  %v1079_v40 = vsel %vm10671_vm0, %v1077_v28, %v1078_v12  ;;  %v9820_v48 = vld [vmem:[#allocation2 + $0x58] ss:$20 sps:$4 sm:$0xff]   ;;  %1028 = vst [vmem:[#allocation2 + $0x90] sm:$0xf] %v948_v39  ;;  %1290 = vst [vmem:[#allocation2 + $0x98] sm:$0xf] %v1210_v15  ;;  %v669_v58 = vsel %vm10625_vm14, %v664_v50, %v668_v17 }
  0x5a   : > { %9678 = vmatprep.subr.bf16.mxu0 %v9874_v61  ;;  %1159 = vst [vmem:[#allocation2 + $0x94] sm:$0xf] %v1079_v40  ;;  %v10905_v57 = vsel %vm10579_vm5, %v10882_v18, 0  ;;  %v674_v60 = vrot.slane %v673_v51, 4  ;;  %v680_v62 = vshrl.u32 %v10846_v54, 16  ;;  %v686_v63 = vshll.u32 %v551_v56, 16 }
  0x5b   : > { %v838_v0 = vadd.bf16 %v669_v58, %v521_v47  ;;  %v690_v5 = vshrl.u32 %v551_v56, 16  ;;  %v696_v6 = vshll.u32 %v10905_v57, 16  ;;  %v525_v49 = vsel %vm10567_vm4, %v10882_v18, 0  ;;  %v10963_v56 = vld [vmem:[%s10541_s16 + $0x40] sm:$0xf] }
  0x5c   : > { %3278 = vmatmul.mubr.bf16.gmra.mxu0 %v8773_v45  ;;  %3503 = vmatmul.mubr.bf16.gmra.mxu1 %v9820_v48  ;;  %v679_v54 = vsel %vm10625_vm14, %v674_v60, %v10895_v42  ;;  %v688_v9 = vrot.slane %v686_v63, 5  ;;  %v526_v36 = vsel %vm10567_vm4, %v10916_v7, 0  ;;  %v10940_v25 = vsel %vm10579_vm5, %v10916_v7, 0 }
  0x5d   : > { %9679 = vmatpush3.bf16.msra.mxu0 %v9874_v61  ;;  %v682_v61 = vrot.slane %v680_v62, 4  ;;  %v839_v10 = vadd.bf16 %v679_v54, %v522_v46  ;;  %862 = vst [vmem:[#allocation2 + $0xb4] sm:$0xf] %v838_v0  ;;  %v950_v41 = vrot.slane %v838_v0, 5  ;;  %1317 = vst [vmem:[#allocation2 + $0xb0] sm:$0xf] %v838_v0 }
  0x5e   : > { %v2159_v47 = vld [vmem:[#allocation2 + $0x78] sm:$0xff]  ;;  %v1081_v44 = vrot.slane %v838_v0, 6  ;;  %v1212_v2 = vrot.slane %v838_v0, 7  ;;  %v692_v3 = vrot.slane %v690_v5, 4  ;;  %v10935_v14 = vrot.slane %v696_v6, 5  ;;  %9680 = vmatprep.subr.bf16.mxu0 %v9890_v22 }
  0x5f   : > { %v683_v12 = vor.u32 %v682_v61, %v10895_v42  ;;  %v951_v19 = vsel %vm10663_vm15, %v949_v8, %v950_v41  ;;  %v952_v20 = vrot.slane %v950_v41, 4  ;;  %v953_v27 = vrot.slane %v839_v10, 5  ;;  %863 = vst [vmem:[#allocation2 + $0xc8] sm:$0xf] %v839_v10  ;;  %1318 = vst [vmem:[#allocation2 + $0xc4] sm:$0xf] %v839_v10 }
  0x60   : > { %v2162_v46 = vld [vmem:[#allocation2 + $0x8c] sm:$0xff]  ;;  %v1082_v28 = vsel %vm10671_vm0, %v1080_v52, %v1081_v44  ;;  %v9823_v30 = vld [vmem:[#allocation2 + $0x84] ss:$20 sps:$4 sm:$0xff]   ;;  %1029 = vst [vmem:[#allocation2 + $0xa4] sm:$0xf] %v951_v19  ;;  %v1083_v33 = vrot.slane %v1081_v44, 4  ;;  %v1213_v37 = vsel %vm10680_vm1, %v1211_v55, %v1212_v2  ;;  %v693_v38 = vor.u32 %v692_v3, %v688_v9 }
  0x61   : > { %v9821_v17 = vld [vmem:[#allocation2 + $0x7c] ss:$20 sps:$4 sm:$0xff]   ;;  %v8778_v31 = vcombine.low %v2159_v47, %v2162_v46  ;;  %v9825_v32 = vld [vmem:[#allocation2 + $0x80] ss:$20 sps:$4 sm:$0xff]   ;;  %1160 = vst [vmem:[#allocation2 + $0xa8] sm:$0xf] %v1082_v28  ;;  %v954_v39 = vsel %vm10663_vm15, %v952_v20, %v953_v27  ;;  %9681 = vmatpush3.bf16.msra.mxu0 %v9890_v22  ;;  %3510 = vmatprep.mubr.bf16.mxu1 %v9823_v30 }
  0x62   : > { %3285 = vmatprep.mubr.bf16.mxu0 %v9821_v17  ;;  %v1084_v40 = vrot.slane %v839_v10, 6  ;;  %v1214_v42 = vrot.slane %v1212_v2, 4  ;;  %v1215_v8 = vrot.slane %v839_v10, 7  ;;  %1291 = vst [vmem:[#allocation2 + $0xac] sm:$0xf] %v1213_v37  ;;  %v684_v43 = vrot.slane %v683_v12, 4 }
  0x63   : > { %1030 = vst [vmem:[#allocation2 + $0xb8] sm:$0xf] %v954_v39  ;;  %v694_v45 = vrot.slane %v693_v38, 4  ;;  %v955_v48 = vrot.slane %v953_v27, 4  ;;  %v10956_v15 = vsel %vm10579_vm5, %v10932_v11, 0  ;;  %v700_v62 = vshrl.u32 %v10905_v57, 16 }
  0x64   : > { %3286 = vmatmul.mubr.bf16.gmra.mxu0 %v8778_v31  ;;  %3511 = vmatmul.mubr.bf16.gmra.mxu1 %v9825_v32  ;;  %v1085_v50 = vsel %vm10671_vm0, %v1083_v33, %v1084_v40  ;;  %v1216_v51 = vsel %vm10680_vm1, %v1214_v42, %v1215_v8  ;;  %v1086_v52 = vrot.slane %v1084_v40, 4  ;;  %v1217_v55 = vrot.slane %v1215_v8, 4 }
  0x65   : > { %1161 = vst [vmem:[#allocation2 + $0xbc] sm:$0xf] %v1085_v50  ;;  %1292 = vst [vmem:[#allocation2 + $0xc0] sm:$0xf] %v1216_v51  ;;  %v689_v58 = vsel %vm10625_vm14, %v684_v43, %v688_v9  ;;  %v699_v60 = vsel %vm10625_vm14, %v694_v45, %v10935_v14  ;;  %v706_v63 = vshll.u32 %v10940_v25, 16  ;;  %v710_v6 = vshrl.u32 %v10940_v25, 16 }
  0x66   : > { %v840_v0 = vadd.bf16 %v689_v58, %v523_v53  ;;  %v841_v5 = vadd.bf16 %v699_v60, %v524_v34  ;;  %v716_v54 = vshll.u32 %v10956_v15, 16  ;;  %v702_v61 = vrot.slane %v700_v62, 4 }
  0x67   : > { %v708_v9 = vrot.slane %v706_v63, 5  ;;  %v527_v57 = vsel %vm10567_vm4, %v10932_v11, 0  ;;  %v528_v23 = vsel %vm10567_vm4, %v10963_v56, 0  ;;  %v2165_v53 = vld [vmem:[#allocation2 + $0xa0] sm:$0xff]  ;;  %v712_v12 = vrot.slane %v710_v6, 4 }
  0x68   : > { %864 = vst [vmem:[#allocation2 + $0xdc] sm:$0xf] %v840_v0  ;;  %v956_v47 = vrot.slane %v840_v0, 5  ;;  %v959_v10 = vrot.slane %v841_v5, 5  ;;  %865 = vst [vmem:[#allocation2 + $0xf0] sm:$0xf] %v841_v5  ;;  %v703_v2 = vor.u32 %v702_v61, %v10935_v14 }
  0x69   : > { %1319 = vst [vmem:[#allocation2 + $0xd8] sm:$0xf] %v840_v0  ;;  %1320 = vst [vmem:[#allocation2 + $0xec] sm:$0xf] %v841_v5  ;;  %v1087_v4 = vrot.slane %v840_v0, 6  ;;  %v1090_v34 = vrot.slane %v841_v5, 6  ;;  %v713_v38 = vor.u32 %v712_v12, %v708_v9 }
  0x6a   : > { %v1218_v41 = vrot.slane %v840_v0, 7  ;;  %v1221_v44 = vrot.slane %v841_v5, 7  ;;  %v2168_v3 = vld [vmem:[#allocation2 + $0xb4] sm:$0xff]  ;;  %v957_v22 = vsel %vm10663_vm15, %v955_v48, %v956_v47  ;;  %v958_v46 = vrot.slane %v956_v47, 4  ;;  %v10996_v14 = vld [vmem:[%s10541_s16 + $0x44] sm:$0xf] }
  0x6b   : > { %v9827_v25 = vld [vmem:[#allocation2 + $0xa4] ss:$20 sps:$4 sm:$0xff]   ;;  %v1088_v17 = vsel %vm10671_vm0, %v1086_v52, %v1087_v4  ;;  %v1089_v19 = vrot.slane %v1087_v4, 4  ;;  %v8783_v20 = vcombine.low %v2165_v53, %v2168_v3  ;;  %1031 = vst [vmem:[#allocation2 + $0xcc] sm:$0xf] %v957_v22  ;;  %v704_v30 = vrot.slane %v703_v2, 4 }
  0x6c   : > { %1162 = vst [vmem:[#allocation2 + $0xd0] sm:$0xf] %v1088_v17  ;;  %v1219_v27 = vsel %vm10680_vm1, %v1217_v55, %v1218_v41  ;;  %v1220_v28 = vrot.slane %v1218_v41, 4  ;;  %3293 = vmatprep.mubr.bf16.mxu0 %v9827_v25  ;;  %v9829_v31 = vld [vmem:[#allocation2 + $0xac] ss:$20 sps:$4 sm:$0xff]   ;;  %v960_v33 = vsel %vm10663_vm15, %v958_v46, %v959_v10  ;;  %v718_v39 = vrot.slane %v716_v54, 5 }
  0x6d   : > { %v9831_v32 = vld [vmem:[#allocation2 + $0xa8] ss:$20 sps:$4 sm:$0xff]   ;;  %v1091_v37 = vsel %vm10671_vm0, %v1089_v19, %v1090_v34  ;;  %1293 = vst [vmem:[#allocation2 + $0xd4] sm:$0xf] %v1219_v27  ;;  %3294 = vmatmul.mubr.bf16.gmra.mxu0 %v8783_v20  ;;  %1032 = vst [vmem:[#allocation2 + $0xe0] sm:$0xf] %v960_v33  ;;  %v709_v42 = vsel %vm10625_vm14, %v704_v30, %v708_v9  ;;  %3518 = vmatprep.mubr.bf16.mxu1 %v9829_v31 }
  0x6e   : > { %1163 = vst [vmem:[#allocation2 + $0xe4] sm:$0xf] %v1091_v37  ;;  %v1222_v40 = vsel %vm10680_vm1, %v1220_v28, %v1221_v44  ;;  %v961_v8 = vrot.slane %v959_v10, 4  ;;  %v1092_v43 = vrot.slane %v1090_v34, 4  ;;  %v714_v45 = vrot.slane %v713_v38, 4  ;;  %3519 = vmatmul.mubr.bf16.gmra.mxu1 %v9831_v32 }
  0x6f   : > { %1294 = vst [vmem:[#allocation2 + $0xe8] sm:$0xf] %v1222_v40  ;;  %v842_v48 = vadd.bf16 %v709_v42, %v525_v49  ;;  %v1223_v50 = vrot.slane %v1221_v44, 4  ;;  %v555_v51 = vsel %vm10579_vm5, %v10963_v56, 0  ;;  %v11016_v52 = vsel %vm10579_vm5, %v10996_v14, 0 }
  0x70   : > { %v720_v55 = vshrl.u32 %v10956_v15, 16  ;;  %v726_v58 = vshll.u32 %v555_v51, 16  ;;  %v730_v60 = vshrl.u32 %v555_v51, 16  ;;  %v719_v62 = vsel %vm10625_vm14, %v714_v45, %v718_v39  ;;  %v11032_v34 = vld [vmem:[%s10541_s16 + $0x48] sm:$0xf] }
  0x71   : > { %866 = vst [vmem:[#allocation2 + $0x104] sm:$0xf] %v842_v48  ;;  %v962_v18 = vrot.slane %v842_v48, 5  ;;  %1321 = vst [vmem:[#allocation2 + $0x100] sm:$0xf] %v842_v48  ;;  %v1093_v49 = vrot.slane %v842_v48, 6  ;;  %v843_v0 = vadd.bf16 %v719_v62, %v526_v36 }
  0x72   : > { %v1224_v63 = vrot.slane %v842_v48, 7  ;;  %v722_v5 = vrot.slane %v720_v55, 4  ;;  %v728_v6 = vrot.slane %v726_v58, 5  ;;  %v732_v15 = vrot.slane %v730_v60, 4  ;;  %v2171_v54 = vld [vmem:[#allocation2 + $0xc8] sm:$0xff] }
  0x73   : > { %v963_v61 = vsel %vm10663_vm15, %v961_v8, %v962_v18  ;;  %v964_v9 = vrot.slane %v962_v18, 4  ;;  %v1094_v53 = vsel %vm10671_vm0, %v1092_v43, %v1093_v49  ;;  %v1095_v47 = vrot.slane %v1093_v49, 4  ;;  %867 = vst [vmem:[#allocation2 + $0x118] sm:$0xf] %v843_v0  ;;  %1322 = vst [vmem:[#allocation2 + $0x114] sm:$0xf] %v843_v0 }
  0x74   : > { %v965_v10 = vrot.slane %v843_v0, 5  ;;  %1033 = vst [vmem:[#allocation2 + $0xf4] sm:$0xf] %v963_v61  ;;  %v1096_v7 = vrot.slane %v843_v0, 6  ;;  %1164 = vst [vmem:[#allocation2 + $0xf8] sm:$0xf] %v1094_v53  ;;  %v1225_v36 = vsel %vm10680_vm1, %v1223_v50, %v1224_v63  ;;  %v723_v3 = vor.u32 %v722_v5, %v718_v39 }
  0x75   : > { %v1226_v4 = vrot.slane %v1224_v63, 4  ;;  %v11035_v41 = vld [vmem:[%s10541_s16 + $0x4c] sm:$0xf]  ;;  %v2174_v44 = vld [vmem:[#allocation2 + $0xdc] sm:$0xff]  ;;  %v1227_v12 = vrot.slane %v843_v0, 7  ;;  %v733_v25 = vor.u32 %v732_v15, %v728_v6  ;;  %v736_v22 = vshll.u32 %v11016_v52, 16 }
  0x76   : > { %v9832_v2 = vld [vmem:[#allocation2 + $0xcc] ss:$20 sps:$4 sm:$0xff]   ;;  %1295 = vst [vmem:[#allocation2 + $0xfc] sm:$0xf] %v1225_v36  ;;  %v9834_v46 = vld [vmem:[#allocation2 + $0xd4] ss:$20 sps:$4 sm:$0xff]   ;;  %v8788_v17 = vcombine.low %v2171_v54, %v2174_v44  ;;  %v966_v20 = vsel %vm10663_vm15, %v964_v9, %v965_v10  ;;  %v1097_v27 = vsel %vm10671_vm0, %v1095_v47, %v1096_v7 }
  0x77   : > { %v9836_v19 = vld [vmem:[#allocation2 + $0xd0] ss:$20 sps:$4 sm:$0xff]   ;;  %v967_v28 = vrot.slane %v965_v10, 4  ;;  %3301 = vmatprep.mubr.bf16.mxu0 %v9832_v2  ;;  %1034 = vst [vmem:[#allocation2 + $0x108] sm:$0xf] %v966_v20  ;;  %v1228_v30 = vsel %vm10680_vm1, %v1226_v4, %v1227_v12  ;;  %v724_v31 = vrot.slane %v723_v3, 4  ;;  %3526 = vmatprep.mubr.bf16.mxu1 %v9834_v46 }
  0x78   : > { %1165 = vst [vmem:[#allocation2 + $0x10c] sm:$0xf] %v1097_v27  ;;  %v734_v32 = vrot.slane %v733_v25, 4  ;;  %v11044_v33 = vrot.slane %v736_v22, 5  ;;  %3302 = vmatmul.mubr.bf16.gmra.mxu0 %v8788_v17  ;;  %1296 = vst [vmem:[#allocation2 + $0x110] sm:$0xf] %v1228_v30  ;;  %3527 = vmatmul.mubr.bf16.gmra.mxu1 %v9836_v19 }
  0x79   : > { %v1098_v37 = vrot.slane %v1096_v7, 4  ;;  %v1229_v38 = vrot.slane %v1227_v12, 4  ;;  %v529_v39 = vsel %vm10567_vm4, %v10996_v14, 0  ;;  %v530_v40 = vsel %vm10567_vm4, %v11032_v34, 0  ;;  %v11053_v42 = vld [vmem:[%s10541_s16 + $0x50] sm:$0xf] }
  0x7a   : > { %v729_v8 = vsel %vm10625_vm14, %v724_v31, %v728_v6  ;;  %v739_v43 = vsel %vm10625_vm14, %v734_v32, %v11044_v33  ;;  %v557_v45 = vsel %vm10579_vm5, %v11032_v34, 0  ;;  %v11066_v48 = vsel %vm10579_vm5, %v11035_v41, 0  ;;  %v11085_v15 = vld [vmem:[%s10541_s16 + $0x54] sm:$0xf]  ;;  %v9906_v7 = vld [vmem:[%s14262_s1 + $0x108] sm:$0xff]  }
  0x7b   : > { %v844_v50 = vadd.bf16 %v729_v8, %v527_v57  ;;  %v845_v51 = vadd.bf16 %v739_v43, %v528_v23  ;;  %v740_v55 = vshrl.u32 %v11016_v52, 16  ;;  %v746_v58 = vshll.u32 %v557_v45, 16  ;;  %v2177_v57 = vld [vmem:[#allocation2 + $0xf0] sm:$0xff]  ;;  %9682 = vmatprep.subr.bf16.mxu0 %v9906_v7 }
  0x7c   : > { %v750_v60 = vshrl.u32 %v557_v45, 16  ;;  %v756_v62 = vshll.u32 %v11066_v48, 16  ;;  %v531_v18 = vsel %vm10567_vm4, %v11035_v41, 0  ;;  %v532_v11 = vsel %vm10567_vm4, %v11053_v42, 0  ;;  %9683 = vmatpush3.bf16.msra.mxu0 %v9906_v7 }
  0x7d   : > { %868 = vst [vmem:[#allocation2 + $0x12c] sm:$0xf] %v844_v50  ;;  %v968_v49 = vrot.slane %v844_v50, 5  ;;  %v971_v56 = vrot.slane %v845_v51, 5  ;;  %869 = vst [vmem:[#allocation2 + $0x140] sm:$0xf] %v845_v51 }
  0x7e   : > { %1323 = vst [vmem:[#allocation2 + $0x128] sm:$0xf] %v844_v50  ;;  %1324 = vst [vmem:[#allocation2 + $0x13c] sm:$0xf] %v845_v51  ;;  %v1099_v23 = vrot.slane %v844_v50, 6  ;;  %v1102_v52 = vrot.slane %v845_v51, 6 }
  0x7f   : > { %v1230_v63 = vrot.slane %v844_v50, 7  ;;  %v1233_v0 = vrot.slane %v845_v51, 7  ;;  %v742_v5 = vrot.slane %v740_v55, 4  ;;  %v748_v6 = vrot.slane %v746_v58, 5  ;;  %v2180_v54 = vld [vmem:[#allocation2 + $0x104] sm:$0xff] }
  0x80   : > { %v9837_v61 = vld [vmem:[#allocation2 + $0xf4] ss:$20 sps:$4 sm:$0xff]   ;;  %v969_v9 = vsel %vm10663_vm15, %v967_v28, %v968_v49  ;;  %v970_v53 = vrot.slane %v968_v49, 4  ;;  %v1100_v47 = vsel %vm10671_vm0, %v1098_v37, %v1099_v23  ;;  %v1101_v10 = vrot.slane %v1099_v23, 4  ;;  %v9839_v36 = vld [vmem:[#allocation2 + $0xfc] ss:$20 sps:$4 sm:$0xff]  }
  0x81   : > { %v8793_v4 = vcombine.low %v2177_v57, %v2180_v54  ;;  %v9841_v44 = vld [vmem:[#allocation2 + $0xf8] ss:$20 sps:$4 sm:$0xff]   ;;  %1035 = vst [vmem:[#allocation2 + $0x11c] sm:$0xf] %v969_v9  ;;  %1166 = vst [vmem:[#allocation2 + $0x120] sm:$0xf] %v1100_v47  ;;  %v1231_v2 = vsel %vm10680_vm1, %v1229_v38, %v1230_v63  ;;  %v743_v3 = vor.u32 %v742_v5, %v11044_v33  ;;  %3309 = vmatprep.mubr.bf16.mxu0 %v9837_v61 }
  0x82   : > { %v1232_v12 = vrot.slane %v1230_v63, 4  ;;  %v972_v25 = vsel %vm10663_vm15, %v970_v53, %v971_v56  ;;  %v1103_v22 = vsel %vm10671_vm0, %v1101_v10, %v1102_v52  ;;  %1297 = vst [vmem:[#allocation2 + $0x124] sm:$0xf] %v1231_v2  ;;  %v752_v46 = vrot.slane %v750_v60, 4  ;;  %3534 = vmatprep.mubr.bf16.mxu1 %v9839_v36  ;;  %v11120_v55 = vld [vmem:[%s10541_s16 + $0x58] sm:$0xf] }
  0x83   : > { %v758_v17 = vrot.slane %v756_v62, 5  ;;  %3310 = vmatmul.mubr.bf16.gmra.mxu0 %v8793_v4  ;;  %1036 = vst [vmem:[#allocation2 + $0x130] sm:$0xf] %v972_v25  ;;  %1167 = vst [vmem:[#allocation2 + $0x134] sm:$0xf] %v1103_v22  ;;  %v744_v20 = vrot.slane %v743_v3, 4  ;;  %3535 = vmatmul.mubr.bf16.gmra.mxu1 %v9841_v44 }
  0x84   : > { %v1234_v19 = vsel %vm10680_vm1, %v1232_v12, %v1233_v0  ;;  %v973_v27 = vrot.slane %v971_v56, 4  ;;  %v1104_v28 = vrot.slane %v1102_v52, 4  ;;  %v753_v30 = vor.u32 %v752_v46, %v748_v6  ;;  %v11141_v10 = vld [vmem:[%s10541_s16 + $0x5c] sm:$0xf] }
  0x85   : > { %1298 = vst [vmem:[#allocation2 + $0x138] sm:$0xf] %v1234_v19  ;;  %v1235_v31 = vrot.slane %v1233_v0, 4  ;;  %v559_v32 = vsel %vm10579_vm5, %v11053_v42, 0  ;;  %v11109_v33 = vsel %vm10579_vm5, %v11085_v15, 0  ;;  %v749_v37 = vsel %vm10625_vm14, %v744_v20, %v748_v6 }
  0x86   : > { %v760_v38 = vshrl.u32 %v11066_v48, 16  ;;  %v766_v8 = vshll.u32 %v559_v32, 16  ;;  %v770_v43 = vshrl.u32 %v559_v32, 16  ;;  %v754_v45 = vrot.slane %v753_v30, 4 }
  0x87   : > { %v846_v50 = vadd.bf16 %v749_v37, %v529_v39  ;;  %v776_v51 = vshll.u32 %v11109_v33, 16  ;;  %v533_v58 = vsel %vm10567_vm4, %v11085_v15, 0  ;;  %v534_v48 = vsel %vm10567_vm4, %v11120_v55, 0 }
  0x88   : > { %v762_v60 = vrot.slane %v760_v38, 4  ;;  %v768_v62 = vrot.slane %v766_v8, 5  ;;  %v772_v57 = vrot.slane %v770_v43, 4  ;;  %v2183_v49 = vld [vmem:[#allocation2 + $0x118] sm:$0xff]  ;;  %v759_v14 = vsel %vm10625_vm14, %v754_v45, %v758_v17 }
  0x89   : > { %870 = vst [vmem:[#allocation2 + $0x154] sm:$0xf] %v846_v50  ;;  %v974_v39 = vrot.slane %v846_v50, 5  ;;  %1325 = vst [vmem:[#allocation2 + $0x150] sm:$0xf] %v846_v50  ;;  %v1105_v56 = vrot.slane %v846_v50, 6  ;;  %v847_v52 = vadd.bf16 %v759_v14, %v530_v40 }
  0x8a   : > { %v1236_v23 = vrot.slane %v846_v50, 7  ;;  %v763_v63 = vor.u32 %v762_v60, %v758_v17  ;;  %v773_v0 = vor.u32 %v772_v57, %v768_v62  ;;  %v11134_v5 = vrot.slane %v776_v51, 5  ;;  %v2186_v6 = vld [vmem:[#allocation2 + $0x12c] sm:$0xff]  ;;  %v9847_v34 = vld [vmem:[#allocation2 + $0x120] ss:$20 sps:$4 sm:$0xff]  }
  0x8b   : > { %v9843_v54 = vld [vmem:[#allocation2 + $0x11c] ss:$20 sps:$4 sm:$0xff]   ;;  %v975_v61 = vsel %vm10663_vm15, %v973_v27, %v974_v39  ;;  %v976_v9 = vrot.slane %v974_v39, 4  ;;  %v1106_v53 = vsel %vm10671_vm0, %v1104_v28, %v1105_v56  ;;  %v1107_v47 = vrot.slane %v1105_v56, 4  ;;  %871 = vst [vmem:[#allocation2 + $0x168] sm:$0xf] %v847_v52 }
  0x8c   : > { %v9845_v7 = vld [vmem:[#allocation2 + $0x124] ss:$20 sps:$4 sm:$0xff]   ;;  %v8798_v36 = vcombine.low %v2183_v49, %v2186_v6  ;;  %v977_v40 = vrot.slane %v847_v52, 5  ;;  %1037 = vst [vmem:[#allocation2 + $0x144] sm:$0xf] %v975_v61  ;;  %v1237_v4 = vsel %vm10680_vm1, %v1235_v31, %v1236_v23  ;;  %3317 = vmatprep.mubr.bf16.mxu0 %v9843_v54  ;;  %v1108_v44 = vrot.slane %v847_v52, 6 }
  0x8d   : > { %1326 = vst [vmem:[#allocation2 + $0x164] sm:$0xf] %v847_v52  ;;  %1168 = vst [vmem:[#allocation2 + $0x148] sm:$0xf] %v1106_v53  ;;  %v1238_v2 = vrot.slane %v1236_v23, 4  ;;  %v1239_v12 = vrot.slane %v847_v52, 7  ;;  %3542 = vmatprep.mubr.bf16.mxu1 %v9845_v7 }
  0x8e   : > { %1299 = vst [vmem:[#allocation2 + $0x14c] sm:$0xf] %v1237_v4  ;;  %v764_v3 = vrot.slane %v763_v63, 4  ;;  %3318 = vmatmul.mubr.bf16.gmra.mxu0 %v8798_v36  ;;  %v978_v25 = vsel %vm10663_vm15, %v976_v9, %v977_v40  ;;  %v774_v22 = vrot.slane %v773_v0, 4  ;;  %v979_v46 = vrot.slane %v977_v40, 4  ;;  %3543 = vmatmul.mubr.bf16.gmra.mxu1 %v9847_v34 }
  0x8f   : > { %v561_v17 = vsel %vm10579_vm5, %v11120_v55, 0  ;;  %1038 = vst [vmem:[#allocation2 + $0x158] sm:$0xf] %v978_v25  ;;  %v1109_v19 = vsel %vm10671_vm0, %v1107_v47, %v1108_v44  ;;  %v1240_v20 = vsel %vm10680_vm1, %v1238_v2, %v1239_v12  ;;  %v1110_v28 = vrot.slane %v1108_v44, 4  ;;  %v474_v0 = vld [vmem:[%s10541_s16 + $0x60] sm:$0xf] }
  0x90   : > { %v769_v27 = vsel %vm10625_vm14, %v764_v3, %v768_v62  ;;  %1169 = vst [vmem:[#allocation2 + $0x15c] sm:$0xf] %v1109_v19  ;;  %1300 = vst [vmem:[#allocation2 + $0x160] sm:$0xf] %v1240_v20  ;;  %v779_v30 = vsel %vm10625_vm14, %v774_v22, %v11134_v5  ;;  %v1241_v32 = vrot.slane %v1239_v12, 4  ;;  %v11166_v37 = vsel %vm10579_vm5, %v11141_v10, 0 }
  0x91   : > { %v848_v31 = vadd.bf16 %v769_v27, %v531_v18  ;;  %v849_v38 = vadd.bf16 %v779_v30, %v532_v11  ;;  %v780_v8 = vshrl.u32 %v11109_v33, 16  ;;  %v786_v43 = vshll.u32 %v561_v17, 16  ;;  %v11191_v4 = vld [vmem:[%s10541_s16 + $0x64] sm:$0xf]  ;;  %v11206_v19 = vld [vmem:[%s10541_s16 + $0x68] sm:$0xf] }
  0x92   : > { %v790_v45 = vshrl.u32 %v561_v17, 16  ;;  %v796_v51 = vshll.u32 %v11166_v37, 16  ;;  %v11198_v22 = vsel %vm10567_vm4, %v11141_v10, 0  ;;  %v11203_v17 = vsel %vm10567_vm4, %v474_v0, 0 }
  0x93   : > { %872 = vst [vmem:[#allocation2 + $0x17c] sm:$0xf] %v848_v31  ;;  %v980_v50 = vrot.slane %v848_v31, 5  ;;  %1327 = vst [vmem:[#allocation2 + $0x178] sm:$0xf] %v848_v31  ;;  %v1111_v41 = vrot.slane %v848_v31, 6 }
  0x94   : > { %v1242_v18 = vrot.slane %v848_v31, 7  ;;  %v983_v60 = vrot.slane %v849_v38, 5  ;;  %873 = vst [vmem:[#allocation2 + $0x190] sm:$0xf] %v849_v38  ;;  %1328 = vst [vmem:[#allocation2 + $0x18c] sm:$0xf] %v849_v38 }
  0x95   : > { %v1114_v62 = vrot.slane %v849_v38, 6  ;;  %v1245_v57 = vrot.slane %v849_v38, 7  ;;  %v782_v49 = vrot.slane %v780_v8, 4  ;;  %v2189_v42 = vld [vmem:[#allocation2 + $0x140] sm:$0xff]  ;;  %v981_v11 = vsel %vm10663_vm15, %v979_v46, %v980_v50 }
  0x96   : > { %v982_v33 = vrot.slane %v980_v50, 4  ;;  %v1112_v14 = vsel %vm10671_vm0, %v1110_v28, %v1111_v41  ;;  %v1113_v39 = vrot.slane %v1111_v41, 4  ;;  %1039 = vst [vmem:[#allocation2 + $0x16c] sm:$0xf] %v981_v11  ;;  %v1243_v56 = vsel %vm10680_vm1, %v1241_v32, %v1242_v18  ;;  %v2192_v6 = vld [vmem:[#allocation2 + $0x154] sm:$0xff] }
  0x97   : > { %1170 = vst [vmem:[#allocation2 + $0x170] sm:$0xf] %v1112_v14  ;;  %v1244_v23 = vrot.slane %v1242_v18, 4  ;;  %v783_v52 = vor.u32 %v782_v49, %v11134_v5  ;;  %v788_v63 = vrot.slane %v786_v43, 5  ;;  %v9848_v54 = vld [vmem:[#allocation2 + $0x144] ss:$20 sps:$4 sm:$0xff]   ;;  %v8803_v36 = vcombine.low %v2189_v42, %v2192_v6 }
  0x98   : > { %v984_v61 = vsel %vm10663_vm15, %v982_v33, %v983_v60  ;;  %v1115_v9 = vsel %vm10671_vm0, %v1113_v39, %v1114_v62  ;;  %1301 = vst [vmem:[#allocation2 + $0x174] sm:$0xf] %v1243_v56  ;;  %v792_v53 = vrot.slane %v790_v45, 4  ;;  %v11186_v47 = vrot.slane %v796_v51, 5  ;;  %v9850_v7 = vld [vmem:[#allocation2 + $0x14c] ss:$20 sps:$4 sm:$0xff]   ;;  %3325 = vmatprep.mubr.bf16.mxu0 %v9848_v54 }
  0x99   : > { %v9852_v34 = vld [vmem:[#allocation2 + $0x148] ss:$20 sps:$4 sm:$0xff]   ;;  %1040 = vst [vmem:[#allocation2 + $0x180] sm:$0xf] %v984_v61  ;;  %1171 = vst [vmem:[#allocation2 + $0x184] sm:$0xf] %v1115_v9  ;;  %v1246_v5 = vsel %vm10680_vm1, %v1244_v23, %v1245_v57  ;;  %3550 = vmatprep.mubr.bf16.mxu1 %v9850_v7  ;;  %3326 = vmatmul.mubr.bf16.gmra.mxu0 %v8803_v36 }
  0x9a   : > { %v784_v40 = vrot.slane %v783_v52, 4  ;;  %1302 = vst [vmem:[#allocation2 + $0x188] sm:$0xf] %v1246_v5  ;;  %v793_v44 = vor.u32 %v792_v53, %v788_v63  ;;  %v985_v2 = vrot.slane %v983_v60, 4  ;;  %v1116_v12 = vrot.slane %v1114_v62, 4  ;;  %3551 = vmatmul.mubr.bf16.gmra.mxu1 %v9852_v34  ;;  %v9922_v6 = vld [vmem:[%s14262_s1 + $0x100] sm:$0xff]  }
  0x9b   : > { %v1247_v3 = vrot.slane %v1245_v57, 4  ;;  %v800_v46 = vshrl.u32 %v11166_v37, 16  ;;  %v882_v28 = vsel %vm10579_vm5, %v474_v0, 0  ;;  %v11217_v10 = vsel %vm10567_vm4, %v11191_v4, 0  ;;  %v11248_v7 = vld [vmem:[%s10541_s16 + $0x6c] sm:$0xf]  ;;  %9684 = vmatprep.subr.bf16.mxu0 %v9922_v6 }
  0x9c   : > { %v789_v25 = vsel %vm10625_vm14, %v784_v40, %v788_v63  ;;  %v794_v20 = vrot.slane %v793_v44, 4  ;;  %v884_v31 = vshll.u32 %v882_v28, 16  ;;  %v888_v32 = vshrl.u32 %v882_v28, 16  ;;  %9685 = vmatpush3.bf16.msra.mxu0 %v9922_v6 }
  0x9d   : > { %v850_v27 = vadd.bf16 %v789_v25, %v533_v58  ;;  %v802_v30 = vrot.slane %v800_v46, 4  ;;  %v1336_v37 = vsel %vm10567_vm4, %v11206_v19, 0  ;;  %v2195_v38 = vld [vmem:[#allocation2 + $0x168] sm:$0xff]  ;;  %v14318_v61 = vmov 0  ;;  %v11263_v25 = vld [vmem:[%s10541_s16 + $0x70] sm:$0xf] }
  0x9e   : > { %v799_v15 = vsel %vm10625_vm14, %v794_v20, %v11186_v47  ;;  %v886_v41 = vrot.slane %v884_v31, 5  ;;  %v890_v18 = vrot.slane %v888_v32, 4  ;;  %v14319_v61 = vsel %vm11243_vm3, 4294967295, %v14318_v61  ;;  %v1044_v32 = vld [vmem:[#allocation2 + $0x1d0] sm:$0xf] }
  0x9f   : > { %874 = vst [vmem:[#allocation2 + $0x1a4] sm:$0xf] %v850_v27  ;;  %v986_v58 = vrot.slane %v850_v27, 5  ;;  %1329 = vst [vmem:[#allocation2 + $0x1a0] sm:$0xf] %v850_v27  ;;  %v1117_v8 = vrot.slane %v850_v27, 6  ;;  %v851_v45 = vadd.bf16 %v799_v15, %v534_v48  ;;  %v803_v50 = vor.u32 %v802_v30, %v11186_v47 }
  0xa0   : > { %v1248_v43 = vrot.slane %v850_v27, 7  ;;  %v2198_v51 = vld [vmem:[#allocation2 + $0x17c] sm:$0xff]  ;;  %v9857_v14 = vld [vmem:[#allocation2 + $0x170] ss:$20 sps:$4 sm:$0xff]   ;;  %v878_v48 = vld [vmem:[#allocation2 + $0x1cc] sm:$0xf]  ;;  %v1047_v56 = vor.u32 %v890_v18, %v886_v41 }
  0xa1   : > { %v9853_v60 = vld [vmem:[#allocation2 + $0x16c] ss:$20 sps:$4 sm:$0xff]   ;;  %v987_v62 = vsel %vm10663_vm15, %v985_v2, %v986_v58  ;;  %v988_v57 = vrot.slane %v986_v58, 4  ;;  %v1118_v49 = vsel %vm10671_vm0, %v1116_v12, %v1117_v8  ;;  %v1119_v42 = vrot.slane %v1117_v8, 4  ;;  %v9855_v11 = vld [vmem:[#allocation2 + $0x174] ss:$20 sps:$4 sm:$0xff]  }
  0xa2   : > { %v8808_v33 = vcombine.low %v2195_v38, %v2198_v51  ;;  %v989_v39 = vrot.slane %v851_v45, 5  ;;  %1041 = vst [vmem:[#allocation2 + $0x194] sm:$0xf] %v987_v62  ;;  %875 = vst [vmem:[#allocation2 + $0x1b8] sm:$0xf] %v851_v45  ;;  %v1249_v55 = vsel %vm10680_vm1, %v1247_v3, %v1248_v43  ;;  %3333 = vmatprep.mubr.bf16.mxu0 %v9853_v60  ;;  %v1120_v23 = vrot.slane %v851_v45, 6 }
  0xa3   : > { %1330 = vst [vmem:[#allocation2 + $0x1b4] sm:$0xf] %v851_v45  ;;  %1172 = vst [vmem:[#allocation2 + $0x198] sm:$0xf] %v1118_v49  ;;  %v1250_v52 = vrot.slane %v1248_v43, 4  ;;  %v1251_v63 = vrot.slane %v851_v45, 7  ;;  %3558 = vmatprep.mubr.bf16.mxu1 %v9855_v11 }
  0xa4   : > { %1303 = vst [vmem:[#allocation2 + $0x19c] sm:$0xf] %v1249_v55  ;;  %v804_v0 = vrot.slane %v803_v50, 4  ;;  %3334 = vmatmul.mubr.bf16.gmra.mxu0 %v8808_v33  ;;  %v990_v54 = vsel %vm10663_vm15, %v988_v57, %v989_v39  ;;  %14320 = vst [vmem:[#allocation14_spill] sm:$0xff] %v14319_v61  ;;  %v891_v9 = vrot.slane %v890_v18, 4  ;;  %v991_v53 = vrot.slane %v989_v39, 4  ;;  %3559 = vmatmul.mubr.bf16.gmra.mxu1 %v9857_v14 }
  0xa5   : > { %v1048_v47 = vrot.slane %v1047_v56, 4  ;;  %1042 = vst [vmem:[#allocation2 + $0x1a8] sm:$0xf] %v990_v54  ;;  %v1121_v36 = vsel %vm10671_vm0, %v1119_v42, %v1120_v23  ;;  %v1252_v34 = vsel %vm10680_vm1, %v1250_v52, %v1251_v63  ;;  %v1122_v3 = vrot.slane %v1120_v23, 4  ;;  %v1175_v18 = vld [vmem:[#allocation2 + $0x1d4] sm:$0xf] }
  0xa6   : > { %v852_v5 = vadd.bf16 %v804_v0, %v11198_v22  ;;  %v887_v40 = vsel %vm10625_vm14, %v804_v0, %v886_v41  ;;  %1173 = vst [vmem:[#allocation2 + $0x1ac] sm:$0xf] %v1121_v36  ;;  %1304 = vst [vmem:[#allocation2 + $0x1b0] sm:$0xf] %v1252_v34  ;;  %v895_v2 = vadd.bf16 %v891_v9, %v11203_v17  ;;  %v1253_v20 = vrot.slane %v1251_v63, 4 }
  0xa7   : > { %v894_v44 = vadd.bf16 %v887_v40, %v11198_v22  ;;  %v11260_v12 = vadd.bf16 %v1048_v47, %v11203_v17  ;;  %v1337_v27 = vsel %vm10567_vm4, %v11248_v7, 0  ;;  %v1359_v22 = vsel %vm10579_vm5, %v11191_v4, 0  ;;  %v1306_v62 = vld [vmem:[#allocation2 + $0x1d8] sm:$0xf]  ;;  %v11303_v47 = vld [vmem:[%s10541_s16 + $0x74] sm:$0xf] }
  0xa8   : > { %v879_v46 = vsel %vm11243_vm3, %v852_v5, %v878_v48  ;;  %v995_v28 = vrot.slane %v895_v2, 5  ;;  %v1360_v58 = vsel %vm10579_vm5, %v11206_v19, 0  ;;  %v1361_v4 = vsel %vm10579_vm5, %v11248_v7, 0 }
  0xa9   : > { %880 = vst [vmem:[#allocation2 + $0x1cc] sm:$0xf] %v879_v46  ;;  %v992_v17 = vrot.slane %v894_v44, 5  ;;  %1331 = vst [vmem:[#allocation2 + $0x1c8] sm:$0xf] %v894_v44  ;;  %v1123_v30 = vrot.slane %v894_v44, 6 }
  0xaa   : > { %v1126_v31 = vrot.slane %v11260_v12, 6  ;;  %v1254_v38 = vrot.slane %v894_v44, 7  ;;  %v1257_v15 = vrot.slane %v11260_v12, 7  ;;  %v2201_v8 = vld [vmem:[#allocation2 + $0x190] sm:$0xff]  ;;  %v1362_v57 = vsel %vm10579_vm5, %v11263_v25, 0 }
  0xab   : > { %v993_v43 = vsel %vm10663_vm15, %v991_v53, %v992_v17  ;;  %v994_v45 = vrot.slane %v992_v17, 4  ;;  %v1124_v50 = vsel %vm10671_vm0, %v1122_v3, %v1123_v30  ;;  %v1125_v41 = vrot.slane %v1123_v30, 4  ;;  %v11306_v44 = vld [vmem:[%s10541_s16 + $0x78] sm:$0xf] }
  0xac   : > { %1043 = vst [vmem:[#allocation2 + $0x1bc] sm:$0xf] %v993_v43  ;;  %1174 = vst [vmem:[#allocation2 + $0x1c0] sm:$0xf] %v1124_v50  ;;  %v1255_v51 = vsel %vm10680_vm1, %v1253_v20, %v1254_v38  ;;  %v1256_v60 = vrot.slane %v1254_v38, 4  ;;  %v1384_v49 = vshrl.u32 %v1359_v22, 16 }
  0xad   : > { %v2204_v42 = vld [vmem:[#allocation2 + $0x1a4] sm:$0xff]  ;;  %v996_v33 = vsel %vm10663_vm15, %v994_v45, %v995_v28  ;;  %v1127_v14 = vsel %vm10671_vm0, %v1125_v41, %v1126_v31  ;;  %1305 = vst [vmem:[#allocation2 + $0x1c4] sm:$0xf] %v1255_v51  ;;  %v1387_v39 = vshll.u32 %v1359_v22, 16  ;;  %v1393_v55 = vshll.u32 %v1360_v58, 16 }
  0xae   : > { %v9859_v11 = vld [vmem:[#allocation2 + $0x194] ss:$20 sps:$4 sm:$0xff]   ;;  %v9861_v48 = vld [vmem:[#allocation2 + $0x19c] ss:$20 sps:$4 sm:$0xff]   ;;  %v8813_v56 = vcombine.low %v2201_v8, %v2204_v42  ;;  %v9863_v23 = vld [vmem:[#allocation2 + $0x198] ss:$20 sps:$4 sm:$0xff]   ;;  %v1045_v52 = vsel %vm11243_vm3, %v996_v33, %v1044_v32  ;;  %v1176_v63 = vsel %vm11243_vm3, %v1127_v14, %v1175_v18  ;;  %v1258_v0 = vsel %vm10680_vm1, %v1256_v60, %v1257_v15 }
  0xaf   : > { %3341 = vmatprep.mubr.bf16.mxu0 %v9859_v11  ;;  %1046 = vst [vmem:[#allocation2 + $0x1d0] sm:$0xf] %v1045_v52  ;;  %1177 = vst [vmem:[#allocation2 + $0x1d4] sm:$0xf] %v1176_v63  ;;  %v1307_v6 = vsel %vm11243_vm3, %v1258_v0, %v1306_v62  ;;  %v1386_v54 = vrot.slane %v1384_v49, 4  ;;  %v1389_v9 = vrot.slane %v1387_v39, 5  ;;  %3566 = vmatprep.mubr.bf16.mxu1 %v9861_v48 }
  0xb0   : > { %v1395_v53 = vrot.slane %v1393_v55, 5  ;;  %3342 = vmatmul.mubr.bf16.gmra.mxu0 %v8813_v56  ;;  %1308 = vst [vmem:[#allocation2 + $0x1d8] sm:$0xf] %v1307_v6  ;;  %v1397_v36 = vshrl.u32 %v1360_v58, 16  ;;  %v1403_v34 = vshll.u32 %v1361_v4, 16  ;;  %v1407_v5 = vshrl.u32 %v1361_v4, 16  ;;  %3567 = vmatmul.mubr.bf16.gmra.mxu1 %v9863_v23 }
  0xb1   : > { %v1413_v40 = vshll.u32 %v1362_v57, 16  ;;  %v1390_v2 = vor.u32 %v1389_v9, %v1386_v54  ;;  %v1987_v3 = vrot.slane %v1386_v54, 4  ;;  %v1338_v46 = vsel %vm10567_vm4, %v11263_v25, 0  ;;  %v11334_v63 = vld [vmem:[%s10541_s16 + $0x7c] sm:$0xf] }
  0xb2   : > { %v1339_v20 = vsel %vm10567_vm4, %v11303_v47, 0  ;;  %v1399_v22 = vrot.slane %v1397_v36, 4  ;;  %v1405_v17 = vrot.slane %v1403_v34, 5  ;;  %v1409_v28 = vrot.slane %v1407_v5, 4 }
  0xb3   : > { %v1415_v30 = vrot.slane %v1413_v40, 5  ;;  %v2207_v31 = vld [vmem:[#allocation2 + $0x1b8] sm:$0xff]  ;;  %v1391_v32 = vrot.slane %v1390_v2, 4  ;;  %v1988_v38 = vsel %vm10625_vm14, %v1987_v3, %v1395_v53  ;;  %v1363_v15 = vsel %vm10579_vm5, %v11303_v47, 0 }
  0xb4   : > { %v11322_v58 = vsel %vm10579_vm5, %v11306_v44, 0  ;;  %v1400_v4 = vor.u32 %v1399_v22, %v1395_v53  ;;  %v1410_v8 = vor.u32 %v1409_v28, %v1405_v17  ;;  %v1990_v43 = vadd.bf16 %v1988_v38, %v11217_v10 }
  0xb5   : > { %v1417_v45 = vshrl.u32 %v1362_v57, 16  ;;  %v1396_v50 = vsel %vm10625_vm14, %v1391_v32, %v1395_v53  ;;  %v1423_v41 = vshll.u32 %v1363_v15, 16  ;;  %v1427_v18 = vshrl.u32 %v1363_v15, 16 }
  0xb6   : > { %v1433_v51 = vshll.u32 %v11322_v58, 16  ;;  %v2210_v60 = vld [vmem:[#allocation2 + $0x1cc] sm:$0xff]  ;;  %v1401_v49 = vrot.slane %v1400_v4, 4  ;;  %v1411_v42 = vrot.slane %v1410_v8, 4  ;;  %v1646_v11 = vadd.bf16 %v1396_v50, %v11217_v10  ;;  %v9868_v55 = vld [vmem:[#allocation2 + $0x1c0] ss:$20 sps:$4 sm:$0xff]  }
  0xb7   : > { %v9864_v62 = vld [vmem:[#allocation2 + $0x1bc] ss:$20 sps:$4 sm:$0xff]   ;;  %v8762_v33 = vrot.slane %v1990_v43, 11  ;;  %v9866_v14 = vld [vmem:[#allocation2 + $0x1c4] ss:$20 sps:$4 sm:$0xff]   ;;  %v8818_v39 = vcombine.low %v2207_v31, %v2210_v60  ;;  %v1419_v48 = vrot.slane %v1417_v45, 4 }
  0xb8   : > { %3349 = vmatprep.mubr.bf16.mxu0 %v9864_v62  ;;  %v1406_v57 = vsel %vm10625_vm14, %v1401_v49, %v1405_v17  ;;  %v1416_v56 = vsel %vm10625_vm14, %v1411_v42, %v1415_v30  ;;  %1670 = vst [vmem:[#allocation2 + $0x1e0] sm:$0xf] %v1646_v11  ;;  %v8760_v23 = vrot.slane %v1646_v11, 9  ;;  %v8761_v52 = vrot.slane %v1646_v11, 10  ;;  %3574 = vmatprep.mubr.bf16.mxu1 %v9866_v14  ;;  %v11357_v31 = vld [vmem:[%s10541_s16 + $0x80] sm:$0xf] }
  0xb9   : > { %3350 = vmatmul.mubr.bf16.gmra.mxu0 %v8818_v39  ;;  %v1647_v10 = vadd.bf16 %v1406_v57, %v1336_v37  ;;  %v1648_v0 = vadd.bf16 %v1416_v56, %v1337_v27  ;;  %v1420_v6 = vor.u32 %v1419_v48, %v1415_v30  ;;  %v1425_v54 = vrot.slane %v1423_v41, 5  ;;  %3575 = vmatmul.mubr.bf16.gmra.mxu1 %v9868_v55 }
  0xba   : > { %v1429_v9 = vrot.slane %v1427_v18, 4  ;;  %v11344_v53 = vrot.slane %v1433_v51, 5  ;;  %v1340_v36 = vsel %vm10567_vm4, %v11306_v44, 0  ;;  %v1341_v19 = vsel %vm10567_vm4, %v11334_v63, 0 }
  0xbb   : > { %1671 = vst [vmem:[#allocation2 + $0x1f4] sm:$0xf] %v1647_v10  ;;  %v1738_v37 = vrot.slane %v1647_v10, 5  ;;  %v1741_v34 = vrot.slane %v1648_v0, 5  ;;  %1672 = vst [vmem:[#allocation2 + $0x208] sm:$0xf] %v1648_v0 }
  0xbc   : > { %2115 = vst [vmem:[#allocation2 + $0x1f0] sm:$0xf] %v1647_v10  ;;  %2116 = vst [vmem:[#allocation2 + $0x204] sm:$0xf] %v1648_v0  ;;  %v1866_v7 = vrot.slane %v1647_v10, 6  ;;  %v1869_v27 = vrot.slane %v1648_v0, 6  ;;  %v1430_v3 = vor.u32 %v1429_v9, %v1425_v54 }
  0xbd   : > { %v1994_v5 = vrot.slane %v1647_v10, 7  ;;  %v1997_v40 = vrot.slane %v1648_v0, 7  ;;  %v1421_v2 = vrot.slane %v1420_v6, 4  ;;  %v1739_v22 = vsel %vm10663_vm15, %v8760_v23, %v1738_v37  ;;  %v11402_v9 = vld [vmem:[%s10541_s16 + $0x88] sm:$0xf] }
  0xbe   : > { %v1740_v17 = vrot.slane %v1738_v37, 4  ;;  %v1867_v28 = vsel %vm10671_vm0, %v8761_v52, %v1866_v7  ;;  %v1868_v30 = vrot.slane %v1866_v7, 4  ;;  %1833 = vst [vmem:[#allocation2 + $0x1e4] sm:$0xf] %v1739_v22  ;;  %v1431_v4 = vrot.slane %v1430_v3, 4 }
  0xbf   : > { %1961 = vst [vmem:[#allocation2 + $0x1e8] sm:$0xf] %v1867_v28  ;;  %v1995_v32 = vsel %vm10680_vm1, %v8762_v33, %v1994_v5  ;;  %v1996_v38 = vrot.slane %v1994_v5, 4  ;;  %v1426_v15 = vsel %vm10625_vm14, %v1421_v2, %v1425_v54  ;;  %v1743_v50 = vrot.slane %v1741_v34, 4  ;;  %v11399_v54 = vld [vmem:[%s10541_s16 + $0x84] sm:$0xf] }
  0xc0   : > { %v1742_v8 = vsel %vm10663_vm15, %v1740_v17, %v1741_v34  ;;  %v1870_v43 = vsel %vm10671_vm0, %v1868_v30, %v1869_v27  ;;  %2089 = vst [vmem:[#allocation2 + $0x1ec] sm:$0xf] %v1995_v32  ;;  %v1649_v45 = vadd.bf16 %v1426_v15, %v1338_v46  ;;  %v1436_v18 = vsel %vm10625_vm14, %v1431_v4, %v11344_v53 }
  0xc1   : > { %1834 = vst [vmem:[#allocation2 + $0x1f8] sm:$0xf] %v1742_v8  ;;  %1962 = vst [vmem:[#allocation2 + $0x1fc] sm:$0xf] %v1870_v43  ;;  %v1998_v41 = vsel %vm10680_vm1, %v1996_v38, %v1997_v40  ;;  %v1871_v51 = vrot.slane %v1869_v27, 4  ;;  %v1999_v60 = vrot.slane %v1997_v40, 4  ;;  %v1650_v62 = vadd.bf16 %v1436_v18, %v1339_v20 }
  0xc2   : > { %2090 = vst [vmem:[#allocation2 + $0x200] sm:$0xf] %v1998_v41  ;;  %1673 = vst [vmem:[#allocation2 + $0x21c] sm:$0xf] %v1649_v45  ;;  %v1744_v25 = vrot.slane %v1649_v45, 5  ;;  %v1872_v46 = vrot.slane %v1649_v45, 6 }
  0xc3   : > { %2117 = vst [vmem:[#allocation2 + $0x218] sm:$0xf] %v1649_v45  ;;  %v2000_v49 = vrot.slane %v1649_v45, 7  ;;  %v1365_v42 = vsel %vm10579_vm5, %v11334_v63, 0  ;;  %v1366_v11 = vsel %vm10579_vm5, %v11357_v31, 0  ;;  %v1437_v33 = vshrl.u32 %v11322_v58, 16 }
  0xc4   : > { %v1342_v47 = vsel %vm10567_vm4, %v11357_v31, 0  ;;  %v1745_v20 = vsel %vm10663_vm15, %v1743_v50, %v1744_v25  ;;  %v1746_v14 = vrot.slane %v1744_v25, 4  ;;  %v1747_v39 = vrot.slane %v1650_v62, 5  ;;  %1674 = vst [vmem:[#allocation2 + $0x230] sm:$0xf] %v1650_v62 }
  0xc5   : > { %2118 = vst [vmem:[#allocation2 + $0x22c] sm:$0xf] %v1650_v62  ;;  %v1873_v55 = vsel %vm10671_vm0, %v1871_v51, %v1872_v46  ;;  %1835 = vst [vmem:[#allocation2 + $0x20c] sm:$0xf] %v1745_v20  ;;  %v1874_v48 = vrot.slane %v1872_v46, 4  ;;  %v1875_v57 = vrot.slane %v1650_v62, 6  ;;  %v2001_v58 = vsel %vm10680_vm1, %v1999_v60, %v2000_v49 }
  0xc6   : > { %1963 = vst [vmem:[#allocation2 + $0x210] sm:$0xf] %v1873_v55  ;;  %v2002_v56 = vrot.slane %v2000_v49, 4  ;;  %v2213_v23 = vld [vmem:[#allocation2 + $0x1e0] sm:$0xff]  ;;  %v1748_v52 = vsel %vm10663_vm15, %v1746_v14, %v1747_v39  ;;  %v2003_v10 = vrot.slane %v1650_v62, 7  ;;  %v1439_v0 = vrot.slane %v1437_v33, 4 }
  0xc7   : > { %2091 = vst [vmem:[#allocation2 + $0x214] sm:$0xf] %v2001_v58  ;;  %v1443_v6 = vshll.u32 %v1365_v42, 16  ;;  %1836 = vst [vmem:[#allocation2 + $0x220] sm:$0xf] %v1748_v52  ;;  %v1876_v37 = vsel %vm10671_vm0, %v1874_v48, %v1875_v57  ;;  %v1447_v34 = vshrl.u32 %v1365_v42, 16 }
  0xc8   : > { %v1453_v7 = vshll.u32 %v1366_v11, 16  ;;  %v1749_v27 = vrot.slane %v1747_v39, 4  ;;  %v2216_v5 = vld [vmem:[#allocation2 + $0x1f4] sm:$0xff]  ;;  %1964 = vst [vmem:[#allocation2 + $0x224] sm:$0xf] %v1876_v37  ;;  %v2004_v2 = vsel %vm10680_vm1, %v2002_v56, %v2003_v10  ;;  %v1440_v3 = vor.u32 %v1439_v0, %v11344_v53 }
  0xc9   : > { %v9869_v40 = vld [vmem:[#allocation2 + $0x1e4] ss:$20 sps:$4 sm:$0xff]   ;;  %v1445_v22 = vrot.slane %v1443_v6, 5  ;;  %v1877_v17 = vrot.slane %v1875_v57, 4  ;;  %v9871_v28 = vld [vmem:[#allocation2 + $0x1ec] ss:$20 sps:$4 sm:$0xff]   ;;  %v8823_v30 = vcombine.low %v2213_v23, %v2216_v5 }
  0xca   : > { %v9873_v32 = vld [vmem:[#allocation2 + $0x1e8] ss:$20 sps:$4 sm:$0xff]   ;;  %2092 = vst [vmem:[#allocation2 + $0x228] sm:$0xf] %v2004_v2  ;;  %v1449_v38 = vrot.slane %v1447_v34, 4  ;;  %3357 = vmatprep.mubr.bf16.mxu0 %v9869_v40  ;;  %v1441_v15 = vrot.slane %v1440_v3, 4  ;;  %3582 = vmatprep.mubr.bf16.mxu1 %v9871_v28 }
  0xcb   : > { %v1455_v4 = vrot.slane %v1453_v7, 5  ;;  %v2005_v8 = vrot.slane %v2003_v10, 4  ;;  %v1343_v43 = vsel %vm10567_vm4, %v11399_v54, 0  ;;  %3358 = vmatmul.mubr.bf16.gmra.mxu0 %v8823_v30  ;;  %v1367_v53 = vsel %vm10579_vm5, %v11399_v54, 0  ;;  %3583 = vmatmul.mubr.bf16.gmra.mxu1 %v9873_v32  ;;  %v11439_v6 = vld [vmem:[%s10541_s16 + $0x8c] sm:$0xf] }
  0xcc   : > { %v1450_v45 = vor.u32 %v1449_v38, %v1445_v22  ;;  %v11418_v50 = vsel %vm10579_vm5, %v11402_v9, 0  ;;  %v1457_v41 = vshrl.u32 %v1366_v11, 16  ;;  %v2219_v18 = vld [vmem:[#allocation2 + $0x208] sm:$0xff]  ;;  %v1446_v51 = vsel %vm10625_vm14, %v1441_v15, %v1445_v22  ;;  %v11446_v40 = vld [vmem:[%s10541_s16 + $0x90] sm:$0xf] }
  0xcd   : > { %v1463_v60 = vshll.u32 %v1367_v53, 16  ;;  %v1467_v62 = vshrl.u32 %v1367_v53, 16  ;;  %v1473_v25 = vshll.u32 %v11418_v50, 16  ;;  %v1651_v49 = vadd.bf16 %v1446_v51, %v1340_v36 }
  0xce   : > { %v1451_v46 = vrot.slane %v1450_v45, 4  ;;  %v1459_v42 = vrot.slane %v1457_v41, 4  ;;  %v1344_v11 = vsel %vm10567_vm4, %v11402_v9, 0  ;;  %v2222_v33 = vld [vmem:[#allocation2 + $0x21c] sm:$0xff]  ;;  %v1369_v51 = vsel %vm10579_vm5, %v11439_v6, 0 }
  0xcf   : > { %v9875_v20 = vld [vmem:[#allocation2 + $0x20c] ss:$20 sps:$4 sm:$0xff]   ;;  %v1465_v14 = vrot.slane %v1463_v60, 5  ;;  %v1469_v39 = vrot.slane %v1467_v62, 4  ;;  %v11430_v55 = vrot.slane %v1473_v25, 5  ;;  %v8828_v48 = vcombine.low %v2219_v18, %v2222_v33 }
  0xd0   : > { %v1456_v57 = vsel %vm10625_vm14, %v1451_v46, %v1455_v4  ;;  %1675 = vst [vmem:[#allocation2 + $0x244] sm:$0xf] %v1651_v49  ;;  %v1750_v44 = vrot.slane %v1651_v49, 5  ;;  %2119 = vst [vmem:[#allocation2 + $0x240] sm:$0xf] %v1651_v49  ;;  %v1878_v36 = vrot.slane %v1651_v49, 6  ;;  %3365 = vmatprep.mubr.bf16.mxu0 %v9875_v20  ;;  %v1460_v10 = vor.u32 %v1459_v42, %v1455_v4 }
  0xd1   : > { %v9877_v58 = vld [vmem:[#allocation2 + $0x214] ss:$20 sps:$4 sm:$0xff]   ;;  %v9879_v56 = vld [vmem:[#allocation2 + $0x210] ss:$20 sps:$4 sm:$0xff]   ;;  %v1652_v23 = vadd.bf16 %v1456_v57, %v1341_v19  ;;  %v2006_v52 = vrot.slane %v1651_v49, 7  ;;  %v1470_v0 = vor.u32 %v1469_v39, %v1465_v14  ;;  %v11478_v60 = vsel %vm10579_vm5, %v11446_v40, 0 }
  0xd2   : > { %v1751_v37 = vsel %vm10663_vm15, %v1749_v27, %v1750_v44  ;;  %v1752_v34 = vrot.slane %v1750_v44, 4  ;;  %v1879_v7 = vsel %vm10671_vm0, %v1877_v17, %v1878_v36  ;;  %v1880_v5 = vrot.slane %v1878_v36, 4  ;;  %3590 = vmatprep.mubr.bf16.mxu1 %v9877_v58  ;;  %v11487_v36 = vld [vmem:[%s10541_s16 + $0x94] sm:$0xf]  ;;  %v11490_v58 = vld [vmem:[%s10541_s16 + $0x98] sm:$0xf] }
  0xd3   : > { %v1753_v2 = vrot.slane %v1652_v23, 5  ;;  %1837 = vst [vmem:[#allocation2 + $0x234] sm:$0xf] %v1751_v37  ;;  %1676 = vst [vmem:[#allocation2 + $0x258] sm:$0xf] %v1652_v23  ;;  %v1881_v63 = vrot.slane %v1652_v23, 6  ;;  %v2007_v19 = vsel %vm10680_vm1, %v2005_v8, %v2006_v52  ;;  %3366 = vmatmul.mubr.bf16.gmra.mxu0 %v8828_v48  ;;  %3591 = vmatmul.mubr.bf16.gmra.mxu1 %v9879_v56 }
  0xd4   : > { %2120 = vst [vmem:[#allocation2 + $0x254] sm:$0xf] %v1652_v23  ;;  %1965 = vst [vmem:[#allocation2 + $0x238] sm:$0xf] %v1879_v7  ;;  %v2008_v3 = vrot.slane %v2006_v52, 4  ;;  %v2009_v27 = vrot.slane %v1652_v23, 7 }
  0xd5   : > { %2093 = vst [vmem:[#allocation2 + $0x23c] sm:$0xf] %v2007_v19  ;;  %v1461_v22 = vrot.slane %v1460_v10, 4  ;;  %v1471_v28 = vrot.slane %v1470_v0, 4  ;;  %v1345_v17 = vsel %vm10567_vm4, %v11439_v6, 0  ;;  %v1754_v30 = vsel %vm10663_vm15, %v1752_v34, %v1753_v2 }
  0xd6   : > { %v1882_v32 = vsel %vm10671_vm0, %v1880_v5, %v1881_v63  ;;  %v1755_v38 = vrot.slane %v1753_v2, 4  ;;  %v1883_v15 = vrot.slane %v1881_v63, 4  ;;  %1838 = vst [vmem:[#allocation2 + $0x248] sm:$0xf] %v1754_v30  ;;  %v2010_v4 = vsel %vm10680_vm1, %v2008_v3, %v2009_v27 }
  0xd7   : > { %1966 = vst [vmem:[#allocation2 + $0x24c] sm:$0xf] %v1882_v32  ;;  %v1466_v8 = vsel %vm10625_vm14, %v1461_v22, %v1465_v14  ;;  %v1476_v45 = vsel %vm10625_vm14, %v1471_v28, %v11430_v55  ;;  %v2011_v53 = vrot.slane %v2009_v27, 4  ;;  %2094 = vst [vmem:[#allocation2 + $0x250] sm:$0xf] %v2010_v4  ;;  %v1477_v62 = vshrl.u32 %v11418_v50, 16 }
  0xd8   : > { %v1653_v41 = vadd.bf16 %v1466_v8, %v1342_v47  ;;  %v1654_v18 = vadd.bf16 %v1476_v45, %v1343_v43  ;;  %v1483_v25 = vshll.u32 %v1369_v51, 16  ;;  %v1487_v46 = vshrl.u32 %v1369_v51, 16 }
  0xd9   : > { %v1493_v31 = vshll.u32 %v11478_v60, 16  ;;  %v1479_v20 = vrot.slane %v1477_v62, 4  ;;  %v1346_v32 = vsel %vm10567_vm4, %v11446_v40, 0  ;;  %v1371_v8 = vsel %vm10579_vm5, %v11487_v36, 0 }
  0xda   : > { %1677 = vst [vmem:[#allocation2 + $0x26c] sm:$0xf] %v1653_v41  ;;  %v1756_v47 = vrot.slane %v1653_v41, 5  ;;  %v1759_v54 = vrot.slane %v1654_v18, 5  ;;  %1678 = vst [vmem:[#allocation2 + $0x280] sm:$0xf] %v1654_v18 }
  0xdb   : > { %2121 = vst [vmem:[#allocation2 + $0x268] sm:$0xf] %v1653_v41  ;;  %2122 = vst [vmem:[#allocation2 + $0x27c] sm:$0xf] %v1654_v18  ;;  %v1884_v43 = vrot.slane %v1653_v41, 6  ;;  %v1887_v49 = vrot.slane %v1654_v18, 6  ;;  %v1480_v52 = vor.u32 %v1479_v20, %v11430_v55 }
  0xdc   : > { %v2012_v42 = vrot.slane %v1653_v41, 7  ;;  %v2015_v33 = vrot.slane %v1654_v18, 7  ;;  %v1485_v14 = vrot.slane %v1483_v25, 5  ;;  %v2225_v39 = vld [vmem:[#allocation2 + $0x230] sm:$0xff]  ;;  %v1757_v50 = vsel %vm10663_vm15, %v1755_v38, %v1756_v47 }
  0xdd   : > { %v1758_v48 = vrot.slane %v1756_v47, 4  ;;  %v1885_v57 = vsel %vm10671_vm0, %v1883_v15, %v1884_v43  ;;  %v1886_v44 = vrot.slane %v1884_v43, 4  ;;  %1839 = vst [vmem:[#allocation2 + $0x25c] sm:$0xf] %v1757_v50  ;;  %v1489_v10 = vrot.slane %v1487_v46, 4  ;;  %v2228_v0 = vld [vmem:[#allocation2 + $0x244] sm:$0xff] }
  0xde   : > { %1967 = vst [vmem:[#allocation2 + $0x260] sm:$0xf] %v1885_v57  ;;  %v2013_v56 = vsel %vm10680_vm1, %v2011_v53, %v2012_v42  ;;  %v2014_v23 = vrot.slane %v2012_v42, 4  ;;  %v9880_v37 = vld [vmem:[#allocation2 + $0x234] ss:$20 sps:$4 sm:$0xff]   ;;  %v11499_v5 = vrot.slane %v1493_v31, 5  ;;  %v8833_v19 = vcombine.low %v2225_v39, %v2228_v0 }
  0xdf   : > { %v1760_v34 = vsel %vm10663_vm15, %v1758_v48, %v1759_v54  ;;  %v1888_v7 = vsel %vm10671_vm0, %v1886_v44, %v1887_v49  ;;  %2095 = vst [vmem:[#allocation2 + $0x264] sm:$0xf] %v2013_v56  ;;  %v1761_v2 = vrot.slane %v1759_v54, 4  ;;  %v9882_v63 = vld [vmem:[#allocation2 + $0x23c] ss:$20 sps:$4 sm:$0xff]   ;;  %v1481_v27 = vrot.slane %v1480_v52, 4  ;;  %3373 = vmatprep.mubr.bf16.mxu0 %v9880_v37 }
  0xe0   : > { %v9884_v3 = vld [vmem:[#allocation2 + $0x238] ss:$20 sps:$4 sm:$0xff]   ;;  %1840 = vst [vmem:[#allocation2 + $0x270] sm:$0xf] %v1760_v34  ;;  %1968 = vst [vmem:[#allocation2 + $0x274] sm:$0xf] %v1888_v7  ;;  %v2016_v55 = vsel %vm10680_vm1, %v2014_v23, %v2015_v33  ;;  %v1490_v22 = vor.u32 %v1489_v10, %v1485_v14  ;;  %3598 = vmatprep.mubr.bf16.mxu1 %v9882_v63  ;;  %3374 = vmatmul.mubr.bf16.gmra.mxu0 %v8833_v19 }
  0xe1   : > { %2096 = vst [vmem:[#allocation2 + $0x278] sm:$0xf] %v2016_v55  ;;  %v1889_v28 = vrot.slane %v1887_v49, 4  ;;  %v2017_v30 = vrot.slane %v2015_v33, 4  ;;  %v1347_v38 = vsel %vm10567_vm4, %v11487_v36, 0  ;;  %v1486_v15 = vsel %vm10625_vm14, %v1481_v27, %v1485_v14  ;;  %3599 = vmatmul.mubr.bf16.gmra.mxu1 %v9884_v3 }
  0xe2   : > { %v1491_v4 = vrot.slane %v1490_v22, 4  ;;  %v11517_v45 = vsel %vm10579_vm5, %v11490_v58, 0  ;;  %v11520_v53 = vld [vmem:[%s10541_s16 + $0x9c] sm:$0xf]  ;;  %v1655_v41 = vadd.bf16 %v1486_v15, %v1344_v11  ;;  %v1497_v18 = vshrl.u32 %v11478_v60, 16 }
  0xe3   : > { %v1503_v51 = vshll.u32 %v1371_v8, 16  ;;  %v1507_v62 = vshrl.u32 %v1371_v8, 16  ;;  %v1513_v46 = vshll.u32 %v11517_v45, 16  ;;  %v1348_v31 = vsel %vm10567_vm4, %v11490_v58, 0 }
  0xe4   : > { %v1496_v25 = vsel %vm10625_vm14, %v1491_v4, %v11499_v5  ;;  %v1349_v47 = vsel %vm10567_vm4, %v11520_v53, 0  ;;  %v2231_v9 = vld [vmem:[#allocation2 + $0x258] sm:$0xff]  ;;  %1679 = vst [vmem:[#allocation2 + $0x294] sm:$0xf] %v1655_v41  ;;  %v1762_v60 = vrot.slane %v1655_v41, 5  ;;  %v1890_v54 = vrot.slane %v1655_v41, 6 }
  0xe5   : > { %v1656_v11 = vadd.bf16 %v1496_v25, %v1345_v17  ;;  %2123 = vst [vmem:[#allocation2 + $0x290] sm:$0xf] %v1655_v41  ;;  %v2018_v43 = vrot.slane %v1655_v41, 7  ;;  %v1499_v49 = vrot.slane %v1497_v18, 4  ;;  %v1505_v42 = vrot.slane %v1503_v51, 5 }
  0xe6   : > { %v1509_v33 = vrot.slane %v1507_v62, 4  ;;  %v11541_v20 = vrot.slane %v1513_v46, 5  ;;  %v1763_v50 = vsel %vm10663_vm15, %v1761_v2, %v1762_v60  ;;  %v1764_v48 = vrot.slane %v1762_v60, 4  ;;  %v11553_v2 = vld [vmem:[%s10541_s16 + $0xa0] sm:$0xf] }
  0xe7   : > { %v2234_v14 = vld [vmem:[#allocation2 + $0x26c] sm:$0xff]  ;;  %v1765_v57 = vrot.slane %v1656_v11, 5  ;;  %1680 = vst [vmem:[#allocation2 + $0x2a8] sm:$0xf] %v1656_v11  ;;  %2124 = vst [vmem:[#allocation2 + $0x2a4] sm:$0xf] %v1656_v11  ;;  %v1891_v6 = vsel %vm10671_vm0, %v1889_v28, %v1890_v54  ;;  %v2019_v52 = vsel %vm10680_vm1, %v2017_v30, %v2018_v43  ;;  %v1500_v10 = vor.u32 %v1499_v49, %v11499_v5 }
  0xe8   : > { %v9885_v39 = vld [vmem:[#allocation2 + $0x25c] ss:$20 sps:$4 sm:$0xff]   ;;  %v9887_v17 = vld [vmem:[#allocation2 + $0x264] ss:$20 sps:$4 sm:$0xff]   ;;  %v8838_v44 = vcombine.low %v2231_v9, %v2234_v14  ;;  %v9889_v56 = vld [vmem:[#allocation2 + $0x260] ss:$20 sps:$4 sm:$0xff]   ;;  %v1510_v19 = vor.u32 %v1509_v33, %v1505_v42 }
  0xe9   : > { %1841 = vst [vmem:[#allocation2 + $0x284] sm:$0xf] %v1763_v50  ;;  %v1892_v23 = vrot.slane %v1890_v54, 4  ;;  %1969 = vst [vmem:[#allocation2 + $0x288] sm:$0xf] %v1891_v6  ;;  %3381 = vmatprep.mubr.bf16.mxu0 %v9885_v39  ;;  %v1766_v0 = vsel %vm10663_vm15, %v1764_v48, %v1765_v57  ;;  %v1893_v37 = vrot.slane %v1656_v11, 6  ;;  %3606 = vmatprep.mubr.bf16.mxu1 %v9887_v17 }
  0xea   : > { %v2020_v34 = vrot.slane %v2018_v43, 4  ;;  %v2021_v7 = vrot.slane %v1656_v11, 7  ;;  %2097 = vst [vmem:[#allocation2 + $0x28c] sm:$0xf] %v2019_v52  ;;  %3382 = vmatmul.mubr.bf16.gmra.mxu0 %v8838_v44  ;;  %1842 = vst [vmem:[#allocation2 + $0x298] sm:$0xf] %v1766_v0  ;;  %3607 = vmatmul.mubr.bf16.gmra.mxu1 %v9889_v56 }
  0xeb   : > { %v1501_v63 = vrot.slane %v1500_v10, 4  ;;  %v1767_v3 = vrot.slane %v1765_v57, 4  ;;  %v1373_v5 = vsel %vm10579_vm5, %v11520_v53, 0  ;;  %v1894_v55 = vsel %vm10671_vm0, %v1892_v23, %v1893_v37  ;;  %v11563_v30 = vld [vmem:[%s10541_s16 + $0xa4] sm:$0xf] }
  0xec   : > { %v2022_v27 = vsel %vm10680_vm1, %v2020_v34, %v2021_v7  ;;  %v1895_v22 = vrot.slane %v1893_v37, 4  ;;  %v2023_v28 = vrot.slane %v2021_v7, 4  ;;  %1970 = vst [vmem:[#allocation2 + $0x29c] sm:$0xf] %v1894_v55  ;;  %v1511_v4 = vrot.slane %v1510_v19, 4 }
  0xed   : > { %2098 = vst [vmem:[#allocation2 + $0x2a0] sm:$0xf] %v2022_v27  ;;  %v1506_v15 = vsel %vm10625_vm14, %v1501_v63, %v1505_v42  ;;  %v11570_v8 = vsel %vm10579_vm5, %v11553_v2, 0  ;;  %v1517_v41 = vshrl.u32 %v11517_v45, 16  ;;  %v1523_v51 = vshll.u32 %v1373_v5, 16 }
  0xee   : > { %v1657_v18 = vadd.bf16 %v1506_v15, %v1346_v32  ;;  %v1527_v62 = vshrl.u32 %v1373_v5, 16  ;;  %v1533_v25 = vshll.u32 %v11570_v8, 16  ;;  %v1516_v46 = vsel %vm10625_vm14, %v1511_v4, %v11541_v20  ;;  %v1332_v39 = vld [vmem:[#allocation2 + $0x1dc] sm:$0xf]  ;;  %v11601_v23 = vld [vmem:[%s10541_s16 + $0xa8] sm:$0xf] }
  0xef   : > { %v1519_v9 = vrot.slane %v1517_v41, 4  ;;  %v1350_v11 = vsel %vm10567_vm4, %v11553_v2, 0  ;;  %v1351_v45 = vsel %vm10567_vm4, %v11563_v30, 0  ;;  %v1658_v40 = vadd.bf16 %v1516_v46, %v1347_v38 }
  0xf0   : > { %v2237_v60 = vld [vmem:[#allocation2 + $0x280] sm:$0xff]  ;;  %1681 = vst [vmem:[#allocation2 + $0x2bc] sm:$0xf] %v1657_v18  ;;  %v1768_v32 = vrot.slane %v1657_v18, 5  ;;  %2125 = vst [vmem:[#allocation2 + $0x2b8] sm:$0xf] %v1657_v18  ;;  %v1333_v7 = vsel %vm11243_vm3, %v11260_v12, %v1332_v39 }
  0xf1   : > { %v1896_v54 = vrot.slane %v1657_v18, 6  ;;  %v2024_v43 = vrot.slane %v1657_v18, 7  ;;  %v1520_v49 = vor.u32 %v1519_v9, %v11541_v20  ;;  %v1525_v42 = vrot.slane %v1523_v51, 5  ;;  %v2240_v50 = vld [vmem:[#allocation2 + $0x294] sm:$0xff]  ;;  %1682 = vst [vmem:[#allocation2 + $0x2d0] sm:$0xf] %v1658_v40 }
  0xf2   : > { %v1529_v33 = vrot.slane %v1527_v62, 4  ;;  %v11592_v14 = vrot.slane %v1533_v25, 5  ;;  %v9891_v48 = vld [vmem:[#allocation2 + $0x284] ss:$20 sps:$4 sm:$0xff]   ;;  %v1769_v57 = vsel %vm10663_vm15, %v1767_v3, %v1768_v32  ;;  %v1770_v36 = vrot.slane %v1768_v32, 4 }
  0xf3   : > { %v1771_v38 = vrot.slane %v1658_v40, 5  ;;  %2126 = vst [vmem:[#allocation2 + $0x2cc] sm:$0xf] %v1658_v40  ;;  %v1897_v6 = vsel %vm10671_vm0, %v1895_v22, %v1896_v54  ;;  %v8843_v17 = vcombine.low %v2237_v60, %v2240_v50  ;;  %1843 = vst [vmem:[#allocation2 + $0x2ac] sm:$0xf] %v1769_v57  ;;  %v1898_v20 = vrot.slane %v1896_v54, 4  ;;  %3389 = vmatprep.mubr.bf16.mxu0 %v9891_v48 }
  0xf4   : > { %v1899_v44 = vrot.slane %v1658_v40, 6  ;;  %1971 = vst [vmem:[#allocation2 + $0x2b0] sm:$0xf] %v1897_v6  ;;  %v2025_v56 = vsel %vm10680_vm1, %v2023_v28, %v2024_v43  ;;  %v9893_v52 = vld [vmem:[#allocation2 + $0x28c] ss:$20 sps:$4 sm:$0xff]   ;;  %v2026_v37 = vrot.slane %v2024_v43, 4  ;;  %v1530_v34 = vor.u32 %v1529_v33, %v1525_v42 }
  0xf5   : > { %v9895_v10 = vld [vmem:[#allocation2 + $0x288] ss:$20 sps:$4 sm:$0xff]   ;;  %v1772_v0 = vsel %vm10663_vm15, %v1770_v36, %v1771_v38  ;;  %2099 = vst [vmem:[#allocation2 + $0x2b4] sm:$0xf] %v2025_v56  ;;  %3390 = vmatmul.mubr.bf16.gmra.mxu0 %v8843_v17  ;;  %v2027_v19 = vrot.slane %v1658_v40, 7  ;;  %v1521_v3 = vrot.slane %v1520_v49, 4  ;;  %3614 = vmatprep.mubr.bf16.mxu1 %v9893_v52 }
  0xf6   : > { %1844 = vst [vmem:[#allocation2 + $0x2c0] sm:$0xf] %v1772_v0  ;;  %v1900_v63 = vsel %vm10671_vm0, %v1898_v20, %v1899_v44  ;;  %v1773_v5 = vrot.slane %v1771_v38, 4  ;;  %1334 = vst [vmem:[#allocation2 + $0x1dc] sm:$0xf] %v1333_v7  ;;  %v1531_v55 = vrot.slane %v1530_v34, 4  ;;  %3615 = vmatmul.mubr.bf16.gmra.mxu1 %v9895_v10 }
  0xf7   : > { %1972 = vst [vmem:[#allocation2 + $0x2c4] sm:$0xf] %v1900_v63  ;;  %v1901_v27 = vrot.slane %v1899_v44, 4  ;;  %v1375_v22 = vsel %vm10579_vm5, %v11563_v30, 0  ;;  %v11616_v12 = vsel %vm10579_vm5, %v11601_v23, 0  ;;  %v2028_v28 = vsel %vm10680_vm1, %v2026_v37, %v2027_v19 }
  0xf8   : > { %v1526_v15 = vsel %vm10625_vm14, %v1521_v3, %v1525_v42  ;;  %v2029_v4 = vrot.slane %v2027_v19, 4  ;;  %v1537_v41 = vshrl.u32 %v11570_v8, 16  ;;  %2100 = vst [vmem:[#allocation2 + $0x2c8] sm:$0xf] %v2028_v28  ;;  %v1536_v18 = vsel %vm10625_vm14, %v1531_v55, %v11592_v14  ;;  %v11653_v10 = vld [vmem:[%s10541_s16 + $0xb0] sm:$0xf] }
  0xf9   : > { %v1659_v51 = vadd.bf16 %v1526_v15, %v1348_v31  ;;  %v1543_v62 = vshll.u32 %v1375_v22, 16  ;;  %v1547_v25 = vshrl.u32 %v1375_v22, 16  ;;  %v1660_v46 = vadd.bf16 %v1536_v18, %v1349_v47 }
  0xfa   : > { %v1539_v9 = vrot.slane %v1537_v41, 4  ;;  %v1553_v8 = vshll.u32 %v11616_v12, 16  ;;  %v1352_v60 = vsel %vm10567_vm4, %v11601_v23, 0  ;;  %v2243_v40 = vld [vmem:[#allocation2 + $0x2a8] sm:$0xff]  ;;  %v11672_v28 = vsel %vm10579_vm5, %v11653_v10, 0 }
  0xfb   : > { %1683 = vst [vmem:[#allocation2 + $0x2e4] sm:$0xf] %v1659_v51  ;;  %v1774_v32 = vrot.slane %v1659_v51, 5  ;;  %2127 = vst [vmem:[#allocation2 + $0x2e0] sm:$0xf] %v1659_v51  ;;  %v1902_v58 = vrot.slane %v1659_v51, 6 }
  0xfc   : > { %v2030_v31 = vrot.slane %v1659_v51, 7  ;;  %v1545_v54 = vrot.slane %v1543_v62, 5  ;;  %v1777_v43 = vrot.slane %v1660_v46, 5  ;;  %1684 = vst [vmem:[#allocation2 + $0x2f8] sm:$0xf] %v1660_v46  ;;  %v1905_v53 = vrot.slane %v1660_v46, 6 }
  0xfd   : > { %2128 = vst [vmem:[#allocation2 + $0x2f4] sm:$0xf] %v1660_v46  ;;  %v2033_v47 = vrot.slane %v1660_v46, 7  ;;  %v1540_v49 = vor.u32 %v1539_v9, %v11592_v14  ;;  %v2246_v42 = vld [vmem:[#allocation2 + $0x2bc] sm:$0xff]  ;;  %v1775_v39 = vsel %vm10663_vm15, %v1773_v5, %v1774_v32  ;;  %v1776_v50 = vrot.slane %v1774_v32, 4 }
  0xfe   : > { %v9896_v33 = vld [vmem:[#allocation2 + $0x2ac] ss:$20 sps:$4 sm:$0xff]   ;;  %v1903_v48 = vsel %vm10671_vm0, %v1901_v27, %v1902_v58  ;;  %v1904_v57 = vrot.slane %v1902_v58, 4  ;;  %v8848_v36 = vcombine.low %v2243_v40, %v2246_v42  ;;  %1845 = vst [vmem:[#allocation2 + $0x2d4] sm:$0xf] %v1775_v39  ;;  %v2031_v38 = vsel %vm10680_vm1, %v2029_v4, %v2030_v31 }
  0xff   : > { %1973 = vst [vmem:[#allocation2 + $0x2d8] sm:$0xf] %v1903_v48  ;;  %v2032_v6 = vrot.slane %v2030_v31, 4  ;;  %v1541_v17 = vrot.slane %v1540_v49, 4  ;;  %v11646_v14 = vld [vmem:[%s10541_s16 + $0xac] sm:$0xf]  ;;  %3397 = vmatprep.mubr.bf16.mxu0 %v9896_v33  ;;  %v1778_v20 = vsel %vm10663_vm15, %v1776_v50, %v1777_v43 }
 0x100   : > { %v1906_v44 = vsel %vm10671_vm0, %v1904_v57, %v1905_v53  ;;  %2101 = vst [vmem:[#allocation2 + $0x2dc] sm:$0xf] %v2031_v38  ;;  %v1549_v56 = vrot.slane %v1547_v25, 4  ;;  %v1555_v52 = vrot.slane %v1553_v8, 5  ;;  %v9898_v0 = vld [vmem:[#allocation2 + $0x2b4] ss:$20 sps:$4 sm:$0xff]   ;;  %3398 = vmatmul.mubr.bf16.gmra.mxu0 %v8848_v36 }
 0x101   : > { %v9900_v37 = vld [vmem:[#allocation2 + $0x2b0] ss:$20 sps:$4 sm:$0xff]   ;;  %1846 = vst [vmem:[#allocation2 + $0x2e8] sm:$0xf] %v1778_v20  ;;  %1974 = vst [vmem:[#allocation2 + $0x2ec] sm:$0xf] %v1906_v44  ;;  %v2034_v34 = vsel %vm10680_vm1, %v2032_v6, %v2033_v47  ;;  %v1546_v7 = vsel %vm10625_vm14, %v1541_v17, %v1545_v54  ;;  %3622 = vmatprep.mubr.bf16.mxu1 %v9898_v0 }
 0x102   : > { %v1779_v63 = vrot.slane %v1777_v43, 4  ;;  %2102 = vst [vmem:[#allocation2 + $0x2f0] sm:$0xf] %v2034_v34  ;;  %v1550_v19 = vor.u32 %v1549_v56, %v1545_v54  ;;  %v1661_v3 = vadd.bf16 %v1546_v7, %v1350_v11  ;;  %v1907_v5 = vrot.slane %v1905_v53, 4  ;;  %3623 = vmatmul.mubr.bf16.gmra.mxu1 %v9900_v37  ;;  %v11691_v39 = vld [vmem:[%s10541_s16 + $0xb4] sm:$0xf] }
 0x103   : > { %v2035_v55 = vrot.slane %v2033_v47, 4  ;;  %v1353_v27 = vsel %vm10567_vm4, %v11646_v14, 0  ;;  %v1377_v22 = vsel %vm10579_vm5, %v11646_v14, 0  ;;  %v1557_v15 = vshrl.u32 %v11616_v12, 16  ;;  %v11694_v57 = vld [vmem:[%s10541_s16 + $0xb8] sm:$0xf] }
 0x104   : > { %v1551_v2 = vrot.slane %v1550_v19, 4  ;;  %1685 = vst [vmem:[#allocation2 + $0x30c] sm:$0xf] %v1661_v3  ;;  %v1780_v11 = vrot.slane %v1661_v3, 5  ;;  %2129 = vst [vmem:[#allocation2 + $0x308] sm:$0xf] %v1661_v3 }
 0x105   : > { %v1908_v4 = vrot.slane %v1661_v3, 6  ;;  %v2036_v41 = vrot.slane %v1661_v3, 7  ;;  %v1559_v18 = vrot.slane %v1557_v15, 4  ;;  %v1563_v51 = vshll.u32 %v1377_v22, 16  ;;  %v2249_v46 = vld [vmem:[#allocation2 + $0x2d0] sm:$0xff] }
 0x106   : > { %v1567_v62 = vshrl.u32 %v1377_v22, 16  ;;  %v1573_v25 = vshll.u32 %v11672_v28, 16  ;;  %v1556_v9 = vsel %vm10625_vm14, %v1551_v2, %v1555_v52  ;;  %v1781_v8 = vsel %vm10663_vm15, %v1779_v63, %v1780_v11 }
 0x107   : > { %v1782_v12 = vrot.slane %v1780_v11, 4  ;;  %v1909_v40 = vsel %vm10671_vm0, %v1907_v5, %v1908_v4  ;;  %v1662_v32 = vadd.bf16 %v1556_v9, %v1351_v45  ;;  %1847 = vst [vmem:[#allocation2 + $0x2fc] sm:$0xf] %v1781_v8  ;;  %v1910_v58 = vrot.slane %v1908_v4, 4 }
 0x108   : > { %1975 = vst [vmem:[#allocation2 + $0x300] sm:$0xf] %v1909_v40  ;;  %v2037_v31 = vsel %vm10680_vm1, %v2035_v55, %v2036_v41  ;;  %v2038_v54 = vrot.slane %v2036_v41, 4  ;;  %v2252_v43 = vld [vmem:[#allocation2 + $0x2e4] sm:$0xff]  ;;  %v1560_v47 = vor.u32 %v1559_v18, %v1555_v52  ;;  %v1565_v49 = vrot.slane %v1563_v51, 5 }
 0x109   : > { %v9901_v53 = vld [vmem:[#allocation2 + $0x2d4] ss:$20 sps:$4 sm:$0xff]   ;;  %2103 = vst [vmem:[#allocation2 + $0x304] sm:$0xf] %v2037_v31  ;;  %v1569_v42 = vrot.slane %v1567_v62, 4  ;;  %v11688_v33 = vrot.slane %v1573_v25, 5  ;;  %v8853_v45 = vcombine.low %v2249_v46, %v2252_v43 }
 0x10a   : > { %v9903_v30 = vld [vmem:[#allocation2 + $0x2dc] ss:$20 sps:$4 sm:$0xff]   ;;  %v9905_v50 = vld [vmem:[#allocation2 + $0x2d8] ss:$20 sps:$4 sm:$0xff]   ;;  %v1783_v48 = vrot.slane %v1662_v32, 5  ;;  %3405 = vmatprep.mubr.bf16.mxu0 %v9901_v53  ;;  %v1911_v36 = vrot.slane %v1662_v32, 6 }
 0x10b   : > { %1686 = vst [vmem:[#allocation2 + $0x320] sm:$0xf] %v1662_v32  ;;  %2130 = vst [vmem:[#allocation2 + $0x31c] sm:$0xf] %v1662_v32  ;;  %v2039_v38 = vrot.slane %v1662_v32, 7  ;;  %v1561_v6 = vrot.slane %v1560_v47, 4  ;;  %v1570_v17 = vor.u32 %v1569_v42, %v1565_v49  ;;  %3630 = vmatprep.mubr.bf16.mxu1 %v9903_v30  ;;  %3406 = vmatmul.mubr.bf16.gmra.mxu0 %v8853_v45 }
 0x10c   : > { %v1784_v20 = vsel %vm10663_vm15, %v1782_v12, %v1783_v48  ;;  %v1785_v44 = vrot.slane %v1783_v48, 4  ;;  %v1354_v56 = vsel %vm10567_vm4, %v11653_v10, 0  ;;  %v1355_v52 = vsel %vm10567_vm4, %v11691_v39, 0  ;;  %3631 = vmatmul.mubr.bf16.gmra.mxu1 %v9905_v50  ;;  %v11738_v32 = vld [vmem:[%s10541_s16 + $0xbc] sm:$0xf] }
 0x10d   : > { %1848 = vst [vmem:[#allocation2 + $0x310] sm:$0xf] %v1784_v20  ;;  %v1912_v0 = vsel %vm10671_vm0, %v1910_v58, %v1911_v36  ;;  %v2040_v37 = vsel %vm10680_vm1, %v2038_v54, %v2039_v38  ;;  %v1566_v34 = vsel %vm10625_vm14, %v1561_v6, %v1565_v49  ;;  %v1571_v7 = vrot.slane %v1570_v17, 4  ;;  %v8755_v58 = vld [vmem:[%s10541_s16 + $0xc0] sm:$0xf] }
 0x10e   : > { %1976 = vst [vmem:[#allocation2 + $0x314] sm:$0xf] %v1912_v0  ;;  %2104 = vst [vmem:[#allocation2 + $0x318] sm:$0xf] %v2040_v37  ;;  %v1663_v63 = vadd.bf16 %v1566_v34, %v1352_v60  ;;  %v1913_v19 = vrot.slane %v1911_v36, 4  ;;  %v2041_v3 = vrot.slane %v2039_v38, 4 }
 0x10f   : > { %v1379_v5 = vsel %vm10579_vm5, %v11691_v39, 0  ;;  %v1576_v55 = vsel %vm10625_vm14, %v1571_v7, %v11688_v33  ;;  %v11723_v22 = vsel %vm10579_vm5, %v11694_v57, 0  ;;  %v1577_v15 = vshrl.u32 %v11672_v28, 16  ;;  %v2255_v25 = vld [vmem:[#allocation2 + $0x2f8] sm:$0xff] }
 0x110   : > { %v1583_v2 = vshll.u32 %v1379_v5, 16  ;;  %v1664_v23 = vadd.bf16 %v1576_v55, %v1353_v27  ;;  %1687 = vst [vmem:[#allocation2 + $0x334] sm:$0xf] %v1663_v63  ;;  %v1786_v60 = vrot.slane %v1663_v63, 5  ;;  %2131 = vst [vmem:[#allocation2 + $0x330] sm:$0xf] %v1663_v63 }
 0x111   : > { %v1914_v11 = vrot.slane %v1663_v63, 6  ;;  %v2042_v4 = vrot.slane %v1663_v63, 7  ;;  %v1579_v41 = vrot.slane %v1577_v15, 4  ;;  %v1587_v51 = vshrl.u32 %v1379_v5, 16 }
 0x112   : > { %v1585_v18 = vrot.slane %v1583_v2, 5  ;;  %v1593_v62 = vshll.u32 %v11723_v22, 16  ;;  %v1787_v28 = vsel %vm10663_vm15, %v1785_v44, %v1786_v60  ;;  %v1788_v46 = vrot.slane %v1786_v60, 4  ;;  %1688 = vst [vmem:[#allocation2 + $0x348] sm:$0xf] %v1664_v23  ;;  %v3488_v2 = vpop.f32.mrf.mxu1 }
 0x113   : > { %v1789_v9 = vrot.slane %v1664_v23, 5  ;;  %2132 = vst [vmem:[#allocation2 + $0x344] sm:$0xf] %v1664_v23  ;;  %v1915_v14 = vsel %vm10671_vm0, %v1913_v19, %v1914_v11  ;;  %1849 = vst [vmem:[#allocation2 + $0x324] sm:$0xf] %v1787_v28  ;;  %v1916_v27 = vrot.slane %v1914_v11, 4  ;;  %v2043_v12 = vsel %vm10680_vm1, %v2041_v3, %v2042_v4  ;;  %v3263_v19 = vpop.f32.mrf.mxu0 }
 0x114   : > { %v1917_v8 = vrot.slane %v1664_v23, 6  ;;  %1977 = vst [vmem:[#allocation2 + $0x328] sm:$0xf] %v1915_v14  ;;  %v2044_v40 = vrot.slane %v2042_v4, 4  ;;  %v2258_v31 = vld [vmem:[#allocation2 + $0x30c] sm:$0xff]  ;;  %v2045_v53 = vrot.slane %v1664_v23, 7  ;;  %v1580_v47 = vor.u32 %v1579_v41, %v11688_v33 }
 0x115   : > { %v9907_v54 = vld [vmem:[#allocation2 + $0x2fc] ss:$20 sps:$4 sm:$0xff]   ;;  %v1790_v43 = vsel %vm10663_vm15, %v1788_v46, %v1789_v9  ;;  %2105 = vst [vmem:[#allocation2 + $0x32c] sm:$0xf] %v2043_v12  ;;  %v1589_v49 = vrot.slane %v1587_v51, 4  ;;  %v8858_v30 = vcombine.low %v2255_v25, %v2258_v31  ;;  %v11746_v48 = vrot.slane %v1593_v62, 5  ;;  %v3265_v10 = vpop.f32.mrf.mxu0  ;;  %v3490_v62 = vpop.f32.mrf.mxu1 }
 0x116   : > { %v9909_v42 = vld [vmem:[#allocation2 + $0x304] ss:$20 sps:$4 sm:$0xff]   ;;  %v9911_v45 = vld [vmem:[#allocation2 + $0x300] ss:$20 sps:$4 sm:$0xff]   ;;  %1850 = vst [vmem:[#allocation2 + $0x338] sm:$0xf] %v1790_v43  ;;  %v1918_v50 = vsel %vm10671_vm0, %v1916_v27, %v1917_v8  ;;  %3413 = vmatprep.mubr.bf16.mxu0 %v9907_v54  ;;  %v2046_v36 = vsel %vm10680_vm1, %v2044_v40, %v2045_v53  ;;  %v11783_v27 = vadd.f32 %v3488_v2, %v3263_v19 }
 0x117   : > { %1978 = vst [vmem:[#allocation2 + $0x33c] sm:$0xf] %v1918_v50  ;;  %v1581_v38 = vrot.slane %v1580_v47, 4  ;;  %v1590_v6 = vor.u32 %v1589_v49, %v1585_v18  ;;  %v1791_v17 = vrot.slane %v1789_v9, 4  ;;  %3638 = vmatprep.mubr.bf16.mxu1 %v9909_v42  ;;  %3414 = vmatmul.mubr.bf16.gmra.mxu0 %v8858_v30  ;;  %2106 = vst [vmem:[#allocation2 + $0x340] sm:$0xf] %v2046_v36 }
 0x118   : > { %v1919_v33 = vrot.slane %v1917_v8, 4  ;;  %v2047_v20 = vrot.slane %v2045_v53, 4  ;;  %v1356_v44 = vsel %vm10567_vm4, %v11694_v57, 0  ;;  %v1357_v0 = vsel %vm10567_vm4, %v11738_v32, 0  ;;  %3639 = vmatmul.mubr.bf16.gmra.mxu1 %v9911_v45  ;;  %v3266_v8 = vpop.f32.mrf.mxu0  ;;  %v9957_v31 = vld [vmem:[%s14265_s4 + $0x78] sm:$0xff]  }
 0x119   : > { %v1586_v37 = vsel %vm10625_vm14, %v1581_v38, %v1585_v18  ;;  %v1591_v34 = vrot.slane %v1590_v6, 4  ;;  %v1381_v7 = vsel %vm10579_vm5, %v11738_v32, 0  ;;  %v11763_v63 = vsel %vm10579_vm5, %v8755_v58, 0  ;;  %v9958_v54 = vld [vmem:[%s14265_s4 + $0x38] sm:$0xff]   ;;  %v8756_v45 = vld [vmem:[%s10541_s16 + $0xc4] sm:$0xf]  ;;  %9324 = vmatprep.subr.bf16.mxu1 %v9957_v31 }
 0x11a   : > { %v1665_v3 = vadd.bf16 %v1586_v37, %v1354_v56  ;;  %v1597_v5 = vshrl.u32 %v11723_v22, 16  ;;  %v1603_v55 = vshll.u32 %v1381_v7, 16  ;;  %v1607_v15 = vshrl.u32 %v1381_v7, 16  ;;  %v2261_v23 = vld [vmem:[#allocation2 + $0x320] sm:$0xff]  ;;  %v3268_v50 = vpop.f32.mrf.mxu0  ;;  %9325 = vmatpush3.bf16.msra.mxu1 %v9958_v54 }
 0x11b   : > { %v1596_v60 = vsel %vm10625_vm14, %v1591_v34, %v11746_v48  ;;  %v1613_v11 = vshll.u32 %v11763_v63, 16  ;;  %v11776_v4 = vsel %vm10567_vm4, %v8755_v58, 0  ;;  %v1617_v41 = vshrl.u32 %v11763_v63, 16  ;;  %v3491_v58 = vpop.f32.mrf.mxu1 }
 0x11c   : > { %v1666_v56 = vadd.bf16 %v1596_v60, %v1355_v52  ;;  %1689 = vst [vmem:[#allocation2 + $0x35c] sm:$0xf] %v1665_v3  ;;  %v1792_v22 = vrot.slane %v1665_v3, 5  ;;  %2133 = vst [vmem:[#allocation2 + $0x358] sm:$0xf] %v1665_v3  ;;  %v1920_v18 = vrot.slane %v1665_v3, 6 }
 0x11d   : > { %v2048_v51 = vrot.slane %v1665_v3, 7  ;;  %v2264_v25 = vld [vmem:[#allocation2 + $0x334] sm:$0xff]  ;;  %v1599_v46 = vrot.slane %v1597_v5, 4  ;;  %v1605_v9 = vrot.slane %v1603_v55, 5  ;;  %v1609_v14 = vrot.slane %v1607_v15, 4  ;;  %v3493_v37 = vpop.f32.mrf.mxu1 }
 0x11e   : > { %v9912_v28 = vld [vmem:[#allocation2 + $0x324] ss:$20 sps:$4 sm:$0xff]   ;;  %v8863_v12 = vcombine.low %v2261_v23, %v2264_v25  ;;  %v1793_v40 = vsel %vm10663_vm15, %v1791_v17, %v1792_v22  ;;  %v1794_v39 = vrot.slane %v1792_v22, 4  ;;  %v1795_v52 = vrot.slane %v1666_v56, 5  ;;  %1690 = vst [vmem:[#allocation2 + $0x370] sm:$0xf] %v1666_v56 }
 0x11f   : > { %2134 = vst [vmem:[#allocation2 + $0x36c] sm:$0xf] %v1666_v56  ;;  %3421 = vmatprep.mubr.bf16.mxu0 %v9912_v28  ;;  %v9914_v43 = vld [vmem:[#allocation2 + $0x32c] ss:$20 sps:$4 sm:$0xff]   ;;  %v9916_v53 = vld [vmem:[#allocation2 + $0x328] ss:$20 sps:$4 sm:$0xff]   ;;  %v1921_v47 = vsel %vm10671_vm0, %v1919_v33, %v1920_v18  ;;  %v2049_v42 = vsel %vm10680_vm1, %v2047_v20, %v2048_v51  ;;  %v1600_v30 = vor.u32 %v1599_v46, %v11746_v48  ;;  %v3271_v48 = vpop.f32.mrf.mxu0  ;;  %v3496_v55 = vpop.f32.mrf.mxu1 }
 0x120   : > { %1851 = vst [vmem:[#allocation2 + $0x34c] sm:$0xf] %v1793_v40  ;;  %v1922_v49 = vrot.slane %v1920_v18, 4  ;;  %3422 = vmatmul.mubr.bf16.gmra.mxu0 %v8863_v12  ;;  %v1796_v36 = vsel %vm10663_vm15, %v1794_v39, %v1795_v52  ;;  %v1923_v38 = vrot.slane %v1666_v56, 6  ;;  %1979 = vst [vmem:[#allocation2 + $0x350] sm:$0xf] %v1921_v47  ;;  %3646 = vmatprep.mubr.bf16.mxu1 %v9914_v43 }
 0x121   : > { %v2050_v6 = vrot.slane %v2048_v51, 4  ;;  %v2051_v17 = vrot.slane %v1666_v56, 7  ;;  %2107 = vst [vmem:[#allocation2 + $0x354] sm:$0xf] %v2049_v42  ;;  %1852 = vst [vmem:[#allocation2 + $0x360] sm:$0xf] %v1796_v36  ;;  %v1610_v34 = vor.u32 %v1609_v14, %v1605_v9  ;;  %3647 = vmatmul.mubr.bf16.gmra.mxu1 %v9916_v53  ;;  %v11817_v22 = vadd.f32 %v3491_v58, %v3266_v8  ;;  %v3498_v51 = vpop.f32.mrf.mxu1 }
 0x122   : > { %v1601_v33 = vrot.slane %v1600_v30, 4  ;;  %v1615_v20 = vrot.slane %v1613_v11, 5  ;;  %v1797_v7 = vrot.slane %v1795_v52, 4  ;;  %v1924_v63 = vsel %vm10671_vm0, %v1922_v49, %v1923_v38  ;;  %v3273_v11 = vpop.f32.mrf.mxu0  ;;  %v1693_v40 = vld [vmem:[#allocation2 + $0x3ac] sm:$0xf] }
 0x123   : > { %v2052_v19 = vsel %vm10680_vm1, %v2050_v6, %v2051_v17  ;;  %v1925_v3 = vrot.slane %v1923_v38, 4  ;;  %v2053_v5 = vrot.slane %v2051_v17, 4  ;;  %1980 = vst [vmem:[#allocation2 + $0x364] sm:$0xf] %v1924_v63  ;;  %v1611_v2 = vrot.slane %v1610_v34, 4  ;;  %v3499_v8 = vpop.f32.mrf.mxu1 }
 0x124   : > { %2108 = vst [vmem:[#allocation2 + $0x368] sm:$0xf] %v2052_v19  ;;  %v1606_v15 = vsel %vm10625_vm14, %v1601_v33, %v1605_v9  ;;  %v1619_v23 = vrot.slane %v1617_v41, 4  ;;  %v11809_v60 = vsel %vm10567_vm4, %v8756_v45, 0  ;;  %v1697_v56 = vsel %vm10579_vm5, %v8756_v45, 0  ;;  %v3274_v46 = vpop.f32.mrf.mxu0 }
 0x125   : > { %v1667_v10 = vadd.bf16 %v1606_v15, %v1356_v44  ;;  %v11819_v18 = vadd.f32 %v3496_v55, %v3271_v48  ;;  %v1616_v41 = vsel %vm10625_vm14, %v1611_v2, %v1615_v20  ;;  %v1699_v25 = vshll.u32 %v1697_v56, 16  ;;  %v3501_v47 = vpop.f32.mrf.mxu1  ;;  %v1856_v2 = vld [vmem:[#allocation2 + $0x3b0] sm:$0xf] }
 0x126   : > { %v1620_v62 = vor.u32 %v1619_v23, %v1615_v20  ;;  %v1703_v28 = vshrl.u32 %v1697_v56, 16  ;;  %v1668_v57 = vadd.bf16 %v1616_v41, %v1357_v0  ;;  %v11827_v58 = vadd.f32 %v3499_v8, %v3274_v46  ;;  %v3276_v31 = vpop.f32.mrf.mxu0  ;;  %v1984_v8 = vld [vmem:[#allocation2 + $0x3b4] sm:$0xf] }
 0x127   : > { %v2267_v9 = vld [vmem:[#allocation2 + $0x348] sm:$0xff]  ;;  %1691 = vst [vmem:[#allocation2 + $0x384] sm:$0xf] %v1667_v10  ;;  %v1798_v29 = vrot.slane %v1667_v10, 5  ;;  %2135 = vst [vmem:[#allocation2 + $0x380] sm:$0xf] %v1667_v10  ;;  %v3504_v23 = vpop.f32.mrf.mxu1 }
 0x128   : > { %v1926_v44 = vrot.slane %v1667_v10, 6  ;;  %v2054_v14 = vrot.slane %v1667_v10, 7  ;;  %v1621_v12 = vrot.slane %v1620_v62, 4  ;;  %v1701_v39 = vrot.slane %v1699_v25, 5  ;;  %v2270_v54 = vld [vmem:[#allocation2 + $0x35c] sm:$0xff] }
 0x129   : > { %v1705_v52 = vrot.slane %v1703_v28, 4  ;;  %v9917_v43 = vld [vmem:[#allocation2 + $0x34c] ss:$20 sps:$4 sm:$0xff]   ;;  %v1799_v26 = vsel %vm10663_vm15, %v1797_v7, %v1798_v29  ;;  %v1800_v32 = vrot.slane %v1798_v29, 4  ;;  %v1801_v0 = vrot.slane %v1668_v57, 5 }
 0x12a   : > { %1692 = vst [vmem:[#allocation2 + $0x398] sm:$0xf] %v1668_v57  ;;  %2136 = vst [vmem:[#allocation2 + $0x394] sm:$0xf] %v1668_v57  ;;  %v1927_v53 = vsel %vm10671_vm0, %v1925_v3, %v1926_v44  ;;  %v8868_v49 = vcombine.low %v2267_v9, %v2270_v54  ;;  %v1928_v42 = vrot.slane %v1926_v44, 4  ;;  %v1929_v30 = vrot.slane %v1668_v57, 6  ;;  %3429 = vmatprep.mubr.bf16.mxu0 %v9917_v43  ;;  %v3506_v9 = vpop.f32.mrf.mxu1 }
 0x12b   : > { %1853 = vst [vmem:[#allocation2 + $0x374] sm:$0xf] %v1799_v26  ;;  %1981 = vst [vmem:[#allocation2 + $0x378] sm:$0xf] %v1927_v53  ;;  %v2055_v45 = vsel %vm10680_vm1, %v2053_v5, %v2054_v14  ;;  %v9919_v50 = vld [vmem:[#allocation2 + $0x354] ss:$20 sps:$4 sm:$0xff]   ;;  %v1802_v38 = vsel %vm10663_vm15, %v1800_v32, %v1801_v0  ;;  %v1669_v17 = vadd.bf16 %v1621_v12, %v11776_v4  ;;  %v3279_v5 = vpop.f32.mrf.mxu0 }
 0x12c   : > { %v9921_v36 = vld [vmem:[#allocation2 + $0x350] ss:$20 sps:$4 sm:$0xff]   ;;  %v2056_v6 = vrot.slane %v2054_v14, 4  ;;  %2109 = vst [vmem:[#allocation2 + $0x37c] sm:$0xf] %v2055_v45  ;;  %v1702_v37 = vsel %vm10625_vm14, %v1621_v12, %v1701_v39  ;;  %3430 = vmatmul.mubr.bf16.gmra.mxu0 %v8868_v49  ;;  %v1930_v33 = vsel %vm10671_vm0, %v1928_v42, %v1929_v30  ;;  %v2057_v34 = vrot.slane %v1668_v57, 7  ;;  %3654 = vmatprep.mubr.bf16.mxu1 %v9919_v50  ;;  %v3507_v54 = vpop.f32.mrf.mxu1 }
 0x12d   : > { %1854 = vst [vmem:[#allocation2 + $0x388] sm:$0xf] %v1802_v38  ;;  %v1706_v20 = vrot.slane %v1705_v52, 4  ;;  %v1709_v7 = vadd.bf16 %v1702_v37, %v11776_v4  ;;  %1982 = vst [vmem:[#allocation2 + $0x38c] sm:$0xf] %v1930_v33  ;;  %v1694_v48 = vsel %vm11243_vm3, %v1669_v17, %v1693_v40  ;;  %v1803_v63 = vrot.slane %v1801_v0, 4  ;;  %3655 = vmatmul.mubr.bf16.gmra.mxu1 %v9921_v36  ;;  %v3281_v41 = vpop.f32.mrf.mxu0 }
 0x12e   : > { %v1859_v19 = vor.u32 %v1705_v52, %v1701_v39  ;;  %v1931_v3 = vrot.slane %v1929_v30, 4  ;;  %v2058_v59 = vsel %vm10680_vm1, %v2056_v6, %v2057_v34  ;;  %1695 = vst [vmem:[#allocation2 + $0x3ac] sm:$0xf] %v1694_v48  ;;  %v2059_v10 = vrot.slane %v2057_v34, 4  ;;  %v2138_v57 = vld [vmem:[#allocation2 + $0x3bc] sm:$0xf]  ;;  %v3509_v42 = vpop.f32.mrf.mxu1 }
 0x12f   : > { %v1710_v55 = vadd.bf16 %v1706_v20, %v11809_v60  ;;  %v1804_v15 = vrot.slane %v1709_v7, 5  ;;  %2137 = vst [vmem:[#allocation2 + $0x3a8] sm:$0xf] %v1709_v7  ;;  %v1932_v4 = vrot.slane %v1709_v7, 6  ;;  %2110 = vst [vmem:[#allocation2 + $0x390] sm:$0xf] %v2058_v59  ;;  %v11848_v51 = vadd.f32 %v3504_v23, %v3279_v5  ;;  %v3282_v52 = vpop.f32.mrf.mxu0 }
 0x130   : > { %v1860_v11 = vrot.slane %v1859_v19, 4  ;;  %v2060_v56 = vrot.slane %v1709_v7, 7  ;;  %v2112_v39 = vld [vmem:[#allocation2 + $0x3b8] sm:$0xf]  ;;  %v11861_v53 = vadd.f32 %v3507_v54, %v3282_v52  ;;  %v3512_v33 = vpop.f32.mrf.mxu1  ;;  %v9959_v7 = vld [vmem:[%s14265_s4 + $0x70] sm:$0xff]   ;;  %vm4555_vm4 = vcmp.ge.s32.totalorder %v10528_v16, 25 }
 0x131   : > { %v1805_v62 = vsel %vm10663_vm15, %v1803_v63, %v1804_v15  ;;  %v1806_v25 = vrot.slane %v1804_v15, 4  ;;  %v1807_v28 = vrot.slane %v1710_v55, 5  ;;  %v1933_v46 = vsel %vm10671_vm0, %v1931_v3, %v1932_v4  ;;  %v3284_v47 = vpop.f32.mrf.mxu0  ;;  %v9960_v48 = vld [vmem:[%s14265_s4 + $0x30] sm:$0xff]   ;;  %9326 = vmatprep.subr.bf16.mxu1 %v9959_v7  ;;  %v9940_v7 = vld [vmem:[#allocation2 + $0x128] ss:$20 sps:$4 sm:$0xff]  }
 0x132   : > { %v2273_v29 = vld [vmem:[#allocation2 + $0x370] sm:$0xff]  ;;  %1855 = vst [vmem:[#allocation2 + $0x39c] sm:$0xf] %v1805_v62  ;;  %v1862_v44 = vadd.bf16 %v1860_v11, %v11809_v60  ;;  %v1934_v14 = vrot.slane %v1932_v4, 4  ;;  %1983 = vst [vmem:[#allocation2 + $0x3a0] sm:$0xf] %v1933_v46  ;;  %v2061_v12 = vsel %vm10680_vm1, %v2059_v10, %v2060_v56  ;;  %v3514_v19 = vpop.f32.mrf.mxu1  ;;  %9327 = vmatpush3.bf16.msra.mxu1 %v9960_v48 }
 0x133   : > { %v2062_v40 = vrot.slane %v2060_v56, 4  ;;  %v1808_v31 = vsel %vm10663_vm15, %v1806_v25, %v1807_v28  ;;  %2111 = vst [vmem:[#allocation2 + $0x3a4] sm:$0xf] %v2061_v12  ;;  %v3287_v36 = vpop.f32.mrf.mxu0  ;;  %v9933_v3 = vld [vmem:[#allocation2 + $0x10] ss:$20 sps:$4 sm:$0xff]   ;;  %vm14290_vm5 = vcmp.lt.s32.totalorder %v10528_v16, 50 }
 0x134   : > { %v2276_v43 = vld [vmem:[#allocation2 + $0x384] sm:$0xff]  ;;  %v1857_v32 = vsel %vm11243_vm3, %v1808_v31, %v1856_v2  ;;  %v1935_v60 = vrot.slane %v1862_v44, 6  ;;  %v2063_v0 = vrot.slane %v1862_v44, 7  ;;  %v2139_v30 = vsel %vm11243_vm3, %v1862_v44, %v2138_v57  ;;  %v9927_v6 = vld [vmem:[#allocation2 + $0x378] ss:$20 sps:$4 sm:$0xff]   ;;  %v3515_v59 = vpop.f32.mrf.mxu1  ;;  %vm12051_vm6 = vmand %vm4555_vm4, %vm14290_vm5 }
 0x135   : > { %v9923_v26 = vld [vmem:[#allocation2 + $0x374] ss:$20 sps:$4 sm:$0xff]   ;;  %v8873_v49 = vcombine.low %v2273_v29, %v2276_v43  ;;  %1858 = vst [vmem:[#allocation2 + $0x3b0] sm:$0xf] %v1857_v32  ;;  %2140 = vst [vmem:[#allocation2 + $0x3bc] sm:$0xf] %v2139_v30  ;;  %v11873_v34 = vadd.f32 %v3512_v33, %v3287_v36  ;;  %v3289_v20 = vpop.f32.mrf.mxu0 }
 0x136   : > { %3437 = vmatprep.mubr.bf16.mxu0 %v9923_v26  ;;  %v1936_v45 = vsel %vm10671_vm0, %v1934_v14, %v1935_v60  ;;  %v2064_v50 = vsel %vm10680_vm1, %v2062_v40, %v2063_v0  ;;  %v9925_v38 = vld [vmem:[#allocation2 + $0x37c] ss:$20 sps:$4 sm:$0xff]   ;;  %v3517_v11 = vpop.f32.mrf.mxu1  ;;  %v9934_v62 = vld [vmem:[#allocation2 + $0x38] ss:$20 sps:$4 sm:$0xff]   ;;  %v9935_v25 = vld [vmem:[#allocation2 + $0x60] ss:$20 sps:$4 sm:$0xff]  }
 0x137   : > { %3438 = vmatmul.mubr.bf16.gmra.mxu0 %v8873_v49  ;;  %v1985_v17 = vsel %vm11243_vm3, %v1936_v45, %v1984_v8  ;;  %v2113_v37 = vsel %vm11243_vm3, %v2064_v50, %v2112_v39  ;;  %3662 = vmatprep.mubr.bf16.mxu1 %v9925_v38  ;;  %v3290_v5 = vpop.f32.mrf.mxu0  ;;  %v9936_v40 = vld [vmem:[#allocation2 + $0x88] ss:$20 sps:$4 sm:$0xff]   ;;  %v9937_v39 = vld [vmem:[#allocation2 + $0xb0] ss:$20 sps:$4 sm:$0xff]   ;;  %v9938_v49 = vld [vmem:[#allocation2 + $0xd8] ss:$20 sps:$4 sm:$0xff]  }
 0x138   : > { %1986 = vst [vmem:[#allocation2 + $0x3b4] sm:$0xf] %v1985_v17  ;;  %2114 = vst [vmem:[#allocation2 + $0x3b8] sm:$0xf] %v2113_v37  ;;  %3663 = vmatmul.mubr.bf16.gmra.mxu1 %v9927_v6  ;;  %v11881_v2 = vadd.f32 %v3515_v59, %v3290_v5  ;;  %v3520_v28 = vpop.f32.mrf.mxu1  ;;  %v9939_v30 = vld [vmem:[#allocation2 + $0x100] ss:$20 sps:$4 sm:$0xff]  }
 0x139   : > { %v2279_v63 = vld [vmem:[#allocation2 + $0x398] sm:$0xff]  ;;  %v3292_v4 = vpop.f32.mrf.mxu0  ;;  %v9961_v6 = vld [vmem:[%s14265_s4 + $0x68] sm:$0xff]   ;;  %v9941_v19 = vld [vmem:[#allocation2 + $0x150] ss:$20 sps:$4 sm:$0xff]   ;;  %vm14294_vm14 = vcmp.ge.s32.totalorder %v10528_v16, 50 }
 0x13a   : > { %v3522_v57 = vpop.f32.mrf.mxu1  ;;  %v9962_v17 = vld [vmem:[%s14265_s4 + $0x28] sm:$0xff]   ;;  %9328 = vmatprep.subr.bf16.mxu1 %v9961_v6  ;;  %vm4584_vm7 = vmpackc.low %vm12051_vm6, %vm12051_vm6  ;;  %vm4561_vm6 = vcmp.ge.s32.totalorder %v10528_v16, 75 }
 0x13b   : > { %v3295_v41 = vpop.f32.mrf.mxu0  ;;  %9329 = vmatpush3.bf16.msra.mxu1 %v9962_v17 }
 0x13c   : > { %v2282_v55 = vld [vmem:[#allocation2 + $0x3ac] sm:$0xff]  ;;  %v11883_v9 = vadd.f32 %v3520_v28, %v3295_v41  ;;  %v3523_v44 = vpop.f32.mrf.mxu1 }
 0x13d   : > { %v9928_v15 = vld [vmem:[#allocation2 + $0x39c] ss:$20 sps:$4 sm:$0xff]   ;;  %v8878_v23 = vcombine.low %v2279_v63, %v2282_v55  ;;  %v3297_v46 = vpop.f32.mrf.mxu0 }
 0x13e   : > { %3445 = vmatprep.mubr.bf16.mxu0 %v9928_v15  ;;  %v3525_v12 = vpop.f32.mrf.mxu1  ;;  %v9944_v46 = vld [vmem:[#allocation2 + $0x1c8] ss:$20 sps:$4 sm:$0xff]  }
 0x13f   : > { %v9930_v10 = vld [vmem:[#allocation2 + $0x3a4] ss:$20 sps:$4 sm:$0xff]   ;;  %3446 = vmatmul.mubr.bf16.gmra.mxu0 %v8878_v23  ;;  %v9932_v56 = vld [vmem:[#allocation2 + $0x3a0] ss:$20 sps:$4 sm:$0xff]   ;;  %v3298_v29 = vpop.f32.mrf.mxu0 }
 0x140   : > { %9686 = vmatprep.mubr.bf16.mxu0 %v9933_v3  ;;  %3670 = vmatprep.mubr.bf16.mxu1 %v9930_v10  ;;  %v11885_v8 = vadd.f32 %v3523_v44, %v3298_v29  ;;  %v3528_v31 = vpop.f32.mrf.mxu1  ;;  %v9942_v23 = vld [vmem:[#allocation2 + $0x178] ss:$20 sps:$4 sm:$0xff]   ;;  %v9943_v10 = vld [vmem:[#allocation2 + $0x1a0] ss:$20 sps:$4 sm:$0xff]   ;;  %v9945_v29 = vld [vmem:[#allocation2 + $0x1f0] ss:$20 sps:$4 sm:$0xff]  }
 0x141   : > { %3671 = vmatmul.mubr.bf16.gmra.mxu1 %v9932_v56  ;;  %v3300_v14 = vpop.f32.mrf.mxu0 }
 0x142   : > { %v3530_v26 = vpop.f32.mrf.mxu1 }
 0x143   : > { %v3303_v52 = vpop.f32.mrf.mxu0 }
 0x144   : > { %v11887_v54 = vadd.f32 %v3528_v31, %v3303_v52  ;;  %v3531_v60 = vpop.f32.mrf.mxu1 }
 0x145   : > { %v3305_v43 = vpop.f32.mrf.mxu0 }
 0x146   : > { %v3533_v42 = vpop.f32.mrf.mxu1 }
 0x147   : > { %9687 = vmatmul.mubr.bf16.vlgmr.msra.gmra.mxu0 %v9934_v62  ;;  %v3306_v32 = vpop.f32.mrf.mxu0 }
 0x148   : > { %9690 = vmatprep.mubr.bf16.mxu0 %v9935_v25  ;;  %v11889_v0 = vadd.f32 %v3531_v60, %v3306_v32  ;;  %v3536_v50 = vpop.f32.mrf.mxu1 }
 0x149   : > { %v3308_v47 = vpop.f32.mrf.mxu0 }
 0x14a   : > { %v3538_v37 = vpop.f32.mrf.mxu1 }
 0x14b   : > { %v3311_v45 = vpop.f32.mrf.mxu0 }
 0x14c   : > { %v11891_v36 = vadd.f32 %v3536_v50, %v3311_v45  ;;  %v3539_v20 = vpop.f32.mrf.mxu1  ;;  %v9963_v50 = vld [vmem:[%s14265_s4 + $0x60] sm:$0xff]  }
 0x14d   : > { %v3313_v38 = vpop.f32.mrf.mxu0  ;;  %9330 = vmatprep.subr.bf16.mxu1 %v9963_v50 }
 0x14e   : > { %v3541_v3 = vpop.f32.mrf.mxu1  ;;  %v9964_v38 = vld [vmem:[%s14265_s4 + $0x20] sm:$0xff]  }
 0x14f   : > { %9691 = vmatmul.mubr.bf16.gmra.mxu0 %v9936_v40  ;;  %v3314_v33 = vpop.f32.mrf.mxu0  ;;  %9331 = vmatpush3.bf16.msra.mxu1 %v9964_v38 }
 0x150   : > { %9694 = vmatprep.mubr.bf16.mxu0 %v9937_v39  ;;  %v11899_v48 = vadd.f32 %v3539_v20, %v3314_v33  ;;  %v3544_v59 = vpop.f32.mrf.mxu1  ;;  %v9948_v20 = vld [vmem:[#allocation2 + $0x268] ss:$20 sps:$4 sm:$0xff]  }
 0x151   : > { %v3316_v63 = vpop.f32.mrf.mxu0 }
 0x152   : > { %v3546_v4 = vpop.f32.mrf.mxu1  ;;  %v9949_v63 = vld [vmem:[#allocation2 + $0x290] ss:$20 sps:$4 sm:$0xff]  }
 0x153   : > { %v3319_v5 = vpop.f32.mrf.mxu0 }
 0x154   : > { %v11901_v55 = vadd.f32 %v3544_v59, %v3319_v5  ;;  %v3547_v56 = vpop.f32.mrf.mxu1 }
 0x155   : > { %v3321_v15 = vpop.f32.mrf.mxu0 }
 0x156   : > { %v3549_v25 = vpop.f32.mrf.mxu1 }
 0x157   : > { %9695 = vmatmul.mubr.bf16.gmra.mxu0 %v9938_v49  ;;  %v3322_v11 = vpop.f32.mrf.mxu0  ;;  %v9946_v49 = vld [vmem:[#allocation2 + $0x218] ss:$20 sps:$4 sm:$0xff]  }
 0x158   : > { %9698 = vmatprep.mubr.bf16.mxu0 %v9939_v30  ;;  %v11903_v41 = vadd.f32 %v3547_v56, %v3322_v11  ;;  %v9947_v30 = vld [vmem:[#allocation2 + $0x240] ss:$20 sps:$4 sm:$0xff]   ;;  %v9950_v56 = vld [vmem:[#allocation2 + $0x2b8] ss:$20 sps:$4 sm:$0xff]  }
 0x159   : > { %v3324_v62 = vpop.f32.mrf.mxu0 }
 0x15a   : > { %v3552_v57 = vpop.f32.mrf.mxu1  ;;  %v9951_v62 = vld [vmem:[#allocation2 + $0x2e0] ss:$20 sps:$4 sm:$0xff]  }
 0x15b   : > { %v3327_v28 = vpop.f32.mrf.mxu0 }
 0x15c   : > { %v11905_v44 = vadd.f32 %v3552_v57, %v3327_v28  ;;  %v3554_v12 = vpop.f32.mrf.mxu1 }
 0x15d   : > { %v3329_v14 = vpop.f32.mrf.mxu0 }
 0x15e   : > { %v3555_v39 = vpop.f32.mrf.mxu1 }
 0x15f   : > { %9699 = vmatmul.mubr.bf16.gmra.mxu0 %v9940_v7  ;;  %v3330_v40 = vpop.f32.mrf.mxu0 }
 0x160   : > { %9702 = vmatprep.mubr.bf16.mxu0 %v9941_v19  ;;  %v11907_v52 = vadd.f32 %v3555_v39, %v3330_v40  ;;  %v3557_v43 = vpop.f32.mrf.mxu1 }
 0x161   : > { %v3332_v31 = vpop.f32.mrf.mxu0 }
 0x162   : > { %v9952_v31 = vld [vmem:[#allocation2 + $0x308] ss:$20 sps:$4 sm:$0xff]  }
 0x164   : > { %v3335_v26 = vpop.f32.mrf.mxu0  ;;  %v3560_v32 = vpop.f32.mrf.mxu1 }
 0x165   : > { %v11909_v60 = vadd.f32 %v3560_v32, %v3335_v26  ;;  %v9953_v26 = vld [vmem:[#allocation2 + $0x330] ss:$20 sps:$4 sm:$0xff]   ;;  %v9954_v32 = vld [vmem:[#allocation2 + $0x358] ss:$20 sps:$4 sm:$0xff]  }
 0x166   : > { %v3337_v47 = vpop.f32.mrf.mxu0  ;;  %v3562_v42 = vpop.f32.mrf.mxu1 }
 0x167   : > { %9703 = vmatmul.mubr.bf16.gmra.mxu0 %v9942_v23  ;;  %v9955_v47 = vld [vmem:[#allocation2 + $0x380] ss:$20 sps:$4 sm:$0xff]  }
 0x168   : > { %9706 = vmatprep.mubr.bf16.mxu0 %v9943_v10  ;;  %v3338_v45 = vpop.f32.mrf.mxu0  ;;  %v3563_v6 = vpop.f32.mrf.mxu1 }
 0x169   : > { %v11917_v17 = vadd.f32 %v3563_v6, %v3338_v45 }
 0x16a   : > { %v3340_v37 = vpop.f32.mrf.mxu0  ;;  %v3565_v33 = vpop.f32.mrf.mxu1 }
 0x16b   : > { %v9956_v37 = vld [vmem:[#allocation2 + $0x3a8] ss:$20 sps:$4 sm:$0xff]  }
 0x16f   : > { %9707 = vmatmul.mubr.bf16.gmra.mxu0 %v9944_v46 }
 0x170   : > { %9710 = vmatprep.mubr.bf16.mxu0 %v9945_v29  ;;  %v3343_v7 = vpop.f32.mrf.mxu0  ;;  %v3568_v19 = vpop.f32.mrf.mxu1 }
 0x171   : > { %v11919_v3 = vadd.f32 %v3568_v19, %v3343_v7 }
 0x172   : > { %v3345_v5 = vpop.f32.mrf.mxu0  ;;  %v3570_v59 = vpop.f32.mrf.mxu1 }
 0x174   : > { %v3346_v15 = vpop.f32.mrf.mxu0  ;;  %v3571_v4 = vpop.f32.mrf.mxu1 }
 0x175   : > { %v11921_v23 = vadd.f32 %v3571_v4, %v3346_v15 }
 0x176   : > { %v3348_v11 = vpop.f32.mrf.mxu0  ;;  %v3573_v10 = vpop.f32.mrf.mxu1 }
 0x177   : > { %9711 = vmatmul.mubr.bf16.gmra.mxu0 %v9946_v49 }
 0x178   : > { %9714 = vmatprep.mubr.bf16.mxu0 %v9947_v30 }
 0x179   : > { %v3351_v25 = vpop.f32.mrf.mxu0  ;;  %v3576_v28 = vpop.f32.mrf.mxu1 }
 0x17a   : > { %v11923_v46 = vadd.f32 %v3576_v28, %v3351_v25 }
 0x17b   : > { %v3353_v57 = vpop.f32.mrf.mxu0  ;;  %v3578_v29 = vpop.f32.mrf.mxu1 }
 0x17d   : > { %v3354_v14 = vpop.f32.mrf.mxu0  ;;  %v3579_v12 = vpop.f32.mrf.mxu1 }
 0x17e   : > { %v11925_v40 = vadd.f32 %v3579_v12, %v3354_v14 }
 0x17f   : > { %9715 = vmatmul.mubr.bf16.gmra.mxu0 %v9948_v20  ;;  %v3356_v39 = vpop.f32.mrf.mxu0  ;;  %v3581_v43 = vpop.f32.mrf.mxu1 }
 0x180   : > { %9718 = vmatprep.mubr.bf16.mxu0 %v9949_v63 }
 0x187   : > { %9719 = vmatmul.mubr.bf16.gmra.mxu0 %v9950_v56 }
 0x188   : > { %9722 = vmatprep.mubr.bf16.mxu0 %v9951_v62 }
 0x18b   : > { %v3359_v49 = vpop.f32.mrf.mxu0  ;;  %v3584_v42 = vpop.f32.mrf.mxu1 }
 0x18c   : > { %v11927_v30 = vadd.f32 %v3584_v42, %v3359_v49 }
 0x18d   : > { %v3361_v45 = vpop.f32.mrf.mxu0  ;;  %v3586_v50 = vpop.f32.mrf.mxu1 }
 0x18f   : > { %9723 = vmatmul.mubr.bf16.gmra.mxu0 %v9952_v31  ;;  %v3362_v38 = vpop.f32.mrf.mxu0  ;;  %v3587_v6 = vpop.f32.mrf.mxu1 }
 0x190   : > { %9726 = vmatprep.mubr.bf16.mxu0 %v9953_v26  ;;  %v11929_v33 = vadd.f32 %v3587_v6, %v3362_v38  ;;  %v9965_v26 = vld [vmem:[%s14265_s4 + $0x58] sm:$0xff]  }
 0x191   : > { %v3364_v20 = vpop.f32.mrf.mxu0  ;;  %v3589_v7 = vpop.f32.mrf.mxu1  ;;  %9332 = vmatprep.subr.bf16.mxu1 %v9965_v26 }
 0x193   : > { %v3367_v63 = vpop.f32.mrf.mxu0  ;;  %v3592_v19 = vpop.f32.mrf.mxu1 }
 0x194   : > { %v11931_v5 = vadd.f32 %v3592_v19, %v3367_v63 }
 0x195   : > { %v3369_v59 = vpop.f32.mrf.mxu0  ;;  %v3594_v15 = vpop.f32.mrf.mxu1 }
 0x197   : > { %9727 = vmatmul.mubr.bf16.gmra.mxu0 %v9954_v32  ;;  %v3370_v4 = vpop.f32.mrf.mxu0  ;;  %v3595_v11 = vpop.f32.mrf.mxu1  ;;  %v9966_v32 = vld [vmem:[%s14265_s4 + $0x18] sm:$0xff]  }
 0x198   : > { %9730 = vmatprep.mubr.bf16.mxu0 %v9955_v47  ;;  %v11933_v10 = vadd.f32 %v3595_v11, %v3370_v4  ;;  %9333 = vmatpush3.bf16.msra.mxu1 %v9966_v32 }
 0x199   : > { %v3372_v56 = vpop.f32.mrf.mxu0  ;;  %v3597_v62 = vpop.f32.mrf.mxu1 }
 0x19f   : > { %9731 = vmatmul.mubr.bf16.gmra.mxu0 %v9956_v37 }
 0x1a0   : > { %v3375_v25 = vpop.f32.mrf.mxu0 }
 0x1a1   : > { %v3600_v28 = vpop.f32.mrf.mxu1 }
 0x1a2   : > { %v11935_v57 = vadd.f32 %v3600_v28, %v3375_v25  ;;  %v3377_v29 = vpop.f32.mrf.mxu0 }
 0x1a3   : > { %v3602_v14 = vpop.f32.mrf.mxu1 }
 0x1a4   : > { %v3378_v12 = vpop.f32.mrf.mxu0 }
 0x1a5   : > { %v3603_v39 = vpop.f32.mrf.mxu1 }
 0x1a6   : > { %v11937_v31 = vadd.f32 %v3603_v39, %v3378_v12  ;;  %v3380_v43 = vpop.f32.mrf.mxu0 }
 0x1a7   : > { %v3605_v47 = vpop.f32.mrf.mxu1 }
 0x1aa   : > { %v3383_v49 = vpop.f32.mrf.mxu0  ;;  %v3608_v42 = vpop.f32.mrf.mxu1 }
 0x1ab   : > { %v11945_v45 = vadd.f32 %v3608_v42, %v3383_v49 }
 0x1ac   : > { %v3385_v50 = vpop.f32.mrf.mxu0  ;;  %v3610_v38 = vpop.f32.mrf.mxu1 }
 0x1ae   : > { %v3386_v6 = vpop.f32.mrf.mxu0  ;;  %v3611_v37 = vpop.f32.mrf.mxu1 }
 0x1af   : > { %v11947_v20 = vadd.f32 %v3611_v37, %v3386_v6  ;;  %v9967_v37 = vld [vmem:[%s14265_s4 + $0x50] sm:$0xff]  }
 0x1b0   : > { %v3388_v7 = vpop.f32.mrf.mxu0  ;;  %v3613_v63 = vpop.f32.mrf.mxu1  ;;  %9334 = vmatprep.subr.bf16.mxu1 %v9967_v37 }
 0x1b1   : > { %v9968_v7 = vld [vmem:[%s14265_s4 + $0x10] sm:$0xff]  }
 0x1b2   : > { %9335 = vmatpush3.bf16.msra.mxu1 %v9968_v7 }
 0x1b5   : > { %v3391_v19 = vpop.f32.mrf.mxu0 }
 0x1b6   : > { %v3616_v59 = vpop.f32.mrf.mxu1 }
 0x1b7   : > { %v3393_v15 = vpop.f32.mrf.mxu0  ;;  %v11949_v4 = vadd.f32 %v3616_v59, %v3391_v19 }
 0x1b8   : > { %v3618_v11 = vpop.f32.mrf.mxu1 }
 0x1b9   : > { %v3394_v56 = vpop.f32.mrf.mxu0 }
 0x1ba   : > { %v3619_v62 = vpop.f32.mrf.mxu1 }
 0x1bb   : > { %v3396_v25 = vpop.f32.mrf.mxu0  ;;  %v11951_v28 = vadd.f32 %v3619_v62, %v3394_v56 }
 0x1bc   : > { %v3621_v29 = vpop.f32.mrf.mxu1 }
 0x1c0   : > { %v3399_v14 = vpop.f32.mrf.mxu0 }
 0x1c2   : > { %v3401_v12 = vpop.f32.mrf.mxu0  ;;  %v3624_v39 = vpop.f32.mrf.mxu1 }
 0x1c3   : > { %v11953_v43 = vadd.f32 %v3624_v39, %v3399_v14 }
 0x1c4   : > { %v3402_v26 = vpop.f32.mrf.mxu0  ;;  %v3626_v32 = vpop.f32.mrf.mxu1 }
 0x1c6   : > { %v3404_v47 = vpop.f32.mrf.mxu0  ;;  %v3627_v49 = vpop.f32.mrf.mxu1 }
 0x1c7   : > { %v11955_v42 = vadd.f32 %v3627_v49, %v3402_v26 }
 0x1c8   : > { %v3629_v50 = vpop.f32.mrf.mxu1 }
 0x1cb   : > { %v3407_v38 = vpop.f32.mrf.mxu0 }
 0x1cc   : > { %v3632_v6 = vpop.f32.mrf.mxu1 }
 0x1cd   : > { %v11963_v63 = vadd.f32 %v3632_v6, %v3407_v38  ;;  %v3409_v19 = vpop.f32.mrf.mxu0 }
 0x1ce   : > { %v3634_v59 = vpop.f32.mrf.mxu1 }
 0x1cf   : > { %v3410_v15 = vpop.f32.mrf.mxu0 }
 0x1d0   : > { %v3635_v11 = vpop.f32.mrf.mxu1 }
 0x1d1   : > { %v11965_v56 = vadd.f32 %v3635_v11, %v3410_v15  ;;  %v3412_v62 = vpop.f32.mrf.mxu0 }
 0x1d2   : > { %v3637_v25 = vpop.f32.mrf.mxu1 }
 0x1d3   : > { %14321 = vst [vmem:[#allocation15_spill] sm:$0xff] %v11965_v56 }
 0x1d7   : > { %v3415_v29 = vpop.f32.mrf.mxu0 }
 0x1d8   : > { %v3640_v14 = vpop.f32.mrf.mxu1 }
 0x1d9   : > { %v11967_v12 = vadd.f32 %v3640_v14, %v3415_v29  ;;  %v3417_v39 = vpop.f32.mrf.mxu0 }
 0x1da   : > { %v3642_v26 = vpop.f32.mrf.mxu1 }
 0x1db   : > { %v3418_v32 = vpop.f32.mrf.mxu0 }
 0x1dc   : > { %v3643_v47 = vpop.f32.mrf.mxu1 }
 0x1dd   : > { %v11969_v49 = vadd.f32 %v3643_v47, %v3418_v32  ;;  %v3420_v50 = vpop.f32.mrf.mxu0  ;;  %v9969_v32 = vld [vmem:[%s14265_s4 + $0x48] sm:$0xff]  }
 0x1de   : > { %v3645_v38 = vpop.f32.mrf.mxu1  ;;  %v9970_v47 = vld [vmem:[%s14265_s4 + $0x8] sm:$0xff]   ;;  %9336 = vmatprep.subr.bf16.mxu1 %v9969_v32 }
 0x1df   : > { %14322 = vst [vmem:[#allocation16_spill] sm:$0xff] %v11969_v49  ;;  %9337 = vmatpush3.bf16.msra.mxu1 %v9970_v47 }
 0x1e0   : > { %v3423_v6 = vpop.f32.mrf.mxu0 }
 0x1e1   : > { %v3648_v37 = vpop.f32.mrf.mxu1 }
 0x1e2   : > { %v3425_v7 = vpop.f32.mrf.mxu0  ;;  %v11971_v19 = vadd.f32 %v3648_v37, %v3423_v6 }
 0x1e3   : > { %v3650_v59 = vpop.f32.mrf.mxu1 }
 0x1e4   : > { %14323 = vst [vmem:[#allocation17_spill] sm:$0xff] %v11971_v19  ;;  %v3426_v15 = vpop.f32.mrf.mxu0 }
 0x1e5   : > { %v3651_v11 = vpop.f32.mrf.mxu1 }
 0x1e6   : > { %v3428_v62 = vpop.f32.mrf.mxu0  ;;  %v11973_v25 = vadd.f32 %v3651_v11, %v3426_v15 }
 0x1e7   : > { %v3653_v29 = vpop.f32.mrf.mxu1 }
 0x1e8   : > { %14324 = vst [vmem:[#allocation18_spill] sm:$0xff] %v11973_v25 }
 0x1ec   : > { %v3431_v14 = vpop.f32.mrf.mxu0 }
 0x1ed   : > { %v3656_v39 = vpop.f32.mrf.mxu1 }
 0x1ee   : > { %v3433_v26 = vpop.f32.mrf.mxu0  ;;  %v11981_v50 = vadd.f32 %v3656_v39, %v3431_v14 }
 0x1ef   : > { %v3658_v38 = vpop.f32.mrf.mxu1 }
 0x1f0   : > { %14325 = vst [vmem:[#allocation19_spill] sm:$0xff] %v11981_v50  ;;  %v3434_v6 = vpop.f32.mrf.mxu0 }
 0x1f1   : > { %v3659_v37 = vpop.f32.mrf.mxu1 }
 0x1f2   : > { %v3436_v7 = vpop.f32.mrf.mxu0  ;;  %v11983_v59 = vadd.f32 %v3659_v37, %v3434_v6  ;;  %v9971_v37 = vld [vmem:[%s14265_s4 + $0x40] sm:$0xff]  }
 0x1f3   : > { %v3661_v15 = vpop.f32.mrf.mxu1  ;;  %9338 = vmatprep.subr.bf16.mxu1 %v9971_v37 }
 0x1f4   : > { %14326 = vst [vmem:[#allocation20_spill] sm:$0xff] %v11983_v59 }
 0x1f7   : > { %v3439_v11 = vpop.f32.mrf.mxu0 }
 0x1f8   : > { %v3664_v29 = vpop.f32.mrf.mxu1 }
 0x1f9   : > { %v3441_v62 = vpop.f32.mrf.mxu0  ;;  %v11985_v26 = vadd.f32 %v3664_v29, %v3439_v11  ;;  %v12002_v11 = vld [vmem:[%s14263_s2] ss:$0 sm:$0xff] }
 0x1fa   : > { %v3666_v13 = vpop.f32.mrf.mxu1 }
 0x1fb   : > { %14327 = vst [vmem:[#allocation21_spill] sm:$0xff] %v11985_v26  ;;  %v3442_v1 = vpop.f32.mrf.mxu0  ;;  %v9972_v13 = vld [vmem:[%s14265_s4] sm:$0xff]  }
 0x1fc   : > { %v3667_v35 = vpop.f32.mrf.mxu1  ;;  %9339 = vmatpush3.bf16.msra.mxu1 %v9972_v13 }
 0x1fd   : > { %v3444_v61 = vpop.f32.mrf.mxu0  ;;  %v11987_v14 = vadd.f32 %v3667_v35, %v3442_v1 }
 0x1fe   : > { %v3669_v38 = vpop.f32.mrf.mxu1 }
 0x1ff   : > { %14328 = vst [vmem:[#allocation22_spill] sm:$0xff] %v11987_v14  ;;  %v3447_v39 = vpop.f32.mrf.mxu0 }
 0x201   : > { %v3449_v32 = vpop.f32.mrf.mxu0  ;;  %v3672_v47 = vpop.f32.mrf.mxu1 }
 0x202   : > { %v11989_v24 = vadd.f32 %v3672_v47, %v3447_v39  ;;  %v12008_v39 = vld [vmem:[%s14264_s3] ss:$0 sm:$0xff] }
 0x203   : > { %v3450_v6 = vpop.f32.mrf.mxu0  ;;  %v3674_v7 = vpop.f32.mrf.mxu1 }
 0x204   : > { %14329 = vst [vmem:[#allocation23_spill] sm:$0xff] %v11989_v24 }
 0x205   : > { %v3452_v61 = vpop.f32.mrf.mxu0  ;;  %v3675_v1 = vpop.f32.mrf.mxu1 }
 0x206   : > { %v11997_v35 = vadd.f32 %v3675_v1, %v3450_v6 }
 0x207   : > { %v9688_v15 = vpop.f32.mrf.mxu0  ;;  %v3677_v29 = vpop.f32.mrf.mxu1 }
 0x208   : > { %14330 = vst [vmem:[#allocation24_spill] sm:$0xff] %v11997_v35  ;;  %v3722_v62 = vadd.f32 %v9688_v15, %v11819_v18 }
 0x209   : > { %v3713_v38 = vpop.f32.mrf.mxu0 }
 0x20a   : > { %v3913_v32 = vmul.f32 %v12002_v11, %v3722_v62  ;;  %v3714_v47 = vadd.f32 %v3713_v38, %v11783_v27 }
 0x20b   : > { %v9689_v6 = vpop.f32.mrf.mxu0 }
 0x20c   : > { %v12013_v37 = vadd.f32 %v12008_v39, %v3913_v32  ;;  %v3911_v7 = vmul.f32 %v12002_v11, %v3714_v47  ;;  %v3725_v13 = vadd.f32 %v9689_v6, %v11827_v58 }
 0x20d   : > { %v3716_v18 = vpop.f32.mrf.mxu0 }
 0x20e   : > { %v4064_v61 = vmin.f32 %v12013_v37, 0.0  ;;  %v12019_v1 = vadd.f32 %v12008_v39, %v3911_v7  ;;  %v3914_v15 = vmul.f32 %v12002_v11, %v3725_v13  ;;  %v3717_v62 = vadd.f32 %v3716_v18, %v11817_v22 }
 0x20f   : > { %v9692_v29 = vpop.f32.mrf.mxu0  ;;  %vm4016_vm8 = vcmp.gt.f32.partialorder %v12013_v37, 0.0 }
 0x210   : > { %v4114_v27 = vmul.f32 1.442695, %v4064_v61  ;;  %v4062_v38 = vmin.f32 %v12019_v1, 0.0  ;;  %v12025_v32 = vadd.f32 %v12008_v39, %v3914_v15  ;;  %v3912_v47 = vmul.f32 %v12002_v11, %v3717_v62 }
 0x211   : > { %v3738_v58 = vadd.f32 %v9692_v29, %v11873_v34  ;;  %v3729_v6 = vpop.f32.mrf.mxu0  ;;  %vm4014_vm9 = vcmp.gt.f32.partialorder %v12019_v1, 0.0 }
 0x212   : > { %10201 = vpow2.f32 %v4114_v27  ;;  %v4110_v21 = vmul.f32 1.442695, %v4062_v38  ;;  %v4065_v7 = vmin.f32 %v12025_v32, 0.0  ;;  %v12031_v13 = vadd.f32 %v12008_v39, %v3912_v47 }
 0x213   : > { %v3917_v22 = vmul.f32 %v12002_v11, %v3738_v58  ;;  %v3730_v18 = vadd.f32 %v3729_v6, %v11848_v51  ;;  %v9693_v61 = vpop.f32.mrf.mxu0  ;;  %vm4017_vm10 = vcmp.gt.f32.partialorder %v12025_v32, 0.0 }
 0x214   : > { %10203 = vpow2.f32 %v4110_v21  ;;  %v4116_v15 = vmul.f32 1.442695, %v4065_v7  ;;  %v3741_v62 = vadd.f32 %v9693_v61, %v11881_v2  ;;  %v4063_v34 = vmin.f32 %v12031_v13, 0.0 }
 0x215   : > { %v12039_v29 = vadd.f32 %v12008_v39, %v3917_v22  ;;  %v3915_v27 = vmul.f32 %v12002_v11, %v3730_v18  ;;  %v3732_v38 = vpop.f32.mrf.mxu0  ;;  %v14335_v7 = vmov 0   ;;  %vm4015_vm13 = vcmp.gt.f32.partialorder %v12031_v13, 0.0 }
 0x216   : > { %10205 = vpow2.f32 %v4116_v15  ;;  %v3918_v51 = vmul.f32 %v12002_v11, %v3741_v62  ;;  %v3733_v21 = vadd.f32 %v3732_v38, %v11861_v53  ;;  %v4112_v47 = vmul.f32 1.442695, %v4063_v34 }
 0x217   : > { %v4068_v58 = vmin.f32 %v12039_v29, 0.0  ;;  %v12047_v2 = vadd.f32 %v12008_v39, %v3915_v27  ;;  %v9696_v6 = vpop.f32.mrf.mxu0  ;;  %v14333_v62 = vlaneseq  ;;  %vm4020_vm4 = vcmp.gt.f32.partialorder %v12039_v29, 0.0 }
 0x218   : > { %v12056_v22 = vadd.f32 %v12008_v39, %v3918_v51  ;;  %v3916_v18 = vmul.f32 %v12002_v11, %v3733_v21  ;;  %v3754_v53 = vadd.f32 %v9696_v6, %v11887_v54  ;;  %10207 = vpow2.f32 %v4112_v47 }
 0x219   : > { %v4122_v61 = vmul.f32 1.442695, %v4068_v58  ;;  %v4066_v15 = vmin.f32 %v12047_v2, 0.0  ;;  %v4572_v34 = vshrl.u32 %v14333_v62, 7  ;;  %v3745_v27 = vpop.f32.mrf.mxu0  ;;  %v12080_v62 = vsel %vm4584_vm7, 65537, %v14335_v7 }
 0x21a   : > { %v4069_v38 = vmin.f32 %v12056_v22, 0.0  ;;  %v12064_v14 = vadd.f32 %v12008_v39, %v3916_v18  ;;  %v3921_v35 = vmul.f32 %v12002_v11, %v3754_v53  ;;  %v3746_v54 = vadd.f32 %v3745_v27, %v11883_v9 }
 0x21b   : > { %10209 = vpow2.f32 %v4122_v61  ;;  %v4118_v51 = vmul.f32 1.442695, %v4066_v15  ;;  %v9697_v21 = vpop.f32.mrf.mxu0  ;;  %v12075_v18 = vsub.s32 0, %v4572_v34  ;;  %vm14295_vm7 = vcmp.lt.s32.totalorder %v10528_v16, 100 }
 0x21c   : > { %v4124_v47 = vmul.f32 1.442695, %v4069_v38  ;;  %v4067_v58 = vmin.f32 %v12064_v14, 0.0  ;;  %v12073_v6 = vadd.f32 %v12008_v39, %v3921_v35  ;;  %v3919_v53 = vmul.f32 %v12002_v11, %v3746_v54 }
 0x21d   : > { %10211 = vpow2.f32 %v4118_v51  ;;  %14334 = vst [vmem:[#allocation25_spill] sm:$0xff] %v12075_v18  ;;  %v3757_v61 = vadd.f32 %v9697_v21, %v11889_v0  ;;  %v3748_v15 = vpop.f32.mrf.mxu0 }
 0x21e   : > { %10213 = vpow2.f32 %v4124_v47  ;;  %v4120_v9 = vmul.f32 1.442695, %v4067_v58  ;;  %v4072_v27 = vmin.f32 %v12073_v6, 0.0  ;;  %v12085_v35 = vadd.f32 %v12008_v39, %v3919_v53 }
 0x21f   : > { %v10202_v38 = vpop.eup %10201  ;;  %v3922_v34 = vmul.f32 %v12002_v11, %v3757_v61  ;;  %v3749_v51 = vadd.f32 %v3748_v15, %v11885_v8  ;;  %v9700_v54 = vpop.f32.mrf.mxu0 }
 0x220   : > { %v8927_v0 = vadd.f32 -1.0, %v10202_v38  ;;  %10215 = vpow2.f32 %v4120_v9  ;;  %v4130_v21 = vmul.f32 1.442695, %v4072_v27  ;;  %v3770_v26 = vadd.f32 %v9700_v54, %v11901_v55 }
 0x221   : > { %v10204_v47 = vpop.eup %10203  ;;  %v4070_v58 = vmin.f32 %v12085_v35, 0.0  ;;  %v12093_v24 = vadd.f32 %v12008_v39, %v3922_v34  ;;  %v3920_v53 = vmul.f32 %v12002_v11, %v3749_v51  ;;  %v3761_v25 = vpop.f32.mrf.mxu0 }
 0x222   : > { %v4256_v61 = vsel %vm4016_vm8, %v12013_v37, %v8927_v0  ;;  %v8925_v8 = vadd.f32 -1.0, %v10204_v47  ;;  %10217 = vpow2.f32 %v4130_v21  ;;  %v3925_v15 = vmul.f32 %v12002_v11, %v3770_v26 }
 0x223   : > { %v10206_v9 = vpop.eup %10205  ;;  %4304 = vst [vmem:[#allocation6 + $0x10] sm:$0xff] %v4256_v61  ;;  %v4126_v55 = vmul.f32 1.442695, %v4070_v58  ;;  %v4073_v27 = vmin.f32 %v12093_v24, 0.0  ;;  %v12101_v38 = vadd.f32 %v12008_v39, %v3920_v53  ;;  %v9701_v34 = vpop.f32.mrf.mxu0  ;;  %v3762_v54 = vadd.f32 %v3761_v25, %v11891_v36 }
 0x224   : > { %v4254_v51 = vsel %vm4014_vm9, %v12019_v1, %v8925_v8  ;;  %v8928_v37 = vadd.f32 -1.0, %v10206_v9  ;;  %v12108_v26 = vadd.f32 %v12008_v39, %v3925_v15  ;;  %v3773_v8 = vadd.f32 %v9701_v34, %v11903_v41 }
 0x225   : > { %4302 = vst [vmem:[#allocation6] sm:$0xff] %v4254_v51  ;;  %10219 = vpow2.f32 %v4126_v55  ;;  %v4132_v0 = vmul.f32 1.442695, %v4073_v27  ;;  %v4071_v21 = vmin.f32 %v12101_v38, 0.0  ;;  %v3764_v1 = vpop.f32.mrf.mxu0  ;;  %v10208_v47 = vpop.eup %10207  ;;  %v3923_v25 = vmul.f32 %v12002_v11, %v3762_v54 }
 0x226   : > { %v4257_v58 = vsel %vm4017_vm10, %v12025_v32, %v8928_v37  ;;  %v4076_v36 = vmin.f32 %v12108_v26, 0.0  ;;  %v8926_v53 = vadd.f32 -1.0, %v10208_v47  ;;  %v3765_v27 = vadd.f32 %v3764_v1, %v11899_v48 }
 0x227   : > { %4305 = vst [vmem:[#allocation6 + $0x18] sm:$0xff] %v4257_v58  ;;  %10221 = vpow2.f32 %v4132_v0  ;;  %v4128_v61 = vmul.f32 1.442695, %v4071_v21  ;;  %v9704_v15 = vpop.f32.mrf.mxu0  ;;  %v12125_v32 = vadd.f32 %v12008_v39, %v3923_v25  ;;  %v3926_v0 = vmul.f32 %v12002_v11, %v3773_v8 }
 0x228   : > { %v10210_v9 = vpop.eup %10209  ;;  %v4138_v55 = vmul.f32 1.442695, %v4076_v36  ;;  %v3786_v51 = vadd.f32 %v9704_v15, %v11909_v60  ;;  %v4255_v37 = vsel %vm4015_vm13, %v12031_v13, %v8926_v53  ;;  %vm4018_vm8 = vcmp.gt.f32.partialorder %v12047_v2, 0.0 }
 0x229   : > { %v8931_v54 = vadd.f32 -1.0, %v10210_v9  ;;  %10223 = vpow2.f32 %v4128_v61  ;;  %v3777_v21 = vpop.f32.mrf.mxu0  ;;  %4303 = vst [vmem:[#allocation6 + $0x8] sm:$0xff] %v4255_v37  ;;  %v4074_v34 = vmin.f32 %v12125_v32, 0.0  ;;  %v3924_v48 = vmul.f32 %v12002_v11, %v3765_v27 }
 0x22a   : > { %v10212_v41 = vpop.eup %10211  ;;  %10225 = vpow2.f32 %v4138_v55  ;;  %v12140_v47 = vadd.f32 %v12008_v39, %v3926_v0  ;;  %v3929_v58 = vmul.f32 %v12002_v11, %v3786_v51  ;;  %v3778_v8 = vadd.f32 %v3777_v21, %v11905_v44 }
 0x22b   : > { %v10214_v1 = vpop.eup %10213  ;;  %v4260_v60 = vsel %vm4020_vm4, %v12039_v29, %v8931_v54  ;;  %v8929_v13 = vadd.f32 -1.0, %v10212_v41  ;;  %v9705_v36 = vpop.f32.mrf.mxu0  ;;  %v4134_v53 = vmul.f32 1.442695, %v4074_v34  ;;  %v12144_v61 = vadd.f32 %v12008_v39, %v3924_v48  ;;  %vm12163_vm4 = vmpackc.low %vm4553_vm11, %vm4553_vm11 }
 0x22c   : > { %4308 = vst [vmem:[#allocation6 + $0x30] sm:$0xff] %v4260_v60  ;;  %v8932_v25 = vadd.f32 -1.0, %v10214_v1  ;;  %vm4021_vm9 = vcmp.gt.f32.partialorder %v12056_v22, 0.0  ;;  %v4077_v9 = vmin.f32 %v12140_v47, 0.0  ;;  %v12153_v55 = vadd.f32 %v12008_v39, %v3929_v58  ;;  %vm12183_vm11 = vmand %vm4561_vm6, %vm14295_vm7 }
 0x22d   : > { %v10216_v15 = vpop.eup %10215  ;;  %v4258_v29 = vsel %vm4018_vm8, %v12047_v2, %v8929_v13  ;;  %v3780_v27 = vpop.f32.mrf.mxu0  ;;  %v4589_v51 = vrot.slane %v12080_v62, %v12075_v18  ;;  %10227 = vpow2.f32 %v4134_v53  ;;  %vm4019_vm10 = vcmp.gt.f32.partialorder %v12064_v14, 0.0  ;;  %vm12173_vm8 = vmand %vm14294_vm14, %vm4559_vm2 }
 0x22e   : > { %4306 = vst [vmem:[#allocation6 + $0x20] sm:$0xff] %v4258_v29  ;;  %v4261_v37 = vsel %vm4021_vm9, %v12056_v22, %v8932_v25  ;;  %v8930_v44 = vadd.f32 -1.0, %v10216_v15  ;;  %vm4024_vm13 = vcmp.gt.f32.partialorder %v12073_v6, 0.0  ;;  %v4140_v0 = vmul.f32 1.442695, %v4077_v9  ;;  %vm4659_vm2 = vmpackc.low %vm12173_vm8, %vm12173_vm8 }
 0x22f   : > { %v10218_v54 = vpop.eup %10217  ;;  %4309 = vst [vmem:[#allocation6 + $0x38] sm:$0xff] %v4261_v37  ;;  %v4075_v21 = vmin.f32 %v12144_v61, 0.0  ;;  %v9708_v41 = vpop.f32.mrf.mxu0  ;;  %v4080_v1 = vmin.f32 %v12153_v55, 0.0  ;;  %v3927_v60 = vmul.f32 %v12002_v11, %v3778_v8  ;;  %v3789_v13 = vadd.f32 %v9705_v36, %v11917_v17  ;;  %vm4704_vm9 = vmpackc.low %vm12183_vm11, %vm12183_vm11 }
 0x230   : > { %v4259_v22 = vsel %vm4019_vm10, %v12064_v14, %v8930_v44  ;;  %v8935_v34 = vadd.f32 -1.0, %v10218_v54  ;;  %10229 = vpow2.f32 %v4140_v0  ;;  %v3781_v58 = vadd.f32 %v3780_v27, %v11907_v52 }
 0x231   : > { %4307 = vst [vmem:[#allocation6 + $0x28] sm:$0xff] %v4259_v22  ;;  %v3802_v25 = vadd.f32 %v9708_v41, %v11923_v46  ;;  %v3793_v53 = vpop.f32.mrf.mxu0  ;;  %v12196_v29 = vsel %vm12163_vm4, 65537, %v14335_v7  ;;  %v4136_v9 = vmul.f32 1.442695, %v4075_v21  ;;  %v4146_v37 = vmul.f32 1.442695, %v4080_v1 }
 0x232   : > { %v10220_v15 = vpop.eup %10219  ;;  %v4264_v8 = vsel %vm4024_vm13, %v12073_v6, %v8935_v34  ;;  %v12202_v52 = vadd.f32 %v12008_v39, %v3927_v60  ;;  %v3930_v17 = vmul.f32 %v12002_v11, %v3789_v13  ;;  %v3928_v46 = vmul.f32 %v12002_v11, %v3781_v58 }
 0x233   : > { %4312 = vst [vmem:[#allocation6 + $0x50] sm:$0xff] %v4264_v8  ;;  %v8933_v44 = vadd.f32 -1.0, %v10220_v15  ;;  %v9709_v6 = vpop.f32.mrf.mxu0  ;;  %vm4022_vm6 = vcmp.gt.f32.partialorder %v12085_v35, 0.0  ;;  %10231 = vpow2.f32 %v4136_v9  ;;  %v3933_v27 = vmul.f32 %v12002_v11, %v3802_v25 }
 0x234   : > { %v10222_v36 = vpop.eup %10221  ;;  %v3794_v54 = vadd.f32 %v3793_v53, %v11919_v3  ;;  %10233 = vpow2.f32 %v4146_v37  ;;  %vm4025_vm10 = vcmp.gt.f32.partialorder %v12093_v24, 0.0  ;;  %v12222_v34 = vsel %vm4659_vm2, 65537, %v14335_v7 }
 0x235   : > { %v4262_v2 = vsel %vm4022_vm6, %v12085_v35, %v8933_v44  ;;  %v8936_v21 = vadd.f32 -1.0, %v10222_v36  ;;  %v3796_v41 = vpop.f32.mrf.mxu0  ;;  %v4078_v3 = vmin.f32 %v12202_v52, 0.0  ;;  %v12226_v35 = vadd.f32 %v12008_v39, %v3930_v17 }
 0x236   : > { %v10224_v22 = vpop.eup %10223  ;;  %4310 = vst [vmem:[#allocation6 + $0x40] sm:$0xff] %v4262_v2  ;;  %v12235_v58 = vsel %vm4704_vm9, 65537, %v14335_v7  ;;  %v12238_v48 = vadd.f32 %v12008_v39, %v3928_v46  ;;  %vm4023_vm13 = vcmp.gt.f32.partialorder %v12101_v38, 0.0  ;;  %v12244_v53 = vadd.f32 %v12008_v39, %v3933_v27  ;;  %v4356_v46 = vld [vmem:[#allocation6 + $0x30] ss:$2 sm:$0xff] }
 0x237   : > { %v10226_v1 = vpop.eup %10225  ;;  %v4265_v60 = vsel %vm4025_vm10, %v12093_v24, %v8936_v21  ;;  %v8934_v13 = vadd.f32 -1.0, %v10224_v22  ;;  %v12240_v25 = vpop.f32.mrf.mxu0  ;;  %v3931_v24 = vmul.f32 %v12002_v11, %v3794_v54  ;;  %v3805_v15 = vadd.f32 %v9709_v6, %v11925_v40  ;;  %v4350_v40 = vld [vmem:[#allocation6] ss:$2 sm:$0xff]  ;;  %v4374_v6 = vld [vmem:[#allocation6 + $0x1] ss:$2 sm:$0xff] }
 0x238   : > { %4313 = vst [vmem:[#allocation6 + $0x58] sm:$0xff] %v4265_v60  ;;  %v8939_v8 = vadd.f32 -1.0, %v10226_v1  ;;  %v4142_v9 = vmul.f32 1.442695, %v4078_v3  ;;  %v3797_v37 = vadd.f32 %v3796_v41, %v11921_v23  ;;  %vm4028_vm4 = vcmp.gt.f32.partialorder %v12108_v26, 0.0 }
 0x239   : > { %v4263_v14 = vsel %vm4023_vm13, %v12101_v38, %v8934_v13  ;;  %v3809_v44 = vpop.f32.mrf.mxu0  ;;  %v4081_v36 = vmin.f32 %v12226_v35, 0.0  ;;  %vm4026_vm8 = vcmp.gt.f32.partialorder %v12125_v32, 0.0  ;;  %v4079_v23 = vmin.f32 %v12238_v48, 0.0  ;;  %v4352_v22 = vld [vmem:[#allocation6 + $0x10] ss:$2 sm:$0xff] }
 0x23a   : > { %4311 = vst [vmem:[#allocation6 + $0x48] sm:$0xff] %v4263_v14  ;;  %v10228_v27 = vpop.eup %10227  ;;  %v4268_v38 = vsel %vm4028_vm4, %v12108_v26, %v8939_v8  ;;  %10235 = vpow2.f32 %v4142_v9  ;;  %vm4029_vm11 = vcmp.gt.f32.partialorder %v12140_v47, 0.0  ;;  %v4084_v41 = vmin.f32 %v12244_v53, 0.0  ;;  %v4376_v3 = vld [vmem:[#allocation6 + $0x11] ss:$2 sm:$0xff] }
 0x23b   : > { %v12259_v54 = vpop.f32.mrf.mxu0  ;;  %4316 = vst [vmem:[#allocation6 + $0x70] sm:$0xff] %v4268_v38  ;;  %v8937_v2 = vadd.f32 -1.0, %v10228_v27  ;;  %v4148_v21 = vmul.f32 1.442695, %v4081_v36  ;;  %v4144_v1 = vmul.f32 1.442695, %v4079_v23  ;;  %v12264_v60 = vadd.f32 %v12008_v39, %v3931_v24 }
 0x23c   : > { %v3934_v26 = vmul.f32 %v12002_v11, %v3805_v15  ;;  %v3932_v13 = vmul.f32 %v12002_v11, %v3797_v37  ;;  %v4397_v9 = vmax.f32 %v4350_v40, %v4374_v6  ;;  %v4412_v27 = vld [vmem:[#allocation6 + $0x12] ss:$2 sm:$0xff]  ;;  %v4154_v38 = vmul.f32 1.442695, %v4084_v41  ;;  %v4380_v23 = vld [vmem:[#allocation6 + $0x31] ss:$2 sm:$0xff] }
 0x23d   : > { %v12268_v14 = vpop.f32.mrf.mxu0  ;;  %v10230_v8 = vpop.eup %10229  ;;  %v4266_v36 = vsel %vm4026_vm8, %v12125_v32, %v8937_v2  ;;  %10237 = vpow2.f32 %v4148_v21  ;;  %vm4027_vm2 = vcmp.gt.f32.partialorder %v12144_v61, 0.0  ;;  %v4398_v40 = vmax.f32 %v4352_v22, %v4376_v3  ;;  %v4354_v6 = vld [vmem:[#allocation6 + $0x20] ss:$2 sm:$0xff]  ;;  %v4378_v2 = vld [vmem:[#allocation6 + $0x21] ss:$2 sm:$0xff] }
 0x23e   : > { %4314 = vst [vmem:[#allocation6 + $0x60] sm:$0xff] %v4266_v36  ;;  %v8940_v24 = vadd.f32 -1.0, %v10230_v8  ;;  %10239 = vpow2.f32 %v4144_v1  ;;  %v12275_v15 = vadd.f32 %v12008_v39, %v3934_v26  ;;  %vm12282_vm6 = vcmp.ne.s16.totalorder %v4589_v51, 0  ;;  %v4410_v1 = vld [vmem:[#allocation6 + $0x2] ss:$2 sm:$0xff] }
 0x23f   : > { %v12277_v37 = vpop.f32.mrf.mxu0  ;;  %vm4032_vm9 = vcmp.gt.f32.partialorder %v12153_v55, 0.0  ;;  %10241 = vpow2.f32 %v4154_v38  ;;  %v4082_v21 = vmin.f32 %v12264_v60, 0.0  ;;  %v4416_v26 = vld [vmem:[#allocation6 + $0x32] ss:$2 sm:$0xff]  ;;  %v12292_v62 = vadd.f32 %v12008_v39, %v3932_v13  ;;  %v4384_v7 = vld [vmem:[#allocation6 + $0x51] ss:$2 sm:$0xff] }
 0x240   : > { %v10232_v41 = vpop.eup %10231  ;;  %v4360_v8 = vld [vmem:[#allocation6 + $0x50] ss:$2 sm:$0xff]  ;;  %v4269_v22 = vsel %vm4029_vm11, %v12140_v47, %v8940_v24  ;;  %v3818_v51 = vadd.f32 %v12240_v25, %v11931_v5  ;;  %v3810_v3 = vadd.f32 %v3809_v44, %v11927_v30  ;;  %v4433_v17 = vmax.f32 %v4397_v9, %v4410_v1 }
 0x241   : > { %v12297_v36 = vpop.f32.mrf.mxu0  ;;  %v10234_v38 = vpop.eup %10233  ;;  %v4400_v0 = vmax.f32 %v4356_v46, %v4380_v23  ;;  %4317 = vst [vmem:[#allocation6 + $0x78] sm:$0xff] %v4269_v22  ;;  %v8938_v16 = vadd.f32 -1.0, %v10232_v41  ;;  %v4150_v59 = vmul.f32 1.442695, %v4082_v21  ;;  %v4434_v19 = vmax.f32 %v4398_v40, %v4412_v27  ;;  %v4358_v47 = vld [vmem:[#allocation6 + $0x40] ss:$2 sm:$0xff] }
 0x242   : > { %v4399_v50 = vmax.f32 %v4354_v6, %v4378_v2  ;;  %v4382_v24 = vld [vmem:[#allocation6 + $0x41] ss:$2 sm:$0xff]  ;;  %v8943_v13 = vadd.f32 -1.0, %v10234_v38  ;;  %v4085_v56 = vmin.f32 %v12275_v15, 0.0  ;;  %v4083_v25 = vmin.f32 %v12292_v62, 0.0 }
 0x243   : > { %v12300_v49 = vpop.f32.mrf.mxu0  ;;  %v4436_v5 = vmax.f32 %v4400_v0, %v4416_v26  ;;  %v4267_v30 = vsel %vm4027_vm2, %v12144_v61, %v8938_v16  ;;  %10243 = vpow2.f32 %v4150_v59  ;;  %v3937_v9 = vmul.f32 %v12002_v11, %v3818_v51  ;;  %v4414_v0 = vld [vmem:[#allocation6 + $0x22] ss:$2 sm:$0xff] }
 0x244   : > { %4315 = vst [vmem:[#allocation6 + $0x68] sm:$0xff] %v4267_v30  ;;  %v4272_v44 = vsel %vm4032_vm9, %v12153_v55, %v8943_v13  ;;  %v4156_v46 = vmul.f32 1.442695, %v4085_v56  ;;  %v3935_v27 = vmul.f32 %v12002_v11, %v3810_v3  ;;  %v4402_v40 = vmax.f32 %v4360_v8, %v4384_v7 }
 0x245   : > { %v12311_v23 = vpop.f32.mrf.mxu0  ;;  %v4401_v6 = vmax.f32 %v4358_v47, %v4382_v24  ;;  %v4420_v2 = vld [vmem:[#allocation6 + $0x52] ss:$2 sm:$0xff]  ;;  %4320 = vst [vmem:[#allocation6 + $0x90] sm:$0xff] %v4272_v44  ;;  %v4152_v16 = vmul.f32 1.442695, %v4083_v25  ;;  %v3821_v59 = vadd.f32 %v12259_v54, %v11933_v10  ;;  %v12315_v61 = vpack.c.bf16 %v4434_v19, %v4433_v17 }
 0x246   : > { %v4435_v21 = vmax.f32 %v4399_v50, %v4414_v0  ;;  %10245 = vpow2.f32 %v4156_v46  ;;  %v12318_v56 = vadd.f32 %v12008_v39, %v3937_v9  ;;  %v14344_v7 = vrot.slane %v12196_v29, %v12075_v18  ;;  %v4418_v50 = vld [vmem:[#allocation6 + $0x42] ss:$2 sm:$0xff] }
 0x247   : > { %v12320_v55 = vpop.f32.mrf.mxu0  ;;  %v10236_v41 = vpop.eup %10235  ;;  %v4438_v26 = vmax.f32 %v4402_v40, %v4420_v2  ;;  %10247 = vpow2.f32 %v4152_v16  ;;  %v12330_v10 = vadd.f32 %v12008_v39, %v3935_v27  ;;  %v14347_v17 = vrot.slane %v12222_v34, %v12075_v18 }
 0x248   : > { %vm12325_vm10 = vcmp.ne.s16.totalorder %v14344_v7, 0  ;;  %v12332_v19 = vpack.c.bf16 %v4436_v5, %v4435_v21  ;;  %v8941_v29 = vadd.f32 -1.0, %v10236_v41  ;;  %v3938_v8 = vmul.f32 %v12002_v11, %v3821_v59  ;;  %v4388_v25 = vld [vmem:[#allocation6 + $0x71] ss:$2 sm:$0xff] }
 0x249   : > { %vm12337_vm13 = vcmp.ne.s16.totalorder %v14347_v17, 0  ;;  %v4437_v22 = vmax.f32 %v4401_v6, %v4418_v50  ;;  %v14350_v51 = vrot.slane %v12235_v58, %v12075_v18  ;;  %vm4030_vm8 = vcmp.gt.f32.partialorder %v12202_v52, 0.0  ;;  %v12354_v47 = vpop.f32.mrf.mxu0 }
 0x24a   : > { %v3813_v34 = vadd.f32 %v12268_v14, %v11929_v33  ;;  %v3834_v38 = vadd.f32 %v12277_v37, %v11945_v45  ;;  %v10238_v24 = vpop.eup %10237  ;;  %v12359_v13 = vsel %vm12282_vm6, %v12315_v61, 0  ;;  %vm4033_vm11 = vcmp.gt.f32.partialorder %v12226_v35, 0.0  ;;  %v4364_v37 = vld [vmem:[#allocation6 + $0x70] ss:$2 sm:$0xff] }
 0x24b   : > { %vm12345_vm4 = vcmp.ne.s16.totalorder %v14350_v51, 0  ;;  %vm4031_vm2 = vcmp.gt.f32.partialorder %v12238_v48, 0.0  ;;  %v4088_v58 = vmin.f32 %v12318_v56, 0.0  ;;  %v10240_v5 = vpop.eup %10239  ;;  %v12364_v30 = vpack.c.bf16 %v4438_v26, %v4437_v22  ;;  %v4362_v27 = vld [vmem:[#allocation6 + $0x60] ss:$2 sm:$0xff]  ;;  %v12381_v2 = vpop.f32.mrf.mxu0 }
 0x24c   : > { %vm4036_vm9 = vcmp.gt.f32.partialorder %v12244_v53, 0.0  ;;  %vm4034_vm12 = vcmp.gt.f32.partialorder %v12264_v60, 0.0  ;;  %v4086_v33 = vmin.f32 %v12330_v10, 0.0  ;;  %v10242_v45 = vpop.eup %10241  ;;  %v4270_v44 = vsel %vm4030_vm8, %v12202_v52, %v8941_v29  ;;  %v4386_v16 = vld [vmem:[#allocation6 + $0x61] ss:$2 sm:$0xff] }
 0x24d   : > { %v8944_v46 = vadd.f32 -1.0, %v10238_v24  ;;  %v12376_v9 = vadd.f32 %v12008_v39, %v3938_v8  ;;  %4318 = vst [vmem:[#allocation6 + $0x80] sm:$0xff] %v4270_v44  ;;  %v8942_v0 = vadd.f32 -1.0, %v10240_v5  ;;  %vm4037_vm5 = vcmp.gt.f32.partialorder %v12275_v15, 0.0  ;;  %v4422_v44 = vld [vmem:[#allocation6 + $0x62] ss:$2 sm:$0xff] }
 0x24e   : > { %v3936_v40 = vmul.f32 %v12002_v11, %v3813_v34  ;;  %v3941_v6 = vmul.f32 %v12002_v11, %v3834_v38  ;;  %v8947_v59 = vadd.f32 -1.0, %v10242_v45  ;;  %vm4035_vm8 = vcmp.gt.f32.partialorder %v12292_v62, 0.0  ;;  %v12410_v34 = vpop.f32.mrf.mxu0 }
 0x24f   : > { %v4273_v52 = vsel %vm4033_vm11, %v12226_v35, %v8944_v46  ;;  %v4162_v21 = vmul.f32 1.442695, %v4088_v58  ;;  %v3826_v41 = vadd.f32 %v12297_v36, %v11935_v57  ;;  %v12392_v7 = vsel %vm12282_vm6, %v12364_v30, 0 }
 0x250   : > { %v4404_v26 = vmax.f32 %v4364_v37, %v4388_v25  ;;  %4321 = vst [vmem:[#allocation6 + $0x98] sm:$0xff] %v4273_v52  ;;  %v4271_v50 = vsel %vm4031_vm2, %v12238_v48, %v8942_v0  ;;  %v4158_v17 = vmul.f32 1.442695, %v4086_v33  ;;  %v10244_v35 = vpop.eup %10243  ;;  %v4668_v29 = vsel %vm12337_vm13, %v12364_v30, 0 }
 0x251   : > { %4319 = vst [vmem:[#allocation6 + $0x88] sm:$0xff] %v4271_v50  ;;  %v4276_v57 = vsel %vm4036_vm9, %v12244_v53, %v8947_v59  ;;  %10249 = vpow2.f32 %v4162_v21  ;;  %v4089_v36 = vmin.f32 %v12376_v9, 0.0  ;;  %v4403_v8 = vmax.f32 %v4362_v27, %v4386_v16  ;;  %v12427_v59 = vpop.f32.mrf.mxu0 }
 0x252   : > { %4324 = vst [vmem:[#allocation6 + $0xb0] sm:$0xff] %v4276_v57  ;;  %v8945_v22 = vadd.f32 -1.0, %v10244_v35  ;;  %v12405_v51 = vadd.f32 %v12008_v39, %v3936_v40  ;;  %v12408_v48 = vadd.f32 %v12008_v39, %v3941_v6  ;;  %v4614_v38 = vshll.u32 %v12392_v7, 16 }
 0x253   : > { %v4713_v53 = vsel %vm12345_vm4, %v12364_v30, 0  ;;  %v4164_v24 = vmul.f32 1.442695, %v4089_v36  ;;  %v3939_v58 = vmul.f32 %v12002_v11, %v3826_v41  ;;  %v10246_v5 = vpop.eup %10245  ;;  %10251 = vpow2.f32 %v4158_v17 }
 0x254   : > { %v4274_v33 = vsel %vm4034_vm12, %v12264_v60, %v8945_v22  ;;  %v4087_v45 = vmin.f32 %v12405_v51, 0.0  ;;  %v3837_v37 = vadd.f32 %v12300_v49, %v11947_v20  ;;  %v10248_v25 = vpop.eup %10247  ;;  %v4424_v46 = vld [vmem:[#allocation6 + $0x72] ss:$2 sm:$0xff]  ;;  %v8948_v27 = vadd.f32 -1.0, %v10246_v5 }
 0x255   : > { %4322 = vst [vmem:[#allocation6 + $0xa0] sm:$0xff] %v4274_v33  ;;  %10253 = vpow2.f32 %v4164_v24  ;;  %v4092_v0 = vmin.f32 %v12408_v48, 0.0  ;;  %v12425_v40 = vadd.f32 %v12008_v39, %v3939_v58  ;;  %v4439_v6 = vmax.f32 %v4403_v8, %v4422_v44 }
 0x256   : > { %v4440_v16 = vmax.f32 %v4404_v26, %v4424_v46  ;;  %v8946_v60 = vadd.f32 -1.0, %v10248_v25  ;;  %v4160_v52 = vmul.f32 1.442695, %v4087_v45  ;;  %v4736_v21 = vshrl.u32 %v4713_v53, 16 }
 0x257   : > { %v4739_v41 = vshll.u32 %v4713_v53, 16  ;;  %v4368_v20 = vld [vmem:[#allocation6 + $0x90] ss:$2 sm:$0xff]  ;;  %v4277_v49 = vsel %vm4037_vm5, %v12275_v15, %v8948_v27  ;;  %v4170_v50 = vmul.f32 1.442695, %v4092_v0  ;;  %v3829_v8 = vadd.f32 %v12311_v23, %v11937_v31  ;;  %v12450_v31 = vpop.f32.mrf.mxu0 }
 0x258   : > { %v12432_v17 = vpack.c.bf16 %v4440_v16, %v4439_v6  ;;  %v4392_v35 = vld [vmem:[#allocation6 + $0x91] ss:$2 sm:$0xff]  ;;  %v4366_v57 = vld [vmem:[#allocation6 + $0x80] ss:$2 sm:$0xff]  ;;  %v4390_v36 = vld [vmem:[#allocation6 + $0x81] ss:$2 sm:$0xff]  ;;  %v4275_v26 = vsel %vm4035_vm8, %v12292_v62, %v8946_v60  ;;  %10255 = vpow2.f32 %v4160_v52  ;;  %v3942_v53 = vmul.f32 %v12002_v11, %v3837_v37 }
 0x259   : > { %4325 = vst [vmem:[#allocation6 + $0xb8] sm:$0xff] %v4277_v49  ;;  %v4405_v22 = vmax.f32 %v4366_v57, %v4390_v36  ;;  %4323 = vst [vmem:[#allocation6 + $0xa8] sm:$0xff] %v4275_v26  ;;  %10257 = vpow2.f32 %v4170_v50  ;;  %v4090_v15 = vmin.f32 %v12425_v40, 0.0  ;;  %v12444_v58 = vrot.slane %v4614_v38, 1  ;;  %v4426_v38 = vld [vmem:[#allocation6 + $0x82] ss:$2 sm:$0xff]  ;;  %v12474_v52 = vpop.f32.mrf.mxu0 }
 0x25a   : > { %v4618_v5 = vshrl.u32 %v12392_v7, 16  ;;  %v12447_v62 = vrot.slane %v4668_v29, 1  ;;  %vm4040_vm12 = vcmp.gt.f32.partialorder %v12318_v56, 0.0  ;;  %v12452_v23 = vrot.slane %v4736_v21, 1 }
 0x25b   : > { %v12454_v33 = vrot.slane %v4739_v41, 2  ;;  %v12459_v45 = vsel %vm12282_vm6, %v12432_v17, 0  ;;  %v4406_v37 = vmax.f32 %v4368_v20, %v4392_v35  ;;  %v4166_v44 = vmul.f32 1.442695, %v4090_v15 }
 0x25c   : > { %v4428_v25 = vld [vmem:[#allocation6 + $0x92] ss:$2 sm:$0xff]  ;;  %v4441_v7 = vmax.f32 %v4405_v22, %v4426_v38  ;;  %vm4038_vm5 = vcmp.gt.f32.partialorder %v12330_v10, 0.0  ;;  %vm4041_vm11 = vcmp.gt.f32.partialorder %v12376_v9, 0.0  ;;  %v12464_v46 = vadd.f32 %v12008_v39, %v3942_v53 }
 0x25d   : > { %v4442_v29 = vmax.f32 %v4406_v37, %v4428_v25  ;;  %v3940_v27 = vmul.f32 %v12002_v11, %v3829_v8  ;;  %v4622_v6 = vshll.u32 %v12459_v45, 16  ;;  %v4669_v16 = vsel %vm12337_vm13, %v12432_v17, 0 }
 0x25e   : > { %v10250_v0 = vpop.eup %10249  ;;  %v4714_v60 = vsel %vm12345_vm4, %v12432_v17, 0  ;;  %10259 = vpow2.f32 %v4166_v44  ;;  %v12477_v21 = vor.u32 %v4618_v5, %v12444_v58  ;;  %v3850_v50 = vadd.f32 %v12320_v55, %v11953_v43 }
 0x25f   : > { %v12479_v41 = vpack.c.bf16 %v4442_v29, %v4441_v7  ;;  %v8951_v26 = vadd.f32 -1.0, %v10250_v0  ;;  %vm4039_vm2 = vcmp.gt.f32.partialorder %v12405_v51, 0.0  ;;  %v12488_v22 = vrot.slane %v4669_v16, 1  ;;  %v12502_v7 = vpop.f32.mrf.mxu0 }
 0x260   : > { %v4372_v20 = vld [vmem:[#allocation6 + $0xb0] ss:$2 sm:$0x7f]  ;;  %v4396_v49 = vld [vmem:[#allocation6 + $0xb1] ss:$2 sm:$0x7f]  ;;  %v10252_v8 = vpop.eup %10251  ;;  %v12500_v44 = vadd.f32 %v12008_v39, %v3940_v27  ;;  %v3945_v16 = vmul.f32 %v12002_v11, %v3850_v50 }
 0x261   : > { %v4370_v36 = vld [vmem:[#allocation6 + $0xa0] ss:$2 sm:$0xff]  ;;  %v4745_v15 = vshrl.u32 %v4714_v60, 16  ;;  %v4748_v53 = vshll.u32 %v4714_v60, 16  ;;  %v4394_v5 = vld [vmem:[#allocation6 + $0xa1] ss:$2 sm:$0xff]  ;;  %v4408_v25 = vmax.f32 %v4372_v20, %v4396_v49  ;;  %v3842_v60 = vadd.f32 %v12354_v47, %v11949_v4 }
 0x262   : > { %v4093_v37 = vmin.f32 %v12464_v46, 0.0  ;;  %v10254_v38 = vpop.eup %10253  ;;  %v12491_v43 = vrot.slane %v4622_v6, 1  ;;  %v12496_v55 = vsel %vm12282_vm6, %v12479_v41, 0  ;;  %vm4044_vm9 = vcmp.gt.f32.partialorder %v12408_v48, 0.0  ;;  %v4430_v49 = vld [vmem:[#allocation6 + $0xa2] ss:$2 sm:$0xff] }
 0x263   : > { %v4432_v29 = vld [vmem:[#allocation6 + $0xb2] ss:$2 sm:$0x7f]  ;;  %v4407_v0 = vmax.f32 %v4370_v36, %v4394_v5  ;;  %v4280_v6 = vsel %vm4040_vm12, %v12318_v56, %v8951_v26  ;;  %v4715_v20 = vsel %vm12345_vm4, %v12479_v41, 0  ;;  %v8949_v27 = vadd.f32 -1.0, %v10252_v8 }
 0x264   : > { %4328 = vst [vmem:[#allocation6 + $0xd0] sm:$0xff] %v4280_v6  ;;  %v8952_v35 = vadd.f32 -1.0, %v10254_v38  ;;  %v3853_v36 = vadd.f32 %v12381_v2, %v11955_v42  ;;  %v4630_v14 = vshll.u32 %v12496_v55, 16  ;;  %v4670_v56 = vsel %vm12337_vm13, %v12479_v41, 0  ;;  %v12526_v38 = vpop.f32.mrf.mxu0 }
 0x265   : > { %v10256_v5 = vpop.eup %10255  ;;  %v4443_v50 = vmax.f32 %v4407_v0, %v4430_v49  ;;  %vm4042_vm8 = vcmp.gt.f32.partialorder %v12425_v40, 0.0  ;;  %v4172_v4 = vmul.f32 1.442695, %v4093_v37  ;;  %v4444_v26 = vmax.f32 %v4408_v25, %v4432_v29 }
 0x266   : > { %v10258_v47 = vpop.eup %10257  ;;  %v4278_v8 = vsel %vm4038_vm5, %v12330_v10, %v8949_v27  ;;  %v4281_v42 = vsel %vm4041_vm11, %v12376_v9, %v8952_v35  ;;  %v8950_v2 = vadd.f32 -1.0, %v10256_v5  ;;  %v4754_v6 = vshrl.u32 %v4715_v20, 16 }
 0x267   : > { %4326 = vst [vmem:[#allocation6 + $0xc0] sm:$0xff] %v4278_v8  ;;  %4329 = vst [vmem:[#allocation6 + $0xd8] sm:$0xff] %v4281_v42  ;;  %v8955_v0 = vadd.f32 -1.0, %v10258_v47  ;;  %10261 = vpow2.f32 %v4172_v4  ;;  %v4091_v37 = vmin.f32 %v12500_v44, 0.0  ;;  %v4757_v49 = vshll.u32 %v4715_v20, 16 }
 0x268   : > { %v12529_v25 = vpack.c.bf16 %v4444_v26, %v4443_v50  ;;  %v4279_v10 = vsel %vm4039_vm2, %v12405_v51, %v8950_v2  ;;  %v12535_v29 = vadd.f32 %v12008_v39, %v3945_v16  ;;  %v12537_v9 = vrot.slane %v4745_v15, 1  ;;  %v12551_v51 = vpop.f32.mrf.mxu0  ;;  %v12589_v2 = vld [vmem:[%s14263_s2] ss:$0 sm:$0xff] }
 0x269   : > { %v12539_v35 = vrot.slane %v4748_v53, 2  ;;  %4327 = vst [vmem:[#allocation6 + $0xc8] sm:$0xff] %v4279_v10  ;;  %v3943_v27 = vmul.f32 %v12002_v11, %v3842_v60  ;;  %v3946_v5 = vmul.f32 %v12002_v11, %v3853_v36  ;;  %v12547_v4 = vrot.slane %v4670_v56, 1 }
 0x26a   : > { %14353 = vst [vmem:[#allocation26_spill] sm:$0xff] %v12529_v25  ;;  %v3845_v39 = vadd.f32 %v12410_v34, %v11951_v28  ;;  %v12553_v53 = vrot.slane %v4630_v14, 1  ;;  %v12555_v16 = vrot.slane %v4754_v6, 1  ;;  %v4284_v11 = vsel %vm4044_vm9, %v12408_v48, %v8955_v0  ;;  %v12574_v48 = vld [vmem:[%s14264_s3] ss:$0 sm:$0xff] }
 0x26b   : > { %v10260_v15 = vpop.eup %10259  ;;  %v4168_v60 = vmul.f32 1.442695, %v4091_v37  ;;  %v12560_v36 = vrot.slane %v4757_v49, 2  ;;  %v12565_v56 = vsel %vm12282_vm6, %v12529_v25, 0  ;;  %4332 = vst [vmem:[#allocation6 + $0xf0] sm:$0xff] %v4284_v11  ;;  %v4096_v34 = vmin.f32 %v12535_v29, 0.0  ;;  %v9729_v37 = vpop.f32.mrf.mxu0 }
 0x26c   : > { %14354 = vst [vmem:[#allocation27_spill] sm:$0xff] %v12565_v56  ;;  %v8953_v28 = vadd.f32 -1.0, %v10260_v15  ;;  %v12577_v47 = vadd.f32 %v12574_v48, %v3943_v27  ;;  %v12580_v26 = vadd.f32 %v12574_v48, %v3946_v5  ;;  %vm4045_vm12 = vcmp.gt.f32.partialorder %v12464_v46, 0.0 }
 0x26d   : > { %10263 = vpow2.f32 %v4168_v60  ;;  %v4178_v42 = vmul.f32 1.442695, %v4096_v34  ;;  %v3944_v6 = vmul.f32 %v12589_v2, %v3845_v39  ;;  %v3866_v0 = vadd.f32 %v12427_v59, %v11967_v12  ;;  %v14355_v60 = vld [vmem:[#allocation16_spill] sm:$0xff] }
 0x26e   : > { %v4282_v8 = vsel %vm4042_vm8, %v12425_v40, %v8953_v28  ;;  %v4638_v49 = vshll.u32 %v12565_v56, 16  ;;  %v4671_v40 = vsel %vm12337_vm13, %v12529_v25, 0  ;;  %v4716_v10 = vsel %vm12345_vm4, %v12529_v25, 0  ;;  %v14360_v56 = vld [vmem:[#allocation17_spill] sm:$0xff] }
 0x26f   : > { %4330 = vst [vmem:[#allocation6 + $0xe0] sm:$0xff] %v4282_v8  ;;  %v4094_v27 = vmin.f32 %v12577_v47, 0.0  ;;  %10265 = vpow2.f32 %v4178_v42  ;;  %v12603_v5 = vadd.f32 %v12574_v48, %v3944_v6  ;;  %v3949_v12 = vmul.f32 %v12589_v2, %v3866_v0  ;;  %v3876_v0 = vpop.f32.mrf.mxu0 }
 0x270   : > { %v3858_v59 = vadd.f32 %v12450_v31, %v11963_v63  ;;  %v4097_v11 = vmin.f32 %v12580_v26, 0.0  ;;  %v3869_v28 = vadd.f32 %v12474_v52, %v14355_v60  ;;  %v4763_v34 = vshrl.u32 %v4716_v10, 16 }
 0x271   : > { %v4174_v15 = vmul.f32 1.442695, %v4094_v27  ;;  %v4095_v8 = vmin.f32 %v12603_v5, 0.0  ;;  %v12614_v42 = vadd.f32 %v12574_v48, %v3949_v12  ;;  %v4766_v14 = vshll.u32 %v4716_v10, 16  ;;  %v4454_v12 = vld [vmem:[#allocation6 + $0xd0] ss:$2 sm:$0xff]  ;;  %v9732_v50 = vpop.f32.mrf.mxu0 }
 0x272   : > { %v3947_v6 = vmul.f32 %v12589_v2, %v3858_v59  ;;  %v4180_v63 = vmul.f32 1.442695, %v4097_v11  ;;  %v3950_v31 = vmul.f32 %v12589_v2, %v3869_v28  ;;  %v12618_v39 = vrot.slane %v4671_v40, 1  ;;  %v14356_v59 = vld [vmem:[#allocation15_spill] sm:$0xff]  ;;  %v4478_v40 = vld [vmem:[#allocation6 + $0xd1] ss:$2 sm:$0xff] }
 0x273   : > { %10267 = vpow2.f32 %v4174_v15  ;;  %vm4043_vm5 = vcmp.gt.f32.partialorder %v12500_v44, 0.0  ;;  %v4176_v52 = vmul.f32 1.442695, %v4095_v8  ;;  %v4100_v60 = vmin.f32 %v12614_v42, 0.0 }
 0x274   : > { %v10262_v27 = vpop.eup %10261  ;;  %v12623_v20 = vadd.f32 %v12574_v48, %v3947_v6  ;;  %10269 = vpow2.f32 %v4180_v63  ;;  %v12626_v10 = vadd.f32 %v12574_v48, %v3950_v31  ;;  %v3861_v15 = vadd.f32 %v12502_v7, %v14356_v59  ;;  %v4476_v31 = vld [vmem:[#allocation6 + $0xc1] ss:$2 sm:$0xff] }
 0x275   : > { %v8956_v24 = vadd.f32 -1.0, %v10262_v27  ;;  %v12630_v11 = vrot.slane %v4638_v49, 1  ;;  %10271 = vpow2.f32 %v4176_v52  ;;  %v4186_v28 = vmul.f32 1.442695, %v4100_v60  ;;  %v4452_v49 = vld [vmem:[#allocation6 + $0xc0] ss:$2 sm:$0xff] }
 0x276   : > { %v4098_v8 = vmin.f32 %v12623_v20, 0.0  ;;  %v12633_v57 = vrot.slane %v4763_v34, 1  ;;  %v12635_v6 = vrot.slane %v4766_v14, 2  ;;  %vm4048_vm11 = vcmp.gt.f32.partialorder %v12535_v29, 0.0  ;;  %v14359_v60 = vld [vmem:[#allocation19_spill] sm:$0xff] }
 0x277   : > { %v4285_v63 = vsel %vm4045_vm12, %v12464_v46, %v8956_v24  ;;  %v4101_v7 = vmin.f32 %v12626_v10, 0.0  ;;  %10273 = vpow2.f32 %v4186_v28  ;;  %v3948_v52 = vmul.f32 %v12589_v2, %v3861_v15  ;;  %v14361_v24 = vld [vmem:[#allocation20_spill] sm:$0xff] }
 0x278   : > { %14357 = vst [vmem:[#allocation16_spill] sm:$0xff] %v12633_v57  ;;  %14358 = vst [vmem:[#allocation15_spill] sm:$0xff] %v12635_v6  ;;  %v4182_v27 = vmul.f32 1.442695, %v4098_v8  ;;  %v3882_v34 = vadd.f32 %v12526_v38, %v14359_v60  ;;  %v4500_v14 = vmax.f32 %v4454_v12, %v4478_v40  ;;  %v3874_v25 = vadd.f32 %v12551_v51, %v14360_v56  ;;  %v4514_v57 = vld [vmem:[#allocation6 + $0xd2] ss:$2 sm:$0xff]  ;;  %v3889_v38 = vpop.f32.mrf.mxu0 }
 0x279   : > { %4333 = vst [vmem:[#allocation6 + $0xf8] sm:$0xff] %v4285_v63  ;;  %v4188_v59 = vmul.f32 1.442695, %v4101_v7  ;;  %v3885_v46 = vadd.f32 %v9729_v37, %v14361_v24  ;;  %vm4046_vm2 = vcmp.gt.f32.partialorder %v12577_v47, 0.0  ;;  %v12650_v28 = vadd.f32 %v12574_v48, %v3948_v52  ;;  %v14362_v8 = vld [vmem:[#allocation18_spill] sm:$0xff] }
 0x27a   : > { %v10264_v6 = vpop.eup %10263  ;;  %10275 = vpow2.f32 %v4182_v27  ;;  %v3953_v15 = vmul.f32 %v12589_v2, %v3882_v34  ;;  %v3877_v63 = vadd.f32 %v3876_v0, %v14362_v8  ;;  %v4499_v12 = vmax.f32 %v4452_v49, %v4476_v31  ;;  %v4512_v49 = vld [vmem:[#allocation6 + $0xc2] ss:$2 sm:$0xff] }
 0x27b   : > { %v8954_v40 = vadd.f32 -1.0, %v10264_v6  ;;  %10277 = vpow2.f32 %v4188_v59  ;;  %v3951_v51 = vmul.f32 %v12589_v2, %v3874_v25  ;;  %vm4049_vm9 = vcmp.gt.f32.partialorder %v12580_v26, 0.0  ;;  %v14363_v59 = vld [vmem:[#allocation23_spill] sm:$0xff] }
 0x27c   : > { %v4099_v56 = vmin.f32 %v12650_v28, 0.0  ;;  %v12658_v37 = vadd.f32 %v12574_v48, %v3953_v15  ;;  %v3954_v7 = vmul.f32 %v12589_v2, %v3885_v46  ;;  %v10266_v27 = vpop.eup %10265  ;;  %v4536_v52 = vmax.f32 %v4500_v14, %v4514_v57  ;;  %v9733_v57 = vpop.f32.mrf.mxu0 }
 0x27d   : > { %v4283_v0 = vsel %vm4043_vm5, %v12500_v44, %v8954_v40  ;;  %vm4047_vm8 = vcmp.gt.f32.partialorder %v12603_v5, 0.0  ;;  %v12666_v6 = vadd.f32 %v12574_v48, %v3951_v51  ;;  %v3952_v25 = vmul.f32 %v12589_v2, %v3877_v63 }
 0x27e   : > { %4331 = vst [vmem:[#allocation6 + $0xe8] sm:$0xff] %v4283_v0  ;;  %v8959_v31 = vadd.f32 -1.0, %v10266_v27  ;;  %v4184_v60 = vmul.f32 1.442695, %v4099_v56  ;;  %v4104_v34 = vmin.f32 %v12658_v37, 0.0  ;;  %v3898_v24 = vadd.f32 %v9732_v50, %v14363_v59  ;;  %v3892_v0 = vpop.f32.mrf.mxu0 }
 0x27f   : > { %v4535_v14 = vmax.f32 %v4499_v12, %v4512_v49  ;;  %v4102_v46 = vmin.f32 %v12666_v6, 0.0  ;;  %v12673_v44 = vadd.f32 %v12574_v48, %v3954_v7  ;;  %v12676_v15 = vadd.f32 %v12574_v48, %v3952_v25 }
 0x280   : > { %v10268_v8 = vpop.eup %10267  ;;  %v4288_v63 = vsel %vm4048_vm11, %v12535_v29, %v8959_v31  ;;  %vm4052_vm12 = vcmp.gt.f32.partialorder %v12614_v42, 0.0  ;;  %10279 = vpow2.f32 %v4184_v60  ;;  %v4194_v40 = vmul.f32 1.442695, %v4104_v34 }
 0x281   : > { %4336 = vst [vmem:[#allocation6 + $0x110] sm:$0xff] %v4288_v63  ;;  %v8957_v50 = vadd.f32 -1.0, %v10268_v8  ;;  %vm4050_vm5 = vcmp.gt.f32.partialorder %v12623_v20, 0.0  ;;  %v4190_v12 = vmul.f32 1.442695, %v4102_v46  ;;  %v4105_v51 = vmin.f32 %v12673_v44, 0.0  ;;  %v10270_v56 = vpop.eup %10269 }
 0x282   : > { %v12684_v7 = vpack.c.bf16 %v4536_v52, %v4535_v14  ;;  %vm4053_vm14 = vcmp.gt.f32.partialorder %v12626_v10, 0.0  ;;  %10281 = vpow2.f32 %v4194_v40  ;;  %v4103_v27 = vmin.f32 %v12676_v15, 0.0  ;;  %v10272_v25 = vpop.eup %10271  ;;  %v14364_v14 = vld [vmem:[#allocation21_spill] sm:$0xff] }
 0x283   : > { %v3957_v29 = vmul.f32 %v12589_v2, %v3898_v24  ;;  %v4286_v49 = vsel %vm4046_vm2, %v12577_v47, %v8957_v50  ;;  %v8960_v31 = vadd.f32 -1.0, %v10270_v56  ;;  %10283 = vpow2.f32 %v4190_v12  ;;  %v14365_v47 = vld [vmem:[#allocation24_spill] sm:$0xff]  ;;  %v14366_v12 = vld [vmem:[#allocation22_spill] sm:$0xff] }
 0x284   : > { %v4196_v60 = vmul.f32 1.442695, %v4105_v51  ;;  %4334 = vst [vmem:[#allocation6 + $0x100] sm:$0xff] %v4286_v49  ;;  %v8958_v34 = vadd.f32 -1.0, %v10272_v25  ;;  %v4192_v52 = vmul.f32 1.442695, %v4103_v27  ;;  %v3890_v46 = vadd.f32 %v3889_v38, %v14364_v14  ;;  %v10274_v8 = vpop.eup %10273 }
 0x285   : > { %v12693_v59 = vadd.f32 %v12574_v48, %v3957_v29  ;;  %vm4597_vm11 = vsmask.f32 7424  ;;  %v4456_v24 = vld [vmem:[#allocation6 + $0xe0] ss:$2 sm:$0xff]  ;;  %v4480_v63 = vld [vmem:[#allocation6 + $0xe1] ss:$2 sm:$0xff]  ;;  %v4289_v40 = vsel %vm4049_vm9, %v12580_v26, %v8960_v31  ;;  %v3901_v50 = vadd.f32 %v9733_v57, %v14365_v47 }
 0x286   : > { %10285 = vpow2.f32 %v4196_v60  ;;  %v3893_v51 = vadd.f32 %v3892_v0, %v14366_v12  ;;  %vm4678_vm2 = vcmask 1046528   ;;  %v12704_v56 = vsel %vm12282_vm6, %v12684_v7, 0  ;;  %4337 = vst [vmem:[#allocation6 + $0x118] sm:$0xff] %v4289_v40  ;;  %v4458_v26 = vld [vmem:[#allocation6 + $0xf0] ss:$2 sm:$0xff] }
 0x287   : > { %v4287_v38 = vsel %vm4047_vm8, %v12603_v5, %v8958_v34  ;;  %v8963_v27 = vadd.f32 -1.0, %v10274_v8  ;;  %10287 = vpow2.f32 %v4192_v52  ;;  %v10276_v29 = vpop.eup %10275  ;;  %v4482_v25 = vld [vmem:[#allocation6 + $0xf1] ss:$2 sm:$0xff]  ;;  %v4501_v49 = vmax.f32 %v4456_v24, %v4480_v63  ;;  %v4516_v63 = vld [vmem:[#allocation6 + $0xe2] ss:$2 sm:$0xff] }
 0x288   : > { %4335 = vst [vmem:[#allocation6 + $0x108] sm:$0xff] %v4287_v38  ;;  %v4108_v57 = vmin.f32 %v12693_v59, 0.0  ;;  %v3955_v0 = vmul.f32 %v12589_v2, %v3890_v46  ;;  %v3958_v31 = vmul.f32 %v12589_v2, %v3901_v50  ;;  %v10278_v60 = vpop.eup %10277  ;;  %v8961_v40 = vadd.f32 -1.0, %v10276_v29 }
 0x289   : > { %v4292_v14 = vsel %vm4052_vm12, %v12614_v42, %v8963_v27  ;;  %vm4051_vm9 = vcmp.gt.f32.partialorder %v12650_v28, 0.0  ;;  %v3956_v5 = vmul.f32 %v12589_v2, %v3893_v51  ;;  %v8964_v34 = vadd.f32 -1.0, %v10278_v60 }
 0x28a   : > { %4340 = vst [vmem:[#allocation6 + $0x130] sm:$0xff] %v4292_v14  ;;  %v4202_v52 = vmul.f32 1.442695, %v4108_v57  ;;  %v12718_v8 = vadd.f32 %v12574_v48, %v3955_v0  ;;  %v12721_v46 = vadd.f32 %v12574_v48, %v3958_v31  ;;  %v4502_v24 = vmax.f32 %v4458_v26, %v4482_v25 }
 0x28b   : > { %v4290_v42 = vsel %vm4050_vm5, %v12623_v20, %v8961_v40  ;;  %vm4056_vm8 = vcmp.gt.f32.partialorder %v12658_v37, 0.0  ;;  %vm4054_vm12 = vcmp.gt.f32.partialorder %v12666_v6, 0.0  ;;  %v4537_v2 = vmax.f32 %v4501_v49, %v4516_v63  ;;  %v4518_v47 = vld [vmem:[#allocation6 + $0xf2] ss:$2 sm:$0xff] }
 0x28c   : > { %4338 = vst [vmem:[#allocation6 + $0x120] sm:$0xff] %v4290_v42  ;;  %v4293_v50 = vsel %vm4053_vm14, %v12626_v10, %v8964_v34  ;;  %10289 = vpow2.f32 %v4202_v52  ;;  %v4106_v12 = vmin.f32 %v12718_v8, 0.0  ;;  %v4538_v51 = vmax.f32 %v4502_v24, %v4518_v47 }
 0x28d   : > { %4341 = vst [vmem:[#allocation6 + $0x138] sm:$0xff] %v4293_v50  ;;  %vm4057_vm7 = vcmp.gt.f32.partialorder %v12673_v44, 0.0  ;;  %v4109_v20 = vmin.f32 %v12721_v46, 0.0  ;;  %v12735_v38 = vadd.f32 %v12574_v48, %v3956_v5  ;;  %v4576_v27 = vsel %vm12325_vm10, %v12315_v61, 0  ;;  %v10280_v29 = vpop.eup %10279  ;;  %v4462_v57 = vld [vmem:[#allocation6 + $0x110] ss:$2 sm:$0xff] }
 0x28e   : > { %v14367_v10 = vshrl.u32 %v12459_v45, 16  ;;  %v14368_v25 = vshrl.u32 %v12496_v55, 16  ;;  %v4486_v0 = vld [vmem:[#allocation6 + $0x111] ss:$2 sm:$0xff]  ;;  %vm4055_vm14 = vcmp.gt.f32.partialorder %v12676_v15, 0.0  ;;  %v4625_v31 = vsel %vm4597_vm11, %v12477_v21, %v12491_v43 }
 0x28f   : > { %v4198_v48 = vmul.f32 1.442695, %v4106_v12  ;;  %v12754_v60 = vpack.c.bf16 %v4538_v51, %v4537_v2  ;;  %v4460_v14 = vld [vmem:[#allocation6 + $0x100] ss:$2 sm:$0xff]  ;;  %v4484_v45 = vld [vmem:[#allocation6 + $0x101] ss:$2 sm:$0xff]  ;;  %v12763_v55 = vor.u32 %v12454_v33, %v12452_v23  ;;  %v12768_v5 = vsel %vm4678_vm2, %v12447_v62, %v12488_v22  ;;  %v10282_v34 = vpop.eup %10281 }
 0x290   : > { %v12743_v26 = vor.u32 %v14367_v10, %v12491_v43  ;;  %v12748_v49 = vor.u32 %v14368_v25, %v12553_v53  ;;  %v12759_v40 = vsel %vm12282_vm6, %v12332_v19, 0  ;;  %v4503_v21 = vmax.f32 %v4460_v14, %v4484_v45  ;;  %v10284_v24 = vpop.eup %10283  ;;  %v4520_v47 = vld [vmem:[#allocation6 + $0x102] ss:$2 sm:$0xff] }
 0x291   : > { %v8962_v43 = vadd.f32 -1.0, %v10280_v29  ;;  %10291 = vpow2.f32 %v4198_v48  ;;  %v4204_v52 = vmul.f32 1.442695, %v4109_v20  ;;  %v4504_v63 = vmax.f32 %v4462_v57, %v4486_v0 }
 0x292   : > { %v8967_v42 = vadd.f32 -1.0, %v10282_v34  ;;  %v4107_v2 = vmin.f32 %v12735_v38, 0.0  ;;  %v14369_v23 = vsel %vm12325_vm10, %v12364_v30, 0  ;;  %v8965_v12 = vadd.f32 -1.0, %v10284_v24  ;;  %v14370_v34 = vld [vmem:[#allocation10_spill] sm:$0xff] }
 0x293   : > { %v12775_v33 = vadd.bf16 %v4625_v31, %v14369_v23  ;;  %v4291_v50 = vsel %vm4051_vm9, %v12650_v28, %v8962_v43  ;;  %10293 = vpow2.f32 %v4204_v52  ;;  %v12782_v51 = vor.u32 %v12539_v35, %v12537_v9  ;;  %v10286_v20 = vpop.eup %10285  ;;  %v4522_v29 = vld [vmem:[#allocation6 + $0x112] ss:$2 sm:$0xff] }
 0x294   : > { %4339 = vst [vmem:[#allocation6 + $0x128] sm:$0xff] %v4291_v50  ;;  %v4296_v10 = vsel %vm4056_vm8, %v12658_v37, %v8967_v42  ;;  %vm4060_vm5 = vcmp.gt.f32.partialorder %v12693_v59, 0.0  ;;  %v4200_v25 = vmul.f32 1.442695, %v4107_v2  ;;  %v4601_v57 = vshll.u32 %v12359_v13, 16  ;;  %v10288_v0 = vpop.eup %10287 }
 0x295   : > { %v4606_v28 = vshll.u32 %v12759_v40, 16  ;;  %v4539_v48 = vmax.f32 %v4503_v21, %v4520_v47  ;;  %v4540_v31 = vmax.f32 %v4504_v63, %v4522_v29  ;;  %v4466_v14 = vld [vmem:[#allocation6 + $0x130] ss:$2 sm:$0xff]  ;;  %v4490_v9 = vld [vmem:[#allocation6 + $0x131] ss:$2 sm:$0xff]  ;;  %4344 = vst [vmem:[#allocation6 + $0x150] sm:$0xff] %v4296_v10  ;;  %v4294_v35 = vsel %vm4054_vm12, %v12666_v6, %v8965_v12 }
 0x296   : > { %v8968_v45 = vadd.f32 -1.0, %v10286_v20  ;;  %4342 = vst [vmem:[#allocation6 + $0x140] sm:$0xff] %v4294_v35  ;;  %v8966_v37 = vadd.f32 -1.0, %v10288_v0  ;;  %10295 = vpow2.f32 %v4200_v25  ;;  %vm4564_vm9 = vcmp.ge.s32.totalorder %v14370_v34, 100 }
 0x297   : > { %vm4565_vm8 = vcmp.lt.s32.totalorder %v14370_v34, 125  ;;  %v4599_v43 = vshrl.u32 %v12359_v13, 16  ;;  %v4603_v52 = vrot.slane %v4601_v57, 1  ;;  %v12796_v21 = vpack.c.bf16 %v4540_v31, %v4539_v48 }
 0x298   : > { %v4297_v24 = vsel %vm4057_vm7, %v12673_v44, %v8968_v45  ;;  %v4608_v63 = vrot.slane %v4606_v28, 1  ;;  %v4666_v6 = vsel %vm12337_vm13, %v12315_v61, 0  ;;  %v4506_v2 = vmax.f32 %v4466_v14, %v4490_v9 }
 0x299   : > { %4345 = vst [vmem:[#allocation6 + $0x158] sm:$0xff] %v4297_v24  ;;  %v4295_v13 = vsel %vm4055_vm14, %v12676_v15, %v8966_v37  ;;  %vm4058_vm12 = vcmp.gt.f32.partialorder %v12718_v8, 0.0  ;;  %v4610_v23 = vshrl.u32 %v12759_v40, 16  ;;  %v5031_v44 = vsel %vm12282_vm6, %v12796_v21, 0  ;;  %v10290_v20 = vpop.eup %10289 }
 0x29a   : > { %v5131_v47 = vsel %vm12345_vm4, %v12796_v21, 0  ;;  %4343 = vst [vmem:[#allocation6 + $0x148] sm:$0xff] %v4295_v13  ;;  %v4604_v50 = vor.u32 %v4603_v52, %v4599_v43  ;;  %v4667_v12 = vsel %vm12337_vm13, %v12332_v19, 0  ;;  %v5051_v15 = vshll.u32 %v5031_v44, 16 }
 0x29b   : > { %v5096_v40 = vsel %vm12337_vm13, %v12796_v21, 0  ;;  %v5153_v29 = vshrl.u32 %v5131_v47, 16  ;;  %v4679_v10 = vrot.slane %v4666_v6, 1  ;;  %v5156_v25 = vshll.u32 %v5131_v47, 16  ;;  %v4464_v57 = vld [vmem:[#allocation6 + $0x120] ss:$2 sm:$0xff] }
 0x29c   : > { %v4488_v28 = vld [vmem:[#allocation6 + $0x121] ss:$2 sm:$0xff]  ;;  %v8971_v0 = vadd.f32 -1.0, %v10290_v20  ;;  %vm4061_vm7 = vcmp.gt.f32.partialorder %v12721_v46, 0.0  ;;  %v4609_v48 = vsel %vm4597_vm11, %v4604_v50, %v4608_v63  ;;  %v4612_v31 = vor.u32 %v4610_v23, %v4608_v63  ;;  %v4524_v43 = vld [vmem:[#allocation6 + $0x122] ss:$2 sm:$0xff] }
 0x29d   : > { %v12829_v9 = vrot.slane %v5051_v15, 1  ;;  %v5055_v35 = vshrl.u32 %v5031_v44, 16  ;;  %v4505_v45 = vmax.f32 %v4464_v57, %v4488_v28  ;;  %v12831_v37 = vrot.slane %v5096_v40, 1  ;;  %v4526_v52 = vld [vmem:[#allocation6 + $0x132] ss:$2 sm:$0xff] }
 0x29e   : > { %v4300_v24 = vsel %vm4060_vm5, %v12693_v59, %v8971_v0  ;;  %vm4059_vm14 = vcmp.gt.f32.partialorder %v12735_v38, 0.0  ;;  %v4617_v63 = vsel %vm4597_vm11, %v4612_v31, %v12444_v58  ;;  %v4680_v6 = vrot.slane %v4667_v12, 1  ;;  %v10292_v13 = vpop.eup %10291  ;;  %vm12877_vm5 = vmand %vm4564_vm9, %vm4565_vm8 }
 0x29f   : > { %v12839_v23 = vrot.slane %v5153_v29, 1  ;;  %v4541_v47 = vmax.f32 %v4505_v45, %v4524_v43  ;;  %v4542_v44 = vmax.f32 %v4506_v2, %v4526_v52  ;;  %4348 = vst [vmem:[#allocation6 + $0x170] sm:$0xff] %v4300_v24  ;;  %v12845_v50 = vadd.bf16 %v4609_v48, %v4576_v27  ;;  %vm4785_vm9 = vmpackc.low %vm12877_vm5, %vm12877_vm5 }
 0x2a0   : > { %v12848_v59 = vor.u32 %v5055_v35, %v12829_v9  ;;  %v12850_v20 = vrot.slane %v5156_v25, 2  ;;  %v4470_v15 = vld [vmem:[#allocation6 + $0x150] ss:$2 sm:$0xff]  ;;  %v4494_v58 = vld [vmem:[#allocation6 + $0x151] ss:$2 sm:$0xff]  ;;  %v8969_v12 = vadd.f32 -1.0, %v10292_v13  ;;  %v10294_v29 = vpop.eup %10293  ;;  %v12861_v0 = vsel %vm4678_vm2, %v4679_v10, %v4680_v6 }
 0x2a1   : > { %v14371_v40 = vsel %vm12325_vm10, %v12332_v19, 0  ;;  %v12858_v57 = vpack.c.bf16 %v4542_v44, %v4541_v47  ;;  %v4468_v28 = vld [vmem:[#allocation6 + $0x140] ss:$2 sm:$0xff]  ;;  %v4492_v27 = vld [vmem:[#allocation6 + $0x141] ss:$2 sm:$0xff]  ;;  %v12865_v25 = vsel %vm4678_vm2, %v4680_v6, %v12447_v62  ;;  %v4711_v48 = vsel %vm12345_vm4, %v12315_v61, 0 }
 0x2a2   : > { %v12856_v2 = vadd.bf16 %v4617_v63, %v14371_v40  ;;  %v4508_v31 = vmax.f32 %v4470_v15, %v4494_v58  ;;  %v4507_v35 = vmax.f32 %v4468_v28, %v4492_v27  ;;  %v4298_v45 = vsel %vm4058_vm12, %v12718_v8, %v8969_v12  ;;  %v4528_v12 = vld [vmem:[#allocation6 + $0x142] ss:$2 sm:$0xff] }
 0x2a3   : > { %v8972_v43 = vadd.f32 -1.0, %v10294_v29  ;;  %v5032_v62 = vsel %vm12282_vm6, %v12858_v57, 0  ;;  %v5097_v52 = vsel %vm12337_vm13, %v12858_v57, 0  ;;  %v5132_v8 = vsel %vm12345_vm4, %v12858_v57, 0  ;;  %4346 = vst [vmem:[#allocation6 + $0x160] sm:$0xff] %v4298_v45  ;;  %v10296_v63 = vpop.eup %10295 }
 0x2a4   : > { %v5059_v6 = vshll.u32 %v5032_v62, 16  ;;  %v5162_v13 = vshrl.u32 %v5132_v8, 16  ;;  %v4712_v44 = vsel %vm12345_vm4, %v12332_v19, 0  ;;  %v5063_v58 = vshrl.u32 %v5032_v62, 16 }
 0x2a5   : > { %v4301_v40 = vsel %vm4061_vm7, %v12721_v46, %v8972_v43  ;;  %v8970_v29 = vadd.f32 -1.0, %v10296_v63  ;;  %v12906_v28 = vrot.slane %v5097_v52, 1  ;;  %v5165_v27 = vshll.u32 %v5132_v8, 16 }
 0x2a6   : > { %v4543_v45 = vmax.f32 %v4507_v35, %v4528_v12  ;;  %4349 = vst [vmem:[#allocation6 + $0x178] sm:$0xff] %v4301_v40  ;;  %v4719_v14 = vshrl.u32 %v4711_v48, 16  ;;  %v12908_v42 = vrot.slane %v5059_v6, 1  ;;  %v4722_v15 = vshll.u32 %v4711_v48, 16 }
 0x2a7   : > { %v4299_v62 = vsel %vm4059_vm14, %v12735_v38, %v8970_v29  ;;  %v4727_v47 = vshrl.u32 %v4712_v44, 16  ;;  %v12913_v46 = vrot.slane %v5162_v13, 1  ;;  %v4730_v10 = vshll.u32 %v4712_v44, 16 }
 0x2a8   : > { %4347 = vst [vmem:[#allocation6 + $0x168] sm:$0xff] %v4299_v62  ;;  %v4721_v43 = vrot.slane %v4719_v14, 1  ;;  %v14374_v63 = vmov 0   ;;  %vm4717_vm8 = vsmask.f32 6400  ;;  %v4724_v8 = vrot.slane %v4722_v15, 2 }
 0x2a9   : > { %v4786_v52 = vsel %vm4785_vm9, 65537, %v14374_v63  ;;  %v4729_v35 = vrot.slane %v4727_v47, 1  ;;  %v12917_v6 = vrot.slane %v5165_v27, 2  ;;  %v4732_v24 = vrot.slane %v4730_v10, 2 }
 0x2aa   : > { %v4790_v12 = vrot.slane %v4786_v52, %v12075_v18  ;;  %v4530_v40 = vld [vmem:[#allocation6 + $0x152] ss:$2 sm:$0xff]  ;;  %vm4804_vm12 = vcmask 1045504   ;;  %v4698_v38 = vadd.bf16 %v12768_v5, %v12775_v33  ;;  %v4725_v13 = vor.u32 %v4724_v8, %v4721_v43 }
 0x2ab   : > { %v4544_v48 = vmax.f32 %v4508_v31, %v4530_v40  ;;  %v4752_v47 = vsel %vm4717_vm8, %v12763_v55, %v12782_v51  ;;  %v4733_v44 = vor.u32 %v4732_v24, %v4729_v35  ;;  %v12938_v33 = vor.u32 %v5063_v58, %v12908_v42 }
 0x2ac   : > { %vm12921_vm7 = vcmp.ne.s16.totalorder %v4790_v12, 0  ;;  %v4779_v24 = vadd.bf16 %v4752_v47, %v4698_v38  ;;  %v14377_v47 = vadd.bf16 %v12861_v0, %v12845_v50  ;;  %vm4880_vm14 = vsmask.f32 1280 }
 0x2ad   : > { %v4792_v15 = vsel %vm12921_vm7, %v12315_v61, 0  ;;  %v4793_v29 = vsel %vm12921_vm7, %v12332_v19, 0  ;;  %v4794_v5 = vsel %vm12921_vm7, %v12364_v30, 0  ;;  %v12940_v31 = vpack.c.bf16 %v4544_v48, %v4543_v45  ;;  %v4474_v27 = vld [vmem:[#allocation6 + $0x170] ss:$2 sm:$0x7f] }
 0x2ae   : > { %v4498_v62 = vld [vmem:[#allocation6 + $0x171] ss:$2 sm:$0x7f]  ;;  %v4633_v61 = vsel %vm4597_vm11, %v12743_v26, %v12553_v53  ;;  %v4734_v10 = vsel %vm4717_vm8, %v4725_v13, %v4733_v44  ;;  %v4743_v19 = vsel %vm4717_vm8, %v4733_v44, %v12763_v55  ;;  %v12951_v30 = vsel %vm4678_vm2, %v12488_v22, %v12547_v4  ;;  %v4534_v48 = vld [vmem:[#allocation6 + $0x172] ss:$2 sm:$0x7f] }
 0x2af   : > { %v4510_v43 = vmax.f32 %v4474_v27, %v4498_v62  ;;  %v5033_v58 = vsel %vm12282_vm6, %v12940_v31, 0  ;;  %v5098_v45 = vsel %vm12337_vm13, %v12940_v31, 0  ;;  %v5133_v53 = vsel %vm12345_vm4, %v12940_v31, 0  ;;  %v4472_v26 = vld [vmem:[#allocation6 + $0x160] ss:$2 sm:$0xff] }
 0x2b0   : > { %v4805_v52 = vrot.slane %v4792_v15, 2  ;;  %v5067_v22 = vshll.u32 %v5033_v58, 16  ;;  %v5071_v8 = vshrl.u32 %v5033_v58, 16  ;;  %v5171_v35 = vshrl.u32 %v5133_v53, 16  ;;  %v4496_v12 = vld [vmem:[#allocation6 + $0x161] ss:$2 sm:$0xff] }
 0x2b1   : > { %v12965_v40 = vrot.slane %v5098_v45, 1  ;;  %v5174_v38 = vshll.u32 %v5133_v53, 16  ;;  %v4509_v13 = vmax.f32 %v4472_v26, %v4496_v12  ;;  %v4777_v44 = vadd.bf16 %v4734_v10, %v14377_v47  ;;  %v4532_v62 = vld [vmem:[#allocation6 + $0x162] ss:$2 sm:$0xff] }
 0x2b2   : > { %v12970_v27 = vrot.slane %v5067_v22, 1  ;;  %v4546_v15 = vmax.f32 %v4510_v43, %v4534_v48  ;;  %v14378_v55 = vadd.bf16 %v12865_v25, %v12856_v2  ;;  %v4806_v58 = vrot.slane %v4793_v29, 2 }
 0x2b3   : > { %v12975_v63 = vrot.slane %v5171_v35, 1  ;;  %v4545_v45 = vmax.f32 %v4509_v13, %v4532_v62  ;;  %v4808_v34 = vrot.slane %v4794_v5, 2  ;;  %v4795_v53 = vsel %vm12921_vm7, %v12432_v17, 0 }
 0x2b4   : > { %v4778_v18 = vadd.bf16 %v4743_v19, %v14378_v55  ;;  %v12980_v26 = vrot.slane %v5174_v38, 2  ;;  %v4807_v50 = vsel %vm4804_vm12, %v4805_v52, %v4806_v58  ;;  %v12983_v0 = vrot.slane %v4795_v53, 2 }
 0x2b5   : > { %v14379_v2 = vsel %vm12325_vm10, %v12432_v17, 0  ;;  %v12990_v29 = vor.u32 %v5071_v8, %v12970_v27  ;;  %v12992_v43 = vpack.c.bf16 %v4546_v15, %v4545_v45  ;;  %v4809_v5 = vsel %vm4804_vm12, %v4806_v58, %v4808_v34 }
 0x2b6   : > { %v4654_v25 = vadd.bf16 %v4633_v61, %v14379_v2  ;;  %v4822_v10 = vadd.bf16 %v4807_v50, %v4777_v44  ;;  %vm4881_vm5 = vsmask.f32 5392  ;;  %v4823_v19 = vadd.bf16 %v4809_v5, %v4778_v18 }
 0x2b7   : > { %14380 = vst [vmem:[#allocation19_spill] sm:$0xff] %v12992_v43  ;;  %v4811_v52 = vsel %vm4804_vm12, %v4808_v34, %v12983_v0  ;;  %v13000_v17 = vor.u32 %v12560_v36, %v12555_v16  ;;  %v13005_v61 = vsel %vm12282_vm6, %v12992_v43, 0  ;;  %v5099_v22 = vsel %vm12337_vm13, %v12992_v43, 0  ;;  %vm13028_vm9 = vmor %vm4880_vm14, %vm4881_vm5 }
 0x2b8   : > { %v4699_v55 = vadd.bf16 %v12951_v30, %v4654_v25  ;;  %14381 = vst [vmem:[#allocation17_spill] sm:$0xff] %v13005_v61  ;;  %v5134_v18 = vsel %vm12345_vm4, %v12992_v43, 0  ;;  %v4796_v34 = vsel %vm12921_vm7, %v12479_v41, 0  ;;  %v5075_v16 = vshll.u32 %v13005_v61, 16 }
 0x2b9   : > { %v13018_v30 = vrot.slane %v5099_v22, 1  ;;  %v5180_v8 = vshrl.u32 %v5134_v18, 16  ;;  %v5183_v35 = vshll.u32 %v5134_v18, 16  ;;  %v8973_v12 = vcombine.low %v4822_v10, %v4822_v10 }
 0x2ba   : > { %v8974_v38 = vcombine.high %v4822_v10, %v4822_v10  ;;  %v8975_v48 = vcombine.low %v4823_v19, %v4823_v19  ;;  %v13020_v13 = vrot.slane %v5075_v16, 1  ;;  %v4824_v44 = vadd.bf16 %v4811_v52, %v4779_v24 }
 0x2bb   : > { %v13022_v47 = vrot.slane %v5180_v8, 1  ;;  %v8976_v15 = vcombine.high %v4823_v19, %v4823_v19  ;;  %v13024_v62 = vrot.slane %v5183_v35, 2  ;;  %4867 = vst [vmem:[#allocation3] sm:$0xf] %v8973_v12  ;;  %v4884_v58 = vshrl.u32 %v8973_v12, 16 }
 0x2bc   : > { %4868 = vst [vmem:[#allocation3 + $0x8] sm:$0xf] %v8974_v38  ;;  %v4887_v45 = vshll.u32 %v8973_v12, 16  ;;  %v4893_v53 = vshrl.u32 %v8974_v38, 16  ;;  %4869 = vst [vmem:[#allocation3 + $0x10] sm:$0xf] %v8975_v48  ;;  %v8977_v5 = vcombine.low %v4824_v44, %v4824_v44  ;;  %v5062_v54 = vsel %vm4597_vm11, %v12848_v59, %v12908_v42 }
 0x2bd   : > { %14382 = vst [vmem:[#allocation20_spill] sm:$0xff] %v13022_v47  ;;  %14383 = vst [vmem:[#allocation18_spill] sm:$0xff] %v13024_v62  ;;  %v4896_v50 = vshll.u32 %v8974_v38, 16  ;;  %v4903_v2 = vshrl.u32 %v8975_v48, 16  ;;  %v4906_v25 = vshll.u32 %v8975_v48, 16  ;;  %v4886_v10 = vrot.slane %v4884_v58, 6 }
 0x2be   : > { %4870 = vst [vmem:[#allocation3 + $0x18] sm:$0xf] %v8976_v15  ;;  %v4889_v22 = vrot.slane %v4887_v45, 7  ;;  %v4895_v18 = vrot.slane %v4893_v53, 6  ;;  %v4913_v16 = vshrl.u32 %v8976_v15, 16  ;;  %v4916_v52 = vshll.u32 %v8976_v15, 16 }
 0x2bf   : > { %v4898_v8 = vrot.slane %v4896_v50, 7  ;;  %v4905_v24 = vrot.slane %v4903_v2, 6  ;;  %v4908_v19 = vrot.slane %v4906_v25, 7  ;;  %4871 = vst [vmem:[#allocation3 + $0x20] sm:$0xf] %v8977_v5  ;;  %v4923_v61 = vshrl.u32 %v8977_v5, 16 }
 0x2c0   : > { %v4890_v35 = vor.u32 %v4889_v22, %v4886_v10  ;;  %v4915_v36 = vrot.slane %v4913_v16, 6  ;;  %v4926_v12 = vshll.u32 %v8977_v5, 16  ;;  %v4918_v45 = vrot.slane %v4916_v52, 7  ;;  %v14400_v14 = vld [vmem:[#allocation17_spill] sm:$0xff] }
 0x2c1   : > { %v4899_v48 = vor.u32 %v4898_v8, %v4895_v18  ;;  %v4909_v58 = vor.u32 %v4908_v19, %v4905_v24  ;;  %v4761_v53 = vsel %vm4717_vm8, %v12782_v51, %v13000_v17  ;;  %v4925_v15 = vrot.slane %v4923_v61, 6 }
 0x2c2   : > { %v4891_v50 = vrot.slane %v4890_v35, 4  ;;  %v4928_v2 = vrot.slane %v4926_v12, 7  ;;  %v4780_v25 = vadd.bf16 %v4761_v53, %v4699_v55  ;;  %v4919_v5 = vor.u32 %v4918_v45, %v4915_v36  ;;  %v14388_v35 = vld [vmem:[#allocation15_spill] sm:$0xff] }
 0x2c3   : > { %v4901_v10 = vrot.slane %v4899_v48, 4  ;;  %v4911_v22 = vrot.slane %v4909_v58, 4  ;;  %v4812_v16 = vrot.slane %v4796_v34, 2  ;;  %v8978_v47 = vcombine.high %v4824_v44, %v4824_v44 }
 0x2c4   : > { %v4900_v43 = vsel %vm13028_vm9, %v4891_v50, %v4899_v48  ;;  %v4929_v62 = vor.u32 %v4928_v2, %v4925_v15  ;;  %v4641_v18 = vsel %vm4597_vm11, %v12748_v49, %v12630_v11  ;;  %v4921_v61 = vrot.slane %v4919_v5, 4 }
 0x2c5   : > { %v4910_v51 = vsel %vm13028_vm9, %v4901_v10, %v4909_v58  ;;  %5012 = vst [vmem:[#allocation3 + $0x4] sm:$0xf] %v4900_v43  ;;  %v4920_v55 = vsel %vm13028_vm9, %v4911_v22, %v4919_v5  ;;  %v4813_v34 = vsel %vm4804_vm12, %v12983_v0, %v4812_v16  ;;  %4872 = vst [vmem:[#allocation3 + $0x28] sm:$0xf] %v8978_v47  ;;  %v4933_v8 = vshrl.u32 %v8978_v47, 16  ;;  %v14387_v0 = vld [vmem:[#allocation16_spill] sm:$0xff] }
 0x2c6   : > { %5013 = vst [vmem:[#allocation3 + $0xc] sm:$0xf] %v4910_v51  ;;  %5014 = vst [vmem:[#allocation3 + $0x14] sm:$0xf] %v4920_v55  ;;  %v4825_v36 = vadd.bf16 %v4813_v34, %v4780_v25  ;;  %v4931_v44 = vrot.slane %v4929_v62, 4  ;;  %v4936_v24 = vshll.u32 %v8978_v47, 16  ;;  %v4930_v49 = vsel %vm13028_vm9, %v4921_v61, %v4929_v62 }
 0x2c7   : > { %v14386_v43 = vsel %vm12325_vm10, %v12479_v41, 0  ;;  %v4689_v52 = vsel %vm4678_vm2, %v12547_v4, %v12618_v39  ;;  %v4769_v12 = vor.u32 %v14388_v35, %v14387_v0  ;;  %5015 = vst [vmem:[#allocation3 + $0x1c] sm:$0xf] %v4930_v49  ;;  %v4935_v58 = vrot.slane %v4933_v8, 6  ;;  %v14389_v47 = vld [vmem:[#allocation26_spill] sm:$0xff]  ;;  %v14390_v10 = vld [vmem:[#allocation27_spill] sm:$0xff] }
 0x2c8   : > { %v4655_v19 = vadd.bf16 %v4641_v18, %v14386_v43  ;;  %v8979_v48 = vcombine.low %v4825_v36, %v4825_v36  ;;  %v4938_v45 = vrot.slane %v4936_v24, 7  ;;  %v4797_v62 = vsel %vm12921_vm7, %v14389_v47, 0  ;;  %v9973_v24 = vld [vmem:[#allocation3] ss:$8 sps:$4 sm:$0xff]  }
 0x2c9   : > { %v4770_v41 = vsel %vm4717_vm8, %v13000_v17, %v4769_v12  ;;  %v4814_v50 = vrot.slane %v4797_v62, 2  ;;  %v8980_v15 = vcombine.high %v4825_v36, %v4825_v36  ;;  %v14391_v22 = vshrl.u32 %v14390_v10, 16 }
 0x2ca   : > { %v4700_v53 = vadd.bf16 %v4689_v52, %v4655_v19  ;;  %v4939_v2 = vor.u32 %v4938_v45, %v4935_v58  ;;  %v4943_v25 = vshrl.u32 %v8979_v48, 16  ;;  %v4946_v4 = vshll.u32 %v8979_v48, 16  ;;  %4873 = vst [vmem:[#allocation3 + $0x30] sm:$0xf] %v8979_v48 }
 0x2cb   : > { %v4644_v5 = vor.u32 %v14391_v22, %v12630_v11  ;;  %v4815_v51 = vsel %vm4804_vm12, %v4812_v16, %v4814_v50  ;;  %4874 = vst [vmem:[#allocation3 + $0x38] sm:$0xf] %v8980_v15  ;;  %v4953_v55 = vshrl.u32 %v8980_v15, 16  ;;  %v4956_v61 = vshll.u32 %v8980_v15, 16 }
 0x2cc   : > { %v4781_v18 = vadd.bf16 %v4770_v41, %v4700_v53  ;;  %v4940_v34 = vsel %vm13028_vm9, %v4931_v44, %v4939_v2  ;;  %v4941_v17 = vrot.slane %v4939_v2, 4  ;;  %v4945_v8 = vrot.slane %v4943_v25, 6 }
 0x2cd   : > { %v4948_v36 = vrot.slane %v4946_v4, 7  ;;  %v9975_v49 = vld [vmem:[#allocation3 + $0x4] ss:$8 sps:$4 sm:$0xff]   ;;  %5016 = vst [vmem:[#allocation3 + $0x24] sm:$0xf] %v4940_v34  ;;  %v4955_v19 = vrot.slane %v4953_v55, 6  ;;  %v13074_v16 = vor.u32 %v12850_v20, %v12839_v23  ;;  %v5112_v3 = vsel %vm4678_vm2, %v12831_v37, %v12906_v28 }
 0x2ce   : > { %v4826_v43 = vadd.bf16 %v4815_v51, %v4781_v18  ;;  %v14392_v11 = vsel %vm12325_vm10, %v14389_v47, 0  ;;  %v4958_v35 = vrot.slane %v4956_v61, 7  ;;  %v5023_v44 = vsel %vm12325_vm10, %v12684_v7, 0  ;;  %5731 = vmatprep.mubr.bf16.mxu1 %v9975_v49  ;;  %v9976_v58 = vld [vmem:[#allocation3 + $0x14] ss:$8 sps:$4 sm:$0xff]  }
 0x2cf   : > { %v4656_v52 = vadd.bf16 %v4644_v5, %v14392_v11  ;;  %v4949_v0 = vor.u32 %v4948_v36, %v4945_v8  ;;  %v5030_v48 = vsel %vm12282_vm6, %v12754_v60, 0  ;;  %v5036_v53 = vshrl.u32 %v12704_v56, 16  ;;  %5732 = vmatmul.mubr.bf16.vlgmr.msra.gmra.mxu1 %v9973_v24 }
 0x2d0   : > { %v8981_v45 = vcombine.low %v4826_v43, %v4826_v43  ;;  %v8982_v62 = vcombine.high %v4826_v43, %v4826_v43  ;;  %v4959_v41 = vor.u32 %v4958_v35, %v4955_v19  ;;  %v5038_v15 = vshll.u32 %v12704_v56, 16  ;;  %5739 = vmatprep.mubr.bf16.mxu1 %v9976_v58  ;;  %v9978_v56 = vld [vmem:[#allocation3 + $0x10] ss:$8 sps:$4 sm:$0xff]  }
 0x2d1   : > { %v4701_v47 = vadd.bf16 %v12618_v39, %v4656_v52  ;;  %v4950_v23 = vsel %vm13028_vm9, %v4941_v17, %v4949_v0  ;;  %v4951_v20 = vrot.slane %v4949_v0, 4  ;;  %v5043_v8 = vshll.u32 %v5030_v48, 16 }
 0x2d2   : > { %5017 = vst [vmem:[#allocation3 + $0x2c] sm:$0xf] %v4950_v23  ;;  %v4963_v32 = vshrl.u32 %v8981_v45, 16  ;;  %v4966_v2 = vshll.u32 %v8981_v45, 16  ;;  %4875 = vst [vmem:[#allocation3 + $0x40] sm:$0xf] %v8981_v45 }
 0x2d3   : > { %v4782_v25 = vadd.bf16 %v4769_v12, %v4701_v47  ;;  %4876 = vst [vmem:[#allocation3 + $0x48] sm:$0xf] %v8982_v62  ;;  %v4973_v4 = vshrl.u32 %v8982_v62, 16  ;;  %v4960_v39 = vsel %vm13028_vm9, %v4951_v20, %v4959_v41  ;;  %v4961_v10 = vrot.slane %v4959_v41, 4 }
 0x2d4   : > { %v4976_v22 = vshll.u32 %v8982_v62, 16  ;;  %v5040_v5 = vrot.slane %v5038_v15, 1  ;;  %v4965_v18 = vrot.slane %v4963_v32, 6  ;;  %v4968_v51 = vrot.slane %v4966_v2, 7  ;;  %5018 = vst [vmem:[#allocation3 + $0x34] sm:$0xf] %v4960_v39 }
 0x2d5   : > { %v4827_v55 = vadd.bf16 %v4814_v50, %v4782_v25  ;;  %v4975_v61 = vrot.slane %v4973_v4, 6  ;;  %v5047_v36 = vshrl.u32 %v5030_v48, 16  ;;  %v5094_v43 = vsel %vm12337_vm13, %v12684_v7, 0 }
 0x2d6   : > { %v4978_v34 = vrot.slane %v4976_v22, 7  ;;  %v5041_v17 = vor.u32 %v5040_v5, %v5036_v53  ;;  %v4969_v24 = vor.u32 %v4968_v51, %v4965_v18  ;;  %v5045_v11 = vrot.slane %v5043_v8, 1  ;;  %v9981_v5 = vld [vmem:[#allocation3 + $0x20] ss:$8 sps:$4 sm:$0xff]  }
 0x2d7   : > { %v8983_v12 = vcombine.low %v4827_v55, %v4827_v55  ;;  %v8984_v49 = vcombine.high %v4827_v55, %v4827_v55  ;;  %v5095_v52 = vsel %vm12337_vm13, %v12754_v60, 0  ;;  %v5106_v50 = vrot.slane %v5094_v43, 1  ;;  %5740 = vmatmul.mubr.bf16.gmra.mxu1 %v9978_v56 }
 0x2d8   : > { %v4979_v19 = vor.u32 %v4978_v34, %v4975_v61  ;;  %v4970_v0 = vsel %vm13028_vm9, %v4961_v10, %v4969_v24  ;;  %v4971_v35 = vrot.slane %v4969_v24, 4  ;;  %v5046_v62 = vsel %vm4597_vm11, %v5041_v17, %v5045_v11 }
 0x2d9   : > { %v4983_v58 = vshrl.u32 %v8983_v12, 16  ;;  %v4986_v48 = vshll.u32 %v8983_v12, 16  ;;  %4877 = vst [vmem:[#allocation3 + $0x50] sm:$0x7] %v8983_v12  ;;  %v9979_v45 = vld [vmem:[#allocation3 + $0x24] ss:$8 sps:$4 sm:$0xff]   ;;  %v5049_v53 = vor.u32 %v5047_v36, %v5045_v11  ;;  %v5088_v25 = vadd.bf16 %v5046_v62, %v5023_v44 }
 0x2da   : > { %5019 = vst [vmem:[#allocation3 + $0x3c] sm:$0xf] %v4970_v0  ;;  %v4981_v47 = vrot.slane %v4979_v19, 4  ;;  %v4980_v23 = vsel %vm13028_vm9, %v4971_v35, %v4979_v19  ;;  %v4993_v15 = vshrl.u32 %v8984_v49, 16  ;;  %5747 = vmatprep.mubr.bf16.mxu1 %v9979_v45  ;;  %v4996_v32 = vshll.u32 %v8984_v49, 16 }
 0x2db   : > { %v4985_v20 = vrot.slane %v4983_v58, 6  ;;  %v4988_v41 = vrot.slane %v4986_v48, 7  ;;  %5020 = vst [vmem:[#allocation3 + $0x44] sm:$0xf] %v4980_v23  ;;  %v5054_v2 = vsel %vm4597_vm11, %v5049_v53, %v12829_v9  ;;  %v5107_v4 = vrot.slane %v5095_v52, 1 }
 0x2dc   : > { %v4995_v42 = vrot.slane %v4993_v15, 6  ;;  %v14393_v59 = vsel %vm12325_vm10, %v12754_v60, 0  ;;  %v5129_v22 = vsel %vm12345_vm4, %v12684_v7, 0  ;;  %v4998_v18 = vrot.slane %v4996_v32, 7 }
 0x2dd   : > { %v4989_v39 = vor.u32 %v4988_v41, %v4985_v20  ;;  %v5089_v10 = vadd.bf16 %v5054_v2, %v14393_v59  ;;  %v5108_v9 = vsel %vm4678_vm2, %v5106_v50, %v5107_v4  ;;  %v5110_v51 = vsel %vm4678_vm2, %v5107_v4, %v12831_v37 }
 0x2de   : > { %v5130_v44 = vsel %vm12345_vm4, %v12754_v60, 0  ;;  %v5123_v56 = vadd.bf16 %v5108_v9, %v5088_v25  ;;  %v4999_v17 = vor.u32 %v4998_v18, %v4995_v42  ;;  %v5136_v8 = vshrl.u32 %v5129_v22, 16 }
 0x2df   : > { %v4990_v55 = vsel %vm13028_vm9, %v4981_v47, %v4989_v39  ;;  %v4991_v61 = vrot.slane %v4989_v39, 4  ;;  %v5124_v34 = vadd.bf16 %v5110_v51, %v5089_v10  ;;  %v5139_v36 = vshll.u32 %v5129_v22, 16  ;;  %5748 = vmatmul.mubr.bf16.gmra.mxu1 %v9981_v5  ;;  %v9984_v39 = vld [vmem:[#allocation3 + $0x30] ss:$8 sps:$4 sm:$0xff]  }
 0x2e0   : > { %5021 = vst [vmem:[#allocation3 + $0x4c] sm:$0xf] %v4990_v55  ;;  %v5144_v24 = vshrl.u32 %v5130_v44, 16  ;;  %v5147_v49 = vshll.u32 %v5130_v44, 16  ;;  %v14394_v43 = vsel %vm12325_vm10, %v12796_v21, 0  ;;  %v5168_v11 = vor.u32 %v12917_v6, %v12913_v46 }
 0x2e1   : > { %v9982_v12 = vld [vmem:[#allocation3 + $0x34] ss:$8 sps:$4 sm:$0xff]   ;;  %v5090_v19 = vadd.bf16 %v5062_v54, %v14394_v43  ;;  %v5000_v52 = vsel %vm13028_vm9, %v4991_v61, %v4999_v17  ;;  %v5138_v50 = vrot.slane %v5136_v8, 1  ;;  %v5141_v0 = vrot.slane %v5139_v36, 2 }
 0x2e2   : > { %v5146_v35 = vrot.slane %v5144_v24, 1  ;;  %5755 = vmatprep.mubr.bf16.mxu1 %v9982_v12  ;;  %5022 = vst [vmem:[#allocation3 + $0x54] sm:$0x7] %v5000_v52  ;;  %v5149_v58 = vrot.slane %v5147_v49, 2  ;;  %v5200_v48 = vsel %vm12921_vm7, %v12684_v7, 0  ;;  %v5201_v37 = vsel %vm12921_vm7, %v12754_v60, 0 }
 0x2e3   : > { %v5202_v46 = vsel %vm12921_vm7, %v12796_v21, 0  ;;  %v5142_v6 = vor.u32 %v5141_v0, %v5138_v50  ;;  %v5212_v45 = vrot.slane %v5200_v48, 2  ;;  %v5213_v47 = vrot.slane %v5201_v37, 2  ;;  %v9985_v0 = vld [vmem:[#allocation3 + $0x40] ss:$8 sps:$4 sm:$0xff]  }
 0x2e4   : > { %v5215_v62 = vrot.slane %v5202_v46, 2  ;;  %v5150_v53 = vor.u32 %v5149_v58, %v5146_v35  ;;  %v5125_v54 = vadd.bf16 %v5112_v3, %v5090_v19  ;;  %v5169_v23 = vsel %vm4717_vm8, %v13074_v16, %v5168_v11 }
 0x2e5   : > { %v5203_v7 = vsel %vm12921_vm7, %v12858_v57, 0  ;;  %v5214_v20 = vsel %vm4804_vm12, %v5212_v45, %v5213_v47  ;;  %v5070_v21 = vsel %vm4597_vm11, %v12938_v33, %v12970_v27  ;;  %v14395_v25 = vsel %vm12325_vm10, %v12858_v57, 0 }
 0x2e6   : > { %v5216_v60 = vsel %vm4804_vm12, %v5213_v47, %v5215_v62  ;;  %v5217_v41 = vrot.slane %v5203_v7, 2  ;;  %v5151_v15 = vsel %vm4717_vm8, %v5142_v6, %v5150_v53  ;;  %v5160_v32 = vsel %vm4717_vm8, %v5150_v53, %v13074_v16 }
 0x2e7   : > { %v5196_v2 = vadd.bf16 %v5169_v23, %v5125_v54  ;;  %v5091_v4 = vadd.bf16 %v5070_v21, %v14395_v25  ;;  %v5194_v42 = vadd.bf16 %v5151_v15, %v5123_v56  ;;  %v5195_v59 = vadd.bf16 %v5160_v32, %v5124_v34  ;;  %v9987_v27 = vld [vmem:[#allocation3 + $0x44] ss:$8 sps:$4 sm:$0xff]   ;;  %5756 = vmatmul.mubr.bf16.gmra.mxu1 %v9984_v39 }
 0x2e8   : > { %v5218_v10 = vsel %vm4804_vm12, %v5215_v62, %v5217_v41  ;;  %v5114_v33 = vsel %vm4678_vm2, %v12906_v28, %v12965_v40  ;;  %v13167_v16 = vor.u32 %v12980_v26, %v12975_v63  ;;  %v5204_v57 = vsel %vm12921_vm7, %v12940_v31, 0  ;;  %5763 = vmatprep.mubr.bf16.mxu1 %v9987_v27 }
 0x2e9   : > { %v5231_v22 = vadd.bf16 %v5218_v10, %v5196_v2  ;;  %v5126_v5 = vadd.bf16 %v5114_v33, %v5091_v4  ;;  %v5229_v18 = vadd.bf16 %v5214_v20, %v5194_v42  ;;  %v5230_v9 = vadd.bf16 %v5216_v60, %v5195_v59  ;;  %v9990_v46 = vld [vmem:[#allocation3 + $0x54] ss:$8 sps:$4 sm:$0xff]  }
 0x2ea   : > { %v13172_v51 = vrot.slane %v5204_v57, 2  ;;  %v5078_v28 = vsel %vm4597_vm11, %v12990_v29, %v13020_v13  ;;  %v5178_v55 = vsel %vm4717_vm8, %v5168_v11, %v13167_v16  ;;  %v14396_v26 = vsel %vm12325_vm10, %v12940_v31, 0 }
 0x2eb   : > { %v8989_v44 = vcombine.low %v5231_v22, %v5231_v22  ;;  %v8990_v63 = vcombine.high %v5231_v22, %v5231_v22  ;;  %v13183_v61 = vadd.bf16 %v5078_v28, %v14396_v26  ;;  %v8985_v56 = vcombine.low %v5229_v18, %v5229_v18  ;;  %v9988_v28 = vld [vmem:[#allocation3 + $0x50] ss:$8 sps:$4 sm:$0xff]  }
 0x2ec   : > { %v8986_v34 = vcombine.high %v5229_v18, %v5229_v18  ;;  %v8987_v17 = vcombine.low %v5230_v9, %v5230_v9  ;;  %v8988_v8 = vcombine.high %v5230_v9, %v5230_v9  ;;  %v5197_v29 = vadd.bf16 %v5178_v55, %v5126_v5  ;;  %v14398_v26 = vld [vmem:[#allocation18_spill] sm:$0xff] }
 0x2ed   : > { %v5327_v36 = vshrl.u32 %v8989_v44, 16  ;;  %v5330_v24 = vshll.u32 %v8989_v44, 16  ;;  %5278 = vst [vmem:[#allocation3 + $0x80] sm:$0xf] %v8989_v44  ;;  %v5220_v12 = vsel %vm4804_vm12, %v5217_v41, %v13172_v51  ;;  %5279 = vst [vmem:[#allocation3 + $0x88] sm:$0xf] %v8990_v63  ;;  %v5116_v55 = vsel %vm4678_vm2, %v12965_v40, %v13018_v30 }
 0x2ee   : > { %5274 = vst [vmem:[#allocation3 + $0x60] sm:$0xf] %v8985_v56  ;;  %5275 = vst [vmem:[#allocation3 + $0x68] sm:$0xf] %v8986_v34  ;;  %v5288_v49 = vshrl.u32 %v8985_v56, 16  ;;  %v5291_v43 = vshll.u32 %v8985_v56, 16  ;;  %v5232_v41 = vadd.bf16 %v5220_v12, %v5197_v29 }
 0x2ef   : > { %v5297_v19 = vshrl.u32 %v8986_v34, 16  ;;  %v5300_v31 = vshll.u32 %v8986_v34, 16  ;;  %5276 = vst [vmem:[#allocation3 + $0x70] sm:$0xf] %v8987_v17  ;;  %5277 = vst [vmem:[#allocation3 + $0x78] sm:$0xf] %v8988_v8  ;;  %5764 = vmatmul.mubr.bf16.gmra.mxu1 %v9985_v0 }
 0x2f0   : > { %v5307_v3 = vshrl.u32 %v8987_v17, 16  ;;  %v5310_v11 = vshll.u32 %v8987_v17, 16  ;;  %v5317_v52 = vshrl.u32 %v8988_v8, 16  ;;  %v5320_v50 = vshll.u32 %v8988_v8, 16  ;;  %5771 = vmatprep.mubr.bf16.mxu1 %v9990_v46  ;;  %v14399_v34 = vld [vmem:[#allocation19_spill] sm:$0xff] }
 0x2f1   : > { %v5290_v35 = vrot.slane %v5288_v49, 6  ;;  %v5293_v58 = vrot.slane %v5291_v43, 7  ;;  %v5299_v48 = vrot.slane %v5297_v19, 6  ;;  %v5302_v37 = vrot.slane %v5300_v31, 7 }
 0x2f2   : > { %v5309_v6 = vrot.slane %v5307_v3, 6  ;;  %v5312_v45 = vrot.slane %v5310_v11, 7  ;;  %v5319_v47 = vrot.slane %v5317_v52, 6  ;;  %v5322_v62 = vrot.slane %v5320_v50, 7 }
 0x2f3   : > { %v5294_v53 = vor.u32 %v5293_v58, %v5290_v35  ;;  %v5303_v54 = vor.u32 %v5302_v37, %v5299_v48  ;;  %v5329_v23 = vrot.slane %v5327_v36, 6  ;;  %v5332_v7 = vrot.slane %v5330_v24, 7 }
 0x2f4   : > { %v5313_v20 = vor.u32 %v5312_v45, %v5309_v6  ;;  %v5323_v60 = vor.u32 %v5322_v62, %v5319_v47  ;;  %v5337_v21 = vshrl.u32 %v8990_v63, 16  ;;  %v5340_v25 = vshll.u32 %v8990_v63, 16  ;;  %v14397_v63 = vld [vmem:[#allocation20_spill] sm:$0xff] }
 0x2f5   : > { %v5295_v15 = vrot.slane %v5294_v53, 4  ;;  %v5305_v32 = vrot.slane %v5303_v54, 4  ;;  %v5333_v2 = vor.u32 %v5332_v7, %v5329_v23  ;;  %v8991_v42 = vcombine.low %v5232_v41, %v5232_v41  ;;  %v9991_v37 = vld [vmem:[#allocation3 + $0x60] ss:$8 sps:$4 sm:$0xff]  }
 0x2f6   : > { %v5315_v4 = vrot.slane %v5313_v20, 4  ;;  %v5325_v39 = vrot.slane %v5323_v60, 4  ;;  %v5339_v59 = vrot.slane %v5337_v21, 6  ;;  %v5342_v22 = vrot.slane %v5340_v25, 7 }
 0x2f7   : > { %v5304_v10 = vsel %vm13028_vm9, %v5295_v15, %v5303_v54  ;;  %v5314_v33 = vsel %vm13028_vm9, %v5305_v32, %v5313_v20  ;;  %v5335_v27 = vrot.slane %v5333_v2, 4  ;;  %v5347_v18 = vshrl.u32 %v8991_v42, 16  ;;  %5280 = vst [vmem:[#allocation3 + $0x90] sm:$0xf] %v8991_v42  ;;  %5772 = vmatmul.mubr.bf16.gmra.mxu1 %v9988_v28 }
 0x2f8   : > { %5416 = vst [vmem:[#allocation3 + $0x64] sm:$0xf] %v5304_v10  ;;  %5417 = vst [vmem:[#allocation3 + $0x6c] sm:$0xf] %v5314_v33  ;;  %v5324_v5 = vsel %vm13028_vm9, %v5315_v4, %v5323_v60  ;;  %v5334_v57 = vsel %vm13028_vm9, %v5325_v39, %v5333_v2  ;;  %v5350_v9 = vshll.u32 %v8991_v42, 16  ;;  %v5343_v44 = vor.u32 %v5342_v22, %v5339_v59 }
 0x2f9   : > { %5418 = vst [vmem:[#allocation3 + $0x74] sm:$0xf] %v5324_v5  ;;  %5419 = vst [vmem:[#allocation3 + $0x7c] sm:$0xf] %v5334_v57  ;;  %v5186_v56 = vor.u32 %v14398_v26, %v14397_v63  ;;  %v5205_v17 = vsel %vm12921_vm7, %v14399_v34, 0  ;;  %v5349_v8 = vrot.slane %v5347_v18, 6  ;;  %v5127_v24 = vadd.bf16 %v5116_v55, %v13183_v61 }
 0x2fa   : > { %v5352_v36 = vrot.slane %v5350_v9, 7  ;;  %v5221_v29 = vrot.slane %v5205_v17, 2  ;;  %v5344_v12 = vsel %vm13028_vm9, %v5335_v27, %v5343_v44  ;;  %v8992_v40 = vcombine.high %v5232_v41, %v5232_v41  ;;  %v9994_v42 = vld [vmem:[#allocation3 + $0x70] ss:$8 sps:$4 sm:$0xff]  }
 0x2fb   : > { %v5187_v49 = vsel %vm4717_vm8, %v13167_v16, %v5186_v56  ;;  %v5345_v43 = vrot.slane %v5343_v44, 4  ;;  %5420 = vst [vmem:[#allocation3 + $0x84] sm:$0xf] %v5344_v12  ;;  %v14401_v3 = vshrl.u32 %v14400_v14, 16  ;;  %v5028_v61 = vsel %vm12325_vm10, %v14399_v34, 0  ;;  %v10010_v14 = vld [vmem:[%s14268_s7 + $0x38] sm:$0xff]  }
 0x2fc   : > { %v5353_v19 = vor.u32 %v5352_v36, %v5349_v8  ;;  %v5198_v31 = vadd.bf16 %v5187_v49, %v5127_v24  ;;  %v5222_v52 = vsel %vm4804_vm12, %v13172_v51, %v5221_v29  ;;  %5281 = vst [vmem:[#allocation3 + $0x98] sm:$0xf] %v8992_v40  ;;  %v5357_v50 = vshrl.u32 %v8992_v40, 16  ;;  %v9997_v36 = vld [vmem:[#allocation3 + $0x80] ss:$8 sps:$4 sm:$0xff]  }
 0x2fd   : > { %v5081_v11 = vor.u32 %v14401_v3, %v13020_v13  ;;  %v5360_v0 = vshll.u32 %v8992_v40, 16  ;;  %v10017_v3 = vld [vmem:[%s14268_s7 + $0xf8] sm:$0xff]  }
 0x2fe   : > { %v5354_v16 = vsel %vm13028_vm9, %v5345_v43, %v5353_v19  ;;  %v5233_v35 = vadd.bf16 %v5222_v52, %v5198_v31  ;;  %v5355_v58 = vrot.slane %v5353_v19, 4  ;;  %v5359_v46 = vrot.slane %v5357_v50, 6  ;;  %v10009_v31 = vld [vmem:[%s14268_s7 + $0x78] sm:$0xff]   ;;  %9464 = vmatprep.subr.bf16.mxu1 %v10017_v3  ;;  %v10019_v52 = vld [vmem:[%s14268_s7 + $0xf0] sm:$0xff]  }
 0x2ff   : > { %v5093_v48 = vadd.bf16 %v5081_v11, %v5028_v61  ;;  %5421 = vst [vmem:[#allocation3 + $0x8c] sm:$0xf] %v5354_v16  ;;  %v5362_v13 = vrot.slane %v5360_v0, 7  ;;  %v9993_v6 = vld [vmem:[#allocation3 + $0x64] ss:$8 sps:$4 sm:$0xff]   ;;  %9412 = vmatprep.subr.bf16.mxu0 %v10009_v31  ;;  %v10018_v11 = vld [vmem:[%s14268_s7 + $0xb8] sm:$0xff]  }
 0x300   : > { %v8993_v45 = vcombine.low %v5233_v35, %v5233_v35  ;;  %v8994_v47 = vcombine.high %v5233_v35, %v5233_v35  ;;  %v9996_v62 = vld [vmem:[#allocation3 + $0x74] ss:$8 sps:$4 sm:$0xff]   ;;  %5779 = vmatprep.mubr.bf16.mxu1 %v9993_v6  ;;  %9413 = vmatpush3.bf16.msra.mxu0 %v10010_v14  ;;  %v10013_v0 = vld [vmem:[%s14268_s7 + $0x68] sm:$0xff]   ;;  %v10026_v6 = vld [vmem:[%s14268_s7 + $0xa0] sm:$0xff]  }
 0x301   : > { %v5128_v1 = vadd.bf16 %v13018_v30, %v5093_v48  ;;  %v5363_v51 = vor.u32 %v5362_v13, %v5359_v46  ;;  %5780 = vmatmul.mubr.bf16.gmra.mxu1 %v9991_v37  ;;  %v10011_v61 = vld [vmem:[%s14268_s7 + $0x70] sm:$0xff]   ;;  %v10014_v35 = vld [vmem:[%s14268_s7 + $0x28] sm:$0xff]   ;;  %v10015_v37 = vld [vmem:[%s14268_s7 + $0x60] sm:$0xff]  }
 0x302   : > { %v5367_v53 = vshrl.u32 %v8993_v45, 16  ;;  %v5370_v54 = vshll.u32 %v8993_v45, 16  ;;  %5282 = vst [vmem:[#allocation3 + $0xa0] sm:$0xf] %v8993_v45  ;;  %5283 = vst [vmem:[#allocation3 + $0xa8] sm:$0xf] %v8994_v47  ;;  %5787 = vmatprep.mubr.bf16.mxu1 %v9996_v62  ;;  %9465 = vmatpush3.bf16.msra.mxu1 %v10018_v11 }
 0x303   : > { %v5199_v23 = vadd.bf16 %v5186_v56, %v5128_v1  ;;  %v5377_v7 = vshrl.u32 %v8994_v47, 16  ;;  %v5364_v20 = vsel %vm13028_vm9, %v5355_v58, %v5363_v51  ;;  %v5380_v60 = vshll.u32 %v8994_v47, 16  ;;  %v10000_v12 = vld [vmem:[#allocation3 + $0x90] ss:$8 sps:$4 sm:$0xff]   ;;  %9414 = vmatprep.subr.bf16.mxu0 %v10011_v61  ;;  %9466 = vmatprep.subr.bf16.mxu1 %v10019_v52  ;;  %v10022_v58 = vld [vmem:[%s14268_s7 + $0xe8] sm:$0xff]   ;;  %v10025_v46 = vld [vmem:[%s14268_s7 + $0xe0] sm:$0xff]  }
 0x304   : > { %v5369_v41 = vrot.slane %v5367_v53, 6  ;;  %v5372_v21 = vrot.slane %v5370_v54, 7  ;;  %5422 = vst [vmem:[#allocation3 + $0x94] sm:$0xf] %v5364_v20  ;;  %v5365_v2 = vrot.slane %v5363_v51, 4  ;;  %v10012_v50 = vld [vmem:[%s14268_s7 + $0x30] sm:$0xff]  }
 0x305   : > { %v5234_v30 = vadd.bf16 %v5221_v29, %v5199_v23  ;;  %v5379_v15 = vrot.slane %v5377_v7, 6  ;;  %v5382_v32 = vrot.slane %v5380_v60, 7  ;;  %v10020_v16 = vld [vmem:[%s14268_s7 + $0xb0] sm:$0xff]   ;;  %9415 = vmatpush3.bf16.msra.mxu0 %v10012_v50  ;;  %v10024_v48 = vld [vmem:[%s14268_s7 + $0xa8] sm:$0xff]   ;;  %v10016_v13 = vld [vmem:[%s14268_s7 + $0x20] sm:$0xff]  }
 0x306   : > { %v5373_v25 = vor.u32 %v5372_v21, %v5369_v41  ;;  %v9999_v10 = vld [vmem:[#allocation3 + $0x84] ss:$8 sps:$4 sm:$0xff]   ;;  %9416 = vmatprep.subr.bf16.mxu0 %v10013_v0  ;;  %9467 = vmatpush3.bf16.msra.mxu1 %v10020_v16  ;;  %v10021_v45 = vld [vmem:[%s14268_s7 + $0x58] sm:$0xff]   ;;  %v10029_v51 = vld [vmem:[%s14268_s7 + $0x50] sm:$0xff]  }
 0x307   : > { %v8995_v4 = vcombine.low %v5234_v30, %v5234_v30  ;;  %v8996_v39 = vcombine.high %v5234_v30, %v5234_v30  ;;  %v5383_v59 = vor.u32 %v5382_v32, %v5379_v15  ;;  %9468 = vmatprep.subr.bf16.mxu1 %v10022_v58  ;;  %v10027_v1 = vld [vmem:[%s14268_s7 + $0xd8] sm:$0xff]   ;;  %v10030_v53 = vld [vmem:[%s14268_s7 + $0xd0] sm:$0xff]   ;;  %v10033_v7 = vld [vmem:[%s14268_s7 + $0x48] sm:$0xff]  }
 0x308   : > { %v5374_v33 = vsel %vm13028_vm9, %v5365_v2, %v5373_v25  ;;  %v5375_v27 = vrot.slane %v5373_v25, 4  ;;  %v10023_v47 = vld [vmem:[%s14268_s7 + $0x18] sm:$0xff]   ;;  %v10031_v54 = vld [vmem:[%s14268_s7 + $0x10] sm:$0xff]   ;;  %v10034_v20 = vld [vmem:[%s14268_s7 + $0xc8] sm:$0xff]  }
 0x309   : > { %v5387_v22 = vshrl.u32 %v8995_v4, 16  ;;  %v5390_v5 = vshll.u32 %v8995_v4, 16  ;;  %5284 = vst [vmem:[#allocation3 + $0xb0] sm:$0x7] %v8995_v4  ;;  %5423 = vst [vmem:[#allocation3 + $0x9c] sm:$0xf] %v5374_v33  ;;  %5788 = vmatmul.mubr.bf16.gmra.mxu1 %v9994_v42  ;;  %9417 = vmatpush3.bf16.msra.mxu0 %v10014_v35 }
 0x30a   : > { %v5397_v57 = vshrl.u32 %v8996_v39, 16  ;;  %v5400_v18 = vshll.u32 %v8996_v39, 16  ;;  %v5384_v9 = vsel %vm13028_vm9, %v5375_v27, %v5383_v59  ;;  %v5385_v28 = vrot.slane %v5383_v59, 4  ;;  %5795 = vmatprep.mubr.bf16.mxu1 %v9999_v10  ;;  %v10003_v40 = vld [vmem:[#allocation3 + $0xa0] ss:$8 sps:$4 sm:$0xff]   ;;  %9469 = vmatpush3.bf16.msra.mxu1 %v10024_v48  ;;  %v10028_v62 = vld [vmem:[%s14268_s7 + $0x98] sm:$0xff]  }
 0x30b   : > { %v5389_v44 = vrot.slane %v5387_v22, 6  ;;  %v5392_v55 = vrot.slane %v5390_v5, 7  ;;  %5424 = vst [vmem:[#allocation3 + $0xa4] sm:$0xf] %v5384_v9  ;;  %9418 = vmatprep.subr.bf16.mxu0 %v10015_v37  ;;  %9470 = vmatprep.subr.bf16.mxu1 %v10025_v46  ;;  %v10032_v23 = vld [vmem:[%s14268_s7 + $0x90] sm:$0xff]   ;;  %v10035_v60 = vld [vmem:[%s14268_s7 + $0x8] sm:$0xff]  }
 0x30c   : > { %v5399_v63 = vrot.slane %v5397_v57, 6  ;;  %v5402_v26 = vrot.slane %v5400_v18, 7  ;;  %v10036_v41 = vld [vmem:[%s14268_s7 + $0x88] sm:$0xff]   ;;  %v10037_v21 = vld [vmem:[%s14268_s7 + $0x40] sm:$0xff]  }
 0x30d   : > { %v5393_v56 = vor.u32 %v5392_v55, %v5389_v44  ;;  %9419 = vmatpush3.bf16.msra.mxu0 %v10016_v13  ;;  %v10038_v30 = vld [vmem:[%s14268_s7 + $0xc0] sm:$0xff]  }
 0x30e   : > { %v5403_v8 = vor.u32 %v5402_v26, %v5399_v63  ;;  %9471 = vmatpush3.bf16.msra.mxu1 %v10026_v6  ;;  %9420 = vmatprep.subr.bf16.mxu0 %v10021_v45  ;;  %v10039_v15 = vld [vmem:[%s14268_s7] sm:$0xff]  }
 0x30f   : > { %v5394_v34 = vsel %vm13028_vm9, %v5385_v28, %v5393_v56  ;;  %v5395_v17 = vrot.slane %v5393_v56, 4  ;;  %9472 = vmatprep.subr.bf16.mxu1 %v10027_v1  ;;  %v10040_v32 = vld [vmem:[%s14268_s7 + $0x80] sm:$0xff]  }
 0x310   : > { %5425 = vst [vmem:[#allocation3 + $0xac] sm:$0xf] %v5394_v34  ;;  %v10002_v24 = vld [vmem:[#allocation3 + $0x94] ss:$8 sps:$4 sm:$0xff]   ;;  %v10006_v19 = vld [vmem:[#allocation3 + $0xb0] ss:$8 sps:$4 sm:$0xff]  }
 0x311   : > { %v5404_v29 = vsel %vm13028_vm9, %v5395_v17, %v5403_v8  ;;  %5796 = vmatmul.mubr.bf16.gmra.mxu1 %v9997_v36  ;;  %9421 = vmatpush3.bf16.msra.mxu0 %v10023_v47  ;;  %v13328_v4 = vld [vmem:[%s14266_s5] ss:$0 sm:$0xff] }
 0x312   : > { %5426 = vst [vmem:[#allocation3 + $0xb4] sm:$0x7] %v5404_v29  ;;  %5803 = vmatprep.mubr.bf16.mxu1 %v10002_v24  ;;  %9473 = vmatpush3.bf16.msra.mxu1 %v10028_v62  ;;  %v13333_v42 = vld [vmem:[%s14267_s6] ss:$0 sm:$0xff] }
 0x313   : > { %9422 = vmatprep.subr.bf16.mxu0 %v10029_v51  ;;  %9474 = vmatprep.subr.bf16.mxu1 %v10030_v53 }
 0x315   : > { %9423 = vmatpush3.bf16.msra.mxu0 %v10031_v54 }
 0x316   : > { %9475 = vmatpush3.bf16.msra.mxu1 %v10032_v23  ;;  %9424 = vmatprep.subr.bf16.mxu0 %v10033_v7 }
 0x317   : > { %v10005_v49 = vld [vmem:[#allocation3 + $0xa4] ss:$8 sps:$4 sm:$0xff]   ;;  %9476 = vmatprep.subr.bf16.mxu1 %v10034_v20 }
 0x319   : > { %5804 = vmatmul.mubr.bf16.gmra.mxu1 %v10000_v12  ;;  %v10008_v43 = vld [vmem:[#allocation3 + $0xb4] ss:$8 sps:$4 sm:$0xff]   ;;  %9425 = vmatpush3.bf16.msra.mxu0 %v10035_v60 }
 0x31a   : > { %5811 = vmatprep.mubr.bf16.mxu1 %v10005_v49  ;;  %9477 = vmatpush3.bf16.msra.mxu1 %v10036_v41  ;;  %v13345_v49 = vld [vmem:[%s14268_s7 + $0x138] sm:$0xff]  }
 0x31b   : > { %9426 = vmatprep.subr.bf16.mxu0 %v10037_v21  ;;  %9478 = vmatprep.subr.bf16.mxu1 %v10038_v30 }
 0x31d   : > { %9427 = vmatpush3.bf16.msra.mxu0 %v10039_v15 }
 0x31e   : > { %9479 = vmatpush3.bf16.msra.mxu1 %v10040_v32  ;;  %9734 = vmatprep.subr.bf16.mxu0 %v13345_v49 }
 0x321   : > { %5812 = vmatmul.mubr.bf16.gmra.mxu1 %v10003_v40 }
 0x322   : > { %5819 = vmatprep.mubr.bf16.mxu1 %v10008_v43 }
 0x329   : > { %5820 = vmatmul.mubr.bf16.gmra.mxu1 %v10006_v19 }
 0x38f   : > { %v9340_v2 = vpop.f32.mrf.mxu1 }
 0x391   : > { %v9341_v25 = vpop.f32.mrf.mxu1 }
 0x392   : > { %v9342_v39 = vadd.f32 %v9341_v25, %v9340_v2 }
 0x393   : > { %v9343_v59 = vpop.f32.mrf.mxu1 }
 0x394   : > { %v5835_v10 = vmul.f32 %v9342_v39, %v13328_v4 }
 0x395   : > { %v9344_v33 = vpop.f32.mrf.mxu1 }
 0x396   : > { %v5866_v27 = vadd.f32 %v13333_v42, %v5835_v10  ;;  %v9345_v22 = vadd.f32 %v9344_v33, %v9343_v59 }
 0x397   : > { %v9346_v5 = vpop.f32.mrf.mxu1 }
 0x398   : > { %v5914_v57 = vmin.f32 %v5866_v27, 0.0  ;;  %v5836_v18 = vmul.f32 %v9345_v22, %v13328_v4  ;;  %vm5890_vm6 = vcmp.gt.f32.partialorder %v5866_v27, 0.0 }
 0x399   : > { %v9347_v9 = vpop.f32.mrf.mxu1 }
 0x39a   : > { %v5938_v28 = vmul.f32 1.442695, %v5914_v57  ;;  %v5867_v44 = vadd.f32 %v13333_v42, %v5836_v18  ;;  %v9348_v55 = vadd.f32 %v9347_v9, %v9346_v5 }
 0x39b   : > { %v9349_v63 = vpop.f32.mrf.mxu1 }
 0x39c   : > { %10297 = vpow2.f32 %v5938_v28  ;;  %v5915_v26 = vmin.f32 %v5867_v44, 0.0  ;;  %v5837_v56 = vmul.f32 %v9348_v55, %v13328_v4  ;;  %vm5891_vm10 = vcmp.gt.f32.partialorder %v5867_v44, 0.0 }
 0x39d   : > { %v9350_v34 = vpop.f32.mrf.mxu1 }
 0x39e   : > { %v5940_v17 = vmul.f32 1.442695, %v5915_v26  ;;  %v5868_v8 = vadd.f32 %v13333_v42, %v5837_v56  ;;  %v9351_v36 = vadd.f32 %v9350_v34, %v9349_v63 }
 0x39f   : > { %v9352_v24 = vpop.f32.mrf.mxu1 }
 0x3a0   : > { %10299 = vpow2.f32 %v5940_v17  ;;  %v5916_v29 = vmin.f32 %v5868_v8, 0.0  ;;  %v5838_v12 = vmul.f32 %v9351_v36, %v13328_v4  ;;  %vm5892_vm13 = vcmp.gt.f32.partialorder %v5868_v8, 0.0 }
 0x3a1   : > { %v9353_v40 = vpop.f32.mrf.mxu1 }
 0x3a2   : > { %v5942_v43 = vmul.f32 1.442695, %v5916_v29  ;;  %v13348_v19 = vadd.f32 %v13333_v42, %v5838_v12  ;;  %v9354_v31 = vadd.f32 %v9353_v40, %v9352_v24 }
 0x3a3   : > { %v9355_v14 = vpop.f32.mrf.mxu1 }
 0x3a4   : > { %10301 = vpow2.f32 %v5942_v43  ;;  %v5917_v3 = vmin.f32 %v13348_v19, 0.0  ;;  %v5839_v11 = vmul.f32 %v9354_v31, %v13328_v4  ;;  %vm5893_vm4 = vcmp.gt.f32.partialorder %v13348_v19, 0.0 }
 0x3a5   : > { %v9356_v61 = vpop.f32.mrf.mxu1 }
 0x3a6   : > { %v5944_v52 = vmul.f32 1.442695, %v5917_v3  ;;  %v13354_v50 = vadd.f32 %v13333_v42, %v5839_v11  ;;  %v9357_v0 = vadd.f32 %v9356_v61, %v9355_v14 }
 0x3a7   : > { %v9358_v16 = vpop.f32.mrf.mxu1 }
 0x3a8   : > { %10303 = vpow2.f32 %v5944_v52  ;;  %v5918_v35 = vmin.f32 %v13354_v50, 0.0  ;;  %v5840_v58 = vmul.f32 %v9357_v0, %v13328_v4  ;;  %vm5894_vm2 = vcmp.gt.f32.partialorder %v13354_v50, 0.0 }
 0x3a9   : > { %v10298_v48 = vpop.eup %10297  ;;  %v9359_v37 = vpop.f32.mrf.mxu1 }
 0x3aa   : > { %v9039_v46 = vadd.f32 -1.0, %v10298_v48  ;;  %v5946_v13 = vmul.f32 1.442695, %v5918_v35  ;;  %v13359_v6 = vadd.f32 %v13333_v42, %v5840_v58  ;;  %v9360_v45 = vadd.f32 %v9359_v37, %v9358_v16  ;;  %v14402_v48 = vld [vmem:[#allocation10_spill] sm:$0xff] }
 0x3ab   : > { %v9361_v1 = vpop.f32.mrf.mxu1  ;;  %vm14403_vm12 = vcmp.lt.s32.totalorder %v14402_v48, 100  ;;  %vm14404_vm7 = vcmp.ge.s32.totalorder %v14402_v48, 50 }
 0x3ac   : > { %v6010_v47 = vsel %vm5890_vm6, %v5866_v27, %v9039_v46  ;;  %10305 = vpow2.f32 %v5946_v13  ;;  %v5919_v62 = vmin.f32 %v13359_v6, 0.0  ;;  %v5841_v53 = vmul.f32 %v9360_v45, %v13328_v4  ;;  %vm13398_vm14 = vmand %vm14404_vm7, %vm14403_vm12 }
 0x3ad   : > { %v10300_v51 = vpop.eup %10299  ;;  %6034 = vst [vmem:[#allocation7] sm:$0xff] %v6010_v47  ;;  %v9362_v54 = vpop.f32.mrf.mxu1  ;;  %vm5895_vm8 = vcmp.gt.f32.partialorder %v13359_v6, 0.0  ;;  %vm6175_vm5 = vmpackc.low %vm13398_vm14, %vm13398_vm14 }
 0x3ae   : > { %v9040_v23 = vadd.f32 -1.0, %v10300_v51  ;;  %v5948_v7 = vmul.f32 1.442695, %v5919_v62  ;;  %v9363_v20 = vadd.f32 %v9362_v54, %v9361_v1  ;;  %v13364_v60 = vadd.f32 %v13333_v42, %v5841_v53 }
 0x3af   : > { %v9364_v41 = vpop.f32.mrf.mxu1 }
 0x3b0   : > { %v6011_v21 = vsel %vm5891_vm10, %v5867_v44, %v9040_v23  ;;  %10307 = vpow2.f32 %v5948_v7  ;;  %v5842_v30 = vmul.f32 %v9363_v20, %v13328_v4  ;;  %v5920_v32 = vmin.f32 %v13364_v60, 0.0 }
 0x3b1   : > { %v10302_v15 = vpop.eup %10301  ;;  %6035 = vst [vmem:[#allocation7 + $0x8] sm:$0xff] %v6011_v21  ;;  %v9365_v2 = vpop.f32.mrf.mxu1  ;;  %vm5896_vm6 = vcmp.gt.f32.partialorder %v13364_v60, 0.0 }
 0x3b2   : > { %v9041_v25 = vadd.f32 -1.0, %v10302_v15  ;;  %v13369_v39 = vadd.f32 %v13333_v42, %v5842_v30  ;;  %v9366_v59 = vadd.f32 %v9365_v2, %v9364_v41  ;;  %v5950_v10 = vmul.f32 1.442695, %v5920_v32 }
 0x3b3   : > { %v9367_v33 = vpop.f32.mrf.mxu1 }
 0x3b4   : > { %v6012_v27 = vsel %vm5892_vm13, %v5868_v8, %v9041_v25  ;;  %v5921_v22 = vmin.f32 %v13369_v39, 0.0  ;;  %v5843_v5 = vmul.f32 %v9366_v59, %v13328_v4  ;;  %10309 = vpow2.f32 %v5950_v10 }
 0x3b5   : > { %v10304_v57 = vpop.eup %10303  ;;  %6036 = vst [vmem:[#allocation7 + $0x10] sm:$0xff] %v6012_v27  ;;  %v9368_v18 = vpop.f32.mrf.mxu1  ;;  %vm5897_vm10 = vcmp.gt.f32.partialorder %v13369_v39, 0.0 }
 0x3b6   : > { %v9042_v9 = vadd.f32 -1.0, %v10304_v57  ;;  %v5952_v28 = vmul.f32 1.442695, %v5921_v22  ;;  %v13374_v44 = vadd.f32 %v13333_v42, %v5843_v5  ;;  %v9369_v55 = vadd.f32 %v9368_v18, %v9367_v33 }
 0x3b7   : > { %v9370_v63 = vpop.f32.mrf.mxu1  ;;  %v14407_v33 = vmov 0  }
 0x3b8   : > { %v6013_v26 = vsel %vm5893_vm4, %v13348_v19, %v9042_v9  ;;  %10311 = vpow2.f32 %v5952_v28  ;;  %v5922_v56 = vmin.f32 %v13374_v44, 0.0  ;;  %v5844_v17 = vmul.f32 %v9369_v55, %v13328_v4  ;;  %v6058_v20 = vld [vmem:[#allocation7] ss:$2 sm:$0xff]  ;;  %v6070_v41 = vld [vmem:[#allocation7 + $0x1] ss:$2 sm:$0xff] }
 0x3b9   : > { %v10306_v34 = vpop.eup %10305  ;;  %6037 = vst [vmem:[#allocation7 + $0x18] sm:$0xff] %v6013_v26  ;;  %v9371_v8 = vpop.f32.mrf.mxu1  ;;  %v6176_v27 = vsel %vm6175_vm5, 65537, %v14407_v33  ;;  %v6081_v9 = vmax.f32 %v6058_v20, %v6070_v41  ;;  %v14408_v26 = vld [vmem:[#allocation25_spill] sm:$0xff]  ;;  %vm5898_vm13 = vcmp.gt.f32.partialorder %v13374_v44, 0.0 }
 0x3ba   : > { %v9043_v36 = vadd.f32 -1.0, %v10306_v34  ;;  %v5954_v24 = vmul.f32 1.442695, %v5922_v56  ;;  %v9372_v29 = vadd.f32 %v9371_v8, %v9370_v63  ;;  %v13382_v12 = vadd.f32 %v13333_v42, %v5844_v17 }
 0x3bb   : > { %v9373_v40 = vpop.f32.mrf.mxu1  ;;  %v6180_v56 = vrot.slane %v6176_v27, %v14408_v26 }
 0x3bc   : > { %v6014_v43 = vsel %vm5894_vm2, %v13354_v50, %v9043_v36  ;;  %10313 = vpow2.f32 %v5954_v24  ;;  %v5845_v19 = vmul.f32 %v9372_v29, %v13328_v4  ;;  %v5923_v14 = vmin.f32 %v13382_v12, 0.0  ;;  %v6088_v22 = vld [vmem:[#allocation7 + $0x2] ss:$2 sm:$0xff] }
 0x3bd   : > { %v10308_v31 = vpop.eup %10307  ;;  %6038 = vst [vmem:[#allocation7 + $0x20] sm:$0xff] %v6014_v43  ;;  %v9374_v3 = vpop.f32.mrf.mxu1  ;;  %v6099_v8 = vmax.f32 %v6081_v9, %v6088_v22  ;;  %vm13432_vm4 = vcmp.ne.s16.totalorder %v6180_v56, 0  ;;  %vm5899_vm2 = vcmp.gt.f32.partialorder %v13382_v12, 0.0 }
 0x3be   : > { %v9044_v11 = vadd.f32 -1.0, %v10308_v31  ;;  %v13388_v61 = vadd.f32 %v13333_v42, %v5845_v19  ;;  %v9375_v52 = vadd.f32 %v9374_v3, %v9373_v40  ;;  %v5956_v0 = vmul.f32 1.442695, %v5923_v14 }
 0x3c0   : > { %v6015_v35 = vsel %vm5895_vm8, %v13359_v6, %v9044_v11  ;;  %v5924_v50 = vmin.f32 %v13388_v61, 0.0  ;;  %v5846_v58 = vmul.f32 %v9375_v52, %v13328_v4  ;;  %10315 = vpow2.f32 %v5956_v0  ;;  %v6060_v51 = vld [vmem:[#allocation7 + $0x10] ss:$2 sm:$0xff]  ;;  %v6072_v53 = vld [vmem:[#allocation7 + $0x11] ss:$2 sm:$0xff] }
 0x3c1   : > { %v9376_v16 = vpop.f32.mrf.mxu1  ;;  %6039 = vst [vmem:[#allocation7 + $0x28] sm:$0xff] %v6015_v35  ;;  %v10310_v13 = vpop.eup %10309  ;;  %v6082_v10 = vmax.f32 %v6060_v51, %v6072_v53  ;;  %vm14411_vm8 = vcmp.lt.s32.totalorder %v14402_v48, 50  ;;  %vm5900_vm7 = vcmp.gt.f32.partialorder %v13388_v61, 0.0 }
 0x3c2   : > { %v5958_v45 = vmul.f32 1.442695, %v5924_v50  ;;  %v5877_v1 = vadd.f32 %v13333_v42, %v5846_v58  ;;  %v9045_v47 = vadd.f32 -1.0, %v10310_v13  ;;  %vm6163_vm12 = vmpackc.low %vm14411_vm8, %vm14411_vm8 }
 0x3c3   : > { %v9377_v46 = vpop.f32.mrf.mxu1  ;;  %v6164_v20 = vsel %vm6163_vm12, 65537, %v14407_v33 }
 0x3c4   : > { %v9378_v6 = vadd.f32 %v9377_v46, %v9376_v16  ;;  %10317 = vpow2.f32 %v5958_v45  ;;  %v5925_v54 = vmin.f32 %v5877_v1, 0.0  ;;  %v6016_v21 = vsel %vm5896_vm6, %v13364_v60, %v9045_v47  ;;  %v6090_v15 = vld [vmem:[#allocation7 + $0x12] ss:$2 sm:$0xff] }
 0x3c5   : > { %v9379_v62 = vpop.f32.mrf.mxu1  ;;  %v10312_v7 = vpop.eup %10311  ;;  %6040 = vst [vmem:[#allocation7 + $0x30] sm:$0xff] %v6016_v21  ;;  %v6100_v28 = vmax.f32 %v6082_v10, %v6090_v15 }
 0x3c6   : > { %v5847_v23 = vmul.f32 %v9378_v6, %v13328_v4  ;;  %v9046_v32 = vadd.f32 -1.0, %v10312_v7  ;;  %v5960_v2 = vmul.f32 1.442695, %v5925_v54 }
 0x3c7   : > { %v9380_v30 = vpop.f32.mrf.mxu1  ;;  %v13428_v40 = vpack.c.bf16 %v6100_v28, %v6099_v8 }
 0x3c8   : > { %v13410_v25 = vadd.f32 %v13333_v42, %v5847_v23  ;;  %v9381_v59 = vadd.f32 %v9380_v30, %v9379_v62  ;;  %v6017_v5 = vsel %vm5897_vm10, %v13369_v39, %v9046_v32  ;;  %10319 = vpow2.f32 %v5960_v2  ;;  %v6062_v52 = vld [vmem:[#allocation7 + $0x20] ss:$2 sm:$0xff]  ;;  %v6074_v50 = vld [vmem:[#allocation7 + $0x21] ss:$2 sm:$0xff] }
 0x3c9   : > { %v9382_v60 = vpop.f32.mrf.mxu1  ;;  %v10314_v18 = vpop.eup %10313  ;;  %6041 = vst [vmem:[#allocation7 + $0x38] sm:$0xff] %v6017_v5  ;;  %v6182_v45 = vsel %vm13432_vm4, %v13428_v40, 0  ;;  %v6083_v48 = vmax.f32 %v6062_v52, %v6074_v50 }
 0x3ca   : > { %v5926_v57 = vmin.f32 %v13410_v25, 0.0  ;;  %v5848_v55 = vmul.f32 %v9381_v59, %v13328_v4  ;;  %v9047_v34 = vadd.f32 -1.0, %v10314_v18  ;;  %v6188_v32 = vshll.u32 %v6182_v45, 16 }
 0x3cb   : > { %v9383_v63 = vpop.f32.mrf.mxu1  ;;  %vm5902_vm14 = vcmp.gt.f32.partialorder %v13410_v25, 0.0 }
 0x3cc   : > { %v5962_v17 = vmul.f32 1.442695, %v5926_v57  ;;  %v13425_v36 = vadd.f32 %v13333_v42, %v5848_v55  ;;  %v9384_v39 = vadd.f32 %v9383_v63, %v9382_v60  ;;  %v6018_v29 = vsel %vm5898_vm13, %v13374_v44, %v9047_v34  ;;  %v6092_v47 = vld [vmem:[#allocation7 + $0x22] ss:$2 sm:$0xff] }
 0x3cd   : > { %v9385_v24 = vpop.f32.mrf.mxu1  ;;  %6042 = vst [vmem:[#allocation7 + $0x40] sm:$0xff] %v6018_v29  ;;  %v10316_v14 = vpop.eup %10315  ;;  %v6101_v2 = vmax.f32 %v6083_v48, %v6092_v47  ;;  %v6168_v57 = vrot.slane %v6164_v20, %v14408_v26  ;;  %v6190_v63 = vrot.slane %v6188_v32, 1 }
 0x3ce   : > { %10321 = vpow2.f32 %v5962_v17  ;;  %v5927_v43 = vmin.f32 %v13425_v36, 0.0  ;;  %v5849_v19 = vmul.f32 %v9384_v39, %v13328_v4  ;;  %v9048_v0 = vadd.f32 -1.0, %v10316_v14 }
 0x3cf   : > { %v9386_v31 = vpop.f32.mrf.mxu1  ;;  %vm13472_vm5 = vcmp.ne.s16.totalorder %v6168_v57, 0  ;;  %vm5903_vm6 = vcmp.gt.f32.partialorder %v13425_v36, 0.0 }
 0x3d0   : > { %v9387_v11 = vadd.f32 %v9386_v31, %v9385_v24  ;;  %v5964_v44 = vmul.f32 1.442695, %v5927_v43  ;;  %v13438_v16 = vadd.f32 %v13333_v42, %v5849_v19  ;;  %v6064_v58 = vld [vmem:[#allocation7 + $0x30] ss:$2 sm:$0xff]  ;;  %v6076_v37 = vld [vmem:[#allocation7 + $0x31] ss:$2 sm:$0xff]  ;;  %v6019_v1 = vsel %vm5899_vm2, %v13382_v12, %v9048_v0 }
 0x3d1   : > { %v9388_v35 = vpop.f32.mrf.mxu1  ;;  %v10318_v13 = vpop.eup %10317  ;;  %6043 = vst [vmem:[#allocation7 + $0x48] sm:$0xff] %v6019_v1  ;;  %v6084_v23 = vmax.f32 %v6064_v58, %v6076_v37  ;;  %v6186_v19 = vshrl.u32 %v6182_v45, 16 }
 0x3d2   : > { %v5850_v46 = vmul.f32 %v9387_v11, %v13328_v4  ;;  %10323 = vpow2.f32 %v5964_v44  ;;  %v9049_v62 = vadd.f32 -1.0, %v10318_v13  ;;  %v5928_v51 = vmin.f32 %v13438_v16, 0.0 }
 0x3d3   : > { %v9389_v6 = vpop.f32.mrf.mxu1  ;;  %v6191_v58 = vor.u32 %v6190_v63, %v6186_v19  ;;  %vm5904_vm10 = vcmp.gt.f32.partialorder %v13438_v16, 0.0 }
 0x3d4   : > { %v13450_v53 = vadd.f32 %v13333_v42, %v5850_v46  ;;  %v9390_v54 = vadd.f32 %v9389_v6, %v9388_v35  ;;  %v6094_v41 = vld [vmem:[#allocation7 + $0x32] ss:$2 sm:$0xff]  ;;  %v6020_v12 = vsel %vm5900_vm7, %v13388_v61, %v9049_v62  ;;  %v5966_v21 = vmul.f32 1.442695, %v5928_v51 }
 0x3d5   : > { %v9391_v7 = vpop.f32.mrf.mxu1  ;;  %v10320_v15 = vpop.eup %10319  ;;  %v6102_v59 = vmax.f32 %v6084_v23, %v6094_v41  ;;  %6044 = vst [vmem:[#allocation7 + $0x50] sm:$0xff] %v6020_v12  ;;  %v6170_v23 = vsel %vm13472_vm5, %v13428_v40, 0  ;;  %vm6235_vm7 = vsmask.f32 256 }
 0x3d6   : > { %v5929_v30 = vmin.f32 %v13450_v53, 0.0  ;;  %v5851_v10 = vmul.f32 %v9390_v54, %v13328_v4  ;;  %10325 = vpow2.f32 %v5966_v21  ;;  %vm5905_vm13 = vcmp.gt.f32.partialorder %v13450_v53, 0.0 }
 0x3d7   : > { %v9392_v27 = vpop.f32.mrf.mxu1  ;;  %v13457_v5 = vpack.c.bf16 %v6102_v59, %v6101_v2 }
 0x3d8   : > { %v5968_v60 = vmul.f32 1.442695, %v5929_v30  ;;  %v9393_v22 = vadd.f32 %v9392_v27, %v9391_v7  ;;  %v13460_v33 = vadd.f32 %v13333_v42, %v5851_v10  ;;  %v6066_v17 = vld [vmem:[#allocation7 + $0x40] ss:$2 sm:$0xff]  ;;  %v6078_v8 = vld [vmem:[#allocation7 + $0x41] ss:$2 sm:$0xff] }
 0x3d9   : > { %v9394_v61 = vpop.f32.mrf.mxu1  ;;  %v6183_v28 = vsel %vm13432_vm4, %v13457_v5, 0  ;;  %v6085_v37 = vmax.f32 %v6066_v17, %v6078_v8 }
 0x3da   : > { %10327 = vpow2.f32 %v5968_v60  ;;  %v5852_v18 = vmul.f32 %v9393_v22, %v13328_v4  ;;  %v6193_v56 = vshll.u32 %v6183_v28, 16  ;;  %v5930_v39 = vmin.f32 %v13460_v33, 0.0 }
 0x3db   : > { %v10322_v9 = vpop.eup %10321  ;;  %v9395_v55 = vpop.f32.mrf.mxu1  ;;  %v6197_v2 = vshrl.u32 %v6183_v28, 16  ;;  %vm5906_vm2 = vcmp.gt.f32.partialorder %v13460_v33, 0.0 }
 0x3dc   : > { %v9051_v34 = vadd.f32 -1.0, %v10322_v9  ;;  %v13470_v26 = vadd.f32 %v13333_v42, %v5852_v18  ;;  %v9396_v24 = vadd.f32 %v9395_v55, %v9394_v61  ;;  %v6195_v31 = vrot.slane %v6193_v56, 1  ;;  %v6068_v14 = vld [vmem:[#allocation7 + $0x50] ss:$2 sm:$0x3] }
 0x3dd   : > { %v9397_v29 = vpop.f32.mrf.mxu1  ;;  %v6080_v52 = vld [vmem:[#allocation7 + $0x51] ss:$2 sm:$0x3]  ;;  %v6096_v0 = vld [vmem:[#allocation7 + $0x42] ss:$2 sm:$0xff] }
 0x3de   : > { %v6022_v11 = vsel %vm5902_vm14, %v13410_v25, %v9051_v34  ;;  %v5853_v44 = vmul.f32 %v9396_v24, %v13328_v4  ;;  %v6086_v46 = vmax.f32 %v6068_v14, %v6080_v52  ;;  %v5970_v13 = vmul.f32 1.442695, %v5930_v39  ;;  %v6098_v1 = vld [vmem:[#allocation7 + $0x52] ss:$2 sm:$0x3] }
 0x3df   : > { %6046 = vst [vmem:[#allocation7 + $0x60] sm:$0xff] %v6022_v11  ;;  %v9398_v35 = vpop.f32.mrf.mxu1  ;;  %v10324_v50 = vpop.eup %10323  ;;  %v5931_v45 = vmin.f32 %v13470_v26, 0.0  ;;  %v6103_v51 = vmax.f32 %v6085_v37, %v6096_v0  ;;  %v6196_v48 = vsel %vm4597_vm11, %v6191_v58, %v6195_v31  ;;  %v6199_v61 = vor.u32 %v6197_v2, %v6195_v31 }
 0x3e0   : > { %v9052_v6 = vadd.f32 -1.0, %v10324_v50  ;;  %v13481_v47 = vadd.f32 %v13333_v42, %v5853_v44  ;;  %v9399_v25 = vadd.f32 %v9398_v35, %v9397_v29  ;;  %v6104_v54 = vmax.f32 %v6086_v46, %v6098_v1 }
 0x3e1   : > { %v9400_v62 = vpop.f32.mrf.mxu1  ;;  %10329 = vpow2.f32 %v5970_v13  ;;  %v5972_v20 = vmul.f32 1.442695, %v5931_v45  ;;  %v6210_v10 = vadd.bf16 %v6196_v48, %v6170_v23  ;;  %v6171_v29 = vsel %vm13472_vm5, %v13457_v5, 0 }
 0x3e2   : > { %v6023_v7 = vsel %vm5903_vm6, %v13425_v36, %v9052_v6  ;;  %v5932_v41 = vmin.f32 %v13481_v47, 0.0  ;;  %v6107_v21 = vpack.c.bf16 %v6104_v54, %v6103_v51  ;;  %v5854_v30 = vmul.f32 %v9399_v25, %v13328_v4 }
 0x3e3   : > { %v9401_v12 = vpop.f32.mrf.mxu1  ;;  %6047 = vst [vmem:[#allocation7 + $0x68] sm:$0xff] %v6023_v7  ;;  %v10326_v32 = vpop.eup %10325  ;;  %10331 = vpow2.f32 %v5972_v20  ;;  %v13511_v24 = vcombine.low %v6210_v10, %v6210_v10  ;;  %v13519_v31 = vcombine.high %v6210_v10, %v6210_v10  ;;  %vm5907_vm8 = vcmp.gt.f32.partialorder %v13470_v26, 0.0 }
 0x3e4   : > { %v9402_v15 = vadd.f32 %v9401_v12, %v9400_v62  ;;  %v5974_v59 = vmul.f32 1.442695, %v5932_v41  ;;  %v13495_v36 = vsel %vm13432_vm4, %v6107_v21, 0  ;;  %v9053_v27 = vadd.f32 -1.0, %v10326_v32 }
 0x3e5   : > { %v9403_v40 = vpop.f32.mrf.mxu1  ;;  %v13499_v60 = vadd.f32 %v13333_v42, %v5854_v30  ;;  %v6201_v57 = vshll.u32 %v13495_v36, 16  ;;  %v6205_v28 = vshrl.u32 %v13495_v36, 16  ;;  %6231 = vst [vmem:[#allocation4] sm:$0xf] %v13511_v24  ;;  %v6172_v5 = vsel %vm13472_vm5, %v6107_v21, 0 }
 0x3e6   : > { %10333 = vpow2.f32 %v5974_v59  ;;  %v5855_v18 = vmul.f32 %v9402_v15, %v13328_v4  ;;  %v6024_v55 = vsel %vm5904_vm10, %v13438_v16, %v9053_v27  ;;  %6232 = vst [vmem:[#allocation4 + $0x14] sm:$0xf] %v13519_v31  ;;  %6328 = vst [vmem:[#allocation4 + $0x10] sm:$0xf] %v13519_v31  ;;  %v9069_v46 = vrot.slane %v13511_v24, 9 }
 0x3e7   : > { %v10328_v22 = vpop.eup %10327  ;;  %v9404_v9 = vpop.f32.mrf.mxu1  ;;  %v5933_v56 = vmin.f32 %v13499_v60, 0.0  ;;  %v6203_v34 = vrot.slane %v6201_v57, 1  ;;  %6048 = vst [vmem:[#allocation7 + $0x70] sm:$0xff] %v6024_v55  ;;  %v6248_v6 = vrot.slane %v13519_v31, 5  ;;  %v9070_v45 = vrot.slane %v13511_v24, 10 }
 0x3e8   : > { %v9054_v63 = vadd.f32 -1.0, %v10328_v22  ;;  %v13509_v17 = vadd.f32 %v13333_v42, %v5855_v18  ;;  %v9405_v8 = vadd.f32 %v9404_v9, %v9403_v40  ;;  %v6274_v48 = vrot.slane %v13519_v31, 6 }
 0x3e9   : > { %v9406_v39 = vpop.f32.mrf.mxu1  ;;  %v5976_v19 = vmul.f32 1.442695, %v5933_v56  ;;  %v6204_v14 = vsel %vm4597_vm11, %v6199_v61, %v6203_v34  ;;  %v6240_v11 = vor.u32 %v6205_v28, %v6203_v34  ;;  %vm5908_vm12 = vcmp.gt.f32.partialorder %v13481_v47, 0.0 }
 0x3ea   : > { %v6025_v16 = vsel %vm5905_vm13, %v13450_v53, %v9054_v63  ;;  %v5934_v52 = vmin.f32 %v13509_v17, 0.0  ;;  %v13529_v53 = vadd.bf16 %v6204_v14, %v6171_v29  ;;  %v5856_v44 = vmul.f32 %v9405_v8, %v13328_v4  ;;  %v13553_v23 = vld [vmem:[#allocation7 + $0x60] ss:$2 sm:$0xff]  ;;  %v13555_v7 = vld [vmem:[#allocation7 + $0x61] ss:$2 sm:$0xff] }
 0x3eb   : > { %6049 = vst [vmem:[#allocation7 + $0x78] sm:$0xff] %v6025_v16  ;;  %v9407_v0 = vpop.f32.mrf.mxu1  ;;  %10335 = vpow2.f32 %v5976_v19  ;;  %v13535_v35 = vadd.bf16 %v6240_v11, %v6172_v5  ;;  %v6249_v15 = vsel %vm10663_vm15, %v9069_v46, %v6248_v6  ;;  %v6250_v32 = vrot.slane %v6248_v6, 4 }
 0x3ec   : > { %v5978_v50 = vmul.f32 1.442695, %v5934_v52  ;;  %v9408_v58 = vadd.f32 %v9407_v0, %v9406_v39  ;;  %v13539_v13 = vadd.f32 %v13333_v42, %v5856_v44  ;;  %v13543_v1 = vcombine.low %v13529_v53, %v13529_v53  ;;  %6265 = vst [vmem:[#allocation4 + $0x4] sm:$0xf] %v6249_v15 }
 0x3ed   : > { %v9409_v37 = vpop.f32.mrf.mxu1  ;;  %v13549_v62 = vcombine.low %v13535_v35, %v13535_v35  ;;  %v6275_v61 = vsel %vm10671_vm0, %v9070_v45, %v6274_v48  ;;  %v6132_v57 = vmax.f32 %v13553_v23, %v13555_v7  ;;  %vm5909_vm14 = vcmp.gt.f32.partialorder %v13499_v60, 0.0  ;;  %v10060_v23 = vld [vmem:[%s14268_s7 + $0x130] sm:$0xff]   ;;  %v6332_v7 = vld [vmem:[#allocation4 + $0x60] sm:$0x1] }
 0x3ee   : > { %v10330_v25 = vpop.eup %10329  ;;  %10337 = vpow2.f32 %v5978_v50  ;;  %v5857_v51 = vmul.f32 %v9408_v58, %v13328_v4  ;;  %v5935_v41 = vmin.f32 %v13539_v13, 0.0  ;;  %6233 = vst [vmem:[#allocation4 + $0x28] sm:$0xf] %v13543_v1  ;;  %6329 = vst [vmem:[#allocation4 + $0x24] sm:$0xf] %v13543_v1  ;;  %v6251_v56 = vrot.slane %v13543_v1, 5 }
 0x3ef   : > { %v9410_v54 = vpop.f32.mrf.mxu1  ;;  %v9055_v20 = vadd.f32 -1.0, %v10330_v25  ;;  %6331 = vst [vmem:[#allocation4 + $0x4c] sm:$0xf] %v13549_v62  ;;  %6291 = vst [vmem:[#allocation4 + $0x8] sm:$0xf] %v6275_v61  ;;  %v6276_v34 = vrot.slane %v6274_v48, 4 }
 0x3f0   : > { %v9411_v12 = vadd.f32 %v9410_v54, %v9409_v37  ;;  %v13563_v21 = vadd.f32 %v13333_v42, %v5857_v51  ;;  %v10332_v2 = vpop.eup %10331  ;;  %v5980_v10 = vmul.f32 1.442695, %v5935_v41  ;;  %v6277_v16 = vrot.slane %v13543_v1, 6  ;;  %v6139_v25 = vld [vmem:[#allocation7 + $0x62] ss:$2 sm:$0xff] }
 0x3f1   : > { %v6026_v40 = vsel %vm5906_vm2, %v13460_v33, %v9055_v20  ;;  %v9056_v9 = vadd.f32 -1.0, %v10332_v2  ;;  %v13579_v33 = vadd.bf16 %v6205_v28, %v6172_v5  ;;  %v6252_v28 = vsel %vm10663_vm15, %v6250_v32, %v6251_v56  ;;  %v10041_v61 = vld [vmem:[#allocation4] ss:$20 sps:$4 sm:$0xff]  }
 0x3f2   : > { %v6111_v59 = vld [vmem:[#allocation7 + $0x70] ss:$2 sm:$0xff]  ;;  %v5858_v27 = vmul.f32 %v9411_v12, %v13328_v4  ;;  %v6123_v18 = vld [vmem:[#allocation7 + $0x71] ss:$2 sm:$0xff]  ;;  %6050 = vst [vmem:[#allocation7 + $0x80] sm:$0xff] %v6026_v40  ;;  %v5936_v55 = vmin.f32 %v13563_v21, 0.0  ;;  %10339 = vpow2.f32 %v5980_v10  ;;  %v9066_v5 = vcombine.high %v13529_v53, %v13529_v53 }
 0x3f3   : > { %v10334_v4 = vpop.eup %10333  ;;  %v6027_v8 = vsel %vm5907_vm8, %v13470_v26, %v9056_v9  ;;  %v6133_v19 = vmax.f32 %v6111_v59, %v6123_v18  ;;  %v9071_v14 = vrot.slane %v13511_v24, 11  ;;  %6266 = vst [vmem:[#allocation4 + $0x18] sm:$0xf] %v6252_v28  ;;  %v6278_v26 = vsel %vm10671_vm0, %v6276_v34, %v6277_v16  ;;  %v6237_v10 = vld [vmem:[#allocation4 + $0x50] sm:$0x1] }
 0x3f4   : > { %v5889_v63 = vadd.f32 %v13333_v42, %v5858_v27  ;;  %v9057_v39 = vadd.f32 -1.0, %v10334_v4  ;;  %v5982_v29 = vmul.f32 1.442695, %v5936_v55  ;;  %6051 = vst [vmem:[#allocation7 + $0x88] sm:$0xff] %v6027_v8  ;;  %v6300_v11 = vrot.slane %v13519_v31, 7 }
 0x3f5   : > { %6292 = vst [vmem:[#allocation4 + $0x1c] sm:$0xf] %v6278_v26  ;;  %v6303_v0 = vrot.slane %v13543_v1, 7  ;;  %v6253_v24 = vrot.slane %v6251_v56, 4  ;;  %v6257_v37 = vrot.slane %v13549_v62, 5  ;;  %v6279_v46 = vrot.slane %v6277_v16, 4 }
 0x3f6   : > { %v5937_v36 = vmin.f32 %v5889_v63, 0.0  ;;  %v6028_v42 = vsel %vm5908_vm12, %v13481_v47, %v9057_v39  ;;  %10341 = vpow2.f32 %v5982_v29  ;;  %v6301_v47 = vsel %vm10680_vm1, %v9071_v14, %v6300_v11  ;;  %6234 = vst [vmem:[#allocation4 + $0x3c] sm:$0xf] %v9066_v5  ;;  %6330 = vst [vmem:[#allocation4 + $0x38] sm:$0xf] %v9066_v5 }
 0x3f7   : > { %6052 = vst [vmem:[#allocation7 + $0x90] sm:$0xff] %v6028_v42  ;;  %v6302_v58 = vrot.slane %v6300_v11, 4  ;;  %6317 = vst [vmem:[#allocation4 + $0xc] sm:$0xf] %v6301_v47  ;;  %v6254_v31 = vrot.slane %v9066_v5, 5  ;;  %v6280_v1 = vrot.slane %v9066_v5, 6  ;;  %v9067_v40 = vcombine.low %v13579_v33, %v13579_v33 }
 0x3f8   : > { %v5984_v52 = vmul.f32 1.442695, %v5937_v36  ;;  %v10336_v44 = vpop.eup %10335  ;;  %v6283_v54 = vrot.slane %v13549_v62, 6  ;;  %v6305_v48 = vrot.slane %v6303_v0, 4  ;;  %vm5910_vm6 = vcmp.gt.f32.partialorder %v13509_v17, 0.0  ;;  %v10061_v36 = vld [vmem:[%s14268_s7 + $0x128] sm:$0xff]  }
 0x3f9   : > { %v6141_v6 = vld [vmem:[#allocation7 + $0x72] ss:$2 sm:$0xff]  ;;  %v9058_v45 = vadd.f32 -1.0, %v10336_v44  ;;  %v6304_v53 = vsel %vm10680_vm1, %v6302_v58, %v6303_v0  ;;  %v6255_v12 = vsel %vm10663_vm15, %v6253_v24, %v6254_v31  ;;  %v6256_v15 = vrot.slane %v6254_v31, 4  ;;  %v6269_v56 = vld [vmem:[#allocation4 + $0x54] sm:$0x1] }
 0x3fa   : > { %10343 = vpow2.f32 %v5984_v52  ;;  %v6151_v51 = vmax.f32 %v6133_v19, %v6141_v6  ;;  %6318 = vst [vmem:[#allocation4 + $0x20] sm:$0xf] %v6304_v53  ;;  %v6281_v32 = vsel %vm10671_vm0, %v6279_v46, %v6280_v1  ;;  %6267 = vst [vmem:[#allocation4 + $0x2c] sm:$0xf] %v6255_v12  ;;  %v6282_v59 = vrot.slane %v6280_v1, 4 }
 0x3fb   : > { %v10338_v20 = vpop.eup %10337  ;;  %v6029_v41 = vsel %vm5909_vm14, %v13499_v60, %v9058_v45  ;;  %6293 = vst [vmem:[#allocation4 + $0x30] sm:$0xf] %v6281_v32  ;;  %vm14417_vm10 = vcmask 1040384   ;;  %v6150_v27 = vmax.f32 %v6132_v57, %v6139_v25  ;;  %v10043_v18 = vld [vmem:[#allocation4 + $0x4] ss:$20 sps:$4 sm:$0xff]   ;;  %v6258_v9 = vsel %vm10663_vm15, %v6256_v15, %v6257_v37 }
 0x3fc   : > { %6053 = vst [vmem:[#allocation7 + $0x98] sm:$0xff] %v6029_v41  ;;  %v9059_v2 = vadd.f32 -1.0, %v10338_v20  ;;  %vm13617_vm13 = vmand %vm14417_vm10, %vm6235_vm7  ;;  %v6306_v55 = vrot.slane %v9066_v5, 7  ;;  %v9072_v33 = vcombine.high %v13535_v35, %v13535_v35  ;;  %v6284_v63 = vsel %vm10671_vm0, %v6282_v59, %v6283_v54  ;;  %7033 = vmatprep.mubr.bf16.mxu0 %v10043_v18  ;;  %v6295_v35 = vld [vmem:[#allocation4 + $0x58] sm:$0x1]  ;;  %v10062_v41 = vld [vmem:[%s14268_s7 + $0x120] sm:$0xff]  }
 0x3fd   : > { %6268 = vst [vmem:[#allocation4 + $0x40] sm:$0xf] %v6258_v9  ;;  %v13634_v57 = vpack.c.bf16 %v6151_v51, %v6150_v27  ;;  %vm5911_vm2 = vcmp.gt.f32.partialorder %v13539_v13, 0.0  ;;  %6294 = vst [vmem:[#allocation4 + $0x44] sm:$0xf] %v6284_v63  ;;  %7034 = vmatmul.mubr.bf16.vlgmr.msra.gmra.mxu0 %v10041_v61  ;;  %v6309_v29 = vrot.slane %v13549_v62, 7  ;;  %v6238_v16 = vsel %vm13617_vm13, %v9067_v40, %v6237_v10 }
 0x3fe   : > { %v6030_v4 = vsel %vm5910_vm6, %v13509_v17, %v9059_v2  ;;  %v6307_v17 = vsel %vm10680_vm1, %v6305_v48, %v6306_v55  ;;  %v6321_v34 = vld [vmem:[#allocation4 + $0x5c] sm:$0x1]  ;;  %v6308_v39 = vrot.slane %v6306_v55, 4  ;;  %v6259_v19 = vrot.slane %v6257_v37, 4  ;;  %v6125_v14 = vld [vmem:[#allocation7 + $0x81] ss:$2 sm:$0xff]  ;;  %9735 = vmatpush3.bf16.msra.mxu0 %v13345_v49 }
 0x3ff   : > { %6054 = vst [vmem:[#allocation7 + $0xa0] sm:$0xff] %v6030_v4  ;;  %v10340_v8 = vpop.eup %10339  ;;  %6319 = vst [vmem:[#allocation4 + $0x34] sm:$0xf] %v6307_v17  ;;  %v6113_v28 = vld [vmem:[#allocation7 + $0x80] ss:$2 sm:$0xff]  ;;  %v6285_v26 = vrot.slane %v6283_v54, 4  ;;  %v6333_v11 = vsel %vm13617_vm13, %v9072_v33, %v6332_v7  ;;  %9736 = vmatprep.subr.bf16.mxu0 %v10060_v23 }
 0x400   : > { %v9060_v42 = vadd.f32 -1.0, %v10340_v8  ;;  %6239 = vst [vmem:[#allocation4 + $0x50] sm:$0x1] %v6238_v16  ;;  %v10044_v62 = vld [vmem:[#allocation4 + $0x8] ss:$20 sps:$4 sm:$0xff]   ;;  %v6310_v0 = vsel %vm10680_vm1, %v6308_v39, %v6309_v29  ;;  %v6270_v5 = vsel %vm13617_vm13, %v6259_v19, %v6269_v56  ;;  %v6311_v24 = vrot.slane %v6309_v29, 4 }
 0x401   : > { %v10046_v52 = vld [vmem:[#allocation4 + $0xc] ss:$20 sps:$4 sm:$0xff]   ;;  %6334 = vst [vmem:[#allocation4 + $0x60] sm:$0x1] %v6333_v11  ;;  %v6338_v47 = vsel %vm13432_vm4, %v13634_v57, 0  ;;  %v6296_v46 = vsel %vm13617_vm13, %v6285_v26, %v6295_v35  ;;  %v6134_v1 = vmax.f32 %v6113_v28, %v6125_v14  ;;  %vm5912_vm8 = vcmp.gt.f32.partialorder %v13563_v21, 0.0 }
 0x402   : > { %v6031_v37 = vsel %vm5911_vm2, %v13539_v13, %v9060_v42  ;;  %6320 = vst [vmem:[#allocation4 + $0x48] sm:$0xf] %v6310_v0  ;;  %6271 = vst [vmem:[#allocation4 + $0x54] sm:$0x1] %v6270_v5  ;;  %v6143_v6 = vld [vmem:[#allocation7 + $0x82] ss:$2 sm:$0xff]  ;;  %7114 = vmatprep.mubr.bf16.mxu1 %v10046_v52  ;;  %v6322_v31 = vsel %vm13617_vm13, %v6311_v24, %v6321_v34  ;;  %9737 = vmatpush3.bf16.msra.mxu0 %v10060_v23 }
 0x403   : > { %v10342_v44 = vpop.eup %10341  ;;  %v6115_v49 = vld [vmem:[#allocation7 + $0x90] ss:$2 sm:$0xff]  ;;  %v6127_v58 = vld [vmem:[#allocation7 + $0x91] ss:$2 sm:$0xff]  ;;  %6055 = vst [vmem:[#allocation7 + $0xa8] sm:$0xff] %v6031_v37  ;;  %7115 = vmatmul.mubr.bf16.vlgmr.msra.gmra.mxu1 %v10044_v62  ;;  %v6344_v53 = vshll.u32 %v6338_v47, 16  ;;  %9738 = vmatprep.subr.bf16.mxu0 %v10061_v36  ;;  %v6152_v12 = vmax.f32 %v6134_v1, %v6143_v6 }
 0x404   : > { %v9061_v45 = vadd.f32 -1.0, %v10342_v44  ;;  %6297 = vst [vmem:[#allocation4 + $0x58] sm:$0x1] %v6296_v46  ;;  %v6135_v25 = vmax.f32 %v6115_v49, %v6127_v58  ;;  %v10049_v51 = vld [vmem:[#allocation4 + $0x2c] ss:$20 sps:$4 sm:$0xff]   ;;  %v6342_v27 = vshrl.u32 %v6338_v47, 16 }
 0x405   : > { %6323 = vst [vmem:[#allocation4 + $0x5c] sm:$0x1] %v6322_v31  ;;  %v10047_v20 = vld [vmem:[#allocation4 + $0x28] ss:$20 sps:$4 sm:$0xff]   ;;  %7041 = vmatprep.mubr.bf16.mxu0 %v10049_v51  ;;  %v6346_v2 = vrot.slane %v6344_v53, 1  ;;  %v10076_v9 = vld [vmem:[%s14268_s7 + $0x110] sm:$0xff]  }
 0x406   : > { %v6145_v54 = vld [vmem:[#allocation7 + $0x92] ss:$2 sm:$0xff]  ;;  %v6032_v48 = vsel %vm5912_vm8, %v13563_v21, %v9061_v45  ;;  %7042 = vmatmul.mubr.bf16.gmra.mxu0 %v10047_v20  ;;  %v10069_v21 = vld [vmem:[%s14268_s7 + $0x118] sm:$0xff]   ;;  %v6335_v34 = vsel %vm13472_vm5, %v13634_v57, 0  ;;  %vm7428_vm8 = vsmask.f32 2304 }
 0x407   : > { %v10344_v13 = vpop.eup %10343  ;;  %v6153_v15 = vmax.f32 %v6135_v25, %v6145_v54  ;;  %6056 = vst [vmem:[#allocation7 + $0xb0] sm:$0xff] %v6032_v48  ;;  %9739 = vmatpush3.bf16.msra.mxu0 %v10061_v36  ;;  %v10050_v10 = vld [vmem:[#allocation4 + $0x30] ss:$20 sps:$4 sm:$0xff]   ;;  %v6347_v63 = vor.u32 %v6346_v2, %v6342_v27  ;;  %v10083_v14 = vld [vmem:[%s14268_s7 + $0x108] sm:$0xff]  }
 0x408   : > { %9740 = vmatprep.subr.bf16.mxu0 %v10062_v41  ;;  %v10053_v7 = vld [vmem:[#allocation4 + $0x50] ss:$20 sps:$4 sm:$0xff]   ;;  %v6391_v13 = vld [vmem:[#allocation4 + $0xc8] sm:$0x1] }
 0x409   : > { %v13667_v32 = vpack.c.bf16 %v6153_v15, %v6152_v12  ;;  %v10052_v59 = vld [vmem:[#allocation4 + $0x34] ss:$20 sps:$4 sm:$0xff]   ;;  %v10085_v49 = vld [vmem:[%s14268_s7 + $0x100] sm:$0xff]  }
 0x40a   : > { %v6117_v18 = vld [vmem:[#allocation7 + $0xa0] ss:$2 sm:$0xff]  ;;  %7122 = vmatprep.mubr.bf16.mxu1 %v10052_v59  ;;  %v6129_v55 = vld [vmem:[#allocation7 + $0xa1] ss:$2 sm:$0xff] }
 0x40b   : > { %v6339_v40 = vsel %vm13432_vm4, %v13667_v32, 0  ;;  %7123 = vmatmul.mubr.bf16.gmra.mxu1 %v10050_v10  ;;  %v10055_v33 = vld [vmem:[#allocation4 + $0x54] ss:$20 sps:$4 sm:$0xff]   ;;  %9741 = vmatpush3.bf16.msra.mxu0 %v10062_v41  ;;  %v6136_v8 = vmax.f32 %v6117_v18, %v6129_v55  ;;  %v10056_v42 = vld [vmem:[#allocation4 + $0x58] ss:$20 sps:$4 sm:$0xff]   ;;  %v6336_v53 = vsel %vm13472_vm5, %v13667_v32, 0 }
 0x40c   : > { %v6349_v61 = vshll.u32 %v6339_v40, 16  ;;  %v10058_v4 = vld [vmem:[#allocation4 + $0x5c] ss:$20 sps:$4 sm:$0xff]   ;;  %9742 = vmatprep.subr.bf16.mxu0 %v10069_v21  ;;  %7049 = vmatprep.mubr.bf16.mxu0 %v10055_v33  ;;  %v6353_v58 = vshrl.u32 %v6339_v40, 16 }
 0x40d   : > { %7130 = vmatprep.mubr.bf16.mxu1 %v10058_v4 }
 0x40e   : > { %v6351_v56 = vrot.slane %v6349_v61, 1  ;;  %v6119_v23 = vld [vmem:[#allocation7 + $0xb0] ss:$2 sm:$0x3]  ;;  %7050 = vmatmul.mubr.bf16.gmra.mxu0 %v10053_v7 }
 0x40f   : > { %v6131_v17 = vld [vmem:[#allocation7 + $0xb1] ss:$2 sm:$0x3]  ;;  %v6147_v35 = vld [vmem:[#allocation7 + $0xa2] ss:$2 sm:$0xff]  ;;  %9743 = vmatpush3.bf16.msra.mxu0 %v10069_v21 }
 0x410   : > { %v6137_v39 = vmax.f32 %v6119_v23, %v6131_v17  ;;  %v6352_v29 = vsel %vm4597_vm11, %v6347_v63, %v6351_v56  ;;  %v6149_v16 = vld [vmem:[#allocation7 + $0xb2] ss:$2 sm:$0x3]  ;;  %v6154_v36 = vmax.f32 %v6136_v8, %v6147_v35  ;;  %9744 = vmatprep.subr.bf16.mxu0 %v10076_v9  ;;  %v6355_v1 = vor.u32 %v6353_v58, %v6351_v56 }
 0x411   : > { %v6366_v19 = vadd.bf16 %v6352_v29, %v6335_v34  ;;  %v6423_v29 = vld [vmem:[#allocation4 + $0xcc] sm:$0x1] }
 0x412   : > { %v6155_v28 = vmax.f32 %v6137_v39, %v6149_v16 }
 0x413   : > { %v9073_v26 = vcombine.low %v6366_v19, %v6366_v19  ;;  %v9074_v11 = vcombine.high %v6366_v19, %v6366_v19  ;;  %7131 = vmatmul.mubr.bf16.gmra.mxu1 %v10056_v42  ;;  %9745 = vmatpush3.bf16.msra.mxu0 %v10076_v9 }
 0x414   : > { %v6158_v62 = vpack.c.bf16 %v6155_v28, %v6154_v36  ;;  %9746 = vmatprep.subr.bf16.mxu0 %v10083_v14 }
 0x415   : > { %6387 = vst [vmem:[#allocation4 + $0x78] sm:$0xf] %v9073_v26  ;;  %6388 = vst [vmem:[#allocation4 + $0x8c] sm:$0xf] %v9074_v11  ;;  %v9079_v57 = vrot.slane %v9073_v26, 9  ;;  %v6402_v52 = vrot.slane %v9074_v11, 5 }
 0x416   : > { %6482 = vst [vmem:[#allocation4 + $0x88] sm:$0xf] %v9074_v11  ;;  %v9080_v0 = vrot.slane %v9073_v26, 10  ;;  %v6428_v5 = vrot.slane %v9074_v11, 6  ;;  %v6340_v24 = vsel %vm13432_vm4, %v6158_v62, 0  ;;  %v9081_v44 = vrot.slane %v9073_v26, 11 }
 0x417   : > { %v6454_v47 = vrot.slane %v9074_v11, 7  ;;  %v6357_v37 = vshll.u32 %v6340_v24, 16  ;;  %v6361_v46 = vshrl.u32 %v6340_v24, 16  ;;  %v6403_v6 = vsel %vm10663_vm15, %v9079_v57, %v6402_v52  ;;  %9747 = vmatpush3.bf16.msra.mxu0 %v10083_v14  ;;  %v6486_v14 = vld [vmem:[#allocation4 + $0xd8] sm:$0x1] }
 0x418   : > { %v6337_v45 = vsel %vm13472_vm5, %v6158_v62, 0  ;;  %6419 = vst [vmem:[#allocation4 + $0x7c] sm:$0xf] %v6403_v6  ;;  %v6429_v3 = vsel %vm10671_vm0, %v9080_v0, %v6428_v5  ;;  %9748 = vmatprep.subr.bf16.mxu0 %v10085_v49  ;;  %v6404_v59 = vrot.slane %v6402_v52, 4  ;;  %v6430_v10 = vrot.slane %v6428_v5, 4 }
 0x419   : > { %v6455_v31 = vsel %vm10680_vm1, %v9081_v44, %v6454_v47  ;;  %v6359_v25 = vrot.slane %v6357_v37, 1  ;;  %6445 = vst [vmem:[#allocation4 + $0x80] sm:$0xf] %v6429_v3  ;;  %v6368_v51 = vadd.bf16 %v6361_v46, %v6337_v45  ;;  %v6456_v27 = vrot.slane %v6454_v47, 4  ;;  %v6449_v57 = vld [vmem:[#allocation4 + $0xd0] sm:$0x1] }
 0x41a   : > { %6471 = vst [vmem:[#allocation4 + $0x84] sm:$0xf] %v6455_v31  ;;  %v6475_v52 = vld [vmem:[#allocation4 + $0xd4] sm:$0x1] }
 0x41b   : > { %v6360_v54 = vsel %vm4597_vm11, %v6355_v1, %v6359_v25  ;;  %v6394_v48 = vor.u32 %v6361_v46, %v6359_v25  ;;  %v9077_v20 = vcombine.low %v6368_v51, %v6368_v51  ;;  %9749 = vmatpush3.bf16.msra.mxu0 %v10085_v49 }
 0x41c   : > { %v6367_v41 = vadd.bf16 %v6360_v54, %v6336_v53  ;;  %v10063_v37 = vld [vmem:[#allocation4 + $0x78] ss:$20 sps:$4 sm:$0xff]   ;;  %v10084_v54 = vld [vmem:[#allocation4 + $0x10] ss:$20 sps:$4 sm:$0xff]  }
 0x41d   : > { %v6396_v12 = vadd.bf16 %v6394_v48, %v6337_v45  ;;  %v6392_v15 = vsel %vm13617_vm13, %v9077_v20, %v6391_v13  ;;  %v10086_v48 = vld [vmem:[#allocation4 + $0x38] ss:$20 sps:$4 sm:$0xff]   ;;  %v10087_v20 = vld [vmem:[#allocation4 + $0x60] ss:$20 sps:$4 sm:$0xff]  }
 0x41e   : > { %v9075_v2 = vcombine.low %v6367_v41, %v6367_v41  ;;  %v9076_v21 = vcombine.high %v6367_v41, %v6367_v41  ;;  %6393 = vst [vmem:[#allocation4 + $0xc8] sm:$0x1] %v6392_v15 }
 0x41f   : > { %v9078_v40 = vcombine.low %v6396_v12, %v6396_v12  ;;  %v9082_v61 = vcombine.high %v6396_v12, %v6396_v12 }
 0x420   : > { %v6405_v43 = vrot.slane %v9075_v2, 5  ;;  %6389 = vst [vmem:[#allocation4 + $0xa0] sm:$0xf] %v9075_v2  ;;  %6483 = vst [vmem:[#allocation4 + $0x9c] sm:$0xf] %v9075_v2  ;;  %v6431_v32 = vrot.slane %v9075_v2, 6 }
 0x421   : > { %v6457_v18 = vrot.slane %v9075_v2, 7  ;;  %6390 = vst [vmem:[#allocation4 + $0xb4] sm:$0xf] %v9076_v21  ;;  %v6408_v9 = vrot.slane %v9076_v21, 5  ;;  %6484 = vst [vmem:[#allocation4 + $0xb0] sm:$0xf] %v9076_v21  ;;  %v6487_v47 = vsel %vm13617_vm13, %v9082_v61, %v6486_v14 }
 0x422   : > { %6485 = vst [vmem:[#allocation4 + $0xc4] sm:$0xf] %v9078_v40  ;;  %v6411_v55 = vrot.slane %v9078_v40, 5  ;;  %v6434_v33 = vrot.slane %v9076_v21, 6  ;;  %v6437_v4 = vrot.slane %v9078_v40, 6  ;;  %v6460_v63 = vrot.slane %v9076_v21, 7 }
 0x423   : > { %v6406_v56 = vsel %vm10663_vm15, %v6404_v59, %v6405_v43  ;;  %v6432_v23 = vsel %vm10671_vm0, %v6430_v10, %v6431_v32  ;;  %v6458_v7 = vsel %vm10680_vm1, %v6456_v27, %v6457_v18  ;;  %v6407_v17 = vrot.slane %v6405_v43, 4  ;;  %6488 = vst [vmem:[#allocation4 + $0xd8] sm:$0x1] %v6487_v47  ;;  %v10091_v2 = vld [vmem:[%s14271_s10 + $0x78] sm:$0xff]   ;;  %v10093_v10 = vld [vmem:[%s14271_s10 + $0x70] sm:$0xff]   ;;  %v10121_v47 = vld [vmem:[%s14271_s10 + $0xc0] sm:$0xff]  }
 0x424   : > { %6420 = vst [vmem:[#allocation4 + $0x90] sm:$0xf] %v6406_v56  ;;  %6446 = vst [vmem:[#allocation4 + $0x94] sm:$0xf] %v6432_v23  ;;  %v6410_v35 = vrot.slane %v6408_v9, 4  ;;  %v6433_v34 = vrot.slane %v6431_v32, 4  ;;  %9530 = vmatprep.subr.bf16.mxu1 %v10091_v2 }
 0x425   : > { %6472 = vst [vmem:[#allocation4 + $0x98] sm:$0xf] %v6458_v7  ;;  %v6436_v8 = vrot.slane %v6434_v33, 4  ;;  %v6459_v39 = vrot.slane %v6457_v18, 4  ;;  %v6409_v16 = vsel %vm10663_vm15, %v6407_v17, %v6408_v9  ;;  %v6462_v19 = vrot.slane %v6460_v63, 4  ;;  %v10092_v59 = vld [vmem:[%s14271_s10 + $0x38] sm:$0xff]  }
 0x426   : > { %v6463_v36 = vrot.slane %v9078_v40, 7  ;;  %v6413_v28 = vrot.slane %v6411_v55, 4  ;;  %v6412_v42 = vsel %vm10663_vm15, %v6410_v35, %v6411_v55  ;;  %6421 = vst [vmem:[#allocation4 + $0xa4] sm:$0xf] %v6409_v16  ;;  %v6435_v26 = vsel %vm10671_vm0, %v6433_v34, %v6434_v33  ;;  %v10077_v13 = vld [vmem:[#allocation4 + $0xc8] ss:$20 sps:$4 sm:$0xff]   ;;  %9531 = vmatpush3.bf16.msra.mxu1 %v10092_v59 }
 0x427   : > { %v6438_v11 = vsel %vm10671_vm0, %v6436_v8, %v6437_v4  ;;  %v6461_v62 = vsel %vm10680_vm1, %v6459_v39, %v6460_v63  ;;  %6422 = vst [vmem:[#allocation4 + $0xb8] sm:$0xf] %v6412_v42  ;;  %6447 = vst [vmem:[#allocation4 + $0xa8] sm:$0xf] %v6435_v26  ;;  %v6439_v24 = vrot.slane %v6437_v4, 4  ;;  %v10097_v21 = vld [vmem:[%s14271_s10 + $0xf8] sm:$0xff]   ;;  %9532 = vmatprep.subr.bf16.mxu1 %v10093_v10 }
 0x428   : > { %6448 = vst [vmem:[#allocation4 + $0xbc] sm:$0xf] %v6438_v11  ;;  %v6464_v0 = vsel %vm10680_vm1, %v6462_v19, %v6463_v36  ;;  %6473 = vst [vmem:[#allocation4 + $0xac] sm:$0xf] %v6461_v62  ;;  %v6424_v5 = vsel %vm13617_vm13, %v6413_v28, %v6423_v29  ;;  %v6465_v44 = vrot.slane %v6463_v36, 4  ;;  %v10098_v40 = vld [vmem:[%s14271_s10 + $0xb8] sm:$0xff]   ;;  %9558 = vmatprep.subr.bf16.mxu0 %v10097_v21 }
 0x429   : > { %6474 = vst [vmem:[#allocation4 + $0xc0] sm:$0xf] %v6464_v0  ;;  %6425 = vst [vmem:[#allocation4 + $0xcc] sm:$0x1] %v6424_v5  ;;  %v6450_v49 = vsel %vm13617_vm13, %v6439_v24, %v6449_v57  ;;  %v10070_v1 = vld [vmem:[#allocation4 + $0xa0] ss:$20 sps:$4 sm:$0xff]  }
 0x42a   : > { %v6476_v58 = vsel %vm13617_vm13, %v6465_v44, %v6475_v52  ;;  %6451 = vst [vmem:[#allocation4 + $0xd0] sm:$0x1] %v6450_v49  ;;  %v10088_v41 = vld [vmem:[#allocation4 + $0x88] ss:$20 sps:$4 sm:$0xff]   ;;  %v10089_v12 = vld [vmem:[#allocation4 + $0xb0] ss:$20 sps:$4 sm:$0xff]  }
 0x42b   : > { %6477 = vst [vmem:[#allocation4 + $0xd4] sm:$0x1] %v6476_v58  ;;  %v10065_v46 = vld [vmem:[#allocation4 + $0x7c] ss:$20 sps:$4 sm:$0xff]   ;;  %v10066_v6 = vld [vmem:[#allocation4 + $0x80] ss:$20 sps:$4 sm:$0xff]  }
 0x42c   : > { %v10068_v45 = vld [vmem:[#allocation4 + $0x84] ss:$20 sps:$4 sm:$0xff]   ;;  %7057 = vmatprep.mubr.bf16.mxu0 %v10065_v46  ;;  %v10094_v27 = vld [vmem:[%s14271_s10 + $0x30] sm:$0xff]   ;;  %v10095_v18 = vld [vmem:[%s14271_s10 + $0x68] sm:$0xff]  }
 0x42d   : > { %7138 = vmatprep.mubr.bf16.mxu1 %v10068_v45  ;;  %7058 = vmatmul.mubr.bf16.gmra.mxu0 %v10063_v37  ;;  %v10090_v15 = vld [vmem:[#allocation4 + $0xd8] ss:$20 sps:$4 sm:$0xff]   ;;  %v10101_v61 = vld [vmem:[%s14271_s10 + $0xf0] sm:$0xff]   ;;  %v10099_v63 = vld [vmem:[%s14271_s10 + $0x60] sm:$0xff]  }
 0x42e   : > { %v10072_v3 = vld [vmem:[#allocation4 + $0xa4] ss:$20 sps:$4 sm:$0xff]   ;;  %7139 = vmatmul.mubr.bf16.gmra.mxu1 %v10066_v6  ;;  %v10102_v43 = vld [vmem:[%s14271_s10 + $0xb0] sm:$0xff]   ;;  %v10096_v9 = vld [vmem:[%s14271_s10 + $0x28] sm:$0xff]  }
 0x42f   : > { %7065 = vmatprep.mubr.bf16.mxu0 %v10072_v3  ;;  %v10073_v25 = vld [vmem:[#allocation4 + $0xa8] ss:$20 sps:$4 sm:$0xff]   ;;  %9533 = vmatpush3.bf16.msra.mxu1 %v10094_v27  ;;  %v10100_v56 = vld [vmem:[%s14271_s10 + $0x20] sm:$0xff]   ;;  %v10109_v16 = vld [vmem:[%s14271_s10 + $0x50] sm:$0xff]  }
 0x430   : > { %v10075_v31 = vld [vmem:[#allocation4 + $0xac] ss:$20 sps:$4 sm:$0xff]   ;;  %9534 = vmatprep.subr.bf16.mxu1 %v10095_v18  ;;  %v10103_v23 = vld [vmem:[%s14271_s10 + $0x58] sm:$0xff]   ;;  %v10114_v28 = vld [vmem:[%s14271_s10 + $0xd0] sm:$0xff]  }
 0x431   : > { %7146 = vmatprep.mubr.bf16.mxu1 %v10075_v31  ;;  %v10079_v51 = vld [vmem:[#allocation4 + $0xcc] ss:$20 sps:$4 sm:$0xff]   ;;  %v10080_v53 = vld [vmem:[#allocation4 + $0xd0] ss:$20 sps:$4 sm:$0xff]   ;;  %v10111_v34 = vld [vmem:[%s14271_s10 + $0xd8] sm:$0xff]  }
 0x432   : > { %v10082_v60 = vld [vmem:[#allocation4 + $0xd4] ss:$20 sps:$4 sm:$0xff]   ;;  %v10107_v17 = vld [vmem:[%s14271_s10 + $0xe0] sm:$0xff]   ;;  %v10105_v29 = vld [vmem:[%s14271_s10 + $0x18] sm:$0xff]  }
 0x433   : > { %v10104_v55 = vld [vmem:[%s14271_s10 + $0xe8] sm:$0xff]   ;;  %9535 = vmatpush3.bf16.msra.mxu1 %v10096_v9  ;;  %v10108_v35 = vld [vmem:[%s14271_s10 + $0xa0] sm:$0xff]   ;;  %v10112_v19 = vld [vmem:[%s14271_s10 + $0x98] sm:$0xff]  }
 0x434   : > { %v10106_v33 = vld [vmem:[%s14271_s10 + $0xa8] sm:$0xff]   ;;  %9536 = vmatprep.subr.bf16.mxu1 %v10099_v63  ;;  %v10110_v42 = vld [vmem:[%s14271_s10 + $0x10] sm:$0xff]   ;;  %v10119_v44 = vld [vmem:[%s14271_s10 + $0x40] sm:$0xff]  }
 0x435   : > { %7066 = vmatmul.mubr.bf16.gmra.mxu0 %v10070_v1  ;;  %v10113_v11 = vld [vmem:[%s14271_s10 + $0x48] sm:$0xff]   ;;  %v10116_v62 = vld [vmem:[%s14271_s10 + $0x90] sm:$0xff]   ;;  %v10120_v58 = vld [vmem:[%s14271_s10] sm:$0xff]  }
 0x436   : > { %7147 = vmatmul.mubr.bf16.gmra.mxu1 %v10073_v25  ;;  %7073 = vmatprep.mubr.bf16.mxu0 %v10079_v51  ;;  %v10117_v57 = vld [vmem:[%s14271_s10 + $0xc8] sm:$0xff]   ;;  %v10122_v46 = vld [vmem:[%s14271_s10 + $0x80] sm:$0xff]   ;;  %v10126_v6 = vld [vmem:[%s14271_s10 + $0x178] sm:$0xff]  }
 0x437   : > { %7154 = vmatprep.mubr.bf16.mxu1 %v10082_v60  ;;  %9537 = vmatpush3.bf16.msra.mxu1 %v10100_v56  ;;  %v10115_v0 = vld [vmem:[%s14271_s10 + $0x8] sm:$0xff]   ;;  %v10131_v45 = vld [vmem:[%s14271_s10 + $0x1f8] sm:$0xff]  }
 0x438   : > { %9538 = vmatprep.subr.bf16.mxu1 %v10103_v23  ;;  %v10118_v24 = vld [vmem:[%s14271_s10 + $0x88] sm:$0xff]  }
 0x43b   : > { %9539 = vmatpush3.bf16.msra.mxu1 %v10105_v29 }
 0x43c   : > { %9540 = vmatprep.subr.bf16.mxu1 %v10109_v16 }
 0x43d   : > { %7074 = vmatmul.mubr.bf16.gmra.mxu0 %v10077_v13 }
 0x43e   : > { %7155 = vmatmul.mubr.bf16.gmra.mxu1 %v10080_v53  ;;  %9750 = vmatprep.mubr.bf16.mxu0 %v10084_v54 }
 0x43f   : > { %9541 = vmatpush3.bf16.msra.mxu1 %v10110_v42 }
 0x440   : > { %9542 = vmatprep.subr.bf16.mxu1 %v10113_v11 }
 0x443   : > { %9543 = vmatpush3.bf16.msra.mxu1 %v10115_v0 }
 0x444   : > { %9544 = vmatprep.subr.bf16.mxu1 %v10119_v44  ;;  %v13876_v44 = vld [vmem:[%s14270_s9] ss:$0 sm:$0xff] }
 0x445   : > { %9751 = vmatmul.mubr.bf16.vlgmr.msra.gmra.mxu0 %v10086_v48 }
 0x446   : > { %9754 = vmatprep.mubr.bf16.mxu0 %v10087_v20  ;;  %9559 = vmatpush3.bf16.msra.mxu0 %v10098_v40 }
 0x447   : > { %9560 = vmatprep.subr.bf16.mxu0 %v10101_v61  ;;  %9545 = vmatpush3.bf16.msra.mxu1 %v10120_v58 }
 0x448   : > { %9586 = vmatprep.subr.bf16.mxu1 %v10126_v6 }
 0x44a   : > { %9561 = vmatpush3.bf16.msra.mxu0 %v10102_v43 }
 0x44b   : > { %9562 = vmatprep.subr.bf16.mxu0 %v10104_v55 }
 0x44d   : > { %9755 = vmatmul.mubr.bf16.gmra.mxu0 %v10088_v41 }
 0x44e   : > { %9758 = vmatprep.mubr.bf16.mxu0 %v10089_v12  ;;  %9563 = vmatpush3.bf16.msra.mxu0 %v10106_v33 }
 0x44f   : > { %9564 = vmatprep.subr.bf16.mxu0 %v10107_v17 }
 0x452   : > { %9565 = vmatpush3.bf16.msra.mxu0 %v10108_v35 }
 0x453   : > { %9566 = vmatprep.subr.bf16.mxu0 %v10111_v34 }
 0x455   : > { %9759 = vmatmul.mubr.bf16.gmra.mxu0 %v10090_v15 }
 0x456   : > { %9567 = vmatpush3.bf16.msra.mxu0 %v10112_v19 }
 0x457   : > { %9568 = vmatprep.subr.bf16.mxu0 %v10114_v28 }
 0x45a   : > { %9569 = vmatpush3.bf16.msra.mxu0 %v10116_v62 }
 0x45b   : > { %9570 = vmatprep.subr.bf16.mxu0 %v10117_v57 }
 0x45e   : > { %9571 = vmatpush3.bf16.msra.mxu0 %v10118_v24 }
 0x45f   : > { %9572 = vmatprep.subr.bf16.mxu0 %v10121_v47 }
 0x462   : > { %9573 = vmatpush3.bf16.msra.mxu0 %v10122_v46 }
 0x463   : > { %9614 = vmatprep.subr.bf16.mxu0 %v10131_v45 }
 0x4bd   : > { %v13754_v32 = vpop.f32.mrf.mxu0 }
 0x4bf   : > { %v13768_v4 = vpop.f32.mrf.mxu0 }
 0x4c0   : > { %v9430_v29 = vadd.f32 %v13768_v4, %v13754_v32 }
 0x4c1   : > { %v13792_v39 = vpop.f32.mrf.mxu0 }
 0x4c3   : > { %v13779_v7 = vpop.f32.mrf.mxu1  ;;  %v13808_v14 = vpop.f32.mrf.mxu0 }
 0x4c4   : > { %v9433_v32 = vadd.f32 %v13808_v14, %v13792_v39 }
 0x4c5   : > { %v13790_v8 = vpop.f32.mrf.mxu1 }
 0x4c6   : > { %v9434_v52 = vpop.f32.mrf.mxu0  ;;  %v9482_v16 = vadd.f32 %v13790_v8, %v13779_v7 }
 0x4c7   : > { %v13803_v36 = vpop.f32.mrf.mxu1 }
 0x4c8   : > { %v9435_v49 = vpop.f32.mrf.mxu0  ;;  %v7117_v24 = vadd.f32 %v9482_v16, %v9430_v29 }
 0x4c9   : > { %v13813_v26 = vpop.f32.mrf.mxu1  ;;  %v9436_v17 = vadd.f32 %v9435_v49, %v9434_v52  ;;  %v13867_v52 = vld [vmem:[%s14269_s8] ss:$0 sm:$0xff] }
 0x4ca   : > { %v9437_v3 = vpop.f32.mrf.mxu0  ;;  %v9485_v4 = vadd.f32 %v13813_v26, %v13803_v36 }
 0x4cb   : > { %v9486_v5 = vpop.f32.mrf.mxu1 }
 0x4cc   : > { %v9438_v1 = vpop.f32.mrf.mxu0 }
 0x4cd   : > { %v9487_v37 = vpop.f32.mrf.mxu1  ;;  %v9439_v42 = vadd.f32 %v9438_v1, %v9437_v3  ;;  %v7120_v1 = vadd.f32 %v9485_v4, %v9433_v32 }
 0x4ce   : > { %v9440_v51 = vpop.f32.mrf.mxu0  ;;  %v9488_v35 = vadd.f32 %v9487_v37, %v9486_v5 }
 0x4cf   : > { %v9489_v31 = vpop.f32.mrf.mxu1 }
 0x4d0   : > { %v9441_v13 = vpop.f32.mrf.mxu0  ;;  %v7125_v62 = vadd.f32 %v9488_v35, %v9436_v17 }
 0x4d1   : > { %v9490_v25 = vpop.f32.mrf.mxu1  ;;  %v9442_v7 = vadd.f32 %v9441_v13, %v9440_v51 }
 0x4d2   : > { %v9443_v54 = vpop.f32.mrf.mxu0  ;;  %v9491_v11 = vadd.f32 %v9490_v25, %v9489_v31 }
 0x4d3   : > { %v9492_v60 = vpop.f32.mrf.mxu1 }
 0x4d4   : > { %v9444_v20 = vpop.f32.mrf.mxu0  ;;  %v7128_v37 = vadd.f32 %v9491_v11, %v9439_v42 }
 0x4d5   : > { %v9493_v53 = vpop.f32.mrf.mxu1  ;;  %v9445_v26 = vadd.f32 %v9444_v20, %v9443_v54 }
 0x4d6   : > { %v9494_v8 = vadd.f32 %v9493_v53, %v9492_v60 }
 0x4d7   : > { %v9495_v48 = vpop.f32.mrf.mxu1 }
 0x4d8   : > { %v7133_v51 = vadd.f32 %v9494_v8, %v9442_v7 }
 0x4d9   : > { %v9496_v41 = vpop.f32.mrf.mxu1 }
 0x4ed   : > { %v9446_v12 = vpop.f32.mrf.mxu0 }
 0x4ee   : > { %v9498_v15 = vpop.f32.mrf.mxu1 }
 0x4ef   : > { %v9447_v2 = vpop.f32.mrf.mxu0 }
 0x4f0   : > { %v9499_v59 = vpop.f32.mrf.mxu1  ;;  %v9448_v46 = vadd.f32 %v9447_v2, %v9446_v12 }
 0x4f1   : > { %v9449_v21 = vpop.f32.mrf.mxu0  ;;  %v9500_v6 = vadd.f32 %v9499_v59, %v9498_v15  ;;  %v9497_v15 = vadd.f32 %v9496_v41, %v9495_v48 }
 0x4f2   : > { %v9501_v40 = vpop.f32.mrf.mxu1 }
 0x4f3   : > { %v9450_v10 = vpop.f32.mrf.mxu0  ;;  %v7141_v17 = vadd.f32 %v9500_v6, %v9448_v46 }
 0x4f4   : > { %v9502_v27 = vpop.f32.mrf.mxu1  ;;  %v9451_v31 = vadd.f32 %v9450_v10, %v9449_v21 }
 0x4f5   : > { %v9452_v61 = vpop.f32.mrf.mxu0  ;;  %v9503_v60 = vadd.f32 %v9502_v27, %v9501_v40 }
 0x4f6   : > { %v9504_v43 = vpop.f32.mrf.mxu1 }
 0x4f7   : > { %v9453_v18 = vpop.f32.mrf.mxu0 }
 0x4f8   : > { %v9505_v55 = vpop.f32.mrf.mxu1  ;;  %v9454_v2 = vadd.f32 %v9453_v18, %v9452_v61  ;;  %v7144_v61 = vadd.f32 %v9503_v60, %v9451_v31 }
 0x4f9   : > { %v13848_v9 = vpop.f32.mrf.mxu0  ;;  %v9506_v29 = vadd.f32 %v9505_v55, %v9504_v43 }
 0x4fa   : > { %v13852_v56 = vpop.f32.mrf.mxu1 }
 0x4fb   : > { %v13850_v33 = vpop.f32.mrf.mxu0 }
 0x4fc   : > { %v13860_v19 = vpop.f32.mrf.mxu1 }
 0x4fd   : > { %v9458_v63 = vpop.f32.mrf.mxu0 }
 0x4fe   : > { %v9510_v0 = vpop.f32.mrf.mxu1 }
 0x4ff   : > { %v9459_v23 = vpop.f32.mrf.mxu0 }
 0x500   : > { %v9511_v3 = vpop.f32.mrf.mxu1  ;;  %v9460_v40 = vadd.f32 %v9459_v23, %v9458_v63 }
 0x501   : > { %v13854_v34 = vpop.f32.mrf.mxu0  ;;  %v9512_v10 = vadd.f32 %v9511_v3, %v9510_v0  ;;  %v7149_v0 = vadd.f32 %v9506_v29, %v9454_v2 }
 0x502   : > { %v9513_v16 = vpop.f32.mrf.mxu1 }
 0x503   : > { %v13862_v28 = vpop.f32.mrf.mxu0  ;;  %v7157_v8 = vadd.f32 %v9512_v10, %v9460_v40 }
 0x505   : > { %v9752_v57 = vpop.f32.mrf.mxu0 }
 0x506   : > { %v7206_v5 = vadd.f32 %v9752_v57, %v7125_v62  ;;  %v7136_v57 = vadd.f32 %v9497_v15, %v9445_v26  ;;  %v9509_v26 = vadd.f32 %v13860_v19, %v13852_v56 }
 0x507   : > { %v7197_v47 = vpop.f32.mrf.mxu0 }
 0x508   : > { %v7253_v49 = vmul.f32 %v13867_v52, %v7206_v5  ;;  %v7198_v58 = vadd.f32 %v7197_v47, %v7117_v24  ;;  %v9514_v5 = vpop.f32.mrf.mxu1  ;;  %v9463_v47 = vadd.f32 %v13862_v28, %v13854_v34 }
 0x509   : > { %v9753_v45 = vpop.f32.mrf.mxu0 }
 0x50a   : > { %v13880_v39 = vadd.f32 %v13876_v44, %v7253_v49  ;;  %v7251_v36 = vmul.f32 %v13867_v52, %v7198_v58  ;;  %v7209_v14 = vadd.f32 %v9753_v45, %v7128_v37  ;;  %v9515_v37 = vadd.f32 %v9514_v5, %v9513_v16 }
 0x50b   : > { %v7200_v25 = vpop.f32.mrf.mxu0 }
 0x50c   : > { %v7296_v13 = vmin.f32 %v13880_v39, 0.0  ;;  %v13885_v53 = vadd.f32 %v13876_v44, %v7251_v36  ;;  %v7254_v12 = vmul.f32 %v13867_v52, %v7209_v14  ;;  %v7201_v59 = vadd.f32 %v7200_v25, %v7120_v1 }
 0x50d   : > { %v9756_v35 = vpop.f32.mrf.mxu0  ;;  %v9457_v36 = vadd.f32 %v13850_v33, %v13848_v9  ;;  %vm7284_vm11 = vcmp.gt.f32.partialorder %v13880_v39, 0.0 }
 0x50e   : > { %v7310_v54 = vmul.f32 1.442695, %v7296_v13  ;;  %v7294_v20 = vmin.f32 %v13885_v53, 0.0  ;;  %v13890_v21 = vadd.f32 %v13876_v44, %v7254_v12  ;;  %v7252_v27 = vmul.f32 %v13867_v52, %v7201_v59 }
 0x50f   : > { %v7222_v42 = vadd.f32 %v9756_v35, %v7141_v17  ;;  %v7213_v11 = vpop.f32.mrf.mxu0  ;;  %v7160_v12 = vadd.f32 %v9515_v37, %v9463_v47  ;;  %v7152_v35 = vadd.f32 %v9509_v26, %v9457_v36  ;;  %vm7282_vm4 = vcmp.gt.f32.partialorder %v13885_v53, 0.0 }
 0x510   : > { %10345 = vpow2.f32 %v7310_v54  ;;  %v7306_v48 = vmul.f32 1.442695, %v7294_v20  ;;  %v7297_v41 = vmin.f32 %v13890_v21, 0.0  ;;  %v13895_v43 = vadd.f32 %v13876_v44, %v7252_v27 }
 0x511   : > { %v7257_v18 = vmul.f32 %v13867_v52, %v7222_v42  ;;  %v7214_v55 = vadd.f32 %v7213_v11, %v7133_v51  ;;  %v9757_v62 = vpop.f32.mrf.mxu0  ;;  %vm7285_vm5 = vcmp.gt.f32.partialorder %v13890_v21, 0.0 }
 0x512   : > { %10347 = vpow2.f32 %v7306_v48  ;;  %v7312_v63 = vmul.f32 1.442695, %v7297_v41  ;;  %v7225_v23 = vadd.f32 %v9757_v62, %v7144_v61  ;;  %v7295_v24 = vmin.f32 %v13895_v43, 0.0 }
 0x513   : > { %v13900_v32 = vadd.f32 %v13876_v44, %v7257_v18  ;;  %v7255_v4 = vmul.f32 %v13867_v52, %v7214_v55  ;;  %v7216_v7 = vpop.f32.mrf.mxu0  ;;  %vm7283_vm12 = vcmp.gt.f32.partialorder %v13895_v43, 0.0 }
 0x514   : > { %10349 = vpow2.f32 %v7312_v63  ;;  %v7258_v49 = vmul.f32 %v13867_v52, %v7225_v23  ;;  %v7217_v58 = vadd.f32 %v7216_v7, %v7136_v57  ;;  %v7308_v46 = vmul.f32 1.442695, %v7295_v24 }
 0x515   : > { %v7300_v6 = vmin.f32 %v13900_v32, 0.0  ;;  %v13908_v45 = vadd.f32 %v13876_v44, %v7255_v4  ;;  %v9760_v3 = vpop.f32.mrf.mxu0  ;;  %vm7288_vm14 = vcmp.gt.f32.partialorder %v13900_v32, 0.0 }
 0x516   : > { %v13913_v14 = vadd.f32 %v13876_v44, %v7258_v49  ;;  %v7256_v34 = vmul.f32 %v13867_v52, %v7217_v58  ;;  %v7238_v28 = vadd.f32 %v9760_v3, %v7157_v8  ;;  %10351 = vpow2.f32 %v7308_v46 }
 0x517   : > { %v7318_v31 = vmul.f32 1.442695, %v7300_v6  ;;  %v7298_v1 = vmin.f32 %v13908_v45, 0.0  ;;  %v7229_v25 = vpop.f32.mrf.mxu0  ;;  %vm7286_vm6 = vcmp.gt.f32.partialorder %v13908_v45, 0.0 }
 0x518   : > { %v7301_v51 = vmin.f32 %v13913_v14, 0.0  ;;  %v7275_v60 = vadd.f32 %v13876_v44, %v7256_v34  ;;  %v7261_v9 = vmul.f32 %v13867_v52, %v7238_v28  ;;  %v7230_v13 = vadd.f32 %v7229_v25, %v7149_v0 }
 0x519   : > { %10353 = vpow2.f32 %v7318_v31  ;;  %v7314_v33 = vmul.f32 1.442695, %v7298_v1  ;;  %v9761_v15 = vpop.f32.mrf.mxu0  ;;  %vm7289_vm10 = vcmp.gt.f32.partialorder %v13913_v14, 0.0 }
 0x51a   : > { %v7320_v2 = vmul.f32 1.442695, %v7301_v51  ;;  %v7299_v59 = vmin.f32 %v7275_v60, 0.0  ;;  %v13923_v56 = vadd.f32 %v13876_v44, %v7261_v9  ;;  %v7259_v19 = vmul.f32 %v13867_v52, %v7230_v13 }
 0x51b   : > { %10355 = vpow2.f32 %v7314_v33  ;;  %v7241_v17 = vadd.f32 %v9761_v15, %v7160_v12  ;;  %v7232_v29 = vpop.f32.mrf.mxu0 }
 0x51c   : > { %10357 = vpow2.f32 %v7320_v2  ;;  %v7316_v16 = vmul.f32 1.442695, %v7299_v59  ;;  %v7304_v54 = vmin.f32 %v13923_v56, 0.0  ;;  %v13928_v40 = vadd.f32 %v13876_v44, %v7259_v19 }
 0x51d   : > { %v10346_v20 = vpop.eup %10345  ;;  %v7262_v10 = vmul.f32 %v13867_v52, %v7241_v17  ;;  %v7233_v27 = vadd.f32 %v7232_v29, %v7152_v35  ;;  %vm7292_vm13 = vcmp.gt.f32.partialorder %v13923_v56, 0.0  ;;  %v7399_v29 = vld [vmem:[#allocation5] sm:$0xf] }
 0x51e   : > { %v9157_v42 = vadd.f32 -1.0, %v10346_v20  ;;  %10359 = vpow2.f32 %v7316_v16  ;;  %v7326_v11 = vmul.f32 1.442695, %v7304_v54  ;;  %v7302_v41 = vmin.f32 %v13928_v40, 0.0 }
 0x51f   : > { %v10348_v48 = vpop.eup %10347  ;;  %v7281_v61 = vadd.f32 %v13876_v44, %v7262_v10  ;;  %v7260_v18 = vmul.f32 %v13867_v52, %v7233_v27  ;;  %vm7290_vm2 = vcmp.gt.f32.partialorder %v13928_v40, 0.0 }
 0x520   : > { %v7344_v55 = vsel %vm7284_vm11, %v13880_v39, %v9157_v42  ;;  %v9155_v62 = vadd.f32 -1.0, %v10348_v48  ;;  %10361 = vpow2.f32 %v7326_v11  ;;  %v7322_v5 = vmul.f32 1.442695, %v7302_v41  ;;  %v10163_v48 = vld [vmem:[%s14271_s10 + $0x1d0] sm:$0xff]  }
 0x521   : > { %v10350_v57 = vpop.eup %10349  ;;  %7356 = vst [vmem:[#allocation8 + $0x10] sm:$0xff] %v7344_v55  ;;  %v7305_v63 = vmin.f32 %v7281_v61, 0.0  ;;  %v13938_v23 = vadd.f32 %v13876_v44, %v7260_v18 }
 0x522   : > { %v7342_v0 = vsel %vm7282_vm4, %v13885_v53, %v9155_v62  ;;  %v9158_v24 = vadd.f32 -1.0, %v10350_v57  ;;  %10363 = vpow2.f32 %v7322_v5  ;;  %vm7429_vm4 = vsmask.f32 6416  ;;  %v7425_v62 = vld [vmem:[#allocation5 + $0x8] sm:$0xf] }
 0x523   : > { %7354 = vst [vmem:[#allocation8] sm:$0xff] %v7342_v0  ;;  %v7328_v52 = vmul.f32 1.442695, %v7305_v63  ;;  %v7303_v39 = vmin.f32 %v13938_v23, 0.0  ;;  %v10352_v4 = vpop.eup %10351  ;;  %vm7291_vm11 = vcmp.gt.f32.partialorder %v13938_v23, 0.0 }
 0x524   : > { %v7345_v7 = vsel %vm7285_vm5, %v13890_v21, %v9158_v24  ;;  %v9156_v8 = vadd.f32 -1.0, %v10352_v4  ;;  %vm13991_vm5 = vmor %vm7428_vm8, %vm7429_vm4 }
 0x525   : > { %7357 = vst [vmem:[#allocation8 + $0x18] sm:$0xff] %v7345_v7  ;;  %10365 = vpow2.f32 %v7328_v52  ;;  %v7324_v47 = vmul.f32 1.442695, %v7303_v39  ;;  %v7453_v39 = vld [vmem:[#allocation5 + $0x10] sm:$0xf] }
 0x526   : > { %v10354_v49 = vpop.eup %10353  ;;  %v7343_v44 = vsel %vm7283_vm12, %v13895_v43, %v9156_v8  ;;  %v7415_v8 = vld [vmem:[#allocation5 + $0x4] sm:$0xf]  ;;  %vm7476_vm12 = vsmask.f32 4368 }
 0x527   : > { %v9161_v53 = vadd.f32 -1.0, %v10354_v49  ;;  %10367 = vpow2.f32 %v7324_v47  ;;  %7355 = vst [vmem:[#allocation8 + $0x8] sm:$0xff] %v7343_v44 }
 0x528   : > { %v10356_v58 = vpop.eup %10355 }
 0x529   : > { %v10358_v37 = vpop.eup %10357  ;;  %v7348_v46 = vsel %vm7288_vm14, %v13900_v32, %v9161_v53  ;;  %v9159_v6 = vadd.f32 -1.0, %v10356_v58  ;;  %vm14064_vm14 = vmor %vm6235_vm7, %vm7476_vm12 }
 0x52a   : > { %7360 = vst [vmem:[#allocation8 + $0x30] sm:$0xff] %v7348_v46  ;;  %v9162_v21 = vadd.f32 -1.0, %v10358_v37 }
 0x52b   : > { %v10360_v3 = vpop.eup %10359  ;;  %v7346_v36 = vsel %vm7286_vm6, %v13908_v45, %v9159_v6 }
 0x52c   : > { %7358 = vst [vmem:[#allocation8 + $0x20] sm:$0xff] %v7346_v36  ;;  %v7349_v43 = vsel %vm7289_vm10, %v13913_v14, %v9162_v21  ;;  %v7368_v28 = vld [vmem:[#allocation8 + $0x10] ss:$2 sm:$0xff]  ;;  %v7372_v32 = vld [vmem:[#allocation8 + $0x11] ss:$2 sm:$0xff] }
 0x52d   : > { %v10362_v34 = vpop.eup %10361  ;;  %7361 = vst [vmem:[#allocation8 + $0x38] sm:$0xff] %v7349_v43  ;;  %v7374_v13 = vmax.f32 %v7368_v28, %v7372_v32  ;;  %v7488_v3 = vld [vmem:[#allocation5 + $0x20] sm:$0xf] }
 0x52e   : > { %v9165_v26 = vadd.f32 -1.0, %v10362_v34  ;;  %v7366_v31 = vld [vmem:[#allocation8] ss:$2 sm:$0xff]  ;;  %v7370_v1 = vld [vmem:[#allocation8 + $0x1] ss:$2 sm:$0xff] }
 0x52f   : > { %v10364_v25 = vpop.eup %10363  ;;  %v7373_v51 = vmax.f32 %v7366_v31, %v7370_v1  ;;  %v7376_v9 = vld [vmem:[#allocation8 + $0x2] ss:$2 sm:$0xff] }
 0x530   : > { %v7352_v60 = vsel %vm7292_vm13, %v13923_v56, %v9165_v26  ;;  %v9163_v45 = vadd.f32 -1.0, %v10364_v25  ;;  %v7445_v34 = vld [vmem:[#allocation5 + $0xc] sm:$0xf] }
 0x531   : > { %7364 = vst [vmem:[#allocation8 + $0x50] sm:$0xff] %v7352_v60  ;;  %v7379_v12 = vmax.f32 %v7373_v51, %v7376_v9 }
 0x532   : > { %v10366_v33 = vpop.eup %10365  ;;  %v7350_v15 = vsel %vm7290_vm2, %v13928_v40, %v9163_v45 }
 0x533   : > { %v7378_v14 = vld [vmem:[#allocation8 + $0x12] ss:$2 sm:$0xff]  ;;  %v13956_v59 = vpack.c.bf16 %v7379_v12, %v7379_v12  ;;  %7362 = vst [vmem:[#allocation8 + $0x40] sm:$0xff] %v7350_v15 }
 0x534   : > { %v10368_v2 = vpop.eup %10367  ;;  %v7380_v19 = vmax.f32 %v7374_v13, %v7378_v14  ;;  %v7383_v17 = vld [vmem:[#allocation8 + $0x30] ss:$2 sm:$0xff]  ;;  %v7387_v35 = vld [vmem:[#allocation8 + $0x31] ss:$2 sm:$0xff] }
 0x535   : > { %v9164_v56 = vadd.f32 -1.0, %v10368_v2  ;;  %v13962_v20 = vshrl.u32 %v13956_v59, 16  ;;  %v7409_v40 = vshll.u32 %v13956_v59, 16  ;;  %v7390_v10 = vmax.f32 %v7383_v17, %v7387_v35  ;;  %v7465_v2 = vld [vmem:[#allocation5 + $0x14] sm:$0xf] }
 0x536   : > { %v13959_v16 = vpack.c.bf16 %v7380_v19, %v7380_v19  ;;  %v7381_v54 = vpack.c.bf16 %v7380_v19, %v7379_v12  ;;  %v9169_v42 = vrot.slane %v13956_v59, 9  ;;  %v9170_v11 = vrot.slane %v13956_v59, 10 }
 0x537   : > { %v7351_v27 = vsel %vm7291_vm11, %v13938_v23, %v9164_v56  ;;  %v7408_v61 = vrot.slane %v13962_v20, 4  ;;  %v7411_v18 = vrot.slane %v7409_v40, 5  ;;  %v7431_v57 = vrot.slane %v13962_v20, 5 }
 0x538   : > { %7363 = vst [vmem:[#allocation8 + $0x48] sm:$0xff] %v7351_v27  ;;  %v7400_v41 = vsel %vm11243_vm3, %v7381_v54, %v7399_v29  ;;  %v7422_v55 = vrot.slane %v13959_v16, 5  ;;  %v7432_v5 = vrot.slane %v7409_v40, 6  ;;  %v13974_v63 = vshrl.u32 %v13959_v16, 16  ;;  %v7473_v27 = vld [vmem:[#allocation5 + $0x18] sm:$0xf] }
 0x539   : > { %7401 = vst [vmem:[#allocation5] sm:$0xf] %v7400_v41  ;;  %v13977_v23 = vshll.u32 %v13959_v16, 16  ;;  %v7412_v0 = vor.u32 %v7411_v18, %v7408_v61  ;;  %v7450_v52 = vrot.slane %v13959_v16, 6  ;;  %v7456_v4 = vrot.slane %v13962_v20, 6 }
 0x53a   : > { %v7423_v24 = vsel %vm10663_vm15, %v9169_v42, %v7422_v55  ;;  %v7393_v7 = vld [vmem:[#allocation8 + $0x32] ss:$2 sm:$0xff]  ;;  %v7433_v49 = vor.u32 %v7432_v5, %v7431_v57  ;;  %v7438_v44 = vrot.slane %v13974_v63, 5  ;;  %v7457_v21 = vrot.slane %v7409_v40, 7 }
 0x53b   : > { %v7426_v47 = vsel %vm11243_vm3, %v7423_v24, %v7425_v62  ;;  %v7441_v53 = vrot.slane %v13977_v23, 6  ;;  %v13987_v58 = vmax.f32 %v7390_v10, %v7393_v7  ;;  %v7413_v37 = vrot.slane %v7412_v0, 4  ;;  %v7499_v42 = vld [vmem:[#allocation5 + $0x50] sm:$0xf]  ;;  %v10130_v62 = vld [vmem:[%s14271_s10 + $0x138] sm:$0xff]   ;;  %v10133_v24 = vld [vmem:[%s14271_s10 + $0x170] sm:$0xff]  }
 0x53c   : > { %7427 = vst [vmem:[#allocation5 + $0x8] sm:$0xf] %v7426_v47  ;;  %v7451_v6 = vsel %vm10671_vm0, %v9170_v11, %v7450_v52  ;;  %v7434_v36 = vrot.slane %v7433_v49, 4  ;;  %v7460_v26 = vrot.slane %v13974_v63, 6  ;;  %v7458_v1 = vor.u32 %v7457_v21, %v7456_v4  ;;  %v7515_v52 = vld [vmem:[#allocation5 + $0x54] sm:$0xf] }
 0x53d   : > { %v7442_v43 = vor.u32 %v7441_v53, %v7438_v44  ;;  %v7454_v28 = vsel %vm11243_vm3, %v7451_v6, %v7453_v39  ;;  %v14002_v32 = vpack.c.bf16 %v13987_v58, %v13987_v58  ;;  %v7416_v31 = vsel %vm11243_vm3, %v7413_v37, %v7415_v8  ;;  %v10132_v44 = vld [vmem:[%s14271_s10 + $0x1b8] sm:$0xff]   ;;  %v7484_v37 = vld [vmem:[#allocation5 + $0x1c] sm:$0xf] }
 0x53e   : > { %7455 = vst [vmem:[#allocation5 + $0x10] sm:$0xf] %v7454_v28  ;;  %v7461_v25 = vrot.slane %v13977_v23, 7  ;;  %7417 = vst [vmem:[#allocation5 + $0x4] sm:$0xf] %v7416_v31  ;;  %v9171_v45 = vrot.slane %v13956_v59, 11  ;;  %v7489_v33 = vsel %vm11243_vm3, %v13959_v16, %v7488_v3 }
 0x53f   : > { %v7385_v51 = vld [vmem:[#allocation8 + $0x40] ss:$2 sm:$0xff]  ;;  %v7389_v60 = vld [vmem:[#allocation8 + $0x41] ss:$2 sm:$0xff]  ;;  %v7443_v9 = vsel %vm13991_vm5, %v7434_v36, %v7442_v43  ;;  %v14016_v14 = vshrl.u32 %v14002_v32, 16  ;;  %v14019_v15 = vshll.u32 %v14002_v32, 16 }
 0x540   : > { %v7391_v13 = vmax.f32 %v7385_v51, %v7389_v60  ;;  %v7446_v12 = vsel %vm11243_vm3, %v7443_v9, %v7445_v34  ;;  %7490 = vst [vmem:[#allocation5 + $0x20] sm:$0xf] %v7489_v33  ;;  %v7395_v19 = vld [vmem:[#allocation8 + $0x42] ss:$2 sm:$0xff]  ;;  %v7459_v17 = vrot.slane %v7458_v1, 4  ;;  %v7462_v59 = vor.u32 %v7461_v25, %v7460_v26 }
 0x541   : > { %7447 = vst [vmem:[#allocation5 + $0xc] sm:$0xf] %v7446_v12  ;;  %v9175_v35 = vrot.slane %v14002_v32, 9  ;;  %v7470_v56 = vrot.slane %v13959_v16, 7  ;;  %v7508_v54 = vrot.slane %v14016_v14, 4  ;;  %v7511_v40 = vrot.slane %v14019_v15, 5 }
 0x542   : > { %v7397_v29 = vmax.f32 %v7391_v13, %v7395_v19  ;;  %v7528_v10 = vrot.slane %v14016_v14, 5  ;;  %v7463_v11 = vsel %vm13028_vm9, %v7459_v17, %v7462_v59  ;;  %v7529_v41 = vrot.slane %v14019_v15, 6  ;;  %v7583_v16 = vld [vmem:[#allocation5 + $0x70] sm:$0xf]  ;;  %v10123_v47 = vld [vmem:[#allocation5] ss:$40 sps:$4 sm:$0xff]  }
 0x543   : > { %v7471_v61 = vsel %vm10680_vm1, %v9171_v45, %v7470_v56  ;;  %v9172_v18 = vrot.slane %v13962_v20, 11  ;;  %v7512_v5 = vor.u32 %v7511_v40, %v7508_v54  ;;  %v7466_v0 = vsel %vm11243_vm3, %v7463_v11, %v7465_v2  ;;  %v7525_v20 = vld [vmem:[#allocation5 + $0x58] sm:$0xf]  ;;  %v7550_v28 = vld [vmem:[#allocation5 + $0x60] sm:$0xf]  ;;  %v10150_v34 = vld [vmem:[%s14271_s10 + $0x1a0] sm:$0xff]  }
 0x544   : > { %v14032_v55 = vpack.c.bf16 %v7397_v29, %v7397_v29  ;;  %v7398_v57 = vpack.c.bf16 %v7397_v29, %v13987_v58  ;;  %7467 = vst [vmem:[#allocation5 + $0x14] sm:$0xf] %v7466_v0  ;;  %v7530_v39 = vor.u32 %v7529_v41, %v7528_v10  ;;  %v7474_v4 = vsel %vm11243_vm3, %v7471_v61, %v7473_v27  ;;  %v10127_v26 = vld [vmem:[#allocation5 + $0x8] ss:$40 sps:$4 sm:$0xff]   ;;  %v10135_v60 = vld [vmem:[%s14271_s10 + $0x1f0] sm:$0xff]   ;;  %v10137_v59 = vld [vmem:[%s14271_s10 + $0x168] sm:$0xff]  }
 0x545   : > { %v7480_v7 = vrot.slane %v13974_v63, 7  ;;  %v9176_v8 = vrot.slane %v14002_v32, 10  ;;  %v10125_v49 = vld [vmem:[#allocation5 + $0x4] ss:$40 sps:$4 sm:$0xff]   ;;  %v7513_v58 = vrot.slane %v7512_v5, 4  ;;  %v7553_v13 = vrot.slane %v14016_v14, 6 }
 0x546   : > { %v7500_v53 = vsel %vm11243_vm3, %v7398_v57, %v7499_v42  ;;  %7475 = vst [vmem:[#allocation5 + $0x18] sm:$0xf] %v7474_v4  ;;  %v7584_v6 = vsel %vm11243_vm3, %v14032_v55, %v7583_v16  ;;  %v7522_v21 = vrot.slane %v14032_v55, 5  ;;  %v7531_v3 = vrot.slane %v7530_v39, 4  ;;  %8386 = vmatprep.mubr.bf16.mxu1 %v10125_v49  ;;  %v10134_v12 = vld [vmem:[%s14271_s10 + $0x130] sm:$0xff]   ;;  %v10139_v27 = vld [vmem:[%s14271_s10 + $0x1e8] sm:$0xff]  }
 0x547   : > { %7501 = vst [vmem:[#allocation5 + $0x50] sm:$0xf] %v7500_v53  ;;  %v14057_v36 = vshrl.u32 %v14032_v55, 16  ;;  %v14060_v43 = vshll.u32 %v14032_v55, 16  ;;  %7585 = vst [vmem:[#allocation5 + $0x70] sm:$0xf] %v7584_v6  ;;  %v7516_v1 = vsel %vm11243_vm3, %v7513_v58, %v7515_v52  ;;  %v7481_v25 = vor.u32 %v7480_v7, %v13977_v23  ;;  %8387 = vmatmul.mubr.bf16.vlgmr.msra.gmra.mxu1 %v10123_v47 }
 0x548   : > { %v10129_v31 = vld [vmem:[#allocation5 + $0xc] ss:$40 sps:$4 sm:$0xff]   ;;  %v7547_v51 = vrot.slane %v14032_v55, 6  ;;  %7517 = vst [vmem:[#allocation5 + $0x54] sm:$0xf] %v7516_v1  ;;  %v7523_v9 = vsel %vm10663_vm15, %v9175_v35, %v7522_v21  ;;  %9587 = vmatpush3.bf16.msra.mxu1 %v10130_v62  ;;  %v7554_v17 = vrot.slane %v14019_v15, 7 }
 0x549   : > { %v7535_v45 = vrot.slane %v14057_v36, 5  ;;  %v7538_v33 = vrot.slane %v14060_v43, 6  ;;  %8435 = vmatprep.mubr.bf16.mxu0 %v10129_v31  ;;  %v7526_v2 = vsel %vm11243_vm3, %v7523_v9, %v7525_v20  ;;  %v7482_v19 = vsel %vm14064_vm14, %v9172_v18, %v7481_v25  ;;  %9588 = vmatprep.subr.bf16.mxu1 %v10133_v24  ;;  %v7542_v56 = vld [vmem:[#allocation5 + $0x5c] sm:$0xf]  ;;  %v10136_v15 = vld [vmem:[%s14271_s10 + $0x1b0] sm:$0xff]   ;;  %v10148_v53 = vld [vmem:[%s14271_s10 + $0x120] sm:$0xff]  }
 0x54a   : > { %v7548_v30 = vsel %vm10671_vm0, %v9176_v8, %v7547_v51  ;;  %8436 = vmatmul.mubr.bf16.vlgmr.msra.gmra.mxu0 %v10127_v26  ;;  %7527 = vst [vmem:[#allocation5 + $0x58] sm:$0xf] %v7526_v2  ;;  %v7485_v29 = vsel %vm11243_vm3, %v7482_v19, %v7484_v37  ;;  %v7557_v22 = vrot.slane %v14057_v36, 6  ;;  %v7555_v40 = vor.u32 %v7554_v17, %v7553_v13  ;;  %v7570_v61 = vld [vmem:[#allocation5 + $0x68] sm:$0xf]  ;;  %v10138_v16 = vld [vmem:[%s14271_s10 + $0x128] sm:$0xff]  }
 0x54b   : > { %v7539_v35 = vor.u32 %v7538_v33, %v7535_v45  ;;  %v7551_v54 = vsel %vm11243_vm3, %v7548_v30, %v7550_v28  ;;  %9615 = vmatpush3.bf16.msra.mxu0 %v10132_v44  ;;  %7486 = vst [vmem:[#allocation5 + $0x1c] sm:$0xf] %v7485_v29  ;;  %v7558_v10 = vrot.slane %v14060_v43, 7  ;;  %v9177_v11 = vrot.slane %v14002_v32, 11  ;;  %v10143_v62 = vld [vmem:[%s14271_s10 + $0x1a8] sm:$0xff]   ;;  %v10154_v21 = vld [vmem:[%s14271_s10 + $0x158] sm:$0xff]  }
 0x54c   : > { %7552 = vst [vmem:[#allocation5 + $0x60] sm:$0xf] %v7551_v54  ;;  %9616 = vmatprep.subr.bf16.mxu0 %v10135_v60  ;;  %v7567_v41 = vrot.slane %v14032_v55, 7  ;;  %v9178_v18 = vrot.slane %v14016_v14, 11  ;;  %9589 = vmatpush3.bf16.msra.mxu1 %v10134_v12  ;;  %v7556_v57 = vrot.slane %v7555_v40, 4  ;;  %v7575_v55 = vrot.slane %v14057_v36, 7 }
 0x54d   : > { %v7540_v42 = vsel %vm13991_vm5, %v7531_v3, %v7539_v35  ;;  %v7559_v5 = vor.u32 %v7558_v10, %v7557_v22  ;;  %v7562_v32 = vld [vmem:[#allocation5 + $0x64] sm:$0xf]  ;;  %9590 = vmatprep.subr.bf16.mxu1 %v10137_v59  ;;  %v10144_v14 = vld [vmem:[%s14271_s10 + $0x160] sm:$0xff]   ;;  %v7579_v24 = vld [vmem:[#allocation5 + $0x6c] sm:$0xf]  ;;  %v7491_v52 = vrot.slane %v13974_v63, 4 }
 0x54e   : > { %v7543_v46 = vsel %vm11243_vm3, %v7540_v42, %v7542_v56  ;;  %v7568_v0 = vsel %vm10680_vm1, %v9177_v11, %v7567_v41  ;;  %v7492_v20 = vrot.slane %v13977_v23, 5  ;;  %v7586_v39 = vrot.slane %v14057_v36, 4  ;;  %v10140_v4 = vld [vmem:[#allocation5 + $0x50] ss:$40 sps:$4 sm:$0xff]   ;;  %v10147_v38 = vld [vmem:[#allocation5 + $0x14] ss:$40 sps:$4 sm:$0xff]  }
 0x54f   : > { %7544 = vst [vmem:[#allocation5 + $0x5c] sm:$0xf] %v7543_v46  ;;  %9617 = vmatpush3.bf16.msra.mxu0 %v10136_v15  ;;  %v10142_v7 = vld [vmem:[#allocation5 + $0x54] ss:$40 sps:$4 sm:$0xff]   ;;  %v7560_v8 = vsel %vm13028_vm9, %v7556_v57, %v7559_v5  ;;  %v7571_v47 = vsel %vm11243_vm3, %v7568_v0, %v7570_v61  ;;  %v7576_v49 = vor.u32 %v7575_v55, %v14060_v43  ;;  %v7587_v50 = vrot.slane %v14060_v43, 5  ;;  %v10155_v26 = vld [vmem:[%s14271_s10 + $0x118] sm:$0xff]  }
 0x550   : > { %9618 = vmatprep.subr.bf16.mxu0 %v10139_v27  ;;  %v10149_v63 = vld [vmem:[%s14271_s10 + $0x1e0] sm:$0xff]   ;;  %v7563_v23 = vsel %vm11243_vm3, %v7560_v8, %v7562_v32  ;;  %7572 = vst [vmem:[#allocation5 + $0x68] sm:$0xf] %v7571_v47  ;;  %v7493_v44 = vor.u32 %v7492_v20, %v7491_v52  ;;  %9591 = vmatpush3.bf16.msra.mxu1 %v10138_v16  ;;  %v7496_v37 = vld [vmem:[#allocation5 + $0x24] sm:$0xf]  ;;  %v10156_v31 = vld [vmem:[%s14271_s10 + $0x1d8] sm:$0xff]  }
 0x551   : > { %8394 = vmatprep.mubr.bf16.mxu1 %v10142_v7  ;;  %7564 = vst [vmem:[#allocation5 + $0x64] sm:$0xf] %v7563_v23  ;;  %v7577_v58 = vsel %vm14064_vm14, %v9178_v18, %v7576_v49  ;;  %v7588_v6 = vor.u32 %v7587_v50, %v7586_v39  ;;  %9592 = vmatprep.subr.bf16.mxu1 %v10144_v14  ;;  %v7591_v43 = vld [vmem:[#allocation5 + $0x74] sm:$0xf]  ;;  %v10151_v25 = vld [vmem:[#allocation5 + $0x58] ss:$40 sps:$4 sm:$0xff]  }
 0x552   : > { %8395 = vmatmul.mubr.bf16.gmra.mxu1 %v10140_v4  ;;  %v7580_v3 = vsel %vm11243_vm3, %v7577_v58, %v7579_v24  ;;  %v7494_v36 = vrot.slane %v7493_v44, 4  ;;  %v10161_v9 = vld [vmem:[%s14271_s10 + $0x150] sm:$0xff]   ;;  %v10160_v33 = vld [vmem:[%s14271_s10 + $0x198] sm:$0xff]   ;;  %v10165_v12 = vld [vmem:[%s14271_s10 + $0x148] sm:$0xff]  }
 0x553   : > { %9619 = vmatpush3.bf16.msra.mxu0 %v10143_v62  ;;  %8484 = vmatprep.mubr.bf16.mxu1 %v10147_v38  ;;  %7581 = vst [vmem:[#allocation5 + $0x6c] sm:$0xf] %v7580_v3  ;;  %v7589_v28 = vrot.slane %v7588_v6, 4  ;;  %v10159_v45 = vld [vmem:[#allocation5 + $0x1c] ss:$40 sps:$4 sm:$0xff]   ;;  %v10169_v17 = vld [vmem:[%s14271_s10 + $0x140] sm:$0xff]  }
 0x554   : > { %9620 = vmatprep.subr.bf16.mxu0 %v10149_v63  ;;  %v7497_v1 = vsel %vm11243_vm3, %v7494_v36, %v7496_v37  ;;  %9593 = vmatpush3.bf16.msra.mxu1 %v10148_v53  ;;  %v10162_v13 = vld [vmem:[%s14271_s10 + $0x110] sm:$0xff]   ;;  %v10167_v19 = vld [vmem:[%s14271_s10 + $0x1c8] sm:$0xff]   ;;  %v10171_v35 = vld [vmem:[%s14271_s10 + $0x1c0] sm:$0xff]  }
 0x555   : > { %7498 = vst [vmem:[#allocation5 + $0x24] sm:$0xf] %v7497_v1  ;;  %v7592_v60 = vsel %vm11243_vm3, %v7589_v28, %v7591_v43  ;;  %9594 = vmatprep.subr.bf16.mxu1 %v10154_v21  ;;  %v10164_v2 = vld [vmem:[%s14271_s10 + $0x190] sm:$0xff]   ;;  %v10166_v30 = vld [vmem:[%s14271_s10 + $0x108] sm:$0xff]   ;;  %v10170_v56 = vld [vmem:[%s14271_s10 + $0x100] sm:$0xff]  }
 0x556   : > { %v10153_v51 = vld [vmem:[#allocation5 + $0x5c] ss:$40 sps:$4 sm:$0xff]   ;;  %7593 = vst [vmem:[#allocation5 + $0x74] sm:$0xf] %v7592_v60  ;;  %v10173_v29 = vld [vmem:[%s14271_s10 + $0x278] sm:$0xff]   ;;  %v10172_v54 = vld [vmem:[%s14271_s10 + $0x180] sm:$0xff]  }
 0x557   : > { %9621 = vmatpush3.bf16.msra.mxu0 %v10150_v34  ;;  %8443 = vmatprep.mubr.bf16.mxu0 %v10153_v51  ;;  %v10168_v59 = vld [vmem:[%s14271_s10 + $0x188] sm:$0xff]   ;;  %v10177_v22 = vld [vmem:[%s14271_s10 + $0x238] sm:$0xff]   ;;  %v10181_v40 = vld [vmem:[%s14271_s10 + $0x270] sm:$0xff]  }
 0x558   : > { %8444 = vmatmul.mubr.bf16.gmra.mxu0 %v10151_v25  ;;  %9622 = vmatprep.subr.bf16.mxu0 %v10156_v31  ;;  %v10145_v15 = vld [vmem:[#allocation5 + $0x10] ss:$40 sps:$4 sm:$0xff]   ;;  %v10176_v10 = vld [vmem:[#allocation5 + $0x64] ss:$40 sps:$4 sm:$0xff]   ;;  %v10174_v18 = vld [vmem:[#allocation5 + $0x60] ss:$40 sps:$4 sm:$0xff]  }
 0x559   : > { %9595 = vmatpush3.bf16.msra.mxu1 %v10155_v26  ;;  %8533 = vmatprep.mubr.bf16.mxu0 %v10159_v45  ;;  %v10157_v27 = vld [vmem:[#allocation5 + $0x18] ss:$40 sps:$4 sm:$0xff]   ;;  %v10188_v16 = vld [vmem:[%s14271_s10 + $0x260] sm:$0xff]   ;;  %v10190_v5 = vld [vmem:[%s14271_s10 + $0x258] sm:$0xff]  }
 0x55a   : > { %9596 = vmatprep.subr.bf16.mxu1 %v10161_v9  ;;  %v10180_v42 = vld [vmem:[#allocation5 + $0x6c] ss:$40 sps:$4 sm:$0xff]   ;;  %v10182_v11 = vld [vmem:[%s14271_s10 + $0x230] sm:$0xff]   ;;  %v10183_v41 = vld [vmem:[%s14271_s10 + $0x268] sm:$0xff]  }
 0x55b   : > { %9623 = vmatpush3.bf16.msra.mxu0 %v10160_v33  ;;  %v10184_v61 = vld [vmem:[%s14271_s10 + $0x228] sm:$0xff]   ;;  %v10178_v46 = vld [vmem:[#allocation5 + $0x68] ss:$40 sps:$4 sm:$0xff]   ;;  %v10192_v55 = vld [vmem:[%s14271_s10 + $0x250] sm:$0xff]  }
 0x55c   : > { %9624 = vmatprep.subr.bf16.mxu0 %v10163_v48  ;;  %v10187_v62 = vld [vmem:[#allocation5 + $0x24] ss:$40 sps:$4 sm:$0xff]   ;;  %v10189_v57 = vld [vmem:[%s14271_s10 + $0x220] sm:$0xff]   ;;  %v10194_v0 = vld [vmem:[%s14271_s10 + $0x248] sm:$0xff]  }
 0x55d   : > { %9597 = vmatpush3.bf16.msra.mxu1 %v10162_v13  ;;  %v10191_v32 = vld [vmem:[%s14271_s10 + $0x218] sm:$0xff]   ;;  %v10193_v14 = vld [vmem:[%s14271_s10 + $0x210] sm:$0xff]   ;;  %v10195_v24 = vld [vmem:[%s14271_s10 + $0x208] sm:$0xff]  }
 0x55e   : > { %9598 = vmatprep.subr.bf16.mxu1 %v10165_v12  ;;  %v10196_v52 = vld [vmem:[%s14271_s10 + $0x240] sm:$0xff]   ;;  %v10185_v39 = vld [vmem:[#allocation5 + $0x20] ss:$40 sps:$4 sm:$0xff]  }
 0x55f   : > { %9625 = vmatpush3.bf16.msra.mxu0 %v10164_v2  ;;  %v10197_v20 = vld [vmem:[%s14271_s10 + $0x200] sm:$0xff]  }
 0x560   : > { %9626 = vmatprep.subr.bf16.mxu0 %v10167_v19  ;;  %v10200_v4 = vld [vmem:[#allocation5 + $0x74] ss:$40 sps:$4 sm:$0xff]   ;;  %v10198_v7 = vld [vmem:[#allocation5 + $0x70] ss:$40 sps:$4 sm:$0xff]  }
 0x561   : > { %9599 = vmatpush3.bf16.msra.mxu1 %v10166_v30 }
 0x562   : > { %9600 = vmatprep.subr.bf16.mxu1 %v10169_v17 }
 0x563   : > { %9627 = vmatpush3.bf16.msra.mxu0 %v10168_v59 }
 0x564   : > { %9628 = vmatprep.subr.bf16.mxu0 %v10171_v35 }
 0x565   : > { %9601 = vmatpush3.bf16.msra.mxu1 %v10170_v56 }
 0x566   : > { %9642 = vmatprep.subr.bf16.mxu1 %v10173_v29 }
 0x567   : > { %9629 = vmatpush3.bf16.msra.mxu0 %v10172_v54 }
 0x568   : > { %8485 = vmatmul.mubr.bf16.vlgmr.msra.gmra.mxu1 %v10145_v15 }
 0x569   : > { %8492 = vmatprep.mubr.bf16.mxu1 %v10176_v10  ;;  %9643 = vmatpush3.bf16.msra.mxu1 %v10177_v22 }
 0x56a   : > { %8534 = vmatmul.mubr.bf16.vlgmr.msra.gmra.mxu0 %v10157_v27  ;;  %9644 = vmatprep.subr.bf16.mxu1 %v10181_v40 }
 0x56b   : > { %8541 = vmatprep.mubr.bf16.mxu0 %v10180_v42 }
 0x56d   : > { %9645 = vmatpush3.bf16.msra.mxu1 %v10182_v11 }
 0x56e   : > { %9646 = vmatprep.subr.bf16.mxu1 %v10183_v41 }
 0x570   : > { %8493 = vmatmul.mubr.bf16.gmra.mxu1 %v10174_v18 }
 0x571   : > { %9647 = vmatpush3.bf16.msra.mxu1 %v10184_v61  ;;  %8582 = vmatprep.mubr.bf16.mxu1 %v10187_v62 }
 0x572   : > { %8542 = vmatmul.mubr.bf16.gmra.mxu0 %v10178_v46  ;;  %9648 = vmatprep.subr.bf16.mxu1 %v10188_v16  ;;  %v9279_v16 = vld [vmem:[%s14272_s11] ss:$0 sm:$0xff] }
 0x575   : > { %9649 = vmatpush3.bf16.msra.mxu1 %v10189_v57 }
 0x576   : > { %9650 = vmatprep.subr.bf16.mxu1 %v10190_v5 }
 0x579   : > { %9651 = vmatpush3.bf16.msra.mxu1 %v10191_v32 }
 0x57a   : > { %9652 = vmatprep.subr.bf16.mxu1 %v10192_v55 }
 0x57d   : > { %9653 = vmatpush3.bf16.msra.mxu1 %v10193_v14  ;;  %v9280_v14 = vld [vmem:[%s14273_s12] ss:$0 sm:$0xff] }
 0x57e   : > { %9654 = vmatprep.subr.bf16.mxu1 %v10194_v0 }
 0x581   : > { %9655 = vmatpush3.bf16.msra.mxu1 %v10195_v24 }
 0x582   : > { %9656 = vmatprep.subr.bf16.mxu1 %v10196_v52 }
 0x585   : > { %9657 = vmatpush3.bf16.msra.mxu1 %v10197_v20 }
 0x588   : > { %8583 = vmatmul.mubr.bf16.vlgmr.msra.gmra.mxu1 %v10185_v39 }
 0x589   : > { %8590 = vmatprep.mubr.bf16.mxu1 %v10200_v4 }
 0x590   : > { %8591 = vmatmul.mubr.bf16.gmra.mxu1 %v10198_v7 }
 0x607   : > { %v9546_v8 = vpop.f32.mrf.mxu1 }
 0x609   : > { %v9547_v47 = vpop.f32.mrf.mxu1 }
 0x60a   : > { %v9574_v50 = vpop.f32.mrf.mxu0  ;;  %v9548_v45 = vadd.f32 %v9547_v47, %v9546_v8 }
 0x60b   : > { %v9549_v49 = vpop.f32.mrf.mxu1 }
 0x60c   : > { %v9575_v44 = vpop.f32.mrf.mxu0 }
 0x60d   : > { %v9550_v63 = vpop.f32.mrf.mxu1  ;;  %v9576_v33 = vadd.f32 %v9575_v44, %v9574_v50 }
 0x60e   : > { %v9577_v53 = vpop.f32.mrf.mxu0  ;;  %v9551_v2 = vadd.f32 %v9550_v63, %v9549_v49 }
 0x60f   : > { %v8438_v30 = vadd.f32 %v9576_v33, %v9548_v45 }
 0x610   : > { %v9578_v37 = vpop.f32.mrf.mxu0 }
 0x611   : > { %v9579_v19 = vadd.f32 %v9578_v37, %v9577_v53 }
 0x612   : > { %v9552_v23 = vpop.f32.mrf.mxu1 }
 0x613   : > { %v8441_v54 = vadd.f32 %v9579_v19, %v9551_v2 }
 0x614   : > { %v9553_v38 = vpop.f32.mrf.mxu1 }
 0x615   : > { %v9554_v11 = vadd.f32 %v9553_v38, %v9552_v23 }
 0x616   : > { %v9555_v58 = vpop.f32.mrf.mxu1 }
 0x618   : > { %v9580_v6 = vpop.f32.mrf.mxu0  ;;  %v9556_v21 = vpop.f32.mrf.mxu1 }
 0x619   : > { %v9557_v4 = vadd.f32 %v9556_v21, %v9555_v58 }
 0x61a   : > { %v9581_v36 = vpop.f32.mrf.mxu0 }
 0x61b   : > { %v9582_v15 = vadd.f32 %v9581_v36, %v9580_v6 }
 0x61c   : > { %v9583_v34 = vpop.f32.mrf.mxu0 }
 0x61d   : > { %v8446_v46 = vadd.f32 %v9582_v15, %v9554_v11 }
 0x61e   : > { %v9584_v26 = vpop.f32.mrf.mxu0 }
 0x61f   : > { %v9585_v32 = vadd.f32 %v9584_v26, %v9583_v34 }
 0x621   : > { %v8449_v63 = vadd.f32 %v9585_v32, %v9557_v4 }
 0x628   : > { %v9602_v3 = vpop.f32.mrf.mxu1 }
 0x62a   : > { %v9603_v43 = vpop.f32.mrf.mxu1  ;;  %v9630_v31 = vpop.f32.mrf.mxu0 }
 0x62b   : > { %v9604_v12 = vadd.f32 %v9603_v43, %v9602_v3 }
 0x62c   : > { %v9605_v28 = vpop.f32.mrf.mxu1  ;;  %v9631_v25 = vpop.f32.mrf.mxu0 }
 0x62d   : > { %v8487_v56 = vadd.f32 %v9604_v12, %v8438_v30  ;;  %v9632_v29 = vadd.f32 %v9631_v25, %v9630_v31 }
 0x62e   : > { %v9606_v1 = vpop.f32.mrf.mxu1  ;;  %v9633_v60 = vpop.f32.mrf.mxu0 }
 0x62f   : > { %v9607_v59 = vadd.f32 %v9606_v1, %v9605_v28  ;;  %v8536_v41 = vadd.f32 %v9632_v29, %v8487_v56 }
 0x630   : > { %v9608_v51 = vpop.f32.mrf.mxu1  ;;  %v9634_v48 = vpop.f32.mrf.mxu0 }
 0x631   : > { %v8490_v10 = vadd.f32 %v9607_v59, %v8441_v54  ;;  %v9635_v27 = vadd.f32 %v9634_v48, %v9633_v60 }
 0x632   : > { %v9609_v9 = vpop.f32.mrf.mxu1  ;;  %v9636_v17 = vpop.f32.mrf.mxu0 }
 0x633   : > { %v9610_v61 = vadd.f32 %v9609_v9, %v9608_v51  ;;  %v8539_v55 = vadd.f32 %v9635_v27, %v8490_v10 }
 0x634   : > { %v9611_v13 = vpop.f32.mrf.mxu1  ;;  %v9637_v40 = vpop.f32.mrf.mxu0 }
 0x635   : > { %v8495_v24 = vadd.f32 %v9610_v61, %v8446_v46  ;;  %v9638_v52 = vadd.f32 %v9637_v40, %v9636_v17 }
 0x636   : > { %v9612_v35 = vpop.f32.mrf.mxu1  ;;  %v9639_v57 = vpop.f32.mrf.mxu0 }
 0x637   : > { %v9613_v7 = vadd.f32 %v9612_v35, %v9611_v13  ;;  %v8544_v44 = vadd.f32 %v9638_v52, %v8495_v24 }
 0x638   : > { %v9640_v47 = vpop.f32.mrf.mxu0 }
 0x639   : > { %v8498_v6 = vadd.f32 %v9613_v7, %v8449_v63  ;;  %v9641_v3 = vadd.f32 %v9640_v47, %v9639_v57 }
 0x63b   : > { %v8547_v31 = vadd.f32 %v9641_v3, %v8498_v6 }
 0x648   : > { %v9658_v22 = vpop.f32.mrf.mxu1 }
 0x64a   : > { %v9659_v42 = vpop.f32.mrf.mxu1 }
 0x64b   : > { %v9660_v18 = vadd.f32 %v9659_v42, %v9658_v22 }
 0x64c   : > { %v9661_v62 = vpop.f32.mrf.mxu1 }
 0x64d   : > { %v8585_v5 = vadd.f32 %v9660_v18, %v8536_v41 }
 0x64e   : > { %v9662_v0 = vpop.f32.mrf.mxu1 }
 0x64f   : > { %v8606_v20 = vmul.f32 %v9279_v16, %v8585_v5  ;;  %v9663_v39 = vadd.f32 %v9662_v0, %v9661_v62 }
 0x650   : > { %v9664_v8 = vpop.f32.mrf.mxu1 }
 0x651   : > { %v8617_v49 = vadd.f32 %v9280_v14, %v8606_v20  ;;  %v8588_v50 = vadd.f32 %v9663_v39, %v8539_v55 }
 0x652   : > { %v9665_v23 = vpop.f32.mrf.mxu1 }
 0x653   : > { %v8625_v38 = vmin.f32 %v8617_v49, 0.0  ;;  %v8607_v53 = vmul.f32 %v9279_v16, %v8588_v50  ;;  %v9666_v37 = vadd.f32 %v9665_v23, %v9664_v8  ;;  %vm8621_vm15 = vcmp.gt.f32.partialorder %v8617_v49, 0.0 }
 0x654   : > { %v9667_v36 = vpop.f32.mrf.mxu1 }
 0x655   : > { %v8629_v43 = vmul.f32 1.442695, %v8625_v38  ;;  %v8618_v34 = vadd.f32 %v9280_v14, %v8607_v53  ;;  %v8593_v28 = vadd.f32 %v9666_v37, %v8544_v44 }
 0x656   : > { %v9668_v26 = vpop.f32.mrf.mxu1 }
 0x657   : > { %10369 = vpow2.f32 %v8629_v43  ;;  %v8626_v58 = vmin.f32 %v8618_v34, 0.0  ;;  %v8608_v21 = vmul.f32 %v9279_v16, %v8593_v28  ;;  %v9669_v1 = vadd.f32 %v9668_v26, %v9667_v36 }
 0x659   : > { %v8631_v25 = vmul.f32 1.442695, %v8626_v58  ;;  %v8619_v51 = vadd.f32 %v9280_v14, %v8608_v21  ;;  %v8596_v60 = vadd.f32 %v9669_v1, %v8547_v31 }
 0x65b   : > { %10371 = vpow2.f32 %v8631_v25  ;;  %v8627_v9 = vmin.f32 %v8619_v51, 0.0  ;;  %v8609_v45 = vmul.f32 %v9279_v16, %v8596_v60  ;;  %vm8623_vm0 = vcmp.gt.f32.partialorder %v8619_v51, 0.0 }
 0x65d   : > { %v8633_v33 = vmul.f32 1.442695, %v8627_v9  ;;  %v8620_v48 = vadd.f32 %v9280_v14, %v8609_v45 }
 0x65f   : > { %10373 = vpow2.f32 %v8633_v33  ;;  %v8628_v13 = vmin.f32 %v8620_v48, 0.0 }
 0x661   : > { %v8635_v12 = vmul.f32 1.442695, %v8628_v13 }
 0x663   : > { %10375 = vpow2.f32 %v8635_v12 }
 0x664   : > { %v10370_v2 = vpop.eup %10369 }
 0x665   : > { %v9281_v19 = vadd.f32 -1.0, %v10370_v2 }
 0x667   : > { %v8641_v30 = vsel %vm8621_vm15, %v8617_v49, %v9281_v19 }
 0x668   : > { %v10372_v17 = vpop.eup %10371  ;;  %8645 = vst [vmem:[#allocation9] sm:$0xff] %v8641_v30 }
 0x66c   : > { %v10374_v59 = vpop.eup %10373 }
 0x66d   : > { %v9283_v35 = vadd.f32 -1.0, %v10374_v59 }
 0x66f   : > { %v8649_v56 = vld [vmem:[#allocation9] ss:$3 sm:$0x3]  ;;  %v8651_v29 = vld [vmem:[#allocation9 + $0x1] ss:$3 sm:$0x3]  ;;  %v8643_v54 = vsel %vm8623_vm0, %v8619_v51, %v9283_v35 }
 0x670   : > { %v8652_v22 = vmax.f32 %v8649_v56, %v8651_v29  ;;  %8647 = vst [vmem:[#allocation9 + $0x10] sm:$0xff] %v8643_v54  ;;  %v10376_v15 = vpop.eup %10375  ;;  %v8654_v40 = vld [vmem:[#allocation9 + $0x2] ss:$3 sm:$0x3] }
 0x672   : > { %v8655_v10 = vmax.f32 %v8652_v22, %v8654_v40 }
 0x674   : > { %8656 = vst [vmem:[%s445_s18] sm:$0x3] %v8655_v10 }
 0x677   : > { %v8658_v27 = vld [vmem:[#allocation9 + $0x10] ss:$3 sm:$0x3]  ;;  %v8660_v42 = vld [vmem:[#allocation9 + $0x11] ss:$3 sm:$0x3] }
 0x678   : > { %v8661_v11 = vmax.f32 %v8658_v27, %v8660_v42  ;;  %v8663_v41 = vld [vmem:[#allocation9 + $0x12] ss:$3 sm:$0x3] }
 0x67a   : > { %v8664_v61 = vmax.f32 %v8661_v11, %v8663_v41 }
 0x67c   : > { %9285 = vst [vmem:[%s445_s18 + $0x2] sm:$0x3] %v8664_v61 }
 0x67d PF: > { %s23_s25 = sadd.s32 1, %s10385_s25  }
 0x67e   : > { %p20_p4 = scmp.ge.s32.totalorder %s23_s25, 4  }
 0x680   :  { %22 = sbr.rel (!%p20_p4) target bundleno = 1 (0x1), region = 226 }

</bundles_post_ra>
